<compile_context>
chip_gen: v7x
topology: tpu7x:2x2x1
jax: 0.10.0
libtpu: 0.0.40
codegen_flags: <defaults>
</compile_context>

<pallas_src>
import jax
import jax.numpy as jnp
from jax.experimental import pallas as pl
from jax.experimental.pallas import tpu as pltpu


_VMEM_LIMIT = 32 << 20  # safe on v5e/v6e/v7x; actual peak usage is ~5 MB


# ----------------------------- Pallas kernels ------------------------------

def _conv_bn_prelu_pool_kernel(x_ref, w_ref, scale_ref, shift_ref, alpha_ref,
                               o_ref):
    """Fused conv-as-matmul -> BN(eval, bias folded) -> PReLU -> MaxPool(1,3).

    x_ref:              (3, G, K) bf16  pool-tap-major im2col patches
    w_ref:              (K, C)    bf16
    scale/shift/alpha:  (1, C)    f32   per-output-channel
    o_ref:              (G, C)    bf16  pooled activation (lane-dense channels)
    """
    scale = scale_ref[...]
    shift = shift_ref[...]
    alpha = alpha_ref[...]

    def tap(p):
        y = jnp.dot(x_ref[p], w_ref[...], preferred_element_type=jnp.float32)
        y = y * scale + shift                       # BN (bias pre-folded)
        return jnp.where(y >= 0.0, y, alpha * y)    # PReLU (f32 epilogue)

    o_ref[...] = jnp.maximum(jnp.maximum(tap(0), tap(1)),
                             tap(2)).astype(o_ref.dtype)


def _fc_head_kernel(x_ref, w1_ref, scale_ref, shift_ref, alpha_ref,
                    w2_ref, b2_ref, o_ref):
    """Fused fc1 -> BN(eval, bias folded) -> PReLU -> output Linear."""
    h = jnp.dot(x_ref[...], w1_ref[...], preferred_element_type=jnp.float32)
    h = h * scale_ref[...] + shift_ref[...]
    h = jnp.where(h >= 0.0, h, alpha_ref[...] * h)
    o_ref[...] = (jnp.dot(h.astype(w2_ref.dtype), w2_ref[...],
                          preferred_element_type=jnp.float32) + b2_ref[...])


# ----------------------------- Pallas wrappers ------------------------------

def conv_bn_prelu_pool(patches, w, scale, shift, alpha):
    _, g, k = patches.shape
    c = w.shape[1]
    vec = lambda v: v.reshape(1, c).astype(jnp.float32)
    cost = pl.CostEstimate(
        flops=2 * 3 * g * k * c + 5 * 3 * g * c,
        transcendentals=0,
        bytes_accessed=(patches.size + w.size + g * c) * 2 + 3 * 4 * c)
    return pl.pallas_call(
        _conv_bn_prelu_pool_kernel,
        out_shape=jax.ShapeDtypeStruct((g, c), jnp.bfloat16),
        grid=(1,),
        in_specs=[
            pl.BlockSpec((3, g, k), lambda i: (0, 0, 0)),
            pl.BlockSpec((k, c), lambda i: (0, 0)),
            pl.BlockSpec((1, c), lambda i: (0, 0)),
            pl.BlockSpec((1, c), lambda i: (0, 0)),
            pl.BlockSpec((1, c), lambda i: (0, 0)),
        ],
        out_specs=pl.BlockSpec((g, c), lambda i: (0, 0)),
        compiler_params=pltpu.CompilerParams(
            dimension_semantics=("arbitrary",),
            vmem_limit_bytes=_VMEM_LIMIT),
        cost_estimate=cost,
    )(patches.astype(jnp.bfloat16), w.astype(jnp.bfloat16),
      vec(scale), vec(shift), vec(alpha))


def fc_head(x, w1, scale, shift, alpha, w2, b2):
    n, k = x.shape
    h = w1.shape[1]        # padded hidden width (512)
    c = w2.shape[1]        # number of classes
    cost = pl.CostEstimate(
        flops=2 * n * k * h + 2 * n * h * c + 5 * n * h,
        transcendentals=0,
        bytes_accessed=(x.size + w1.size + w2.size) * 2 + n * c * 4 + 3 * 4 * h)
    return pl.pallas_call(
        _fc_head_kernel,
        out_shape=jax.ShapeDtypeStruct((n, c), jnp.float32),
        grid=(1,),
        in_specs=[
            pl.BlockSpec((n, k), lambda i: (0, 0)),
            pl.BlockSpec((k, h), lambda i: (0, 0)),
            pl.BlockSpec((1, h), lambda i: (0, 0)),
            pl.BlockSpec((1, h), lambda i: (0, 0)),
            pl.BlockSpec((1, h), lambda i: (0, 0)),
            pl.BlockSpec((h, c), lambda i: (0, 0)),
            pl.BlockSpec((1, c), lambda i: (0, 0)),
        ],
        out_specs=pl.BlockSpec((n, c), lambda i: (0, 0)),
        compiler_params=pltpu.CompilerParams(
            dimension_semantics=("arbitrary",),
            vmem_limit_bytes=_VMEM_LIMIT),
        cost_estimate=cost,
    )(x.astype(jnp.bfloat16), w1.astype(jnp.bfloat16),
      scale.reshape(1, h).astype(jnp.float32),
      shift.reshape(1, h).astype(jnp.float32),
      alpha.reshape(1, h).astype(jnp.float32),
      w2.astype(jnp.bfloat16), b2.reshape(1, c).astype(jnp.float32))


# ------------------------------- JAX glue -----------------------------------

def _pooled_conv_patches(x_nhwc, kh, kw):
    """im2col restricted to the columns the (1,3) floor max-pool keeps.

    Returns (3, N*Ho*Wp, kh*kw*C), pool-tap index leading so the fused kernel
    can max over the 3 taps with no in-kernel reshape; K ordered (kh, kw, C_in)
    to match the converted conv weights.
    """
    n, h, w, c = x_nhwc.shape
    ho = h - kh + 1
    wo = w - kw + 1
    wp = wo // 3          # pooled output width (floor mode)
    wu = wp * 3           # input columns the pool actually consumes
    taps = []
    for dh in range(kh):
        for dw in range(kw):
            taps.append(x_nhwc[:, dh:dh + ho, dw:dw + wu, :])
    p = jnp.stack(taps, axis=3)                        # (N, Ho, Wu, kh*kw, C)
    p = p.reshape(n, ho, wp, 3, kh * kw, c)
    p = jnp.transpose(p, (3, 0, 1, 2, 4, 5))           # (3, N, Ho, Wp, kh*kw, C)
    return p.reshape(3, n * ho * wp, kh * kw * c), ho, wp


def _fold_bn(gamma, beta, mean, var, bias, eps=1e-5):
    """Eval-mode BN folded to scale/shift, with the conv/linear bias folded in."""
    scale = gamma / jnp.sqrt(var + eps)
    shift = beta - mean * scale + bias * scale
    return scale, shift


def _conv_w_to_matmul(w_pt):
    # PyTorch (C_out, C_in, kh, kw) -> (kh*kw*C_in, C_out), K order (kh, kw, C_in)
    co, ci, kh, kw = w_pt.shape
    return jnp.transpose(w_pt, (2, 3, 1, 0)).reshape(kh * kw * ci, co)


def init_params(key, number_of_class=12, k_c=3):
    """Random weights in PyTorch layout (mirrors Model.initialize_weights)."""
    ks = jax.random.split(key, 10)
    kaiming = lambda k, shape, fan_in: (
        jax.random.normal(k, shape, jnp.float32) * jnp.sqrt(2.0 / fan_in))
    fc1_in = (16 - 2 * k_c + 2) * 3 * 64
    return {
        'conv1_w': kaiming(ks[0], (32, 1, k_c, 5), 1 * k_c * 5),
        'conv1_b': jnp.zeros((32,), jnp.float32),
        'bn1': dict(gamma=1.0 + 0.1 * jax.random.normal(ks[1], (32,)),
                    beta=0.1 * jax.random.normal(ks[2], (32,)),
                    mean=jnp.zeros((32,)), var=jnp.ones((32,))),
        'prelu1': jnp.full((32,), 0.25, jnp.float32),
        'conv2_w': kaiming(ks[3], (64, 32, k_c, 5), 32 * k_c * 5),
        'conv2_b': jnp.zeros((64,), jnp.float32),
        'bn2': dict(gamma=1.0 + 0.1 * jax.random.normal(ks[4], (64,)),
                    beta=0.1 * jax.random.normal(ks[5], (64,)),
                    mean=jnp.zeros((64,)), var=jnp.ones((64,))),
        'prelu2': jnp.full((64,), 0.25, jnp.float32),
        'fc1_w': kaiming(ks[6], (500, fc1_in), fc1_in),
        'fc1_b': jnp.zeros((500,), jnp.float32),
        'bn3': dict(gamma=1.0 + 0.1 * jax.random.normal(ks[7], (500,)),
                    beta=0.1 * jax.random.normal(ks[8], (500,)),
                    mean=jnp.zeros((500,)), var=jnp.ones((500,))),
        'prelu3': jnp.full((500,), 0.25, jnp.float32),
        'out_w': kaiming(ks[9], (number_of_class, 500), 500),
        'out_b': jnp.zeros((number_of_class,), jnp.float32),
    }


def prepare_params(raw, k_c=3, hidden_pad=512):
    """Convert PyTorch-layout weights to kernel-ready form (one-time, offline):
    fold biases into BN shifts, reorder K axes to the NHWC data layout,
    pad fc1 width 500->512, and store matmul weights in bf16."""
    p = {}
    # conv1 / conv2
    p['w1'] = _conv_w_to_matmul(raw['conv1_w']).astype(jnp.bfloat16)   # (15, 32)
    p['s1'], p['t1'] = _fold_bn(**raw['bn1'], bias=raw['conv1_b'])
    p['a1'] = raw['prelu1']
    p['w2'] = _conv_w_to_matmul(raw['conv2_w']).astype(jnp.bfloat16)   # (480, 64)
    p['s2'], p['t2'] = _fold_bn(**raw['bn2'], bias=raw['conv2_b'])
    p['a2'] = raw['prelu2']
    # fc1: reorder K from PyTorch NCHW flatten (C,H,W) to our NHWC flatten (H,W,C)
    h_out = 16 - 2 * k_c + 2          # 12
    w_out, c_out = 3, 64
    wf = raw['fc1_w'].reshape(500, c_out, h_out, w_out)
    wf = jnp.transpose(wf, (0, 2, 3, 1)).reshape(500, h_out * w_out * c_out).T
    pad = hidden_pad - 500
    p['w_fc1'] = jnp.pad(wf, ((0, 0), (0, pad))).astype(jnp.bfloat16)  # (2304, 512)
    s3, t3 = _fold_bn(**raw['bn3'], bias=raw['fc1_b'])
    p['s3'] = jnp.pad(s3, (0, pad))
    p['t3'] = jnp.pad(t3, (0, pad))
    p['a3'] = jnp.pad(raw['prelu3'], (0, pad))
    # output linear (padded rows are zero so the 12 dead hidden lanes contribute 0)
    p['w_out'] = jnp.pad(raw['out_w'].T, ((0, pad), (0, 0))).astype(jnp.bfloat16)
    p['b_out'] = raw['out_b']
    return p


@jax.jit
def model_forward(x, params):
    """x: (N, 1, 16, 50) NCHW float32 -> (N, num_classes) float32 logits."""
    n = x.shape[0]

    # ---- block 1: conv1 + BN1 + PReLU1 (+Dropout=id) + MaxPool(1,3) ----
    x1 = jnp.transpose(x, (0, 2, 3, 1)).astype(jnp.bfloat16)     # NHWC (N,16,50,1)
    patches1, ho1, wp1 = _pooled_conv_patches(x1, 3, 5)          # (3, N*14*15, 15)
    y1 = conv_bn_prelu_pool(patches1, params['w1'],
                            params['s1'], params['t1'], params['a1'])
    y1 = y1.reshape(n, ho1, wp1, 32)                             # NHWC bf16

    # ---- block 2: conv2 + BN2 + PReLU2 (+Dropout=id) + MaxPool(1,3) ----
    patches2, ho2, wp2 = _pooled_conv_patches(y1, 3, 5)          # (3, N*12*3, 480)
    y2 = conv_bn_prelu_pool(patches2, params['w2'],
                            params['s2'], params['t2'], params['a2'])
    flat = y2.reshape(n, ho2 * wp2 * 64)                         # (N, 2304), NHWC order

    # ---- head: fc1 + BN3 + PReLU3 (+Dropout=id) + output Linear, fused ----
    return fc_head(flat, params['w_fc1'], params['s3'], params['t3'],
                   params['a3'], params['w_out'], params['b_out'])


if __name__ == "__main__":
    key = jax.random.PRNGKey(0)
    kx, kp = jax.random.split(key)
    # Input implied by fc1's in-features: H=16, W=50 -> (14,46)->pool(14,15)
    # -> (12,11)->pool(12,3) -> 12*3*64 = 2304.
    x = jax.random.normal(kx, (2, 1, 16, 50), jnp.float32)
    params = prepare_params(init_params(kp))

    out = model_forward(x, params)
    out = jax.block_until_ready(out)
    assert out.shape == (2, 12), out.shape
    assert bool(jnp.all(jnp.isfinite(out)))
    print("KERNEL_OK")
</pallas_src>

<mosaic_0001>
module attributes {stable_mosaic.version = 11 : i64} {
  func.func @_conv_bn_prelu_pool_kernel(%arg0: i32, %arg1: memref<3x420x15xbf16, #tpu.memory_space<vmem>>, %arg2: memref<15x32xbf16, #tpu.memory_space<vmem>>, %arg3: memref<1x32xf32, #tpu.memory_space<vmem>>, %arg4: memref<1x32xf32, #tpu.memory_space<vmem>>, %arg5: memref<1x32xf32, #tpu.memory_space<vmem>>, %arg6: memref<420x32xbf16, #tpu.memory_space<vmem>>) attributes {dimension_semantics = [#tpu.dimension_semantics<arbitrary>], iteration_bounds = array<i64: 1>, scalar_prefetch = 0 : i64, scratch_operands = 0 : i64, tpu.core_type = #tpu.core_type<tc>, window_params = [{pipeline_mode = #tpu.pipeline_mode<synchronous>, transform_indices = @transform_0, window_bounds = array<i64: 3, 420, 15>}, {pipeline_mode = #tpu.pipeline_mode<synchronous>, transform_indices = @transform_1, window_bounds = array<i64: 15, 32>}, {pipeline_mode = #tpu.pipeline_mode<synchronous>, transform_indices = @transform_2, window_bounds = array<i64: 1, 32>}, {pipeline_mode = #tpu.pipeline_mode<synchronous>, transform_indices = @transform_3, window_bounds = array<i64: 1, 32>}, {pipeline_mode = #tpu.pipeline_mode<synchronous>, transform_indices = @transform_4, window_bounds = array<i64: 1, 32>}, {pipeline_mode = #tpu.pipeline_mode<synchronous>, transform_indices = @transform_5, window_bounds = array<i64: 420, 32>}]} {
    %c0 = arith.constant 0 : index
    %c0_0 = arith.constant 0 : index
    %0 = vector.load %arg3[%c0, %c0_0] : memref<1x32xf32, #tpu.memory_space<vmem>>, vector<1x32xf32>
    %c0_1 = arith.constant 0 : index
    %c0_2 = arith.constant 0 : index
    %1 = vector.load %arg4[%c0_1, %c0_2] : memref<1x32xf32, #tpu.memory_space<vmem>>, vector<1x32xf32>
    %c0_3 = arith.constant 0 : index
    %c0_4 = arith.constant 0 : index
    %2 = vector.load %arg5[%c0_3, %c0_4] : memref<1x32xf32, #tpu.memory_space<vmem>>, vector<1x32xf32>
    %c0_5 = arith.constant 0 : index
    %c0_6 = arith.constant 0 : index
    %c0_7 = arith.constant 0 : index
    %3 = vector.load %arg1[%c0_5, %c0_6, %c0_7] : memref<3x420x15xbf16, #tpu.memory_space<vmem>>, vector<1x420x15xbf16>
    %4 = vector.shape_cast %3 : vector<1x420x15xbf16> to vector<420x15xbf16>
    %c0_8 = arith.constant 0 : index
    %c0_9 = arith.constant 0 : index
    %5 = vector.load %arg2[%c0_8, %c0_9] : memref<15x32xbf16, #tpu.memory_space<vmem>>, vector<15x32xbf16>
    %cst = arith.constant dense<0.000000e+00> : vector<420x32xf32>
    %6 = tpu.matmul %4, %5, %cst {dimension_numbers = #tpu.dot_dimension_numbers<[1], [0], [0], [1], [0, 0, 1, 1], [], []>} : vector<420x15xbf16>, vector<15x32xbf16>, vector<420x32xf32> -> vector<420x32xf32>
    %7 = vector.broadcast %0 : vector<1x32xf32> to vector<420x32xf32>
    %8 = arith.mulf %6, %7 : vector<420x32xf32>
    %9 = vector.broadcast %1 : vector<1x32xf32> to vector<420x32xf32>
    %10 = arith.addf %8, %9 : vector<420x32xf32>
    %cst_10 = arith.constant 0.000000e+00 : f32
    %11 = vector.broadcast %cst_10 : f32 to vector<420x32xf32>
    %12 = arith.cmpf oge, %10, %11 : vector<420x32xf32>
    %13 = vector.broadcast %2 : vector<1x32xf32> to vector<420x32xf32>
    %14 = arith.mulf %13, %10 : vector<420x32xf32>
    %15 = arith.select %12, %10, %14 : vector<420x32xi1>, vector<420x32xf32>
    %c1 = arith.constant 1 : index
    %c0_11 = arith.constant 0 : index
    %c0_12 = arith.constant 0 : index
    %16 = vector.load %arg1[%c1, %c0_11, %c0_12] : memref<3x420x15xbf16, #tpu.memory_space<vmem>>, vector<1x420x15xbf16>
    %17 = vector.shape_cast %16 : vector<1x420x15xbf16> to vector<420x15xbf16>
    %c0_13 = arith.constant 0 : index
    %c0_14 = arith.constant 0 : index
    %18 = vector.load %arg2[%c0_13, %c0_14] : memref<15x32xbf16, #tpu.memory_space<vmem>>, vector<15x32xbf16>
    %cst_15 = arith.constant dense<0.000000e+00> : vector<420x32xf32>
    %19 = tpu.matmul %17, %18, %cst_15 {dimension_numbers = #tpu.dot_dimension_numbers<[1], [0], [0], [1], [0, 0, 1, 1], [], []>} : vector<420x15xbf16>, vector<15x32xbf16>, vector<420x32xf32> -> vector<420x32xf32>
    %20 = vector.broadcast %0 : vector<1x32xf32> to vector<420x32xf32>
    %21 = arith.mulf %19, %20 : vector<420x32xf32>
    %22 = vector.broadcast %1 : vector<1x32xf32> to vector<420x32xf32>
    %23 = arith.addf %21, %22 : vector<420x32xf32>
    %cst_16 = arith.constant 0.000000e+00 : f32
    %24 = vector.broadcast %cst_16 : f32 to vector<420x32xf32>
    %25 = arith.cmpf oge, %23, %24 : vector<420x32xf32>
    %26 = vector.broadcast %2 : vector<1x32xf32> to vector<420x32xf32>
    %27 = arith.mulf %26, %23 : vector<420x32xf32>
    %28 = arith.select %25, %23, %27 : vector<420x32xi1>, vector<420x32xf32>
    %29 = arith.maximumf %15, %28 : vector<420x32xf32>
    %c2 = arith.constant 2 : index
    %c0_17 = arith.constant 0 : index
    %c0_18 = arith.constant 0 : index
    %30 = vector.load %arg1[%c2, %c0_17, %c0_18] : memref<3x420x15xbf16, #tpu.memory_space<vmem>>, vector<1x420x15xbf16>
    %31 = vector.shape_cast %30 : vector<1x420x15xbf16> to vector<420x15xbf16>
    %c0_19 = arith.constant 0 : index
    %c0_20 = arith.constant 0 : index
    %32 = vector.load %arg2[%c0_19, %c0_20] : memref<15x32xbf16, #tpu.memory_space<vmem>>, vector<15x32xbf16>
    %cst_21 = arith.constant dense<0.000000e+00> : vector<420x32xf32>
    %33 = tpu.matmul %31, %32, %cst_21 {dimension_numbers = #tpu.dot_dimension_numbers<[1], [0], [0], [1], [0, 0, 1, 1], [], []>} : vector<420x15xbf16>, vector<15x32xbf16>, vector<420x32xf32> -> vector<420x32xf32>
    %34 = vector.broadcast %0 : vector<1x32xf32> to vector<420x32xf32>
    %35 = arith.mulf %33, %34 : vector<420x32xf32>
    %36 = vector.broadcast %1 : vector<1x32xf32> to vector<420x32xf32>
    %37 = arith.addf %35, %36 : vector<420x32xf32>
    %cst_22 = arith.constant 0.000000e+00 : f32
    %38 = vector.broadcast %cst_22 : f32 to vector<420x32xf32>
    %39 = arith.cmpf oge, %37, %38 : vector<420x32xf32>
    %40 = vector.broadcast %2 : vector<1x32xf32> to vector<420x32xf32>
    %41 = arith.mulf %40, %37 : vector<420x32xf32>
    %42 = arith.select %39, %37, %41 : vector<420x32xi1>, vector<420x32xf32>
    %43 = arith.maximumf %29, %42 : vector<420x32xf32>
    %44 = arith.truncf %43 : vector<420x32xf32> to vector<420x32xbf16>
    %c0_23 = arith.constant 0 : index
    %c0_24 = arith.constant 0 : index
    %45 = vector.load %arg6[%c0_23, %c0_24] : memref<420x32xbf16, #tpu.memory_space<vmem>>, vector<420x32xbf16>
    tpu.vector_store %arg6[%c0_23, %c0_24], %44 {strides = array<i32>} : memref<420x32xbf16, #tpu.memory_space<vmem>>, vector<420x32xbf16>,
    return
  }
  func.func @transform_0(%arg0: i32) -> (i32, i32, i32) {
    %c0_i32 = arith.constant 0 : i32
    %c0_i32_0 = arith.constant 0 : i32
    %c0_i32_1 = arith.constant 0 : i32
    %c0_i32_2 = arith.constant 0 : i32
    return %c0_i32, %c0_i32_0, %c0_i32_1 : i32, i32, i32
  }
  func.func @transform_1(%arg0: i32) -> (i32, i32) {
    %c0_i32 = arith.constant 0 : i32
    %c0_i32_0 = arith.constant 0 : i32
    %c0_i32_1 = arith.constant 0 : i32
    return %c0_i32, %c0_i32_0 : i32, i32
  }
  func.func @transform_2(%arg0: i32) -> (i32, i32) {
    %c0_i32 = arith.constant 0 : i32
    %c0_i32_0 = arith.constant 0 : i32
    %c0_i32_1 = arith.constant 0 : i32
    return %c0_i32, %c0_i32_0 : i32, i32
  }
  func.func @transform_3(%arg0: i32) -> (i32, i32) {
    %c0_i32 = arith.constant 0 : i32
    %c0_i32_0 = arith.constant 0 : i32
    %c0_i32_1 = arith.constant 0 : i32
    return %c0_i32, %c0_i32_0 : i32, i32
  }
  func.func @transform_4(%arg0: i32) -> (i32, i32) {
    %c0_i32 = arith.constant 0 : i32
    %c0_i32_0 = arith.constant 0 : i32
    %c0_i32_1 = arith.constant 0 : i32
    return %c0_i32, %c0_i32_0 : i32, i32
  }
  func.func @transform_5(%arg0: i32) -> (i32, i32) {
    %c0_i32 = arith.constant 0 : i32
    %c0_i32_0 = arith.constant 0 : i32
    %c0_i32_1 = arith.constant 0 : i32
    return %c0_i32, %c0_i32_0 : i32, i32
  }
}

module attributes {stable_mosaic.version = 11 : i64} {
  func.func @_fc_head_kernel(%arg0: i32, %arg1: memref<2x2304xbf16, #tpu.memory_space<vmem>>, %arg2: memref<2304x512xbf16, #tpu.memory_space<vmem>>, %arg3: memref<1x512xf32, #tpu.memory_space<vmem>>, %arg4: memref<1x512xf32, #tpu.memory_space<vmem>>, %arg5: memref<1x512xf32, #tpu.memory_space<vmem>>, %arg6: memref<512x12xbf16, #tpu.memory_space<vmem>>, %arg7: memref<1x12xf32, #tpu.memory_space<vmem>>, %arg8: memref<2x12xf32, #tpu.memory_space<vmem>>) attributes {dimension_semantics = [#tpu.dimension_semantics<arbitrary>], iteration_bounds = array<i64: 1>, scalar_prefetch = 0 : i64, scratch_operands = 0 : i64, tpu.core_type = #tpu.core_type<tc>, window_params = [{pipeline_mode = #tpu.pipeline_mode<synchronous>, transform_indices = @transform_0, window_bounds = array<i64: 2, 2304>}, {pipeline_mode = #tpu.pipeline_mode<synchronous>, transform_indices = @transform_1, window_bounds = array<i64: 2304, 512>}, {pipeline_mode = #tpu.pipeline_mode<synchronous>, transform_indices = @transform_2, window_bounds = array<i64: 1, 512>}, {pipeline_mode = #tpu.pipeline_mode<synchronous>, transform_indices = @transform_3, window_bounds = array<i64: 1, 512>}, {pipeline_mode = #tpu.pipeline_mode<synchronous>, transform_indices = @transform_4, window_bounds = array<i64: 1, 512>}, {pipeline_mode = #tpu.pipeline_mode<synchronous>, transform_indices = @transform_5, window_bounds = array<i64: 512, 12>}, {pipeline_mode = #tpu.pipeline_mode<synchronous>, transform_indices = @transform_6, window_bounds = array<i64: 1, 12>}, {pipeline_mode = #tpu.pipeline_mode<synchronous>, transform_indices = @transform_7, window_bounds = array<i64: 2, 12>}]} {
    %c0 = arith.constant 0 : index
    %c0_0 = arith.constant 0 : index
    %0 = vector.load %arg1[%c0, %c0_0] : memref<2x2304xbf16, #tpu.memory_space<vmem>>, vector<2x2304xbf16>
    %c0_1 = arith.constant 0 : index
    %c0_2 = arith.constant 0 : index
    %1 = vector.load %arg2[%c0_1, %c0_2] : memref<2304x512xbf16, #tpu.memory_space<vmem>>, vector<2304x512xbf16>
    %cst = arith.constant dense<0.000000e+00> : vector<2x512xf32>
    %2 = tpu.matmul %0, %1, %cst {dimension_numbers = #tpu.dot_dimension_numbers<[1], [0], [0], [1], [0, 0, 1, 1], [], []>} : vector<2x2304xbf16>, vector<2304x512xbf16>, vector<2x512xf32> -> vector<2x512xf32>
    %c0_3 = arith.constant 0 : index
    %c0_4 = arith.constant 0 : index
    %3 = vector.load %arg3[%c0_3, %c0_4] : memref<1x512xf32, #tpu.memory_space<vmem>>, vector<1x512xf32>
    %4 = vector.broadcast %3 : vector<1x512xf32> to vector<2x512xf32>
    %5 = arith.mulf %2, %4 : vector<2x512xf32>
    %c0_5 = arith.constant 0 : index
    %c0_6 = arith.constant 0 : index
    %6 = vector.load %arg4[%c0_5, %c0_6] : memref<1x512xf32, #tpu.memory_space<vmem>>, vector<1x512xf32>
    %7 = vector.broadcast %6 : vector<1x512xf32> to vector<2x512xf32>
    %8 = arith.addf %5, %7 : vector<2x512xf32>
    %cst_7 = arith.constant 0.000000e+00 : f32
    %9 = vector.broadcast %cst_7 : f32 to vector<2x512xf32>
    %10 = arith.cmpf oge, %8, %9 : vector<2x512xf32>
    %c0_8 = arith.constant 0 : index
    %c0_9 = arith.constant 0 : index
    %11 = vector.load %arg5[%c0_8, %c0_9] : memref<1x512xf32, #tpu.memory_space<vmem>>, vector<1x512xf32>
    %12 = vector.broadcast %11 : vector<1x512xf32> to vector<2x512xf32>
    %13 = arith.mulf %12, %8 : vector<2x512xf32>
    %14 = arith.select %10, %8, %13 : vector<2x512xi1>, vector<2x512xf32>
    %15 = arith.truncf %14 : vector<2x512xf32> to vector<2x512xbf16>
    %c0_10 = arith.constant 0 : index
    %c0_11 = arith.constant 0 : index
    %16 = vector.load %arg6[%c0_10, %c0_11] : memref<512x12xbf16, #tpu.memory_space<vmem>>, vector<512x12xbf16>
    %cst_12 = arith.constant dense<0.000000e+00> : vector<2x12xf32>
    %17 = tpu.matmul %15, %16, %cst_12 {dimension_numbers = #tpu.dot_dimension_numbers<[1], [0], [0], [1], [0, 0, 1, 1], [], []>} : vector<2x512xbf16>, vector<512x12xbf16>, vector<2x12xf32> -> vector<2x12xf32>
    %c0_13 = arith.constant 0 : index
    %c0_14 = arith.constant 0 : index
    %18 = vector.load %arg7[%c0_13, %c0_14] : memref<1x12xf32, #tpu.memory_space<vmem>>, vector<1x12xf32>
    %19 = vector.broadcast %18 : vector<1x12xf32> to vector<2x12xf32>
    %20 = arith.addf %17, %19 : vector<2x12xf32>
    %c0_15 = arith.constant 0 : index
    %c0_16 = arith.constant 0 : index
    %21 = vector.load %arg8[%c0_15, %c0_16] : memref<2x12xf32, #tpu.memory_space<vmem>>, vector<2x12xf32>
    tpu.vector_store %arg8[%c0_15, %c0_16], %20 {strides = array<i32>} : memref<2x12xf32, #tpu.memory_space<vmem>>, vector<2x12xf32>,
    return
  }
  func.func @transform_0(%arg0: i32) -> (i32, i32) {
    %c0_i32 = arith.constant 0 : i32
    %c0_i32_0 = arith.constant 0 : i32
    %c0_i32_1 = arith.constant 0 : i32
    return %c0_i32, %c0_i32_0 : i32, i32
  }
  func.func @transform_1(%arg0: i32) -> (i32, i32) {
    %c0_i32 = arith.constant 0 : i32
    %c0_i32_0 = arith.constant 0 : i32
    %c0_i32_1 = arith.constant 0 : i32
    return %c0_i32, %c0_i32_0 : i32, i32
  }
  func.func @transform_2(%arg0: i32) -> (i32, i32) {
    %c0_i32 = arith.constant 0 : i32
    %c0_i32_0 = arith.constant 0 : i32
    %c0_i32_1 = arith.constant 0 : i32
    return %c0_i32, %c0_i32_0 : i32, i32
  }
  func.func @transform_3(%arg0: i32) -> (i32, i32) {
    %c0_i32 = arith.constant 0 : i32
    %c0_i32_0 = arith.constant 0 : i32
    %c0_i32_1 = arith.constant 0 : i32
    return %c0_i32, %c0_i32_0 : i32, i32
  }
  func.func @transform_4(%arg0: i32) -> (i32, i32) {
    %c0_i32 = arith.constant 0 : i32
    %c0_i32_0 = arith.constant 0 : i32
    %c0_i32_1 = arith.constant 0 : i32
    return %c0_i32, %c0_i32_0 : i32, i32
  }
  func.func @transform_5(%arg0: i32) -> (i32, i32) {
    %c0_i32 = arith.constant 0 : i32
    %c0_i32_0 = arith.constant 0 : i32
    %c0_i32_1 = arith.constant 0 : i32
    return %c0_i32, %c0_i32_0 : i32, i32
  }
  func.func @transform_6(%arg0: i32) -> (i32, i32) {
    %c0_i32 = arith.constant 0 : i32
    %c0_i32_0 = arith.constant 0 : i32
    %c0_i32_1 = arith.constant 0 : i32
    return %c0_i32, %c0_i32_0 : i32, i32
  }
  func.func @transform_7(%arg0: i32) -> (i32, i32) {
    %c0_i32 = arith.constant 0 : i32
    %c0_i32_0 = arith.constant 0 : i32
    %c0_i32_1 = arith.constant 0 : i32
    return %c0_i32, %c0_i32_0 : i32, i32
  }
}

module attributes {stable_mosaic.version = 11 : i64} {
  func.func @_conv_bn_prelu_pool_kernel(%arg0: i32, %arg1: memref<3x72x480xbf16, #tpu.memory_space<vmem>>, %arg2: memref<480x64xbf16, #tpu.memory_space<vmem>>, %arg3: memref<1x64xf32, #tpu.memory_space<vmem>>, %arg4: memref<1x64xf32, #tpu.memory_space<vmem>>, %arg5: memref<1x64xf32, #tpu.memory_space<vmem>>, %arg6: memref<72x64xbf16, #tpu.memory_space<vmem>>) attributes {dimension_semantics = [#tpu.dimension_semantics<arbitrary>], iteration_bounds = array<i64: 1>, scalar_prefetch = 0 : i64, scratch_operands = 0 : i64, tpu.core_type = #tpu.core_type<tc>, window_params = [{pipeline_mode = #tpu.pipeline_mode<synchronous>, transform_indices = @transform_0, window_bounds = array<i64: 3, 72, 480>}, {pipeline_mode = #tpu.pipeline_mode<synchronous>, transform_indices = @transform_1, window_bounds = array<i64: 480, 64>}, {pipeline_mode = #tpu.pipeline_mode<synchronous>, transform_indices = @transform_2, window_bounds = array<i64: 1, 64>}, {pipeline_mode = #tpu.pipeline_mode<synchronous>, transform_indices = @transform_3, window_bounds = array<i64: 1, 64>}, {pipeline_mode = #tpu.pipeline_mode<synchronous>, transform_indices = @transform_4, window_bounds = array<i64: 1, 64>}, {pipeline_mode = #tpu.pipeline_mode<synchronous>, transform_indices = @transform_5, window_bounds = array<i64: 72, 64>}]} {
    %c0 = arith.constant 0 : index
    %c0_0 = arith.constant 0 : index
    %0 = vector.load %arg3[%c0, %c0_0] : memref<1x64xf32, #tpu.memory_space<vmem>>, vector<1x64xf32>
    %c0_1 = arith.constant 0 : index
    %c0_2 = arith.constant 0 : index
    %1 = vector.load %arg4[%c0_1, %c0_2] : memref<1x64xf32, #tpu.memory_space<vmem>>, vector<1x64xf32>
    %c0_3 = arith.constant 0 : index
    %c0_4 = arith.constant 0 : index
    %2 = vector.load %arg5[%c0_3, %c0_4] : memref<1x64xf32, #tpu.memory_space<vmem>>, vector<1x64xf32>
    %c0_5 = arith.constant 0 : index
    %c0_6 = arith.constant 0 : index
    %c0_7 = arith.constant 0 : index
    %3 = vector.load %arg1[%c0_5, %c0_6, %c0_7] : memref<3x72x480xbf16, #tpu.memory_space<vmem>>, vector<1x72x480xbf16>
    %4 = vector.shape_cast %3 : vector<1x72x480xbf16> to vector<72x480xbf16>
    %c0_8 = arith.constant 0 : index
    %c0_9 = arith.constant 0 : index
    %5 = vector.load %arg2[%c0_8, %c0_9] : memref<480x64xbf16, #tpu.memory_space<vmem>>, vector<480x64xbf16>
    %cst = arith.constant dense<0.000000e+00> : vector<72x64xf32>
    %6 = tpu.matmul %4, %5, %cst {dimension_numbers = #tpu.dot_dimension_numbers<[1], [0], [0], [1], [0, 0, 1, 1], [], []>} : vector<72x480xbf16>, vector<480x64xbf16>, vector<72x64xf32> -> vector<72x64xf32>
    %7 = vector.broadcast %0 : vector<1x64xf32> to vector<72x64xf32>
    %8 = arith.mulf %6, %7 : vector<72x64xf32>
    %9 = vector.broadcast %1 : vector<1x64xf32> to vector<72x64xf32>
    %10 = arith.addf %8, %9 : vector<72x64xf32>
    %cst_10 = arith.constant 0.000000e+00 : f32
    %11 = vector.broadcast %cst_10 : f32 to vector<72x64xf32>
    %12 = arith.cmpf oge, %10, %11 : vector<72x64xf32>
    %13 = vector.broadcast %2 : vector<1x64xf32> to vector<72x64xf32>
    %14 = arith.mulf %13, %10 : vector<72x64xf32>
    %15 = arith.select %12, %10, %14 : vector<72x64xi1>, vector<72x64xf32>
    %c1 = arith.constant 1 : index
    %c0_11 = arith.constant 0 : index
    %c0_12 = arith.constant 0 : index
    %16 = vector.load %arg1[%c1, %c0_11, %c0_12] : memref<3x72x480xbf16, #tpu.memory_space<vmem>>, vector<1x72x480xbf16>
    %17 = vector.shape_cast %16 : vector<1x72x480xbf16> to vector<72x480xbf16>
    %c0_13 = arith.constant 0 : index
    %c0_14 = arith.constant 0 : index
    %18 = vector.load %arg2[%c0_13, %c0_14] : memref<480x64xbf16, #tpu.memory_space<vmem>>, vector<480x64xbf16>
    %cst_15 = arith.constant dense<0.000000e+00> : vector<72x64xf32>
    %19 = tpu.matmul %17, %18, %cst_15 {dimension_numbers = #tpu.dot_dimension_numbers<[1], [0], [0], [1], [0, 0, 1, 1], [], []>} : vector<72x480xbf16>, vector<480x64xbf16>, vector<72x64xf32> -> vector<72x64xf32>
    %20 = vector.broadcast %0 : vector<1x64xf32> to vector<72x64xf32>
    %21 = arith.mulf %19, %20 : vector<72x64xf32>
    %22 = vector.broadcast %1 : vector<1x64xf32> to vector<72x64xf32>
    %23 = arith.addf %21, %22 : vector<72x64xf32>
    %cst_16 = arith.constant 0.000000e+00 : f32
    %24 = vector.broadcast %cst_16 : f32 to vector<72x64xf32>
    %25 = arith.cmpf oge, %23, %24 : vector<72x64xf32>
    %26 = vector.broadcast %2 : vector<1x64xf32> to vector<72x64xf32>
    %27 = arith.mulf %26, %23 : vector<72x64xf32>
    %28 = arith.select %25, %23, %27 : vector<72x64xi1>, vector<72x64xf32>
    %29 = arith.maximumf %15, %28 : vector<72x64xf32>
    %c2 = arith.constant 2 : index
    %c0_17 = arith.constant 0 : index
    %c0_18 = arith.constant 0 : index
    %30 = vector.load %arg1[%c2, %c0_17, %c0_18] : memref<3x72x480xbf16, #tpu.memory_space<vmem>>, vector<1x72x480xbf16>
    %31 = vector.shape_cast %30 : vector<1x72x480xbf16> to vector<72x480xbf16>
    %c0_19 = arith.constant 0 : index
    %c0_20 = arith.constant 0 : index
    %32 = vector.load %arg2[%c0_19, %c0_20] : memref<480x64xbf16, #tpu.memory_space<vmem>>, vector<480x64xbf16>
    %cst_21 = arith.constant dense<0.000000e+00> : vector<72x64xf32>
    %33 = tpu.matmul %31, %32, %cst_21 {dimension_numbers = #tpu.dot_dimension_numbers<[1], [0], [0], [1], [0, 0, 1, 1], [], []>} : vector<72x480xbf16>, vector<480x64xbf16>, vector<72x64xf32> -> vector<72x64xf32>
    %34 = vector.broadcast %0 : vector<1x64xf32> to vector<72x64xf32>
    %35 = arith.mulf %33, %34 : vector<72x64xf32>
    %36 = vector.broadcast %1 : vector<1x64xf32> to vector<72x64xf32>
    %37 = arith.addf %35, %36 : vector<72x64xf32>
    %cst_22 = arith.constant 0.000000e+00 : f32
    %38 = vector.broadcast %cst_22 : f32 to vector<72x64xf32>
    %39 = arith.cmpf oge, %37, %38 : vector<72x64xf32>
    %40 = vector.broadcast %2 : vector<1x64xf32> to vector<72x64xf32>
    %41 = arith.mulf %40, %37 : vector<72x64xf32>
    %42 = arith.select %39, %37, %41 : vector<72x64xi1>, vector<72x64xf32>
    %43 = arith.maximumf %29, %42 : vector<72x64xf32>
    %44 = arith.truncf %43 : vector<72x64xf32> to vector<72x64xbf16>
    %c0_23 = arith.constant 0 : index
    %c0_24 = arith.constant 0 : index
    %45 = vector.load %arg6[%c0_23, %c0_24] : memref<72x64xbf16, #tpu.memory_space<vmem>>, vector<72x64xbf16>
    tpu.vector_store %arg6[%c0_23, %c0_24], %44 {strides = array<i32>} : memref<72x64xbf16, #tpu.memory_space<vmem>>, vector<72x64xbf16>,
    return
  }
  func.func @transform_0(%arg0: i32) -> (i32, i32, i32) {
    %c0_i32 = arith.constant 0 : i32
    %c0_i32_0 = arith.constant 0 : i32
    %c0_i32_1 = arith.constant 0 : i32
    %c0_i32_2 = arith.constant 0 : i32
    return %c0_i32, %c0_i32_0, %c0_i32_1 : i32, i32, i32
  }
  func.func @transform_1(%arg0: i32) -> (i32, i32) {
    %c0_i32 = arith.constant 0 : i32
    %c0_i32_0 = arith.constant 0 : i32
    %c0_i32_1 = arith.constant 0 : i32
    return %c0_i32, %c0_i32_0 : i32, i32
  }
  func.func @transform_2(%arg0: i32) -> (i32, i32) {
    %c0_i32 = arith.constant 0 : i32
    %c0_i32_0 = arith.constant 0 : i32
    %c0_i32_1 = arith.constant 0 : i32
    return %c0_i32, %c0_i32_0 : i32, i32
  }
  func.func @transform_3(%arg0: i32) -> (i32, i32) {
    %c0_i32 = arith.constant 0 : i32
    %c0_i32_0 = arith.constant 0 : i32
    %c0_i32_1 = arith.constant 0 : i32
    return %c0_i32, %c0_i32_0 : i32, i32
  }
  func.func @transform_4(%arg0: i32) -> (i32, i32) {
    %c0_i32 = arith.constant 0 : i32
    %c0_i32_0 = arith.constant 0 : i32
    %c0_i32_1 = arith.constant 0 : i32
    return %c0_i32, %c0_i32_0 : i32, i32
  }
  func.func @transform_5(%arg0: i32) -> (i32, i32) {
    %c0_i32 = arith.constant 0 : i32
    %c0_i32_0 = arith.constant 0 : i32
    %c0_i32_1 = arith.constant 0 : i32
    return %c0_i32, %c0_i32_0 : i32, i32
  }
}

</mosaic_0001>

<bundles_post_ra>
// kernel: model_forward.3
= control target key start
LH: loop header
LB: loop body
LE: loop exit
PB: predicated region body
PF: predicated region fallthrough
CT: control target
= control target key end

     0   :  { %vm299_vm0 = vcmask 1046528   ;;  %vm300_vm1 = vcmask 1047552   ;;  %v5345_v0 = vmov 0.0   ;;  %v3663_v2 = vmov 65535   ;;  %s5339_s1 = inlined_call_operand.vmem [shape: bf16[15,32], index: 1, kind: input, shape index: {}]   ;;  %s5340_s0 = inlined_call_operand.vmem [shape: bf16[3,420,15], index: 0, kind: input, shape index: {}]   ;;  %s5341_s2 = inlined_call_operand.vmem [shape: f32[1,32], index: 2, kind: input, shape index: {}]   ;;  %s5342_s3 = inlined_call_operand.vmem [shape: f32[1,32], index: 3, kind: input, shape index: {}]   ;;  %s5343_s4 = inlined_call_operand.vmem [shape: f32[1,32], index: 4, kind: input, shape index: {}]   ;;  %s5344_s5 = inlined_call_operand.vmem [shape: bf16[420,32], index: 5, kind: output, shape index: {}]  }
   0x1   :  { %3239 = vmatprep.subr.bf16.mxu0 %v5345_v0  ;;  %3569 = vmatprep.subr.bf16.mxu1 %v5345_v0  ;;  %v3574_v1 = vld [vmem:[%s5339_s1] sm:$0xff]   ;;  %v301_v3 = vsel %vm299_vm0, 4294967295, %v3663_v2  ;;  %vm3664_vm2 = vmmov 0   ;;  %v3576_v7 = vld [vmem:[%s5340_s0 + $0x70] sm:$0xff]   ;;  %vm217_vm3 = vcmask 121856   ;;  %v3577_v8 = vld [vmem:[%s5340_s0 + $0x8] sm:$0xff]  }
   0x2   :  { %v302_v4 = vsel %vm300_vm1, %v301_v3, 0  ;;  %3241 = vmatprep.mubr.msk.bf16.mxu0 %vm3664_vm2, %v5345_v0  ;;  %3297 = vmatprep.mubr.msk.bf16.mxu1 %vm3664_vm2, %v5345_v0  ;;  %v3575_v6 = vld [vmem:[%s5340_s0] sm:$0xff]   ;;  %v3578_v9 = vld [vmem:[%s5340_s0 + $0x78] sm:$0xff]   ;;  %v3579_v10 = vld [vmem:[%s5340_s0 + $0x10] sm:$0xff]  }
   0x3   :  { %v304_v5 = vand.u32 %v3574_v1, %v302_v4  ;;  %v3580_v11 = vld [vmem:[%s5340_s0 + $0x80] sm:$0xff]   ;;  %v3581_v12 = vld [vmem:[%s5340_s0 + $0x18] sm:$0xff]   ;;  %v3582_v13 = vld [vmem:[%s5340_s0 + $0x88] sm:$0xff]  }
   0x4   :  { %v3583_v14 = vld [vmem:[%s5340_s0 + $0x20] sm:$0xff]   ;;  %v3584_v15 = vld [vmem:[%s5340_s0 + $0x90] sm:$0xff]   ;;  %v3585_v16 = vld [vmem:[%s5340_s0 + $0x28] sm:$0xff]  }
   0x5   :  { %3240 = vmatpush3.bf16.msra.mxu0 %v304_v5  ;;  %3570 = vmatpush3.bf16.msra.mxu1 %v304_v5  ;;  %v3586_v17 = vld [vmem:[%s5340_s0 + $0x98] sm:$0xff]   ;;  %v3587_v18 = vld [vmem:[%s5340_s0 + $0x30] sm:$0xff]   ;;  %v3588_v19 = vld [vmem:[%s5340_s0 + $0xa0] sm:$0xff]  }
   0x6   :  { %3459 = vmatprep.subr.bf16.mxu0 %v5345_v0  ;;  %3349 = vmatprep.subr.bf16.mxu1 %v5345_v0  ;;  %v3589_v20 = vld [vmem:[%s5340_s0 + $0x38] sm:$0xff]   ;;  %v3590_v21 = vld [vmem:[%s5340_s0 + $0xa8] sm:$0xff]   ;;  %v3591_v22 = vld [vmem:[%s5340_s0 + $0x40] sm:$0xff]  }
   0x7   :  { %v3592_v23 = vld [vmem:[%s5340_s0 + $0xb0] sm:$0xff]   ;;  %v3593_v24 = vld [vmem:[%s5340_s0 + $0x48] sm:$0xff]   ;;  %v3594_v25 = vld [vmem:[%s5340_s0 + $0xb8] sm:$0xff]  }
   0x8   :  { %3242 = vmatmul.mubr.msk.bf16.vlgmr.msra.gmra.mrb[0].mxu0 %vm217_vm3, %v3575_v6  ;;  %3298 = vmatmul.mubr.msk.bf16.vlgmr.msra.gmra.mrb[0].mxu1 %vm217_vm3, %v3576_v7  ;;  %v3595_v26 = vld [vmem:[%s5340_s0 + $0x50] sm:$0xff]   ;;  %v3596_v27 = vld [vmem:[%s5340_s0 + $0xc0] sm:$0xff]   ;;  %v3597_v28 = vld [vmem:[%s5340_s0 + $0x58] sm:$0xff]  }
   0x9   :  { %3460 = vmatpush3.bf16.msra.mxu0 %v304_v5  ;;  %3245 = vmatprep.mubr.msk.bf16.mxu0 %vm3664_vm2, %v5345_v0  ;;  %v3598_v29 = vld [vmem:[%s5340_s0 + $0xc8] sm:$0xff]   ;;  %v3599_v30 = vld [vmem:[%s5340_s0 + $0x60] sm:$0xff]   ;;  %v3600_v31 = vld [vmem:[%s5340_s0 + $0xd0] ss:$0 sps:$4 sm:$0x33]  }
   0xa   :  { %3301 = vmatprep.mubr.msk.bf16.mxu1 %vm3664_vm2, %v5345_v0  ;;  %3350 = vmatpush3.bf16.msra.mxu1 %v304_v5  ;;  %v3601_v32 = vld [vmem:[%s5340_s0 + $0x68] sm:$0xff]   ;;  %v3602_v33 = vld [vmem:[%s5340_s0 + $0xd4] sm:$0xff]   ;;  %v3603_v34 = vld [vmem:[%s5340_s0 + $0xdc] sm:$0xff]  }
   0xb   :  { %v3604_v35 = vld [vmem:[%s5340_s0 + $0x1a8] sm:$0xff]   ;;  %v3606_v37 = vld [vmem:[%s5340_s0 + $0x1b0] sm:$0xff]   ;;  %v3608_v39 = vld [vmem:[%s5340_s0 + $0x1b8] sm:$0xff]  }
   0xc   :  { %v3605_v36 = vld [vmem:[%s5340_s0 + $0xe4] sm:$0xff]   ;;  %v3607_v38 = vld [vmem:[%s5340_s0 + $0xec] sm:$0xff]   ;;  %v3609_v40 = vld [vmem:[%s5340_s0 + $0xf4] sm:$0xff]  }
   0xd   :  { %v3610_v41 = vld [vmem:[%s5340_s0 + $0x1c0] sm:$0xff]   ;;  %v3612_v43 = vld [vmem:[%s5340_s0 + $0x1c8] sm:$0xff]   ;;  %v3614_v45 = vld [vmem:[%s5340_s0 + $0x1d0] sm:$0xff]  }
   0xe   :  { %v3611_v42 = vld [vmem:[%s5340_s0 + $0xfc] sm:$0xff]   ;;  %v3613_v44 = vld [vmem:[%s5340_s0 + $0x104] sm:$0xff]   ;;  %v3615_v46 = vld [vmem:[%s5340_s0 + $0x10c] sm:$0xff]  }
   0xf   :  { %v3616_v47 = vld [vmem:[%s5340_s0 + $0x1d8] sm:$0xff]   ;;  %v3618_v49 = vld [vmem:[%s5340_s0 + $0x1e0] sm:$0xff]   ;;  %v3620_v51 = vld [vmem:[%s5340_s0 + $0x1e8] sm:$0xff]  }
  0x10   :  { %3246 = vmatmul.mubr.msk.bf16.gmra.mrb[4].mxu0 %vm217_vm3, %v3577_v8  ;;  %3302 = vmatmul.mubr.msk.bf16.gmra.mrb[4].mxu1 %vm217_vm3, %v3578_v9  ;;  %v3617_v48 = vld [vmem:[%s5340_s0 + $0x114] sm:$0xff]   ;;  %v3619_v50 = vld [vmem:[%s5340_s0 + $0x11c] sm:$0xff]   ;;  %v3621_v52 = vld [vmem:[%s5340_s0 + $0x124] sm:$0xff]  }
  0x11   :  { %3249 = vmatprep.mubr.msk.bf16.mxu0 %vm3664_vm2, %v5345_v0  ;;  %3305 = vmatprep.mubr.msk.bf16.mxu1 %vm3664_vm2, %v5345_v0  ;;  %v3622_v53 = vld [vmem:[%s5340_s0 + $0x1f0] sm:$0xff]   ;;  %v3624_v55 = vld [vmem:[%s5340_s0 + $0x1f8] sm:$0xff]   ;;  %v3626_v57 = vld [vmem:[%s5340_s0 + $0x200] sm:$0xff]  }
  0x12   :  { %v3623_v54 = vld [vmem:[%s5340_s0 + $0x12c] sm:$0xff]   ;;  %v3625_v56 = vld [vmem:[%s5340_s0 + $0x134] sm:$0xff]   ;;  %v3627_v58 = vld [vmem:[%s5340_s0 + $0x13c] sm:$0xff]  }
  0x13   :  { %v3628_v59 = vld [vmem:[%s5340_s0 + $0x208] sm:$0xff]   ;;  %v3630_v2 = vld [vmem:[%s5340_s0 + $0x210] sm:$0xff]  }
  0x14   :  { %v3629_v1 = vld [vmem:[%s5340_s0 + $0x144] sm:$0xff]  }
  0x18   :  { %3250 = vmatmul.mubr.msk.bf16.gmra.mrb[8].mxu0 %vm217_vm3, %v3579_v10  ;;  %3306 = vmatmul.mubr.msk.bf16.gmra.mrb[8].mxu1 %vm217_vm3, %v3580_v11  ;;  %v3631_v11 = vld [vmem:[%s5340_s0 + $0x14c] sm:$0xff]  }
  0x19   :  { %3253 = vmatprep.mubr.msk.bf16.mxu0 %vm3664_vm2, %v5345_v0  ;;  %3309 = vmatprep.mubr.msk.bf16.mxu1 %vm3664_vm2, %v5345_v0 }
  0x20   :  { %3254 = vmatmul.mubr.msk.bf16.gmra.mrb[12].mxu0 %vm217_vm3, %v3581_v12  ;;  %3310 = vmatmul.mubr.msk.bf16.gmra.mrb[12].mxu1 %vm217_vm3, %v3582_v13  ;;  %v3632_v12 = vld [vmem:[%s5340_s0 + $0x218] sm:$0xff]  }
  0x21   :  { %3257 = vmatprep.mubr.msk.bf16.mxu0 %vm3664_vm2, %v5345_v0  ;;  %3313 = vmatprep.mubr.msk.bf16.mxu1 %vm3664_vm2, %v5345_v0 }
  0x28   :  { %3258 = vmatmul.mubr.msk.bf16.gmra.mrb[16].mxu0 %vm217_vm3, %v3583_v14  ;;  %3314 = vmatmul.mubr.msk.bf16.gmra.mrb[16].mxu1 %vm217_vm3, %v3584_v15 }
  0x29   :  { %3261 = vmatprep.mubr.msk.bf16.mxu0 %vm3664_vm2, %v5345_v0  ;;  %3317 = vmatprep.mubr.msk.bf16.mxu1 %vm3664_vm2, %v5345_v0 }
  0x30   :  { %3262 = vmatmul.mubr.msk.bf16.gmra.mrb[20].mxu0 %vm217_vm3, %v3585_v16  ;;  %3318 = vmatmul.mubr.msk.bf16.gmra.mrb[20].mxu1 %vm217_vm3, %v3586_v17 }
  0x31   :  { %3265 = vmatprep.mubr.msk.bf16.mxu0 %vm3664_vm2, %v5345_v0  ;;  %3321 = vmatprep.mubr.msk.bf16.mxu1 %vm3664_vm2, %v5345_v0 }
  0x38   :  { %3266 = vmatmul.mubr.msk.bf16.gmra.mrb[24].mxu0 %vm217_vm3, %v3587_v18  ;;  %3322 = vmatmul.mubr.msk.bf16.gmra.mrb[24].mxu1 %vm217_vm3, %v3588_v19 }
  0x39   :  { %3269 = vmatprep.mubr.msk.bf16.mxu0 %vm3664_vm2, %v5345_v0  ;;  %3325 = vmatprep.mubr.msk.bf16.mxu1 %vm3664_vm2, %v5345_v0 }
  0x40   :  { %3270 = vmatmul.mubr.msk.bf16.gmra.mrb[28].mxu0 %vm217_vm3, %v3589_v20  ;;  %3326 = vmatmul.mubr.msk.bf16.gmra.mrb[28].mxu1 %vm217_vm3, %v3590_v21  ;;  %v3633_v21 = vld [vmem:[%s5340_s0 + $0x154] sm:$0xff]  }
  0x41   :  { %3273 = vmatprep.mubr.msk.bf16.mxu0 %vm3664_vm2, %v5345_v0  ;;  %3329 = vmatprep.mubr.msk.bf16.mxu1 %vm3664_vm2, %v5345_v0 }
  0x48   :  { %3274 = vmatmul.mubr.msk.bf16.gmra.mrb[32].mxu0 %vm217_vm3, %v3591_v22  ;;  %3330 = vmatmul.mubr.msk.bf16.gmra.mrb[32].mxu1 %vm217_vm3, %v3592_v23  ;;  %v3634_v22 = vld [vmem:[%s5340_s0 + $0x220] sm:$0xff]  }
  0x49   :  { %3277 = vmatprep.mubr.msk.bf16.mxu0 %vm3664_vm2, %v5345_v0  ;;  %3333 = vmatprep.mubr.msk.bf16.mxu1 %vm3664_vm2, %v5345_v0 }
  0x50   :  { %3278 = vmatmul.mubr.msk.bf16.gmra.mrb[36].mxu0 %vm217_vm3, %v3593_v24  ;;  %3334 = vmatmul.mubr.msk.bf16.gmra.mrb[36].mxu1 %vm217_vm3, %v3594_v25 }
  0x51   :  { %3281 = vmatprep.mubr.msk.bf16.mxu0 %vm3664_vm2, %v5345_v0  ;;  %3337 = vmatprep.mubr.msk.bf16.mxu1 %vm3664_vm2, %v5345_v0 }
  0x58   :  { %3282 = vmatmul.mubr.msk.bf16.gmra.mrb[40].mxu0 %vm217_vm3, %v3595_v26  ;;  %3338 = vmatmul.mubr.msk.bf16.gmra.mrb[40].mxu1 %vm217_vm3, %v3596_v27 }
  0x59   :  { %3285 = vmatprep.mubr.msk.bf16.mxu0 %vm3664_vm2, %v5345_v0  ;;  %3341 = vmatprep.mubr.msk.bf16.mxu1 %vm3664_vm2, %v5345_v0 }
  0x60   :  { %3286 = vmatmul.mubr.msk.bf16.gmra.mrb[44].mxu0 %vm217_vm3, %v3597_v28  ;;  %3342 = vmatmul.mubr.msk.bf16.gmra.mrb[44].mxu1 %vm217_vm3, %v3598_v29 }
  0x61   :  { %3289 = vmatprep.mubr.msk.bf16.mxu0 %vm3664_vm2, %v5345_v0  ;;  %3345 = vmatprep.mubr.msk.bf16.mxu1 %vm3664_vm2, %v5345_v0 }
  0x68   :  { %3290 = vmatmul.mubr.msk.bf16.gmra.mrb[48].mxu0 %vm217_vm3, %v3599_v30  ;;  %3346 = vmatmul.mubr.msk.bf16.gmra.mrb[48].mxu1 %vm217_vm3, %v3600_v31  ;;  %v3635_v31 = vld [vmem:[%s5340_s0 + $0x15c] sm:$0xff]  }
  0x69   :  { %3293 = vmatprep.mubr.msk.bf16.mxu0 %vm3664_vm2, %v5345_v0  ;;  %3351 = vmatprep.mubr.msk.bf16.mxu1 %vm3664_vm2, %v5345_v0 }
  0x70   :  { %3294 = vmatmul.mubr.msk.bf16.gmra.mrb[52].mxu0 %vm217_vm3, %v3601_v32  ;;  %3352 = vmatmul.mubr.msk.bf16.vlgmr.msra.gmra.mrb[52].mxu1 %vm217_vm3, %v3602_v33  ;;  %v3636_v32 = vld [vmem:[%s5340_s0 + $0x228] sm:$0xff]  }
  0x71   :  { %3355 = vmatprep.mubr.msk.bf16.mxu1 %vm3664_vm2, %v5345_v0  ;;  %3461 = vmatprep.mubr.msk.bf16.mxu0 %vm3664_vm2, %v5345_v0 }
  0x78   :  { %3356 = vmatmul.mubr.msk.bf16.gmra.mrb[56].mxu1 %vm217_vm3, %v3603_v34  ;;  %3462 = vmatmul.mubr.msk.bf16.vlgmr.msra.gmra.mrb[56].mxu0 %vm217_vm3, %v3604_v35 }
  0x79   :  { %3359 = vmatprep.mubr.msk.bf16.mxu1 %vm3664_vm2, %v5345_v0  ;;  %3465 = vmatprep.mubr.msk.bf16.mxu0 %vm3664_vm2, %v5345_v0 }
  0x80   :  { %3360 = vmatmul.mubr.msk.bf16.gmra.mrb[60].mxu1 %vm217_vm3, %v3605_v36  ;;  %3466 = vmatmul.mubr.msk.bf16.gmra.mrb[60].mxu0 %vm217_vm3, %v3606_v37 }
  0x81   :  { %3363 = vmatprep.mubr.msk.bf16.mxu1 %vm3664_vm2, %v5345_v0  ;;  %3469 = vmatprep.mubr.msk.bf16.mxu0 %vm3664_vm2, %v5345_v0 }
  0x88   :  { %3364 = vmatmul.mubr.msk.bf16.gmra.mrb[64].mxu1 %vm217_vm3, %v3607_v38  ;;  %3470 = vmatmul.mubr.msk.bf16.gmra.mrb[64].mxu0 %vm217_vm3, %v3608_v39 }
  0x89   :  { %3367 = vmatprep.mubr.msk.bf16.mxu1 %vm3664_vm2, %v5345_v0  ;;  %3473 = vmatprep.mubr.msk.bf16.mxu0 %vm3664_vm2, %v5345_v0 }
  0x90   :  { %3368 = vmatmul.mubr.msk.bf16.gmra.mrb[68].mxu1 %vm217_vm3, %v3609_v40  ;;  %3474 = vmatmul.mubr.msk.bf16.gmra.mrb[68].mxu0 %vm217_vm3, %v3610_v41  ;;  %v3637_v41 = vld [vmem:[%s5340_s0 + $0x164] sm:$0xff]  }
  0x91   :  { %3371 = vmatprep.mubr.msk.bf16.mxu1 %vm3664_vm2, %v5345_v0  ;;  %3477 = vmatprep.mubr.msk.bf16.mxu0 %vm3664_vm2, %v5345_v0 }
  0x98   :  { %3372 = vmatmul.mubr.msk.bf16.gmra.mrb[72].mxu1 %vm217_vm3, %v3611_v42  ;;  %3478 = vmatmul.mubr.msk.bf16.gmra.mrb[72].mxu0 %vm217_vm3, %v3612_v43  ;;  %v3638_v42 = vld [vmem:[%s5340_s0 + $0x230] sm:$0xff]  }
  0x99   :  { %3375 = vmatprep.mubr.msk.bf16.mxu1 %vm3664_vm2, %v5345_v0  ;;  %3481 = vmatprep.mubr.msk.bf16.mxu0 %vm3664_vm2, %v5345_v0 }
  0xa0   :  { %3376 = vmatmul.mubr.msk.bf16.gmra.mrb[76].mxu1 %vm217_vm3, %v3613_v44  ;;  %3482 = vmatmul.mubr.msk.bf16.gmra.mrb[76].mxu0 %vm217_vm3, %v3614_v45 }
  0xa1   :  { %3379 = vmatprep.mubr.msk.bf16.mxu1 %vm3664_vm2, %v5345_v0  ;;  %3485 = vmatprep.mubr.msk.bf16.mxu0 %vm3664_vm2, %v5345_v0 }
  0xa8   :  { %3380 = vmatmul.mubr.msk.bf16.gmra.mrb[80].mxu1 %vm217_vm3, %v3615_v46  ;;  %3486 = vmatmul.mubr.msk.bf16.gmra.mrb[80].mxu0 %vm217_vm3, %v3616_v47 }
  0xa9   :  { %3383 = vmatprep.mubr.msk.bf16.mxu1 %vm3664_vm2, %v5345_v0  ;;  %3489 = vmatprep.mubr.msk.bf16.mxu0 %vm3664_vm2, %v5345_v0 }
  0xb0   :  { %3384 = vmatmul.mubr.msk.bf16.gmra.mrb[84].mxu1 %vm217_vm3, %v3617_v48  ;;  %3490 = vmatmul.mubr.msk.bf16.gmra.mrb[84].mxu0 %vm217_vm3, %v3618_v49 }
  0xb1   :  { %3387 = vmatprep.mubr.msk.bf16.mxu1 %vm3664_vm2, %v5345_v0  ;;  %3493 = vmatprep.mubr.msk.bf16.mxu0 %vm3664_vm2, %v5345_v0 }
  0xb8   :  { %3388 = vmatmul.mubr.msk.bf16.gmra.mrb[88].mxu1 %vm217_vm3, %v3619_v50  ;;  %3494 = vmatmul.mubr.msk.bf16.gmra.mrb[88].mxu0 %vm217_vm3, %v3620_v51  ;;  %v3639_v51 = vld [vmem:[%s5340_s0 + $0x16c] sm:$0xff]  }
  0xb9   :  { %3391 = vmatprep.mubr.msk.bf16.mxu1 %vm3664_vm2, %v5345_v0  ;;  %3497 = vmatprep.mubr.msk.bf16.mxu0 %vm3664_vm2, %v5345_v0 }
  0xc0   :  { %3392 = vmatmul.mubr.msk.bf16.gmra.mrb[92].mxu1 %vm217_vm3, %v3621_v52  ;;  %3498 = vmatmul.mubr.msk.bf16.gmra.mrb[92].mxu0 %vm217_vm3, %v3622_v53  ;;  %v3640_v52 = vld [vmem:[%s5340_s0 + $0x238] sm:$0xff]  }
  0xc1   :  { %3395 = vmatprep.mubr.msk.bf16.mxu1 %vm3664_vm2, %v5345_v0  ;;  %3501 = vmatprep.mubr.msk.bf16.mxu0 %vm3664_vm2, %v5345_v0 }
  0xc8   :  { %3396 = vmatmul.mubr.msk.bf16.gmra.mrb[96].mxu1 %vm217_vm3, %v3623_v54  ;;  %3502 = vmatmul.mubr.msk.bf16.gmra.mrb[96].mxu0 %vm217_vm3, %v3624_v55 }
  0xc9   :  { %3399 = vmatprep.mubr.msk.bf16.mxu1 %vm3664_vm2, %v5345_v0  ;;  %3505 = vmatprep.mubr.msk.bf16.mxu0 %vm3664_vm2, %v5345_v0 }
  0xd0   :  { %3400 = vmatmul.mubr.msk.bf16.gmra.mrb[100].mxu1 %vm217_vm3, %v3625_v56  ;;  %3506 = vmatmul.mubr.msk.bf16.gmra.mrb[100].mxu0 %vm217_vm3, %v3626_v57 }
  0xd1   :  { %3403 = vmatprep.mubr.msk.bf16.mxu1 %vm3664_vm2, %v5345_v0  ;;  %3509 = vmatprep.mubr.msk.bf16.mxu0 %vm3664_vm2, %v5345_v0 }
  0xd8   :  { %3404 = vmatmul.mubr.msk.bf16.gmra.mrb[104].mxu1 %vm217_vm3, %v3627_v58  ;;  %3510 = vmatmul.mubr.msk.bf16.gmra.mrb[104].mxu0 %vm217_vm3, %v3628_v59 }
  0xd9   :  { %3407 = vmatprep.mubr.msk.bf16.mxu1 %vm3664_vm2, %v5345_v0  ;;  %3513 = vmatprep.mubr.msk.bf16.mxu0 %vm3664_vm2, %v5345_v0 }
  0xdb   :  { %v4030_v60 = vpop.f32.mrb[0].mxu0  ;;  %v4032_v61 = vpop.f32.mrb[0].mxu1 }
  0xdc   :  { %v3243_v62 = vpop.f32.mrb[1].mxu0  ;;  %v3299_v63 = vpop.f32.mrb[1].mxu1 }
  0xdd   :  { %v4040_v3 = vpop.f32.mrb[2].mxu0  ;;  %v4042_v4 = vpop.f32.mrb[2].mxu1  ;;  %v3641_v63 = vld [vmem:[%s5340_s0 + $0x174] sm:$0xff]  }
  0xde   :  { %v3244_v5 = vpop.f32.mrb[3].mxu0  ;;  %v3300_v6 = vpop.f32.mrb[3].mxu1 }
  0xe0   :  { %3408 = vmatmul.mubr.msk.bf16.gmra.mrb[108].mxu1 %vm217_vm3, %v3629_v1  ;;  %3514 = vmatmul.mubr.msk.bf16.gmra.mrb[108].mxu0 %vm217_vm3, %v3630_v2  ;;  %v3642_v1 = vld [vmem:[%s5340_s0 + $0x240] sm:$0xff]  }
  0xe1   :  { %3411 = vmatprep.mubr.msk.bf16.mxu1 %vm3664_vm2, %v5345_v0  ;;  %3517 = vmatprep.mubr.msk.bf16.mxu0 %vm3664_vm2, %v5345_v0 }
  0xe3   :  { %v4050_v7 = vpop.f32.mrb[4].mxu0  ;;  %v4052_v8 = vpop.f32.mrb[4].mxu1 }
  0xe4   :  { %v3247_v9 = vpop.f32.mrb[5].mxu0  ;;  %v3303_v10 = vpop.f32.mrb[5].mxu1 }
  0xe5   :  { %v4060_v13 = vpop.f32.mrb[6].mxu0  ;;  %v4062_v14 = vpop.f32.mrb[6].mxu1 }
  0xe6   :  { %v3248_v15 = vpop.f32.mrb[7].mxu0  ;;  %v3304_v16 = vpop.f32.mrb[7].mxu1 }
  0xe7   :  { %v3643_v16 = vld [vmem:[%s5340_s0 + $0x17c] sm:$0xff]  }
  0xe8   :  { %3412 = vmatmul.mubr.msk.bf16.gmra.mrb[112].mxu1 %vm217_vm3, %v3631_v11  ;;  %3518 = vmatmul.mubr.msk.bf16.gmra.mrb[112].mxu0 %vm217_vm3, %v3632_v12 }
  0xe9   :  { %3415 = vmatprep.mubr.msk.bf16.mxu1 %vm3664_vm2, %v5345_v0  ;;  %3521 = vmatprep.mubr.msk.bf16.mxu0 %vm3664_vm2, %v5345_v0 }
  0xeb   :  { %v4070_v17 = vpop.f32.mrb[8].mxu0  ;;  %v4072_v18 = vpop.f32.mrb[8].mxu1 }
  0xec   :  { %v3251_v19 = vpop.f32.mrb[9].mxu0  ;;  %v3307_v20 = vpop.f32.mrb[9].mxu1 }
  0xed   :  { %v4080_v23 = vpop.f32.mrb[10].mxu0  ;;  %v4082_v24 = vpop.f32.mrb[10].mxu1  ;;  %v3644_v19 = vld [vmem:[%s5340_s0 + $0x248] sm:$0xff]  }
  0xee   :  { %v3252_v25 = vpop.f32.mrb[11].mxu0  ;;  %v3308_v26 = vpop.f32.mrb[11].mxu1 }
  0xf0   :  { %3416 = vmatmul.mubr.msk.bf16.gmra.mrb[116].mxu1 %vm217_vm3, %v3633_v21  ;;  %3522 = vmatmul.mubr.msk.bf16.gmra.mrb[116].mxu0 %vm217_vm3, %v3634_v22 }
  0xf1   :  { %3419 = vmatprep.mubr.msk.bf16.mxu1 %vm3664_vm2, %v5345_v0  ;;  %3525 = vmatprep.mubr.msk.bf16.mxu0 %vm3664_vm2, %v5345_v0 }
  0xf3   :  { %v4090_v27 = vpop.f32.mrb[12].mxu0  ;;  %v4092_v28 = vpop.f32.mrb[12].mxu1 }
  0xf4   :  { %v3255_v29 = vpop.f32.mrb[13].mxu0  ;;  %v3311_v30 = vpop.f32.mrb[13].mxu1 }
  0xf5   :  { %v4100_v33 = vpop.f32.mrb[14].mxu0  ;;  %v4102_v34 = vpop.f32.mrb[14].mxu1 }
  0xf6   :  { %v3256_v35 = vpop.f32.mrb[15].mxu0  ;;  %v3312_v36 = vpop.f32.mrb[15].mxu1 }
  0xf7   :  { %v3646_v35 = vld [vmem:[%s5340_s0 + $0x250] sm:$0xff]  }
  0xf8   :  { %3420 = vmatmul.mubr.msk.bf16.gmra.mrb[120].mxu1 %vm217_vm3, %v3635_v31  ;;  %3526 = vmatmul.mubr.msk.bf16.gmra.mrb[120].mxu0 %vm217_vm3, %v3636_v32  ;;  %v3645_v32 = vld [vmem:[%s5340_s0 + $0x184] sm:$0xff]  }
  0xf9   :  { %3423 = vmatprep.mubr.msk.bf16.mxu1 %vm3664_vm2, %v5345_v0  ;;  %3529 = vmatprep.mubr.msk.bf16.mxu0 %vm3664_vm2, %v5345_v0 }
  0xfb   :  { %v4110_v37 = vpop.f32.mrb[16].mxu0  ;;  %v4112_v38 = vpop.f32.mrb[16].mxu1 }
  0xfc   :  { %v3259_v39 = vpop.f32.mrb[17].mxu0  ;;  %v3315_v40 = vpop.f32.mrb[17].mxu1 }
  0xfd   :  { %v4120_v43 = vpop.f32.mrb[18].mxu0  ;;  %v4122_v44 = vpop.f32.mrb[18].mxu1 }
  0xfe   :  { %v3260_v45 = vpop.f32.mrb[19].mxu0  ;;  %v3316_v46 = vpop.f32.mrb[19].mxu1 }
  0xff   :  { %v4217_v46 = vld [vmem:[%s5341_s2] ss:$0 sm:$0xff] }
 0x100   :  { %3424 = vmatmul.mubr.msk.bf16.gmra.mrb[124].mxu1 %vm217_vm3, %v3637_v41  ;;  %3530 = vmatmul.mubr.msk.bf16.gmra.mrb[124].mxu0 %vm217_vm3, %v3638_v42 }
 0x101   :  { %3427 = vmatprep.mubr.msk.bf16.mxu1 %vm3664_vm2, %v5345_v0  ;;  %3533 = vmatprep.mubr.msk.bf16.mxu0 %vm3664_vm2, %v5345_v0 }
 0x103   :  { %v4130_v47 = vpop.f32.mrb[20].mxu0  ;;  %v4132_v48 = vpop.f32.mrb[20].mxu1 }
 0x104   :  { %v3263_v49 = vpop.f32.mrb[21].mxu0  ;;  %v3319_v50 = vpop.f32.mrb[21].mxu1 }
 0x105   :  { %v4140_v53 = vpop.f32.mrb[22].mxu0  ;;  %v4142_v54 = vpop.f32.mrb[22].mxu1 }
 0x106   :  { %v3264_v55 = vpop.f32.mrb[23].mxu0  ;;  %v3320_v56 = vpop.f32.mrb[23].mxu1 }
 0x108   :  { %3428 = vmatmul.mubr.msk.bf16.gmra.mrb[128].mxu1 %vm217_vm3, %v3639_v51  ;;  %3534 = vmatmul.mubr.msk.bf16.gmra.mrb[128].mxu0 %vm217_vm3, %v3640_v52  ;;  %v3647_v51 = vld [vmem:[%s5340_s0 + $0x18c] sm:$0xff]   ;;  %v3648_v52 = vld [vmem:[%s5340_s0 + $0x258] sm:$0xff]  }
 0x109   :  { %3431 = vmatprep.mubr.msk.bf16.mxu1 %vm3664_vm2, %v5345_v0  ;;  %3537 = vmatprep.mubr.msk.bf16.mxu0 %vm3664_vm2, %v5345_v0 }
 0x10b   :  { %v4150_v57 = vpop.f32.mrb[24].mxu0  ;;  %v4152_v58 = vpop.f32.mrb[24].mxu1 }
 0x10c   :  { %v3267_v59 = vpop.f32.mrb[25].mxu0  ;;  %v3323_v62 = vpop.f32.mrb[25].mxu1 }
 0x10d   :  { %v4160_v2 = vpop.f32.mrb[26].mxu0  ;;  %v4162_v5 = vpop.f32.mrb[26].mxu1 }
 0x10e   :  { %v3268_v6 = vpop.f32.mrb[27].mxu0  ;;  %v3324_v9 = vpop.f32.mrb[27].mxu1 }
 0x10f   :  { %v588_v6 = vmul.f32 %v4217_v46, %v4032_v61  ;;  %v561_v61 = vmul.f32 %v4217_v46, %v4040_v3  ;;  %v562_v3 = vmul.f32 %v4217_v46, %v4050_v7 }
 0x110   :  { %3432 = vmatmul.mubr.msk.bf16.gmra.mrb[132].mxu1 %vm217_vm3, %v3641_v63  ;;  %3538 = vmatmul.mubr.msk.bf16.gmra.mrb[132].mxu0 %vm217_vm3, %v3642_v1  ;;  %v560_v63 = vmul.f32 %v4217_v46, %v4030_v60  ;;  %v4234_v1 = vld [vmem:[%s5342_s3] ss:$0 sm:$0xff] }
 0x111   :  { %3435 = vmatprep.mubr.msk.bf16.mxu1 %vm3664_vm2, %v5345_v0  ;;  %3541 = vmatprep.mubr.msk.bf16.mxu0 %vm3664_vm2, %v5345_v0 }
 0x112   :  { %v619_v60 = vadd.f32 %v4234_v1, %v560_v63 }
 0x113   :  { %v4170_v10 = vpop.f32.mrb[28].mxu0  ;;  %v4172_v11 = vpop.f32.mrb[28].mxu1 }
 0x114   :  { %v3271_v12 = vpop.f32.mrb[29].mxu0  ;;  %v3327_v15 = vpop.f32.mrb[29].mxu1  ;;  %vm672_vm4 = vcmp.ge.f32.partialorder %v619_v60, 0.0 }
 0x115   :  { %v4180_v20 = vpop.f32.mrb[30].mxu0  ;;  %v4182_v21 = vpop.f32.mrb[30].mxu1  ;;  %v4252_v15 = vld [vmem:[%s5343_s4] ss:$0 sm:$0xff] }
 0x116   :  { %5347 = vst [vmem:[#allocation2_spill] sm:$0xff] %v4182_v21  ;;  %v3272_v22 = vpop.f32.mrb[31].mxu0  ;;  %v3328_v25 = vpop.f32.mrb[31].mxu1 }
 0x117   :  { %v3649_v22 = vld [vmem:[%s5340_s0 + $0x194] sm:$0xff]   ;;  %v3650_v25 = vld [vmem:[%s5340_s0 + $0x260] sm:$0xff]  }
 0x118   :  { %3436 = vmatmul.mubr.msk.bf16.gmra.mrb[136].mxu1 %vm217_vm3, %v3643_v16  ;;  %3542 = vmatmul.mubr.msk.bf16.gmra.mrb[136].mxu0 %vm217_vm3, %v3644_v19 }
 0x119   :  { %3439 = vmatprep.mubr.msk.bf16.mxu1 %vm3664_vm2, %v5345_v0  ;;  %3545 = vmatprep.mubr.msk.bf16.mxu0 %vm3664_vm2, %v5345_v0 }
 0x11b   :  { %v4190_v26 = vpop.f32.mrb[32].mxu0  ;;  %v4192_v29 = vpop.f32.mrb[32].mxu1 }
 0x11c   :  { %5348 = vst [vmem:[#allocation3_spill] sm:$0xff] %v4192_v29  ;;  %v3275_v30 = vpop.f32.mrb[33].mxu0  ;;  %v3331_v31 = vpop.f32.mrb[33].mxu1 }
 0x11d   :  { %v4200_v36 = vpop.f32.mrb[34].mxu0  ;;  %v4202_v39 = vpop.f32.mrb[34].mxu1  ;;  %v647_v30 = vadd.f32 %v4234_v1, %v588_v6  ;;  %v589_v31 = vmul.f32 %v4217_v46, %v4042_v4  ;;  %v563_v4 = vmul.f32 %v4217_v46, %v4060_v13 }
 0x11e   :  { %5349 = vst [vmem:[#allocation4_spill] sm:$0xff] %v4202_v39  ;;  %v3276_v40 = vpop.f32.mrb[35].mxu0  ;;  %v3332_v41 = vpop.f32.mrb[35].mxu1 }
 0x11f   :  { %v590_v40 = vmul.f32 %v4217_v46, %v4052_v8  ;;  %v648_v7 = vadd.f32 %v4234_v1, %v589_v31  ;;  %vm700_vm5 = vcmp.ge.f32.partialorder %v647_v30, 0.0  ;;  %v621_v8 = vadd.f32 %v4234_v1, %v562_v3 }
 0x120   :  { %3440 = vmatmul.mubr.msk.bf16.gmra.mrb[140].mxu1 %vm217_vm3, %v3645_v32  ;;  %3546 = vmatmul.mubr.msk.bf16.gmra.mrb[140].mxu0 %vm217_vm3, %v3646_v35 }
 0x121   :  { %3443 = vmatprep.mubr.msk.bf16.mxu1 %vm3664_vm2, %v5345_v0  ;;  %3549 = vmatprep.mubr.msk.bf16.mxu0 %vm3664_vm2, %v5345_v0  ;;  %v760_v3 = vmul.f32 %v4252_v15, %v648_v7  ;;  %vm701_vm7 = vcmp.ge.f32.partialorder %v648_v7, 0.0  ;;  %vm674_vm8 = vcmp.ge.f32.partialorder %v621_v8, 0.0 }
 0x123   :  { %v4210_v42 = vpop.f32.mrb[36].mxu0  ;;  %v4212_v45 = vpop.f32.mrb[36].mxu1 }
 0x124   :  { %5350 = vst [vmem:[#allocation5_spill] sm:$0xff] %v4212_v45  ;;  %v3279_v49 = vpop.f32.mrb[37].mxu0  ;;  %v3335_v50 = vpop.f32.mrb[37].mxu1 }
 0x125   :  { %v4225_v55 = vpop.f32.mrb[38].mxu0  ;;  %v4227_v56 = vpop.f32.mrb[38].mxu1  ;;  %v731_v50 = vmul.f32 %v4252_v15, %v619_v60 }
 0x126   :  { %5351 = vst [vmem:[#allocation6_spill] sm:$0xff] %v4227_v56  ;;  %v3280_v59 = vpop.f32.mrb[39].mxu0  ;;  %v3336_v62 = vpop.f32.mrb[39].mxu1 }
 0x127   :  { %v649_v59 = vadd.f32 %v4234_v1, %v590_v40  ;;  %v4287_v13 = vsel %vm672_vm4, %v619_v60, %v731_v50  ;;  %v591_v62 = vmul.f32 %v4217_v46, %v4062_v14  ;;  %v3651_v60 = vld [vmem:[%s5340_s0 + $0x19c] sm:$0xff]   ;;  %v3652_v14 = vld [vmem:[%s5340_s0 + $0x268] sm:$0xff]   ;;  %v565_v40 = vmul.f32 %v4217_v46, %v4080_v23 }
 0x128   :  { %3444 = vmatmul.mubr.msk.bf16.gmra.mrb[144].mxu1 %vm217_vm3, %v3647_v51  ;;  %3550 = vmatmul.mubr.msk.bf16.gmra.mrb[144].mxu0 %vm217_vm3, %v3648_v52  ;;  %v620_v51 = vadd.f32 %v4234_v1, %v561_v61  ;;  %v759_v52 = vmul.f32 %v4252_v15, %v647_v30  ;;  %v733_v50 = vmul.f32 %v4252_v15, %v621_v8 }
 0x129   :  { %3447 = vmatprep.mubr.msk.bf16.mxu1 %vm3664_vm2, %v5345_v0  ;;  %3553 = vmatprep.mubr.msk.bf16.mxu0 %vm3664_vm2, %v5345_v0  ;;  %vm702_vm9 = vcmp.ge.f32.partialorder %v649_v59, 0.0  ;;  %v650_v23 = vadd.f32 %v4234_v1, %v591_v62 }
 0x12a   :  { %vm673_vm6 = vcmp.ge.f32.partialorder %v620_v51, 0.0  ;;  %v732_v61 = vmul.f32 %v4252_v15, %v620_v51  ;;  %v4305_v31 = vsel %vm700_vm5, %v647_v30, %v759_v52  ;;  %v593_v30 = vmul.f32 %v4217_v46, %v4082_v24 }
 0x12b   :  { %v4245_v9 = vpop.f32.mrb[40].mxu0  ;;  %v4247_v12 = vpop.f32.mrb[40].mxu1  ;;  %v4330_v24 = vsel %vm701_vm7, %v648_v7, %v760_v3  ;;  %v594_v7 = vmul.f32 %v4217_v46, %v4092_v28  ;;  %vm703_vm11 = vcmp.ge.f32.partialorder %v650_v23, 0.0  ;;  %v568_v28 = vmul.f32 %v4217_v46, %v4110_v37 }
 0x12c   :  { %5352 = vst [vmem:[#allocation7_spill] sm:$0xff] %v4247_v12  ;;  %v3283_v16 = vpop.f32.mrb[41].mxu0  ;;  %v3339_v19 = vpop.f32.mrb[41].mxu1 }
 0x12d   :  { %v4265_v32 = vpop.f32.mrb[42].mxu0  ;;  %v4267_v35 = vpop.f32.mrb[42].mxu1  ;;  %v622_v16 = vadd.f32 %v4234_v1, %v563_v4  ;;  %v564_v19 = vmul.f32 %v4217_v46, %v4070_v17  ;;  %v592_v17 = vmul.f32 %v4217_v46, %v4072_v18  ;;  %v761_v4 = vmul.f32 %v4252_v15, %v649_v59 }
 0x12e   :  { %5353 = vst [vmem:[#allocation8_spill] sm:$0xff] %v4267_v35  ;;  %v3284_v41 = vpop.f32.mrb[43].mxu0  ;;  %v3340_v49 = vpop.f32.mrb[43].mxu1  ;;  %v566_v18 = vmul.f32 %v4217_v46, %v4090_v27  ;;  %v4338_v27 = vsel %vm674_vm8, %v621_v8, %v733_v50  ;;  %v627_v45 = vadd.f32 %v4234_v1, %v568_v28 }
 0x12f   :  { %vm675_vm10 = vcmp.ge.f32.partialorder %v622_v16, 0.0  ;;  %v651_v62 = vadd.f32 %v4234_v1, %v592_v17  ;;  %v595_v17 = vmul.f32 %v4217_v46, %v4102_v34  ;;  %v596_v34 = vmul.f32 %v4217_v46, %v4112_v38 }
 0x130   :  { %3448 = vmatmul.mubr.msk.bf16.gmra.mrb[148].mxu1 %vm217_vm3, %v3649_v22  ;;  %3554 = vmatmul.mubr.msk.bf16.gmra.mrb[148].mxu0 %vm217_vm3, %v3650_v25  ;;  %vm680_vm5 = vcmp.ge.f32.partialorder %v627_v45, 0.0 }
 0x131   :  { %3451 = vmatprep.mubr.msk.bf16.mxu1 %vm3664_vm2, %v5345_v0  ;;  %3557 = vmatprep.mubr.msk.bf16.mxu0 %vm3664_vm2, %v5345_v0  ;;  %v734_v0 = vmul.f32 %v4252_v15, %v622_v16  ;;  %vm704_vm14 = vcmp.ge.f32.partialorder %v651_v62, 0.0 }
 0x133   :  { %v4291_v63 = vpop.f32.mrb[44].mxu0  ;;  %v4293_v6 = vpop.f32.mrb[44].mxu1  ;;  %v4353_v8 = vsel %vm675_vm10, %v622_v16, %v734_v0  ;;  %v763_v16 = vmul.f32 %v4252_v15, %v651_v62 }
 0x134   :  { %5354 = vst [vmem:[#allocation9_spill] sm:$0xff] %v4293_v6  ;;  %v3287_v22 = vpop.f32.mrb[45].mxu0  ;;  %v3343_v25 = vpop.f32.mrb[45].mxu1 }
 0x135   :  { %v4312_v41 = vpop.f32.mrb[46].mxu0  ;;  %v4314_v49 = vpop.f32.mrb[46].mxu1  ;;  %v4324_v25 = vsel %vm673_vm6, %v620_v51, %v732_v61  ;;  %v4340_v51 = vsel %vm702_vm9, %v649_v59, %v761_v4  ;;  %v652_v61 = vadd.f32 %v4234_v1, %v593_v30  ;;  %v3654_v30 = vld [vmem:[%s5340_s0 + $0x270] sm:$0xff]  }
 0x136   :  { %5355 = vst [vmem:[#allocation10_spill] sm:$0xff] %v4314_v49  ;;  %v3288_v52 = vpop.f32.mrb[47].mxu0  ;;  %v3344_v22 = vpop.f32.mrb[47].mxu1  ;;  %v623_v49 = vadd.f32 %v4234_v1, %v564_v19  ;;  %v762_v19 = vmul.f32 %v4252_v15, %v650_v23 }
 0x137   :  { %v624_v52 = vadd.f32 %v4234_v1, %v565_v40  ;;  %v5356_v22 = vmov 0.0   ;;  %vm705_vm15 = vcmp.ge.f32.partialorder %v652_v61, 0.0 }
 0x138   :  { %3452 = vmatmul.mubr.msk.bf16.gmra.mrb[152].mxu1 %vm217_vm3, %v3651_v60  ;;  %3558 = vmatmul.mubr.msk.bf16.gmra.mrb[152].mxu0 %vm217_vm3, %v3652_v14  ;;  %v625_v60 = vadd.f32 %v4234_v1, %v566_v18  ;;  %v567_v14 = vmul.f32 %v4217_v46, %v4100_v33  ;;  %v735_v59 = vmul.f32 %v4252_v15, %v623_v49  ;;  %v3653_v33 = vld [vmem:[%s5340_s0 + $0x1a4] ss:$0 sps:$4 sm:$0x33]   ;;  %vm676_vm12 = vcmp.ge.f32.partialorder %v623_v49, 0.0 }
 0x139   :  { %3455 = vmatprep.mubr.msk.bf16.mxu1 %vm3664_vm2, %v5356_v22  ;;  %3561 = vmatprep.mubr.msk.bf16.mxu0 %vm3664_vm2, %v5356_v22  ;;  %v736_v0 = vmul.f32 %v4252_v15, %v624_v52  ;;  %vm677_vm13 = vcmp.ge.f32.partialorder %v624_v52, 0.0  ;;  %v4375_v35 = vsel %vm703_vm11, %v650_v23, %v762_v19  ;;  %v4390_v23 = vsel %vm704_vm14, %v651_v62, %v763_v16 }
 0x13a   :  { %v737_v12 = vmul.f32 %v4252_v15, %v625_v60  ;;  %v626_v56 = vadd.f32 %v4234_v1, %v567_v14  ;;  %v4380_v38 = vsel %vm676_vm12, %v623_v49, %v735_v59  ;;  %vm678_vm0 = vcmp.ge.f32.partialorder %v625_v60, 0.0 }
 0x13b   :  { %v4349_v3 = vpop.f32.mrb[48].mxu0  ;;  %v4351_v40 = vpop.f32.mrb[48].mxu1  ;;  %v655_v49 = vadd.f32 %v4234_v1, %v596_v34  ;;  %v597_v14 = vmul.f32 %v4217_v46, %v4122_v44  ;;  %v571_v59 = vmul.f32 %v4217_v46, %v4140_v53  ;;  %v739_v44 = vmul.f32 %v4252_v15, %v627_v45 }
 0x13c   :  { %5357 = vst [vmem:[#allocation11_spill] sm:$0xff] %v4351_v40  ;;  %v3291_v50 = vpop.f32.mrb[49].mxu0  ;;  %v3347_v4 = vpop.f32.mrb[49].mxu1  ;;  %v738_v62 = vmul.f32 %v4252_v15, %v626_v56  ;;  %vm2718_vm11 = vcmask 257024  }
 0x13d   :  { %v4370_v18 = vpop.f32.mrb[50].mxu0  ;;  %v551_v37 = vpop.f32.mrb[50].mxu1  ;;  %v764_v50 = vmul.f32 %v4252_v15, %v652_v61  ;;  %v653_v4 = vadd.f32 %v4234_v1, %v594_v7  ;;  %v569_v7 = vmul.f32 %v4217_v46, %v4120_v43  ;;  %v4422_v16 = vadd.f32 %v4234_v1, %v597_v14 }
 0x13e   :  { %v3292_v40 = vpop.f32.mrb[51].mxu0  ;;  %v3348_v6 = vpop.f32.mrb[51].mxu1  ;;  %v654_v37 = vadd.f32 %v4234_v1, %v595_v17  ;;  %vm708_vm6 = vcmp.ge.f32.partialorder %v655_v49, 0.0  ;;  %v630_v29 = vadd.f32 %v4234_v1, %v571_v59 }
 0x13f   :  { %v4387_v6 = vsel %vm677_vm13, %v624_v52, %v736_v0  ;;  %v4397_v19 = vsel %vm705_vm15, %v652_v61, %v764_v50  ;;  %vm706_vm1 = vcmp.ge.f32.partialorder %v653_v4, 0.0  ;;  %v570_v52 = vmul.f32 %v4217_v46, %v4130_v47 }
 0x140   :  { %3456 = vmatmul.mubr.msk.bf16.gmra.mrb[156].mxu1 %vm217_vm3, %v3653_v33  ;;  %3562 = vmatmul.mubr.msk.bf16.gmra.mrb[156].mxu0 %vm217_vm3, %v3654_v30  ;;  %5358 = vst [vmem:[#allocation12_spill] sm:$0xff] %v4397_v19  ;;  %v4403_v40 = vsel %vm678_vm0, %v625_v60, %v737_v12  ;;  %v765_v43 = vmul.f32 %v4252_v15, %v653_v4  ;;  %v3655_v60 = vld [vmem:[%s5340_s0 + $0x278] ss:$0 sps:$4 sm:$0x33]   ;;  %vm707_vm4 = vcmp.ge.f32.partialorder %v654_v37, 0.0  ;;  %vm683_vm10 = vcmp.ge.f32.partialorder %v630_v29, 0.0 }
 0x141   :  { %3565 = vmatprep.mubr.msk.bf16.mxu0 %vm3664_vm2, %v5356_v22  ;;  %vm679_vm2 = vcmp.ge.f32.partialorder %v626_v56, 0.0  ;;  %v766_v61 = vmul.f32 %v4252_v15, %v654_v37  ;;  %v628_v53 = vadd.f32 %v4234_v1, %v569_v7  ;;  %v767_v33 = vmul.f32 %v4252_v15, %v655_v49 }
 0x142   :  { %v629_v34 = vadd.f32 %v4234_v1, %v570_v52  ;;  %v4428_v39 = vsel %vm679_vm2, %v626_v56, %v738_v62  ;;  %v4431_v7 = vsel %vm706_vm1, %v653_v4, %v765_v43  ;;  %v4438_v52 = vsel %vm680_vm5, %v627_v45, %v739_v44 }
 0x143   :  { %v4409_v17 = vpop.f32.mrb[52].mxu0  ;;  %v1139_v22 = vpop.f32.mrb[52].mxu1  ;;  %5359 = vst [vmem:[#allocation13_spill] sm:$0xff] %v4431_v7  ;;  %v4435_v14 = vsel %vm707_vm4, %v654_v37, %v766_v61  ;;  %vm681_vm8 = vcmp.ge.f32.partialorder %v628_v53, 0.0  ;;  %v740_v56 = vmul.f32 %v4252_v15, %v628_v53  ;;  %v572_v4 = vmul.f32 %v4217_v46, %v4150_v57 }
 0x144   :  { %v1353_v28 = vmul.f32 %v4217_v46, %v1139_v22  ;;  %v3295_v47 = vpop.f32.mrb[53].mxu0  ;;  %v3353_v12 = vpop.f32.mrb[53].mxu1  ;;  %5360 = vst [vmem:[#allocation14_spill] sm:$0xff] %v4435_v14  ;;  %v4446_v43 = vsel %vm708_vm6, %v655_v49, %v767_v33  ;;  %v4450_v37 = vmul.f32 %v4252_v15, %v4422_v16  ;;  %vm682_vm9 = vcmp.ge.f32.partialorder %v629_v34, 0.0 }
 0x145   :  { %v4419_v30 = vpop.f32.mrb[54].mxu0  ;;  %v1142_v0 = vpop.f32.mrb[54].mxu1  ;;  %5361 = vst [vmem:[#allocation15_spill] sm:$0xff] %v4446_v43  ;;  %v741_v59 = vmul.f32 %v4252_v15, %v629_v34  ;;  %v742_v61 = vmul.f32 %v4252_v15, %v630_v29 }
 0x146   :  { %v1406_v50 = vadd.f32 %v4234_v1, %v1353_v28  ;;  %v1354_v22 = vmul.f32 %v4217_v46, %v1142_v0  ;;  %v3296_v47 = vpop.f32.mrb[55].mxu0  ;;  %v3354_v12 = vpop.f32.mrb[55].mxu1 }
 0x147   :  { %v4463_v12 = vmul.f32 %v4217_v46, %v4132_v48  ;;  %v4475_v48 = vsel %vm682_vm9, %v629_v34, %v741_v59 }
 0x148   :  { %vm1459_vm7 = vcmp.ge.f32.partialorder %v1406_v50, 0.0  ;;  %v1512_v28 = vmul.f32 %v4252_v15, %v1406_v50  ;;  %3566 = vmatmul.mubr.msk.bf16.gmra.mrb[160].mxu0 %vm217_vm3, %v3655_v60  ;;  %v1407_v62 = vadd.f32 %v4234_v1, %v1354_v22 }
 0x14a   :  { %v1565_v45 = vsel %vm1459_vm7, %v1406_v50, %v1512_v28  ;;  %vm1460_vm3 = vcmp.ge.f32.partialorder %v1407_v62, 0.0  ;;  %v1513_v57 = vmul.f32 %v4252_v15, %v1407_v62  ;;  %v4459_v50 = vsel %vm681_vm8, %v628_v53, %v740_v56 }
 0x14b   :  { %v1618_v44 = vmax.f32 %v4287_v13, %v1565_v45  ;;  %v1147_v60 = vpop.f32.mrb[56].mxu1  ;;  %v1973_v0 = vpop.f32.mrb[56].mxu0  ;;  %v4466_v13 = vadd.f32 %v4234_v1, %v572_v4  ;;  %v573_v28 = vmul.f32 %v4217_v46, %v4160_v2  ;;  %v4478_v4 = vsel %vm683_vm10, %v630_v29, %v742_v61 }
 0x14c   :  { %v1355_v49 = vmul.f32 %v4217_v46, %v1147_v60  ;;  %v2187_v33 = vmul.f32 %v4217_v46, %v1973_v0  ;;  %v3357_v22 = vpop.f32.mrb[57].mxu1  ;;  %v3463_v47 = vpop.f32.mrb[57].mxu0  ;;  %v1566_v0 = vsel %vm1460_vm3, %v1407_v62, %v1513_v57 }
 0x14d   :  { %v1150_v45 = vpop.f32.mrb[58].mxu1  ;;  %v1976_v60 = vpop.f32.mrb[58].mxu0  ;;  %v1619_v2 = vmax.f32 %v4324_v25, %v1566_v0  ;;  %vm684_vm14 = vcmp.ge.f32.partialorder %v4466_v13, 0.0  ;;  %v743_v29 = vmul.f32 %v4252_v15, %v4466_v13  ;;  %v574_v25 = vmul.f32 %v4217_v46, %v4170_v10 }
 0x14e   :  { %v1408_v22 = vadd.f32 %v4234_v1, %v1355_v49  ;;  %v2240_v47 = vadd.f32 %v4234_v1, %v2187_v33  ;;  %v1356_v53 = vmul.f32 %v4217_v46, %v1150_v45  ;;  %v3464_v56 = vpop.f32.mrb[59].mxu0  ;;  %v3358_v43 = vpop.f32.mrb[59].mxu1  ;;  %v2188_v14 = vmul.f32 %v4217_v46, %v1976_v60 }
 0x14f   :  { %v632_v43 = vadd.f32 %v4234_v1, %v573_v28 }
 0x150   :  { %vm1461_vm12 = vcmp.ge.f32.partialorder %v1408_v22, 0.0  ;;  %v1514_v62 = vmul.f32 %v4252_v15, %v1408_v22  ;;  %vm2293_vm13 = vcmp.ge.f32.partialorder %v2240_v47, 0.0  ;;  %v2346_v57 = vmul.f32 %v4252_v15, %v2240_v47 }
 0x151   :  { %v1409_v34 = vadd.f32 %v4234_v1, %v1356_v53  ;;  %v2241_v59 = vadd.f32 %v4234_v1, %v2188_v14  ;;  %vm685_vm1 = vcmp.ge.f32.partialorder %v632_v43, 0.0  ;;  %v744_v10 = vmul.f32 %v4252_v15, %v632_v43 }
 0x152   :  { %v1567_v61 = vsel %vm1461_vm12, %v1408_v22, %v1514_v62  ;;  %v2399_v49 = vsel %vm2293_vm13, %v2240_v47, %v2346_v57 }
 0x153   :  { %v1620_v33 = vmax.f32 %v4338_v27, %v1567_v61  ;;  %v2452_v45 = vmax.f32 %v1618_v44, %v2399_v49  ;;  %vm1462_vm15 = vcmp.ge.f32.partialorder %v1409_v34, 0.0  ;;  %v1515_v60 = vmul.f32 %v4252_v15, %v1409_v34  ;;  %v1155_v0 = vpop.f32.mrb[60].mxu1  ;;  %v1981_v28 = vpop.f32.mrb[60].mxu0 }
 0x154   :  { %vm2294_vm0 = vcmp.ge.f32.partialorder %v2241_v59, 0.0  ;;  %v2347_v53 = vmul.f32 %v4252_v15, %v2241_v59  ;;  %v1357_v14 = vmul.f32 %v4217_v46, %v1155_v0  ;;  %v2189_v56 = vmul.f32 %v4217_v46, %v1981_v28  ;;  %v3361_v7 = vpop.f32.mrb[61].mxu1  ;;  %v3467_v21 = vpop.f32.mrb[61].mxu0 }
 0x155   :  { %v3102_v22 = vpack.c.bf16 %v2452_v45, %v2452_v45  ;;  %v1568_v27 = vsel %vm1462_vm15, %v1409_v34, %v1515_v60  ;;  %v1158_v44 = vpop.f32.mrb[62].mxu1  ;;  %v1984_v47 = vpop.f32.mrb[62].mxu0  ;;  %v4502_v28 = vadd.f32 %v4234_v1, %v574_v25 }
 0x156   :  { %v1621_v62 = vmax.f32 %v4353_v8, %v1568_v27  ;;  %v2400_v57 = vsel %vm2294_vm0, %v2241_v59, %v2347_v53  ;;  %v1410_v61 = vadd.f32 %v4234_v1, %v1357_v14  ;;  %v2242_v49 = vadd.f32 %v4234_v1, %v2189_v56  ;;  %v3468_v19 = vpop.f32.mrb[63].mxu0  ;;  %v3362_v0 = vpop.f32.mrb[63].mxu1 }
 0x157   :  { %2719 = vst.msk [vmem:[%s5344_s5] sm:$0xf] %vm2718_vm11, %v3102_v22  ;;  %v2453_v21 = vmax.f32 %v1619_v2, %v2400_v57  ;;  %v1358_v7 = vmul.f32 %v4217_v46, %v1158_v44  ;;  %v2190_v8 = vmul.f32 %v4217_v46, %v1984_v47  ;;  %v575_v59 = vmul.f32 %v4217_v46, %v4180_v20 }
 0x158   :  { %vm1463_vm2 = vcmp.ge.f32.partialorder %v1410_v61, 0.0  ;;  %v1516_v34 = vmul.f32 %v4252_v15, %v1410_v61  ;;  %vm2295_vm4 = vcmp.ge.f32.partialorder %v2242_v49, 0.0  ;;  %v2348_v19 = vmul.f32 %v4252_v15, %v2242_v49 }
 0x159   :  { %v3103_v25 = vpack.c.bf16 %v2453_v21, %v2453_v21  ;;  %v1411_v45 = vadd.f32 %v4234_v1, %v1358_v7  ;;  %v2243_v60 = vadd.f32 %v4234_v1, %v2190_v8  ;;  %v4519_v2 = vsel %vm684_vm14, %v4466_v13, %v743_v29 }
 0x15a   :  { %v4522_v53 = vsel %vm685_vm1, %v632_v43, %v744_v10  ;;  %v1569_v14 = vsel %vm1463_vm2, %v1410_v61, %v1516_v34  ;;  %v2401_v56 = vsel %vm2295_vm4, %v2242_v49, %v2348_v19  ;;  %vm686_vm7 = vcmp.ge.f32.partialorder %v4502_v28, 0.0 }
 0x15b   :  { %2720 = vst.msk [vmem:[%s5344_s5 + $0x4] sm:$0xf] %vm2718_vm11, %v3103_v25  ;;  %v1622_v20 = vmax.f32 %v4380_v38, %v1569_v14  ;;  %v2454_v22 = vmax.f32 %v1620_v33, %v2401_v56  ;;  %vm1464_vm5 = vcmp.ge.f32.partialorder %v1411_v45, 0.0  ;;  %v1517_v27 = vmul.f32 %v4252_v15, %v1411_v45  ;;  %v1163_v44 = vpop.f32.mrb[64].mxu1  ;;  %v1989_v47 = vpop.f32.mrb[64].mxu0 }
 0x15c   :  { %vm2296_vm6 = vcmp.ge.f32.partialorder %v2243_v60, 0.0  ;;  %v2349_v13 = vmul.f32 %v4252_v15, %v2243_v60  ;;  %v1359_v43 = vmul.f32 %v4217_v46, %v1163_v44  ;;  %v2191_v29 = vmul.f32 %v4217_v46, %v1989_v47  ;;  %v3365_v10 = vpop.f32.mrb[65].mxu1  ;;  %v3471_v57 = vpop.f32.mrb[65].mxu0 }
 0x15d   :  { %v634_v61 = vadd.f32 %v4234_v1, %v575_v59  ;;  %v3104_v38 = vpack.c.bf16 %v2454_v22, %v2454_v22  ;;  %v1570_v33 = vsel %vm1464_vm5, %v1411_v45, %v1517_v27  ;;  %v1166_v49 = vpop.f32.mrb[66].mxu1  ;;  %v1992_v0 = vpop.f32.mrb[66].mxu0  ;;  %v745_v14 = vmul.f32 %v4252_v15, %v4502_v28 }
 0x15e   :  { %v1623_v21 = vmax.f32 %v4387_v6, %v1570_v33  ;;  %v2402_v7 = vsel %vm2296_vm6, %v2243_v60, %v2349_v13  ;;  %v1412_v8 = vadd.f32 %v4234_v1, %v1359_v43  ;;  %v2244_v34 = vadd.f32 %v4234_v1, %v2191_v29  ;;  %v3472_v19 = vpop.f32.mrb[67].mxu0  ;;  %v3366_v25 = vpop.f32.mrb[67].mxu1 }
 0x15f   :  { %2721 = vst.msk [vmem:[%s5344_s5 + $0x8] sm:$0xf] %vm2718_vm11, %v3104_v38  ;;  %v2455_v59 = vmax.f32 %v1621_v62, %v2402_v7  ;;  %v1360_v45 = vmul.f32 %v4217_v46, %v1166_v49  ;;  %v2192_v6 = vmul.f32 %v4217_v46, %v1992_v0  ;;  %v576_v22 = vmul.f32 %v4217_v46, %v4190_v26 }
 0x160   :  { %vm1465_vm8 = vcmp.ge.f32.partialorder %v1412_v8, 0.0  ;;  %v1518_v60 = vmul.f32 %v4252_v15, %v1412_v8  ;;  %vm2297_vm9 = vcmp.ge.f32.partialorder %v2244_v34, 0.0  ;;  %v2350_v56 = vmul.f32 %v4252_v15, %v2244_v34 }
 0x161   :  { %v3105_v27 = vpack.c.bf16 %v2455_v59, %v2455_v59  ;;  %v1413_v44 = vadd.f32 %v4234_v1, %v1360_v45  ;;  %v2245_v47 = vadd.f32 %v4234_v1, %v2192_v6  ;;  %vm687_vm3 = vcmp.ge.f32.partialorder %v634_v61, 0.0 }
 0x162   :  { %v746_v62 = vmul.f32 %v4252_v15, %v634_v61  ;;  %v1571_v13 = vsel %vm1465_vm8, %v1412_v8, %v1518_v60  ;;  %v2403_v43 = vsel %vm2297_vm9, %v2244_v34, %v2350_v56  ;;  %v4565_v34 = vsel %vm686_vm7, %v4502_v28, %v745_v14 }
 0x163   :  { %2722 = vst.msk [vmem:[%s5344_s5 + $0xc] sm:$0xf] %vm2718_vm11, %v3105_v27  ;;  %v1624_v29 = vmax.f32 %v4403_v40, %v1571_v13  ;;  %v2456_v10 = vmax.f32 %v1622_v20, %v2403_v43  ;;  %vm1466_vm10 = vcmp.ge.f32.partialorder %v1413_v44, 0.0  ;;  %v1519_v26 = vmul.f32 %v4252_v15, %v1413_v44  ;;  %v1171_v57 = vpop.f32.mrb[68].mxu1  ;;  %v1997_v38 = vpop.f32.mrb[68].mxu0 }
 0x164   :  { %vm2298_vm12 = vcmp.ge.f32.partialorder %v2245_v47, 0.0  ;;  %v2351_v33 = vmul.f32 %v4252_v15, %v2245_v47  ;;  %v1361_v49 = vmul.f32 %v4217_v46, %v1171_v57  ;;  %v2193_v0 = vmul.f32 %v4217_v46, %v1997_v38  ;;  %v3369_v7 = vpop.f32.mrb[69].mxu1  ;;  %v3475_v8 = vpop.f32.mrb[69].mxu0 }
 0x165   :  { %v635_v40 = vadd.f32 %v4234_v1, %v576_v22  ;;  %v3106_v20 = vpack.c.bf16 %v2456_v10, %v2456_v10  ;;  %v1572_v19 = vsel %vm1466_vm10, %v1413_v44, %v1519_v26  ;;  %v1174_v25 = vpop.f32.mrb[70].mxu1  ;;  %v2000_v59 = vpop.f32.mrb[70].mxu0  ;;  %v4572_v43 = vsel %vm687_vm3, %v634_v61, %v746_v62 }
 0x166   :  { %v1625_v45 = vmax.f32 %v4428_v39, %v1572_v19  ;;  %v2404_v6 = vsel %vm2298_vm12, %v2245_v47, %v2351_v33  ;;  %v1414_v60 = vadd.f32 %v4234_v1, %v1361_v49  ;;  %v2246_v56 = vadd.f32 %v4234_v1, %v2193_v0  ;;  %v3476_v27 = vpop.f32.mrb[71].mxu0  ;;  %v3370_v13 = vpop.f32.mrb[71].mxu1 }
 0x167   :  { %2723 = vst.msk [vmem:[%s5344_s5 + $0x10] sm:$0xf] %vm2718_vm11, %v3106_v20  ;;  %v2457_v28 = vmax.f32 %v1623_v21, %v2404_v6  ;;  %v1362_v14 = vmul.f32 %v4217_v46, %v1174_v25  ;;  %v2194_v39 = vmul.f32 %v4217_v46, %v2000_v59  ;;  %v577_v61 = vmul.f32 %v4217_v46, %v4200_v36 }
 0x168   :  { %vm1467_vm13 = vcmp.ge.f32.partialorder %v1414_v60, 0.0  ;;  %v1520_v22 = vmul.f32 %v4252_v15, %v1414_v60  ;;  %vm2299_vm14 = vcmp.ge.f32.partialorder %v2246_v56, 0.0  ;;  %v2352_v44 = vmul.f32 %v4252_v15, %v2246_v56 }
 0x169   :  { %v3107_v47 = vpack.c.bf16 %v2457_v28, %v2457_v28  ;;  %v1415_v62 = vadd.f32 %v4234_v1, %v1362_v14  ;;  %v2247_v10 = vadd.f32 %v4234_v1, %v2194_v39  ;;  %vm688_vm15 = vcmp.ge.f32.partialorder %v635_v40, 0.0 }
 0x16a   :  { %v747_v21 = vmul.f32 %v4252_v15, %v635_v40  ;;  %v1573_v26 = vsel %vm1467_vm13, %v1414_v60, %v1520_v22  ;;  %v2405_v57 = vsel %vm2299_vm14, %v2246_v56, %v2352_v44  ;;  %v636_v59 = vadd.f32 %v4234_v1, %v577_v61 }
 0x16b   :  { %2724 = vst.msk [vmem:[%s5344_s5 + $0x14] sm:$0xf] %vm2718_vm11, %v3107_v47  ;;  %v1626_v38 = vmax.f32 %v4438_v52, %v1573_v26  ;;  %v2458_v33 = vmax.f32 %v1624_v29, %v2405_v57  ;;  %vm1468_vm0 = vcmp.ge.f32.partialorder %v1415_v62, 0.0  ;;  %v1521_v36 = vmul.f32 %v4252_v15, %v1415_v62  ;;  %v1179_v49 = vpop.f32.mrb[72].mxu1  ;;  %v2005_v0 = vpop.f32.mrb[72].mxu0 }
 0x16c   :  { %vm2300_vm1 = vcmp.ge.f32.partialorder %v2247_v10, 0.0  ;;  %v2353_v7 = vmul.f32 %v4252_v15, %v2247_v10  ;;  %v1363_v8 = vmul.f32 %v4217_v46, %v1179_v49  ;;  %v2195_v20 = vmul.f32 %v4217_v46, %v2005_v0  ;;  %v3373_v19 = vpop.f32.mrb[73].mxu1  ;;  %v3479_v25 = vpop.f32.mrb[73].mxu0 }
 0x16d   :  { %v578_v52 = vmul.f32 %v4217_v46, %v4210_v42  ;;  %v3108_v29 = vpack.c.bf16 %v2458_v33, %v2458_v33  ;;  %v1574_v6 = vsel %vm1468_vm0, %v1415_v62, %v1521_v36  ;;  %v1182_v60 = vpop.f32.mrb[74].mxu1  ;;  %v2008_v56 = vpop.f32.mrb[74].mxu0  ;;  %v4603_v44 = vsel %vm688_vm15, %v635_v40, %v747_v21 }
 0x16e   :  { %v1627_v27 = vmax.f32 %v4459_v50, %v1574_v6  ;;  %v2406_v13 = vsel %vm2300_vm1, %v2247_v10, %v2353_v7  ;;  %v1416_v28 = vadd.f32 %v4234_v1, %v1363_v8  ;;  %v2248_v14 = vadd.f32 %v4234_v1, %v2195_v20  ;;  %v3480_v39 = vpop.f32.mrb[75].mxu0  ;;  %v3374_v22 = vpop.f32.mrb[75].mxu1 }
 0x16f   :  { %2725 = vst.msk [vmem:[%s5344_s5 + $0x18] sm:$0xf] %vm2718_vm11, %v3108_v29  ;;  %v2459_v42 = vmax.f32 %v1625_v45, %v2406_v13  ;;  %v1364_v61 = vmul.f32 %v4217_v46, %v1182_v60  ;;  %v2196_v50 = vmul.f32 %v4217_v46, %v2008_v56  ;;  %v748_v10 = vmul.f32 %v4252_v15, %v636_v59 }
 0x170   :  { %vm1469_vm2 = vcmp.ge.f32.partialorder %v1416_v28, 0.0  ;;  %v1522_v47 = vmul.f32 %v4252_v15, %v1416_v28  ;;  %vm2301_vm4 = vcmp.ge.f32.partialorder %v2248_v14, 0.0  ;;  %v2354_v62 = vmul.f32 %v4252_v15, %v2248_v14 }
 0x171   :  { %v3109_v40 = vpack.c.bf16 %v2459_v42, %v2459_v42  ;;  %v1417_v21 = vadd.f32 %v4234_v1, %v1364_v61  ;;  %v2249_v26 = vadd.f32 %v4234_v1, %v2196_v50  ;;  %vm689_vm5 = vcmp.ge.f32.partialorder %v636_v59, 0.0 }
 0x172   :  { %v4617_v45 = vadd.f32 %v4234_v1, %v578_v52  ;;  %v1575_v57 = vsel %vm1469_vm2, %v1416_v28, %v1522_v47  ;;  %v2407_v33 = vsel %vm2301_vm4, %v2248_v14, %v2354_v62  ;;  %v4629_v6 = vsel %vm689_vm5, %v636_v59, %v748_v10 }
 0x173   :  { %2726 = vst.msk [vmem:[%s5344_s5 + $0x1c] sm:$0xf] %vm2718_vm11, %v3109_v40  ;;  %v1628_v36 = vmax.f32 %v4475_v48, %v1575_v57  ;;  %v2460_v49 = vmax.f32 %v1626_v38, %v2407_v33  ;;  %vm1470_vm6 = vcmp.ge.f32.partialorder %v1417_v21, 0.0  ;;  %v1523_v0 = vmul.f32 %v4252_v15, %v1417_v21  ;;  %v1187_v7 = vpop.f32.mrb[76].mxu1  ;;  %v2013_v8 = vpop.f32.mrb[76].mxu0 }
 0x174   :  { %vm2302_vm7 = vcmp.ge.f32.partialorder %v2249_v26, 0.0  ;;  %v2355_v20 = vmul.f32 %v4252_v15, %v2249_v26  ;;  %v1365_v19 = vmul.f32 %v4217_v46, %v1187_v7  ;;  %v2197_v25 = vmul.f32 %v4217_v46, %v2013_v8  ;;  %v3377_v52 = vpop.f32.mrb[77].mxu1  ;;  %v3483_v29 = vpop.f32.mrb[77].mxu0 }
 0x175   :  { %v579_v48 = vmul.f32 %v4217_v46, %v4225_v55  ;;  %v3110_v38 = vpack.c.bf16 %v2460_v49, %v2460_v49  ;;  %v1576_v60 = vsel %vm1470_vm6, %v1417_v21, %v1523_v0  ;;  %v1190_v56 = vpop.f32.mrb[78].mxu1  ;;  %v2016_v13 = vpop.f32.mrb[78].mxu0  ;;  %vm690_vm8 = vcmp.ge.f32.partialorder %v4617_v45, 0.0 }
 0x176   :  { %v1629_v28 = vmax.f32 %v4478_v4, %v1576_v60  ;;  %v2408_v14 = vsel %vm2302_vm7, %v2249_v26, %v2355_v20  ;;  %v1418_v39 = vadd.f32 %v4234_v1, %v1365_v19  ;;  %v2250_v22 = vadd.f32 %v4234_v1, %v2197_v25  ;;  %v3484_v42 = vpop.f32.mrb[79].mxu0  ;;  %v3378_v61 = vpop.f32.mrb[79].mxu1 }
 0x177   :  { %2727 = vst.msk [vmem:[%s5344_s5 + $0x20] sm:$0xf] %vm2718_vm11, %v3110_v38  ;;  %v2461_v55 = vmax.f32 %v1627_v27, %v2408_v14  ;;  %v1366_v59 = vmul.f32 %v4217_v46, %v1190_v56  ;;  %v2198_v50 = vmul.f32 %v4217_v46, %v2016_v13  ;;  %v638_v62 = vadd.f32 %v4234_v1, %v579_v48 }
 0x178   :  { %vm1471_vm9 = vcmp.ge.f32.partialorder %v1418_v39, 0.0  ;;  %v1524_v4 = vmul.f32 %v4252_v15, %v1418_v39  ;;  %vm2303_vm3 = vcmp.ge.f32.partialorder %v2250_v22, 0.0  ;;  %v2356_v47 = vmul.f32 %v4252_v15, %v2250_v22 }
 0x179   :  { %v3111_v10 = vpack.c.bf16 %v2461_v55, %v2461_v55  ;;  %v1419_v40 = vadd.f32 %v4234_v1, %v1366_v59  ;;  %v2251_v21 = vadd.f32 %v4234_v1, %v2198_v50  ;;  %v749_v27 = vmul.f32 %v4252_v15, %v4617_v45 }
 0x17a   :  { %v580_v26 = vmul.f32 %v4217_v46, %v4245_v9  ;;  %v1577_v57 = vsel %vm1471_vm9, %v1418_v39, %v1524_v4  ;;  %v2409_v33 = vsel %vm2303_vm3, %v2250_v22, %v2356_v47  ;;  %vm691_vm13 = vcmp.ge.f32.partialorder %v638_v62, 0.0 }
 0x17b   :  { %2728 = vst.msk [vmem:[%s5344_s5 + $0x24] sm:$0xf] %vm2718_vm11, %v3111_v10  ;;  %v1630_v49 = vmax.f32 %v4519_v2, %v1577_v57  ;;  %v2462_v0 = vmax.f32 %v1628_v36, %v2409_v33  ;;  %vm1472_vm10 = vcmp.ge.f32.partialorder %v1419_v40, 0.0  ;;  %v1525_v7 = vmul.f32 %v4252_v15, %v1419_v40  ;;  %v1195_v8 = vpop.f32.mrb[80].mxu1  ;;  %v2021_v20 = vpop.f32.mrb[80].mxu0 }
 0x17c   :  { %vm2304_vm12 = vcmp.ge.f32.partialorder %v2251_v21, 0.0  ;;  %v2357_v19 = vmul.f32 %v4252_v15, %v2251_v21  ;;  %v1367_v9 = vmul.f32 %v4217_v46, %v1195_v8  ;;  %v2199_v25 = vmul.f32 %v4217_v46, %v2021_v20  ;;  %v3381_v52 = vpop.f32.mrb[81].mxu1  ;;  %v3487_v29 = vpop.f32.mrb[81].mxu0 }
 0x17d   :  { %v750_v48 = vmul.f32 %v4252_v15, %v638_v62  ;;  %v3112_v38 = vpack.c.bf16 %v2462_v0, %v2462_v0  ;;  %v1578_v2 = vsel %vm1472_vm10, %v1419_v40, %v1525_v7  ;;  %v1198_v36 = vpop.f32.mrb[82].mxu1  ;;  %v2024_v60 = vpop.f32.mrb[82].mxu0  ;;  %v4666_v61 = vadd.f32 %v4234_v1, %v580_v26 }
 0x17e   :  { %v1631_v56 = vmax.f32 %v4522_v53, %v1578_v2  ;;  %v2410_v13 = vsel %vm2304_vm12, %v2251_v21, %v2357_v19  ;;  %v1420_v14 = vadd.f32 %v4234_v1, %v1367_v9  ;;  %v2252_v39 = vadd.f32 %v4234_v1, %v2199_v25  ;;  %v3488_v22 = vpop.f32.mrb[83].mxu0  ;;  %v3382_v42 = vpop.f32.mrb[83].mxu1 }
 0x17f   :  { %2729 = vst.msk [vmem:[%s5344_s5 + $0x28] sm:$0xf] %vm2718_vm11, %v3112_v38  ;;  %v2463_v55 = vmax.f32 %v1629_v28, %v2410_v13  ;;  %v1368_v59 = vmul.f32 %v4217_v46, %v1198_v36  ;;  %v2200_v53 = vmul.f32 %v4217_v46, %v2024_v60  ;;  %v581_v47 = vmul.f32 %v4217_v46, %v4265_v32 }
 0x180   :  { %vm1473_vm14 = vcmp.ge.f32.partialorder %v1420_v14, 0.0  ;;  %v1526_v50 = vmul.f32 %v4252_v15, %v1420_v14  ;;  %vm2305_vm15 = vcmp.ge.f32.partialorder %v2252_v39, 0.0  ;;  %v2358_v4 = vmul.f32 %v4252_v15, %v2252_v39 }
 0x181   :  { %v3113_v10 = vpack.c.bf16 %v2463_v55, %v2463_v55  ;;  %v1421_v40 = vadd.f32 %v4234_v1, %v1368_v59  ;;  %v2253_v21 = vadd.f32 %v4234_v1, %v2200_v53  ;;  %v4683_v28 = vsel %vm690_vm8, %v4617_v45, %v749_v27 }
 0x182   :  { %v4686_v26 = vsel %vm691_vm13, %v638_v62, %v750_v48  ;;  %v1579_v57 = vsel %vm1473_vm14, %v1420_v14, %v1526_v50  ;;  %v2411_v33 = vsel %vm2305_vm15, %v2252_v39, %v2358_v4  ;;  %vm692_vm2 = vcmp.ge.f32.partialorder %v4666_v61, 0.0 }
 0x183   :  { %2730 = vst.msk [vmem:[%s5344_s5 + $0x2c] sm:$0xf] %vm2718_vm11, %v3113_v10  ;;  %v1632_v32 = vmax.f32 %v4565_v34, %v1579_v57  ;;  %v2464_v0 = vmax.f32 %v1630_v49, %v2411_v33  ;;  %vm1474_vm0 = vcmp.ge.f32.partialorder %v1421_v40, 0.0  ;;  %v1527_v7 = vmul.f32 %v4252_v15, %v1421_v40  ;;  %v1203_v8 = vpop.f32.mrb[84].mxu1  ;;  %v2029_v20 = vpop.f32.mrb[84].mxu0 }
 0x184   :  { %vm2306_vm1 = vcmp.ge.f32.partialorder %v2253_v21, 0.0  ;;  %v2359_v45 = vmul.f32 %v4252_v15, %v2253_v21  ;;  %v1369_v62 = vmul.f32 %v4217_v46, %v1203_v8  ;;  %v2201_v27 = vmul.f32 %v4217_v46, %v2029_v20  ;;  %v3385_v19 = vpop.f32.mrb[85].mxu1  ;;  %v3491_v9 = vpop.f32.mrb[85].mxu0  ;;  %v4727_v33 = vld [vmem:[%s5341_s2] ss:$0 sm:$0xff] }
 0x185   :  { %v640_v25 = vadd.f32 %v4234_v1, %v581_v47  ;;  %v3114_v34 = vpack.c.bf16 %v2464_v0, %v2464_v0  ;;  %v1580_v49 = vsel %vm1474_vm0, %v1421_v40, %v1527_v7  ;;  %v1206_v52 = vpop.f32.mrb[86].mxu1  ;;  %v2032_v29 = vpop.f32.mrb[86].mxu0  ;;  %v751_v14 = vmul.f32 %v4252_v15, %v4666_v61 }
 0x186   :  { %v1633_v48 = vmax.f32 %v4572_v43, %v1580_v49  ;;  %v2412_v38 = vsel %vm2306_vm1, %v2253_v21, %v2359_v45  ;;  %v1422_v2 = vadd.f32 %v4234_v1, %v1369_v62  ;;  %v2254_v36 = vadd.f32 %v4234_v1, %v2201_v27  ;;  %v3492_v60 = vpop.f32.mrb[87].mxu0  ;;  %v3386_v13 = vpop.f32.mrb[87].mxu1 }
 0x187   :  { %2731 = vst.msk [vmem:[%s5344_s5 + $0x30] sm:$0xf] %vm2718_vm11, %v3114_v34  ;;  %v2465_v39 = vmax.f32 %v1631_v56, %v2412_v38  ;;  %v1370_v22 = vmul.f32 %v4217_v46, %v1206_v52  ;;  %v2202_v43 = vmul.f32 %v4217_v46, %v2032_v29  ;;  %v582_v59 = vmul.f32 %v4217_v46, %v4291_v63  ;;  %v4757_v60 = vld [vmem:[%s5343_s4] ss:$0 sm:$0xff] }
 0x188   :  { %vm1475_vm4 = vcmp.ge.f32.partialorder %v1422_v2, 0.0  ;;  %v1528_v42 = vmul.f32 %v4252_v15, %v1422_v2  ;;  %vm2307_vm5 = vcmp.ge.f32.partialorder %v2254_v36, 0.0  ;;  %v2360_v55 = vmul.f32 %v4252_v15, %v2254_v36 }
 0x189   :  { %v3115_v53 = vpack.c.bf16 %v2465_v39, %v2465_v39  ;;  %v1423_v50 = vadd.f32 %v4234_v1, %v1370_v22  ;;  %v2255_v4 = vadd.f32 %v4234_v1, %v2202_v43  ;;  %vm693_vm6 = vcmp.ge.f32.partialorder %v640_v25, 0.0 }
 0x18a   :  { %v752_v56 = vmul.f32 %v4252_v15, %v640_v25  ;;  %v1581_v47 = vsel %vm1475_vm4, %v1422_v2, %v1528_v42  ;;  %v2413_v10 = vsel %vm2307_vm5, %v2254_v36, %v2360_v55 }
 0x18b   :  { %2732 = vst.msk [vmem:[%s5344_s5 + $0x34] sm:$0xf] %vm2718_vm11, %v3115_v53  ;;  %v1634_v40 = vmax.f32 %v4603_v44, %v1581_v47  ;;  %v2466_v21 = vmax.f32 %v1632_v32, %v2413_v10  ;;  %vm1476_vm7 = vcmp.ge.f32.partialorder %v1423_v50, 0.0  ;;  %v1529_v46 = vmul.f32 %v4252_v15, %v1423_v50  ;;  %v1211_v63 = vpop.f32.mrb[88].mxu1  ;;  %v2037_v57 = vpop.f32.mrb[88].mxu0 }
 0x18c   :  { %vm2308_vm8 = vcmp.ge.f32.partialorder %v2255_v4, 0.0  ;;  %v2361_v1 = vmul.f32 %v4252_v15, %v2255_v4  ;;  %v1371_v0 = vmul.f32 %v4727_v33, %v1211_v63  ;;  %v2203_v7 = vmul.f32 %v4727_v33, %v2037_v57  ;;  %v3389_v8 = vpop.f32.mrb[89].mxu1  ;;  %v3495_v44 = vpop.f32.mrb[89].mxu0  ;;  %v4739_v15 = vld [vmem:[%s5342_s3] ss:$0 sm:$0xff] }
 0x18d   :  { %v4734_v32 = vsel %vm692_vm2, %v4666_v61, %v751_v14  ;;  %v641_v20 = vadd.f32 %v4739_v15, %v582_v59  ;;  %v3116_v45 = vpack.c.bf16 %v2466_v21, %v2466_v21  ;;  %v1582_v62 = vsel %vm1476_vm7, %v1423_v50, %v1529_v46  ;;  %v1214_v27 = vpop.f32.mrb[90].mxu1  ;;  %v2040_v19 = vpop.f32.mrb[90].mxu0 }
 0x18e   :  { %v1635_v9 = vmax.f32 %v4629_v6, %v1582_v62  ;;  %v2414_v34 = vsel %vm2308_vm8, %v2255_v4, %v2361_v1  ;;  %v1424_v49 = vadd.f32 %v4739_v15, %v1371_v0  ;;  %v2256_v52 = vadd.f32 %v4739_v15, %v2203_v7  ;;  %v3496_v61 = vpop.f32.mrb[91].mxu0  ;;  %v3390_v29 = vpop.f32.mrb[91].mxu1 }
 0x18f   :  { %v4746_v38 = vsel %vm693_vm6, %v640_v25, %v752_v56  ;;  %2733 = vst.msk [vmem:[%s5344_s5 + $0x38] sm:$0xf] %vm2718_vm11, %v3116_v45  ;;  %v2467_v2 = vmax.f32 %v1633_v48, %v2414_v34  ;;  %v1372_v36 = vmul.f32 %v4727_v33, %v1214_v27  ;;  %v2204_v6 = vmul.f32 %v4727_v33, %v2040_v19 }
 0x190   :  { %vm1477_vm9 = vcmp.ge.f32.partialorder %v1424_v49, 0.0  ;;  %v1530_v13 = vmul.f32 %v4757_v60, %v1424_v49  ;;  %vm2309_vm3 = vcmp.ge.f32.partialorder %v2256_v52, 0.0  ;;  %v2362_v25 = vmul.f32 %v4757_v60, %v2256_v52 }
 0x191   :  { %v583_v14 = vmul.f32 %v4727_v33, %v4312_v41  ;;  %v3117_v39 = vpack.c.bf16 %v2467_v2, %v2467_v2  ;;  %v1425_v48 = vadd.f32 %v4739_v15, %v1372_v36  ;;  %v2257_v22 = vadd.f32 %v4739_v15, %v2204_v6 }
 0x192   :  { %vm694_vm10 = vcmp.ge.f32.partialorder %v641_v20, 0.0  ;;  %v753_v43 = vmul.f32 %v4757_v60, %v641_v20  ;;  %v1583_v42 = vsel %vm1477_vm9, %v1424_v49, %v1530_v13  ;;  %v2415_v55 = vsel %vm2309_vm3, %v2256_v52, %v2362_v25 }
 0x193   :  { %2734 = vst.msk [vmem:[%s5344_s5 + $0x3c] sm:$0xf] %vm2718_vm11, %v3117_v39  ;;  %v1636_v59 = vmax.f32 %v4683_v28, %v1583_v42  ;;  %v2468_v53 = vmax.f32 %v1634_v40, %v2415_v55  ;;  %vm1478_vm12 = vcmp.ge.f32.partialorder %v1425_v48, 0.0  ;;  %v1531_v41 = vmul.f32 %v4757_v60, %v1425_v48  ;;  %v1219_v50 = vpop.f32.mrb[92].mxu1  ;;  %v2045_v4 = vpop.f32.mrb[92].mxu0 }
 0x194   :  { %vm2310_vm13 = vcmp.ge.f32.partialorder %v2257_v22, 0.0  ;;  %v2363_v56 = vmul.f32 %v4757_v60, %v2257_v22  ;;  %v1373_v47 = vmul.f32 %v4727_v33, %v1219_v50  ;;  %v2205_v10 = vmul.f32 %v4727_v33, %v2045_v4  ;;  %v3393_v21 = vpop.f32.mrb[93].mxu1  ;;  %v3499_v46 = vpop.f32.mrb[93].mxu0 }
 0x195   :  { %v642_v63 = vadd.f32 %v4739_v15, %v583_v14  ;;  %v584_v28 = vmul.f32 %v4727_v33, %v4349_v3  ;;  %v3118_v40 = vpack.c.bf16 %v2468_v53, %v2468_v53  ;;  %v1584_v57 = vsel %vm1478_vm12, %v1425_v48, %v1531_v41  ;;  %v1222_v1 = vpop.f32.mrb[94].mxu1  ;;  %v2048_v0 = vpop.f32.mrb[94].mxu0 }
 0x196   :  { %v1637_v7 = vmax.f32 %v4686_v26, %v1584_v57  ;;  %v2416_v8 = vsel %vm2310_vm13, %v2257_v22, %v2363_v56  ;;  %v1426_v44 = vadd.f32 %v4739_v15, %v1373_v47  ;;  %v2258_v45 = vadd.f32 %v4739_v15, %v2205_v10  ;;  %v3500_v62 = vpop.f32.mrb[95].mxu0  ;;  %v3394_v27 = vpop.f32.mrb[95].mxu1 }
 0x197   :  { %v4782_v19 = vsel %vm694_vm10, %v641_v20, %v753_v43  ;;  %2735 = vst.msk [vmem:[%s5344_s5 + $0x40] sm:$0xf] %vm2718_vm11, %v3118_v40  ;;  %v2469_v3 = vmax.f32 %v1635_v9, %v2416_v8  ;;  %v1374_v34 = vmul.f32 %v4727_v33, %v1222_v1  ;;  %v2206_v26 = vmul.f32 %v4727_v33, %v2048_v0 }
 0x198   :  { %vm1479_vm14 = vcmp.ge.f32.partialorder %v1426_v44, 0.0  ;;  %v1532_v49 = vmul.f32 %v4757_v60, %v1426_v44  ;;  %vm2311_vm15 = vcmp.ge.f32.partialorder %v2258_v45, 0.0  ;;  %v2364_v52 = vmul.f32 %v4757_v60, %v2258_v45 }
 0x199   :  { %v754_v61 = vmul.f32 %v4757_v60, %v642_v63  ;;  %v3119_v20 = vpack.c.bf16 %v2469_v3, %v2469_v3  ;;  %v1427_v29 = vadd.f32 %v4739_v15, %v1374_v34  ;;  %v2259_v2 = vadd.f32 %v4739_v15, %v2206_v26 }
 0x19a   :  { %vm695_vm0 = vcmp.ge.f32.partialorder %v642_v63, 0.0  ;;  %v4796_v9 = vadd.f32 %v4739_v15, %v584_v28  ;;  %v1585_v36 = vsel %vm1479_vm14, %v1426_v44, %v1532_v49  ;;  %v2417_v6 = vsel %vm2311_vm15, %v2258_v45, %v2364_v52 }
 0x19b   :  { %2736 = vst.msk [vmem:[%s5344_s5 + $0x44] sm:$0xf] %vm2718_vm11, %v3119_v20  ;;  %v1638_v13 = vmax.f32 %v4734_v32, %v1585_v36  ;;  %v2470_v25 = vmax.f32 %v1636_v59, %v2417_v6  ;;  %vm1480_vm1 = vcmp.ge.f32.partialorder %v1427_v29, 0.0  ;;  %v1533_v14 = vmul.f32 %v4757_v60, %v1427_v29  ;;  %v1227_v39 = vpop.f32.mrb[96].mxu1  ;;  %v2053_v48 = vpop.f32.mrb[96].mxu0 }
 0x19c   :  { %vm2312_vm2 = vcmp.ge.f32.partialorder %v2259_v2, 0.0  ;;  %v2365_v22 = vmul.f32 %v4757_v60, %v2259_v2  ;;  %v1375_v43 = vmul.f32 %v4727_v33, %v1227_v39  ;;  %v2207_v42 = vmul.f32 %v4727_v33, %v2053_v48  ;;  %v3397_v55 = vpop.f32.mrb[97].mxu1  ;;  %v3503_v53 = vpop.f32.mrb[97].mxu0 }
 0x19d   :  { %v4808_v41 = vsel %vm695_vm0, %v642_v63, %v754_v61  ;;  %v585_v32 = vmul.f32 %v4727_v33, %v4370_v18  ;;  %v3120_v59 = vpack.c.bf16 %v2470_v25, %v2470_v25  ;;  %v1586_v50 = vsel %vm1480_vm1, %v1427_v29, %v1533_v14  ;;  %v1230_v4 = vpop.f32.mrb[98].mxu1  ;;  %v2056_v56 = vpop.f32.mrb[98].mxu0 }
 0x19e   :  { %v1639_v47 = vmax.f32 %v4746_v38, %v1586_v50  ;;  %v2418_v10 = vsel %vm2312_vm2, %v2259_v2, %v2365_v22  ;;  %v1428_v21 = vadd.f32 %v4739_v15, %v1375_v43  ;;  %v2260_v46 = vadd.f32 %v4739_v15, %v2207_v42  ;;  %v3504_v28 = vpop.f32.mrb[99].mxu0  ;;  %v3398_v40 = vpop.f32.mrb[99].mxu1 }
 0x19f   :  { %vm696_vm4 = vcmp.ge.f32.partialorder %v4796_v9, 0.0  ;;  %2737 = vst.msk [vmem:[%s5344_s5 + $0x48] sm:$0xf] %vm2718_vm11, %v3120_v59  ;;  %v2471_v18 = vmax.f32 %v1637_v7, %v2418_v10  ;;  %v1376_v63 = vmul.f32 %v4727_v33, %v1230_v4  ;;  %v2208_v57 = vmul.f32 %v4727_v33, %v2056_v56 }
 0x1a0   :  { %vm1481_vm5 = vcmp.ge.f32.partialorder %v1428_v21, 0.0  ;;  %v1534_v38 = vmul.f32 %v4757_v60, %v1428_v21  ;;  %vm2313_vm6 = vcmp.ge.f32.partialorder %v2260_v46, 0.0  ;;  %v2366_v1 = vmul.f32 %v4757_v60, %v2260_v46 }
 0x1a1   :  { %v644_v0 = vadd.f32 %v4739_v15, %v585_v32  ;;  %v3121_v8 = vpack.c.bf16 %v2471_v18, %v2471_v18  ;;  %v1429_v44 = vadd.f32 %v4739_v15, %v1376_v63  ;;  %v2261_v45 = vadd.f32 %v4739_v15, %v2208_v57 }
 0x1a2   :  { %v755_v7 = vmul.f32 %v4757_v60, %v4796_v9  ;;  %v586_v62 = vmul.f32 %v4727_v33, %v4409_v17  ;;  %v1587_v27 = vsel %vm1481_vm5, %v1428_v21, %v1534_v38  ;;  %v2419_v3 = vsel %vm2313_vm6, %v2260_v46, %v2366_v1 }
 0x1a3   :  { %2738 = vst.msk [vmem:[%s5344_s5 + $0x4c] sm:$0xf] %vm2718_vm11, %v3121_v8  ;;  %v1640_v34 = vmax.f32 %v4782_v19, %v1587_v27  ;;  %v2472_v26 = vmax.f32 %v1638_v13, %v2419_v3  ;;  %vm1482_vm7 = vcmp.ge.f32.partialorder %v1429_v44, 0.0  ;;  %v1535_v49 = vmul.f32 %v4757_v60, %v1429_v44  ;;  %v1235_v52 = vpop.f32.mrb[100].mxu1  ;;  %v2061_v61 = vpop.f32.mrb[100].mxu0 }
 0x1a4   :  { %vm2314_vm8 = vcmp.ge.f32.partialorder %v2261_v45, 0.0  ;;  %v2367_v20 = vmul.f32 %v4757_v60, %v2261_v45  ;;  %v1377_v17 = vmul.f32 %v4727_v33, %v1235_v52  ;;  %v2209_v29 = vmul.f32 %v4727_v33, %v2061_v61  ;;  %v3401_v2 = vpop.f32.mrb[101].mxu1  ;;  %v3507_v36 = vpop.f32.mrb[101].mxu0 }
 0x1a5   :  { %vm697_vm9 = vcmp.ge.f32.partialorder %v644_v0, 0.0  ;;  %v756_v6 = vmul.f32 %v4757_v60, %v644_v0  ;;  %v3122_v25 = vpack.c.bf16 %v2472_v26, %v2472_v26  ;;  %v1588_v19 = vsel %vm1482_vm7, %v1429_v44, %v1535_v49  ;;  %v1238_v13 = vpop.f32.mrb[102].mxu1  ;;  %v2064_v14 = vpop.f32.mrb[102].mxu0 }
 0x1a6   :  { %v1641_v39 = vmax.f32 %v4808_v41, %v1588_v19  ;;  %v2420_v48 = vsel %vm2314_vm8, %v2261_v45, %v2367_v20  ;;  %v1430_v22 = vadd.f32 %v4739_v15, %v1377_v17  ;;  %v2262_v43 = vadd.f32 %v4739_v15, %v2209_v29  ;;  %v3508_v42 = vpop.f32.mrb[103].mxu0  ;;  %v3402_v55 = vpop.f32.mrb[103].mxu1 }
 0x1a7   :  { %v645_v53 = vadd.f32 %v4739_v15, %v586_v62  ;;  %2739 = vst.msk [vmem:[%s5344_s5 + $0x50] sm:$0xf] %vm2718_vm11, %v3122_v25  ;;  %v2473_v32 = vmax.f32 %v1639_v47, %v2420_v48  ;;  %v1378_v59 = vmul.f32 %v4727_v33, %v1238_v13  ;;  %v2210_v50 = vmul.f32 %v4727_v33, %v2064_v14 }
 0x1a8   :  { %vm1483_vm3 = vcmp.ge.f32.partialorder %v1430_v22, 0.0  ;;  %v1536_v41 = vmul.f32 %v4757_v60, %v1430_v22  ;;  %vm2315_vm10 = vcmp.ge.f32.partialorder %v2262_v43, 0.0  ;;  %v2368_v4 = vmul.f32 %v4757_v60, %v2262_v43 }
 0x1a9   :  { %v587_v56 = vmul.f32 %v4727_v33, %v4419_v30  ;;  %v3123_v10 = vpack.c.bf16 %v2473_v32, %v2473_v32  ;;  %v1431_v21 = vadd.f32 %v4739_v15, %v1378_v59  ;;  %v2263_v46 = vadd.f32 %v4739_v15, %v2210_v50 }
 0x1aa   :  { %v808_v47 = vsel %vm696_vm4, %v4796_v9, %v755_v7  ;;  %v4861_v28 = vsel %vm697_vm9, %v644_v0, %v756_v6  ;;  %v1589_v40 = vsel %vm1483_vm3, %v1430_v22, %v1536_v41  ;;  %v2421_v18 = vsel %vm2315_vm10, %v2262_v43, %v2368_v4 }
 0x1ab   :  { %2740 = vst.msk [vmem:[%s5344_s5 + $0x54] sm:$0xf] %vm2718_vm11, %v3123_v10  ;;  %v1642_v30 = vmax.f32 %v808_v47, %v1589_v40  ;;  %v2474_v63 = vmax.f32 %v1640_v34, %v2421_v18  ;;  %vm1484_vm12 = vcmp.ge.f32.partialorder %v1431_v21, 0.0  ;;  %v1537_v57 = vmul.f32 %v4757_v60, %v1431_v21  ;;  %v1243_v38 = vpop.f32.mrb[104].mxu1  ;;  %v2069_v1 = vpop.f32.mrb[104].mxu0 }
 0x1ac   :  { %vm709_vm13 = vcmp.ge.f32.partialorder %v4422_v16, 0.0  ;;  %vm2316_vm14 = vcmp.ge.f32.partialorder %v2263_v46, 0.0  ;;  %v2369_v9 = vmul.f32 %v4757_v60, %v2263_v46  ;;  %v1379_v0 = vmul.f32 %v4727_v33, %v1243_v38  ;;  %v3405_v44 = vpop.f32.mrb[105].mxu1  ;;  %v3511_v45 = vpop.f32.mrb[105].mxu0 }
 0x1ad   :  { %v2211_v8 = vmul.f32 %v4727_v33, %v2069_v1  ;;  %v757_v7 = vmul.f32 %v4757_v60, %v645_v53  ;;  %v646_v62 = vadd.f32 %v4739_v15, %v587_v56  ;;  %v3124_v27 = vpack.c.bf16 %v2474_v63, %v2474_v63  ;;  %v1246_v34 = vpop.f32.mrb[106].mxu1  ;;  %v2072_v26 = vpop.f32.mrb[106].mxu0 }
 0x1ae   :  { %v1590_v3 = vsel %vm1484_vm12, %v1431_v21, %v1537_v57  ;;  %v2422_v52 = vsel %vm2316_vm14, %v2263_v46, %v2369_v9  ;;  %v1432_v61 = vadd.f32 %v4739_v15, %v1379_v0  ;;  %v3512_v17 = vpop.f32.mrb[107].mxu0  ;;  %v3406_v29 = vpop.f32.mrb[107].mxu1  ;;  %vm698_vm15 = vcmp.ge.f32.partialorder %v645_v53, 0.0 }
 0x1af   :  { %v1643_v49 = vmax.f32 %v4861_v28, %v1590_v3  ;;  %v2264_v20 = vadd.f32 %v4739_v15, %v2211_v8  ;;  %2741 = vst.msk [vmem:[%s5344_s5 + $0x58] sm:$0xf] %vm2718_vm11, %v3124_v27  ;;  %v2475_v2 = vmax.f32 %v1641_v39, %v2422_v52  ;;  %v1380_v36 = vmul.f32 %v4727_v33, %v1246_v34 }
 0x1b0   :  { %v2212_v6 = vmul.f32 %v4727_v33, %v2072_v26  ;;  %vm1485_vm0 = vcmp.ge.f32.partialorder %v1432_v61, 0.0  ;;  %v1538_v25 = vmul.f32 %v4757_v60, %v1432_v61  ;;  %v758_v13 = vmul.f32 %v4757_v60, %v646_v62 }
 0x1b1   :  { %vm2317_vm1 = vcmp.ge.f32.partialorder %v2264_v20, 0.0  ;;  %v2370_v19 = vmul.f32 %v4757_v60, %v2264_v20  ;;  %v3125_v14 = vpack.c.bf16 %v2475_v2, %v2475_v2  ;;  %v1433_v48 = vadd.f32 %v4739_v15, %v1380_v36 }
 0x1b2   :  { %v2265_v22 = vadd.f32 %v4739_v15, %v2212_v6  ;;  %v810_v43 = vsel %vm698_vm15, %v645_v53, %v757_v7  ;;  %vm699_vm2 = vcmp.ge.f32.partialorder %v646_v62, 0.0  ;;  %v1591_v39 = vsel %vm1485_vm0, %v1432_v61, %v1538_v25 }
 0x1b3   :  { %v2423_v42 = vsel %vm2317_vm1, %v2264_v20, %v2370_v19  ;;  %2742 = vst.msk [vmem:[%s5344_s5 + $0x5c] sm:$0xf] %vm2718_vm11, %v3125_v14  ;;  %v1644_v55 = vmax.f32 %v810_v43, %v1591_v39  ;;  %vm1486_vm4 = vcmp.ge.f32.partialorder %v1433_v48, 0.0  ;;  %v1539_v59 = vmul.f32 %v4757_v60, %v1433_v48  ;;  %v1251_v50 = vpop.f32.mrb[108].mxu1  ;;  %v2077_v41 = vpop.f32.mrb[108].mxu0 }
 0x1b4   :  { %v2476_v32 = vmax.f32 %v1642_v30, %v2423_v42  ;;  %vm2318_vm5 = vcmp.ge.f32.partialorder %v2265_v22, 0.0  ;;  %v2371_v4 = vmul.f32 %v4757_v60, %v2265_v22  ;;  %v1381_v53 = vmul.f32 %v4727_v33, %v1251_v50  ;;  %v3409_v10 = vpop.f32.mrb[109].mxu1  ;;  %v3515_v21 = vpop.f32.mrb[109].mxu0 }
 0x1b5   :  { %v2213_v56 = vmul.f32 %v4727_v33, %v2077_v41  ;;  %v657_v46 = vadd.f32 %v4739_v15, %v4463_v12  ;;  %v811_v47 = vsel %vm699_vm2, %v646_v62, %v758_v13  ;;  %v1592_v40 = vsel %vm1486_vm4, %v1433_v48, %v1539_v59  ;;  %v1254_v18 = vpop.f32.mrb[110].mxu1  ;;  %v2080_v30 = vpop.f32.mrb[110].mxu0 }
 0x1b6   :  { %v3126_v28 = vpack.c.bf16 %v2476_v32, %v2476_v32  ;;  %v1645_v63 = vmax.f32 %v811_v47, %v1592_v40  ;;  %v2424_v57 = vsel %vm2318_vm5, %v2265_v22, %v2371_v4  ;;  %v1434_v38 = vadd.f32 %v4739_v15, %v1381_v53  ;;  %v3516_v9 = vpop.f32.mrb[111].mxu0  ;;  %v3410_v0 = vpop.f32.mrb[111].mxu1 }
 0x1b7   :  { %v2266_v1 = vadd.f32 %v4739_v15, %v2213_v56  ;;  %v4905_v8 = vsel %vm709_vm13, %v4422_v16, %v4450_v37  ;;  %v2477_v12 = vmax.f32 %v1643_v49, %v2424_v57  ;;  %v1382_v44 = vmul.f32 %v4727_v33, %v1254_v18 }
 0x1b8   :  { %2743 = vst.msk [vmem:[%s5344_s5 + $0x60] sm:$0xf] %vm2718_vm11, %v3126_v28  ;;  %v2214_v45 = vmul.f32 %v4727_v33, %v2080_v30  ;;  %vm1487_vm6 = vcmp.ge.f32.partialorder %v1434_v38, 0.0  ;;  %v1540_v7 = vmul.f32 %v4757_v60, %v1434_v38  ;;  %v599_v16 = vmul.f32 %v4727_v33, %v4142_v54 }
 0x1b9   :  { %vm2319_vm7 = vcmp.ge.f32.partialorder %v2266_v1, 0.0  ;;  %v2372_v62 = vmul.f32 %v4757_v60, %v2266_v1  ;;  %v3127_v37 = vpack.c.bf16 %v2477_v12, %v2477_v12  ;;  %v1435_v27 = vadd.f32 %v4739_v15, %v1382_v44 }
 0x1ba   :  { %v2267_v3 = vadd.f32 %v4739_v15, %v2214_v45  ;;  %vm710_vm8 = vcmp.ge.f32.partialorder %v657_v46, 0.0  ;;  %v769_v34 = vmul.f32 %v4757_v60, %v657_v46  ;;  %v1593_v26 = vsel %vm1487_vm6, %v1434_v38, %v1540_v7 }
 0x1bb   :  { %v2425_v49 = vsel %vm2319_vm7, %v2266_v1, %v2372_v62  ;;  %2744 = vst.msk [vmem:[%s5344_s5 + $0x64] sm:$0xf] %vm2718_vm11, %v3127_v37  ;;  %v1646_v52 = vmax.f32 %v4305_v31, %v1593_v26  ;;  %vm1488_vm9 = vcmp.ge.f32.partialorder %v1435_v27, 0.0  ;;  %v1541_v54 = vmul.f32 %v4757_v60, %v1435_v27  ;;  %v1259_v20 = vpop.f32.mrb[112].mxu1  ;;  %v2085_v17 = vpop.f32.mrb[112].mxu0 }
 0x1bc   :  { %v2478_v61 = vmax.f32 %v1644_v55, %v2425_v49  ;;  %vm2320_vm3 = vcmp.ge.f32.partialorder %v2267_v3, 0.0  ;;  %v2373_v29 = vmul.f32 %v4757_v60, %v2267_v3  ;;  %v1383_v2 = vmul.f32 %v4727_v33, %v1259_v20  ;;  %v3413_v6 = vpop.f32.mrb[113].mxu1  ;;  %v3519_v25 = vpop.f32.mrb[113].mxu0 }
 0x1bd   :  { %v2215_v36 = vmul.f32 %v4727_v33, %v2085_v17  ;;  %v658_v19 = vadd.f32 %v4739_v15, %v599_v16  ;;  %v600_v31 = vmul.f32 %v4727_v33, %v4152_v58  ;;  %v1594_v14 = vsel %vm1488_vm9, %v1435_v27, %v1541_v54  ;;  %v1262_v48 = vpop.f32.mrb[114].mxu1  ;;  %v2088_v22 = vpop.f32.mrb[114].mxu0 }
 0x1be   :  { %v3128_v13 = vpack.c.bf16 %v2478_v61, %v2478_v61  ;;  %v1647_v43 = vmax.f32 %v4330_v24, %v1594_v14  ;;  %v2426_v39 = vsel %vm2320_vm3, %v2267_v3, %v2373_v29  ;;  %v1436_v42 = vadd.f32 %v4739_v15, %v1383_v2  ;;  %v3520_v32 = vpop.f32.mrb[115].mxu0  ;;  %v3414_v59 = vpop.f32.mrb[115].mxu1 }
 0x1bf   :  { %v2268_v55 = vadd.f32 %v4739_v15, %v2215_v36  ;;  %v4936_v50 = vsel %vm710_vm8, %v657_v46, %v769_v34  ;;  %v2479_v58 = vmax.f32 %v1645_v63, %v2426_v39  ;;  %v1384_v41 = vmul.f32 %v4727_v33, %v1262_v48 }
 0x1c0   :  { %2745 = vst.msk [vmem:[%s5344_s5 + $0x68] sm:$0xf] %vm2718_vm11, %v3128_v13  ;;  %v2216_v24 = vmul.f32 %v4727_v33, %v2088_v22  ;;  %vm1489_vm10 = vcmp.ge.f32.partialorder %v1436_v42, 0.0  ;;  %v1542_v4 = vmul.f32 %v4757_v60, %v1436_v42  ;;  %v770_v56 = vmul.f32 %v4757_v60, %v658_v19 }
 0x1c1   :  { %vm2321_vm12 = vcmp.ge.f32.partialorder %v2268_v55, 0.0  ;;  %v2374_v53 = vmul.f32 %v4757_v60, %v2268_v55  ;;  %v3129_v10 = vpack.c.bf16 %v2479_v58, %v2479_v58  ;;  %v1437_v21 = vadd.f32 %v4739_v15, %v1384_v41 }
 0x1c2   :  { %v2269_v46 = vadd.f32 %v4739_v15, %v2216_v24  ;;  %vm711_vm13 = vcmp.ge.f32.partialorder %v658_v19, 0.0  ;;  %v4950_v47 = vadd.f32 %v4739_v15, %v600_v31  ;;  %v1595_v28 = vsel %vm1489_vm10, %v1436_v42, %v1542_v4  ;;  %v5362_v4 = vld [vmem:[#allocation12_spill] sm:$0xff] }
 0x1c3   :  { %v2427_v40 = vsel %vm2321_vm12, %v2268_v55, %v2374_v53  ;;  %2746 = vst.msk [vmem:[%s5344_s5 + $0x6c] sm:$0xf] %vm2718_vm11, %v3129_v10  ;;  %v1648_v18 = vmax.f32 %v4340_v51, %v1595_v28  ;;  %vm1490_vm14 = vcmp.ge.f32.partialorder %v1437_v21, 0.0  ;;  %v1543_v63 = vmul.f32 %v4757_v60, %v1437_v21  ;;  %v1267_v57 = vpop.f32.mrb[116].mxu1  ;;  %v2093_v38 = vpop.f32.mrb[116].mxu0 }
 0x1c4   :  { %v2480_v30 = vmax.f32 %v1646_v52, %v2427_v40  ;;  %vm2322_vm15 = vcmp.ge.f32.partialorder %v2269_v46, 0.0  ;;  %v2375_v1 = vmul.f32 %v4757_v60, %v2269_v46  ;;  %v1385_v9 = vmul.f32 %v4727_v33, %v1267_v57  ;;  %v3417_v12 = vpop.f32.mrb[117].mxu1  ;;  %v3523_v44 = vpop.f32.mrb[117].mxu0 }
 0x1c5   :  { %v2217_v0 = vmul.f32 %v4727_v33, %v2093_v38  ;;  %v4962_v45 = vsel %vm711_vm13, %v658_v19, %v770_v56  ;;  %v601_v51 = vmul.f32 %v4727_v33, %v4162_v5  ;;  %v1596_v62 = vsel %vm1490_vm14, %v1437_v21, %v1543_v63  ;;  %v1270_v16 = vpop.f32.mrb[118].mxu1  ;;  %v2096_v37 = vpop.f32.mrb[118].mxu0 }
 0x1c6   :  { %v3130_v7 = vpack.c.bf16 %v2480_v30, %v2480_v30  ;;  %v1649_v27 = vmax.f32 %v4375_v35, %v1596_v62  ;;  %v2428_v3 = vsel %vm2322_vm15, %v2269_v46, %v2375_v1  ;;  %v1438_v34 = vadd.f32 %v4739_v15, %v1385_v9  ;;  %v3524_v49 = vpop.f32.mrb[119].mxu0  ;;  %v3418_v52 = vpop.f32.mrb[119].mxu1  ;;  %v5363_v1 = vld [vmem:[#allocation2_spill] sm:$0xff] }
 0x1c7   :  { %v2270_v26 = vadd.f32 %v4739_v15, %v2217_v0  ;;  %vm712_vm0 = vcmp.ge.f32.partialorder %v4950_v47, 0.0  ;;  %v2481_v5 = vmax.f32 %v1647_v43, %v2428_v3  ;;  %v1386_v61 = vmul.f32 %v4727_v33, %v1270_v16 }
 0x1c8   :  { %2747 = vst.msk [vmem:[%s5344_s5 + $0x70] sm:$0xf] %vm2718_vm11, %v3130_v7  ;;  %v2218_v54 = vmul.f32 %v4727_v33, %v2096_v37  ;;  %vm1491_vm1 = vcmp.ge.f32.partialorder %v1438_v34, 0.0  ;;  %v1544_v35 = vmul.f32 %v4757_v60, %v1438_v34  ;;  %v660_v17 = vadd.f32 %v4739_v15, %v601_v51  ;;  %v5364_v37 = vld [vmem:[#allocation13_spill] sm:$0xff] }
 0x1c9   :  { %vm2323_vm2 = vcmp.ge.f32.partialorder %v2270_v26, 0.0  ;;  %v2376_v20 = vmul.f32 %v4757_v60, %v2270_v26  ;;  %v3131_v29 = vpack.c.bf16 %v2481_v5, %v2481_v5  ;;  %v1439_v2 = vadd.f32 %v4739_v15, %v1386_v61 }
 0x1ca   :  { %v2271_v36 = vadd.f32 %v4739_v15, %v2218_v54  ;;  %v771_v6 = vmul.f32 %v4757_v60, %v4950_v47  ;;  %v602_v25 = vmul.f32 %v4727_v33, %v4172_v11  ;;  %v1597_v19 = vsel %vm1491_vm1, %v1438_v34, %v1544_v35 }
 0x1cb   :  { %v2429_v31 = vsel %vm2323_vm2, %v2270_v26, %v2376_v20  ;;  %2748 = vst.msk [vmem:[%s5344_s5 + $0x74] sm:$0xf] %vm2718_vm11, %v3131_v29  ;;  %v1650_v13 = vmax.f32 %v4390_v23, %v1597_v19  ;;  %vm1492_vm4 = vcmp.ge.f32.partialorder %v1439_v2, 0.0  ;;  %v1545_v48 = vmul.f32 %v4757_v60, %v1439_v2  ;;  %v1275_v22 = vpop.f32.mrb[120].mxu1  ;;  %v2101_v43 = vpop.f32.mrb[120].mxu0 }
 0x1cc   :  { %v2482_v14 = vmax.f32 %v1648_v18, %v2429_v31  ;;  %vm2324_vm5 = vcmp.ge.f32.partialorder %v2271_v36, 0.0  ;;  %v2377_v39 = vmul.f32 %v4757_v60, %v2271_v36  ;;  %v1387_v11 = vmul.f32 %v4727_v33, %v1275_v22  ;;  %v3421_v55 = vpop.f32.mrb[121].mxu1  ;;  %v3527_v32 = vpop.f32.mrb[121].mxu0 }
 0x1cd   :  { %v2219_v42 = vmul.f32 %v4727_v33, %v2101_v43  ;;  %vm713_vm6 = vcmp.ge.f32.partialorder %v660_v17, 0.0  ;;  %v772_v59 = vmul.f32 %v4757_v60, %v660_v17  ;;  %v1598_v23 = vsel %vm1492_vm4, %v1439_v2, %v1545_v48  ;;  %v1278_v41 = vpop.f32.mrb[122].mxu1  ;;  %v2104_v24 = vpop.f32.mrb[122].mxu0  ;;  %v5366_v55 = vld [vmem:[#allocation3_spill] sm:$0xff] }
 0x1ce   :  { %v3132_v58 = vpack.c.bf16 %v2482_v14, %v2482_v14  ;;  %v1651_v53 = vmax.f32 %v5362_v4, %v1598_v23  ;;  %v2430_v56 = vsel %vm2324_vm5, %v2271_v36, %v2377_v39  ;;  %v1440_v10 = vadd.f32 %v4739_v15, %v1387_v11  ;;  %v3528_v46 = vpop.f32.mrb[123].mxu0  ;;  %v3422_v28 = vpop.f32.mrb[123].mxu1  ;;  %v5365_v36 = vld [vmem:[#allocation14_spill] sm:$0xff] }
 0x1cf   :  { %v2272_v21 = vadd.f32 %v4739_v15, %v2219_v42  ;;  %v4999_v40 = vadd.f32 %v4739_v15, %v602_v25  ;;  %v2483_v18 = vmax.f32 %v1649_v27, %v2430_v56  ;;  %v1388_v30 = vmul.f32 %v4727_v33, %v1278_v41 }
 0x1d0   :  { %2749 = vst.msk [vmem:[%s5344_s5 + $0x78] sm:$0xf] %vm2718_vm11, %v3132_v58  ;;  %v2220_v63 = vmul.f32 %v4727_v33, %v2104_v24  ;;  %vm1493_vm7 = vcmp.ge.f32.partialorder %v1440_v10, 0.0  ;;  %v1546_v57 = vmul.f32 %v4757_v60, %v1440_v10  ;;  %v603_v9 = vmul.f32 %v4727_v33, %v5363_v1 }
 0x1d1   :  { %vm2325_vm8 = vcmp.ge.f32.partialorder %v2272_v21, 0.0  ;;  %v2378_v38 = vmul.f32 %v4757_v60, %v2272_v21  ;;  %v3133_v0 = vpack.c.bf16 %v2483_v18, %v2483_v18  ;;  %v1441_v12 = vadd.f32 %v4739_v15, %v1388_v30 }
 0x1d2   :  { %v2273_v44 = vadd.f32 %v4739_v15, %v2220_v63  ;;  %v5016_v51 = vsel %vm712_vm0, %v4950_v47, %v771_v6  ;;  %v5019_v7 = vsel %vm713_vm6, %v660_v17, %v772_v59  ;;  %v1599_v62 = vsel %vm1493_vm7, %v1440_v10, %v1546_v57 }
 0x1d3   :  { %v2431_v16 = vsel %vm2325_vm8, %v2272_v21, %v2378_v38  ;;  %2750 = vst.msk [vmem:[%s5344_s5 + $0x7c] sm:$0xf] %vm2718_vm11, %v3133_v0  ;;  %v1652_v27 = vmax.f32 %v5364_v37, %v1599_v62  ;;  %vm1494_vm9 = vcmp.ge.f32.partialorder %v1441_v12, 0.0  ;;  %v1547_v34 = vmul.f32 %v4757_v60, %v1441_v12  ;;  %v1283_v26 = vpop.f32.mrb[124].mxu1  ;;  %v2109_v49 = vpop.f32.mrb[124].mxu0 }
 0x1d4   :  { %v2484_v3 = vmax.f32 %v1650_v13, %v2431_v16  ;;  %vm2326_vm3 = vcmp.ge.f32.partialorder %v2273_v44, 0.0  ;;  %v2379_v47 = vmul.f32 %v4757_v60, %v2273_v44  ;;  %v1389_v52 = vmul.f32 %v4727_v33, %v1283_v26  ;;  %v3425_v61 = vpop.f32.mrb[125].mxu1  ;;  %v3531_v54 = vpop.f32.mrb[125].mxu0 }
 0x1d5   :  { %v2221_v5 = vmul.f32 %v4727_v33, %v2109_v49  ;;  %vm714_vm10 = vcmp.ge.f32.partialorder %v4999_v40, 0.0  ;;  %v662_v35 = vadd.f32 %v4739_v15, %v603_v9  ;;  %v1600_v17 = vsel %vm1494_vm9, %v1441_v12, %v1547_v34  ;;  %v1286_v29 = vpop.f32.mrb[126].mxu1  ;;  %v2112_v2 = vpop.f32.mrb[126].mxu0  ;;  %v5368_v61 = vld [vmem:[#allocation4_spill] sm:$0xff] }
 0x1d6   :  { %v3134_v20 = vpack.c.bf16 %v2484_v3, %v2484_v3  ;;  %v1653_v6 = vmax.f32 %v5365_v36, %v1600_v17  ;;  %v2432_v25 = vsel %vm2326_vm3, %v2273_v44, %v2379_v47  ;;  %v1442_v19 = vadd.f32 %v4739_v15, %v1389_v52  ;;  %v3532_v13 = vpop.f32.mrb[127].mxu0  ;;  %v3426_v14 = vpop.f32.mrb[127].mxu1 }
 0x1d7   :  { %v2274_v31 = vadd.f32 %v4739_v15, %v2221_v5  ;;  %v773_v48 = vmul.f32 %v4757_v60, %v4999_v40  ;;  %v2485_v22 = vmax.f32 %v1651_v53, %v2432_v25  ;;  %v1390_v43 = vmul.f32 %v4727_v33, %v1286_v29  ;;  %v5367_v53 = vld [vmem:[#allocation15_spill] sm:$0xff] }
 0x1d8   :  { %2751 = vst.msk [vmem:[%s5344_s5 + $0x80] sm:$0xf] %vm2718_vm11, %v3134_v20  ;;  %v2222_v39 = vmul.f32 %v4727_v33, %v2112_v2  ;;  %vm1495_vm12 = vcmp.ge.f32.partialorder %v1442_v19, 0.0  ;;  %v1548_v11 = vmul.f32 %v4757_v60, %v1442_v19  ;;  %v604_v32 = vmul.f32 %v4727_v33, %v5366_v55 }
 0x1d9   :  { %vm2327_vm13 = vcmp.ge.f32.partialorder %v2274_v31, 0.0  ;;  %v2380_v42 = vmul.f32 %v4757_v60, %v2274_v31  ;;  %v3135_v59 = vpack.c.bf16 %v2485_v22, %v2485_v22  ;;  %v1443_v58 = vadd.f32 %v4739_v15, %v1390_v43 }
 0x1da   :  { %v2275_v23 = vadd.f32 %v4739_v15, %v2222_v39  ;;  %vm715_vm14 = vcmp.ge.f32.partialorder %v662_v35, 0.0  ;;  %v774_v41 = vmul.f32 %v4757_v60, %v662_v35  ;;  %v1601_v24 = vsel %vm1495_vm12, %v1442_v19, %v1548_v11 }
 0x1db   :  { %v2433_v4 = vsel %vm2327_vm13, %v2274_v31, %v2380_v42  ;;  %2752 = vst.msk [vmem:[%s5344_s5 + $0x84] sm:$0xf] %vm2718_vm11, %v3135_v59  ;;  %v1654_v56 = vmax.f32 %v5367_v53, %v1601_v24  ;;  %vm1496_vm15 = vcmp.ge.f32.partialorder %v1443_v58, 0.0  ;;  %v1549_v21 = vmul.f32 %v4757_v60, %v1443_v58  ;;  %v1291_v46 = vpop.f32.mrb[128].mxu1  ;;  %v2117_v28 = vpop.f32.mrb[128].mxu0  ;;  %v5369_v42 = vld [vmem:[#allocation5_spill] sm:$0xff] }
 0x1dc   :  { %v2486_v10 = vmax.f32 %v1652_v27, %v2433_v4  ;;  %vm2328_vm0 = vcmp.ge.f32.partialorder %v2275_v23, 0.0  ;;  %v2381_v18 = vmul.f32 %v4757_v60, %v2275_v23  ;;  %v1391_v30 = vmul.f32 %v4727_v33, %v1291_v46  ;;  %v3429_v57 = vpop.f32.mrb[129].mxu1  ;;  %v3535_v38 = vpop.f32.mrb[129].mxu0 }
 0x1dd   :  { %v2223_v63 = vmul.f32 %v4727_v33, %v2117_v28  ;;  %v5062_v1 = vsel %vm714_vm10, %v4999_v40, %v773_v48  ;;  %v663_v9 = vadd.f32 %v4739_v15, %v604_v32  ;;  %v1602_v12 = vsel %vm1496_vm15, %v1443_v58, %v1549_v21  ;;  %v1294_v44 = vpop.f32.mrb[130].mxu1  ;;  %v2120_v62 = vpop.f32.mrb[130].mxu0 }
 0x1de   :  { %v3136_v0 = vpack.c.bf16 %v2486_v10, %v2486_v10  ;;  %v1655_v16 = vmax.f32 %v4905_v8, %v1602_v12  ;;  %v2434_v37 = vsel %vm2328_vm0, %v2275_v23, %v2381_v18  ;;  %v1444_v27 = vadd.f32 %v4739_v15, %v1391_v30  ;;  %v3536_v34 = vpop.f32.mrb[131].mxu0  ;;  %v3430_v26 = vpop.f32.mrb[131].mxu1 }
 0x1df   :  { %v2276_v3 = vadd.f32 %v4739_v15, %v2223_v63  ;;  %v5069_v49 = vsel %vm715_vm14, %v662_v35, %v774_v41  ;;  %v2487_v40 = vmax.f32 %v1653_v6, %v2434_v37  ;;  %v1392_v47 = vmul.f32 %v4727_v33, %v1294_v44 }
 0x1e0   :  { %2753 = vst.msk [vmem:[%s5344_s5 + $0x88] sm:$0xf] %vm2718_vm11, %v3136_v0  ;;  %v2224_v8 = vmul.f32 %v4727_v33, %v2120_v62  ;;  %vm1497_vm1 = vcmp.ge.f32.partialorder %v1444_v27, 0.0  ;;  %v1550_v52 = vmul.f32 %v4757_v60, %v1444_v27  ;;  %v605_v54 = vmul.f32 %v4727_v33, %v5368_v61 }
 0x1e1   :  { %vm2329_vm2 = vcmp.ge.f32.partialorder %v2276_v3, 0.0  ;;  %v2382_v5 = vmul.f32 %v4757_v60, %v2276_v3  ;;  %v3137_v35 = vpack.c.bf16 %v2487_v40, %v2487_v40  ;;  %v1445_v20 = vadd.f32 %v4739_v15, %v1392_v47 }
 0x1e2   :  { %v2277_v17 = vadd.f32 %v4739_v15, %v2224_v8  ;;  %vm716_vm4 = vcmp.ge.f32.partialorder %v663_v9, 0.0  ;;  %v775_v29 = vmul.f32 %v4757_v60, %v663_v9  ;;  %v1603_v2 = vsel %vm1497_vm1, %v1444_v27, %v1550_v52  ;;  %v5370_v8 = vld [vmem:[#allocation6_spill] sm:$0xff] }
 0x1e3   :  { %v2435_v36 = vsel %vm2329_vm2, %v2276_v3, %v2382_v5  ;;  %2754 = vst.msk [vmem:[%s5344_s5 + $0x8c] sm:$0xf] %vm2718_vm11, %v3137_v35  ;;  %v1656_v6 = vmax.f32 %v4936_v50, %v1603_v2  ;;  %vm1498_vm5 = vcmp.ge.f32.partialorder %v1445_v20, 0.0  ;;  %v1551_v19 = vmul.f32 %v4757_v60, %v1445_v20  ;;  %v1299_v31 = vpop.f32.mrb[132].mxu1  ;;  %v2125_v13 = vpop.f32.mrb[132].mxu0 }
 0x1e4   :  { %v2488_v25 = vmax.f32 %v1654_v56, %v2435_v36  ;;  %vm2330_vm6 = vcmp.ge.f32.partialorder %v2277_v17, 0.0  ;;  %v2383_v14 = vmul.f32 %v4757_v60, %v2277_v17  ;;  %v1393_v48 = vmul.f32 %v4727_v33, %v1299_v31  ;;  %v3433_v43 = vpop.f32.mrb[133].mxu1  ;;  %v3539_v39 = vpop.f32.mrb[133].mxu0 }
 0x1e5   :  { %v2225_v22 = vmul.f32 %v4727_v33, %v2125_v13  ;;  %v664_v11 = vadd.f32 %v4739_v15, %v605_v54  ;;  %v606_v50 = vmul.f32 %v4727_v33, %v5369_v42  ;;  %v1604_v32 = vsel %vm1498_vm5, %v1445_v20, %v1551_v19  ;;  %v1302_v59 = vpop.f32.mrb[134].mxu1  ;;  %v2128_v58 = vpop.f32.mrb[134].mxu0  ;;  %v5158_v39 = vld [vmem:[%s5343_s4] ss:$0 sm:$0xff]  ;;  %v5371_v42 = vld [vmem:[#allocation7_spill] sm:$0xff] }
 0x1e6   :  { %v3138_v55 = vpack.c.bf16 %v2488_v25, %v2488_v25  ;;  %v1657_v23 = vmax.f32 %v4962_v45, %v1604_v32  ;;  %v2436_v41 = vsel %vm2330_vm6, %v2277_v17, %v2383_v14  ;;  %v1446_v24 = vadd.f32 %v4739_v15, %v1393_v48  ;;  %v3540_v53 = vpop.f32.mrb[135].mxu0  ;;  %v3434_v56 = vpop.f32.mrb[135].mxu1  ;;  %v5134_v17 = vld [vmem:[%s5342_s3] ss:$0 sm:$0xff] }
 0x1e7   :  { %v2278_v4 = vadd.f32 %v4739_v15, %v2225_v22  ;;  %v5100_v10 = vsel %vm716_vm4, %v663_v9, %v775_v29  ;;  %v2489_v21 = vmax.f32 %v1655_v16, %v2436_v41  ;;  %v1394_v46 = vmul.f32 %v4727_v33, %v1302_v59 }
 0x1e8   :  { %2755 = vst.msk [vmem:[%s5344_s5 + $0x90] sm:$0xf] %vm2718_vm11, %v3138_v55  ;;  %v2226_v45 = vmul.f32 %v4727_v33, %v2128_v58  ;;  %vm1499_vm7 = vcmp.ge.f32.partialorder %v1446_v24, 0.0  ;;  %v1552_v28 = vmul.f32 %v4757_v60, %v1446_v24  ;;  %v776_v30 = vmul.f32 %v4757_v60, %v664_v11 }
 0x1e9   :  { %vm2331_vm8 = vcmp.ge.f32.partialorder %v2278_v4, 0.0  ;;  %v2384_v18 = vmul.f32 %v4757_v60, %v2278_v4  ;;  %v3139_v63 = vpack.c.bf16 %v2489_v21, %v2489_v21  ;;  %v1447_v57 = vadd.f32 %v4739_v15, %v1394_v46 }
 0x1ea   :  { %v2279_v38 = vadd.f32 %v4739_v15, %v2226_v45  ;;  %vm717_vm9 = vcmp.ge.f32.partialorder %v664_v11, 0.0  ;;  %v5114_v9 = vadd.f32 %v4739_v15, %v606_v50  ;;  %v1605_v0 = vsel %vm1499_vm7, %v1446_v24, %v1552_v28 }
 0x1eb   :  { %v2437_v12 = vsel %vm2331_vm8, %v2278_v4, %v2384_v18  ;;  %2756 = vst.msk [vmem:[%s5344_s5 + $0x94] sm:$0xf] %vm2718_vm11, %v3139_v63  ;;  %v1658_v44 = vmax.f32 %v5016_v51, %v1605_v0  ;;  %vm1500_vm3 = vcmp.ge.f32.partialorder %v1447_v57, 0.0  ;;  %v1553_v16 = vmul.f32 %v4757_v60, %v1447_v57  ;;  %v1307_v37 = vpop.f32.mrb[136].mxu1  ;;  %v2133_v27 = vpop.f32.mrb[136].mxu0 }
 0x1ec   :  { %v2490_v62 = vmax.f32 %v1656_v6, %v2437_v12  ;;  %vm2332_vm10 = vcmp.ge.f32.partialorder %v2279_v38, 0.0  ;;  %v2385_v3 = vmul.f32 %v4757_v60, %v2279_v38  ;;  %v1395_v15 = vmul.f32 %v4727_v33, %v1307_v37  ;;  %v3437_v26 = vpop.f32.mrb[137].mxu1  ;;  %v3543_v40 = vpop.f32.mrb[137].mxu0 }
 0x1ed   :  { %v2227_v34 = vmul.f32 %v4727_v33, %v2133_v27  ;;  %v5126_v47 = vsel %vm717_vm9, %v664_v11, %v776_v30  ;;  %v607_v51 = vmul.f32 %v4727_v33, %v5370_v8  ;;  %v1606_v5 = vsel %vm1500_vm3, %v1447_v57, %v1553_v16  ;;  %v1310_v61 = vpop.f32.mrb[138].mxu1  ;;  %v2136_v54 = vpop.f32.mrb[138].mxu0 }
 0x1ee   :  { %v3140_v52 = vpack.c.bf16 %v2490_v62, %v2490_v62  ;;  %v1659_v35 = vmax.f32 %v5019_v7, %v1606_v5  ;;  %v2438_v20 = vsel %vm2332_vm10, %v2279_v38, %v2385_v3  ;;  %v1448_v29 = vadd.f32 %v5134_v17, %v1395_v15  ;;  %v3544_v36 = vpop.f32.mrb[139].mxu0  ;;  %v3438_v6 = vpop.f32.mrb[139].mxu1  ;;  %v5146_v7 = vld [vmem:[%s5341_s2] ss:$0 sm:$0xff]  ;;  %v5372_v3 = vld [vmem:[#allocation8_spill] sm:$0xff] }
 0x1ef   :  { %v2280_v2 = vadd.f32 %v5134_v17, %v2227_v34  ;;  %vm718_vm12 = vcmp.ge.f32.partialorder %v5114_v9, 0.0  ;;  %v2491_v33 = vmax.f32 %v1657_v23, %v2438_v20  ;;  %v1396_v25 = vmul.f32 %v5146_v7, %v1310_v61 }
 0x1f0   :  { %2757 = vst.msk [vmem:[%s5344_s5 + $0x98] sm:$0xf] %vm2718_vm11, %v3140_v52  ;;  %v2228_v19 = vmul.f32 %v5146_v7, %v2136_v54  ;;  %vm1501_vm13 = vcmp.ge.f32.partialorder %v1448_v29, 0.0  ;;  %v1554_v31 = vmul.f32 %v4757_v60, %v1448_v29  ;;  %v666_v14 = vadd.f32 %v5134_v17, %v607_v51 }
 0x1f1   :  { %vm2333_vm14 = vcmp.ge.f32.partialorder %v2280_v2, 0.0  ;;  %v2386_v13 = vmul.f32 %v4757_v60, %v2280_v2  ;;  %v3141_v48 = vpack.c.bf16 %v2491_v33, %v2491_v33  ;;  %v1449_v22 = vadd.f32 %v5134_v17, %v1396_v25 }
 0x1f2   :  { %v2281_v43 = vadd.f32 %v5134_v17, %v2228_v19  ;;  %v777_v11 = vmul.f32 %v5158_v39, %v5114_v9  ;;  %v608_v50 = vmul.f32 %v5146_v7, %v5371_v42  ;;  %v1607_v55 = vsel %vm1501_vm13, %v1448_v29, %v1554_v31 }
 0x1f3   :  { %v2439_v60 = vsel %vm2333_vm14, %v2280_v2, %v2386_v13  ;;  %2758 = vst.msk [vmem:[%s5344_s5 + $0x9c] sm:$0xf] %vm2718_vm11, %v3141_v48  ;;  %v1660_v32 = vmax.f32 %v5062_v1, %v1607_v55  ;;  %vm1502_vm15 = vcmp.ge.f32.partialorder %v1449_v22, 0.0  ;;  %v1555_v58 = vmul.f32 %v5158_v39, %v1449_v22  ;;  %v1315_v23 = vpop.f32.mrb[140].mxu1  ;;  %v2141_v41 = vpop.f32.mrb[140].mxu0 }
 0x1f4   :  { %v2492_v59 = vmax.f32 %v1658_v44, %v2439_v60  ;;  %vm2334_vm0 = vcmp.ge.f32.partialorder %v2281_v43, 0.0  ;;  %v2387_v24 = vmul.f32 %v5158_v39, %v2281_v43  ;;  %v1397_v4 = vmul.f32 %v5146_v7, %v1315_v23  ;;  %v3441_v56 = vpop.f32.mrb[141].mxu1  ;;  %v3547_v21 = vpop.f32.mrb[141].mxu0 }
 0x1f5   :  { %v2229_v53 = vmul.f32 %v5146_v7, %v2141_v41  ;;  %vm719_vm1 = vcmp.ge.f32.partialorder %v666_v14, 0.0  ;;  %v778_v46 = vmul.f32 %v5158_v39, %v666_v14  ;;  %v1608_v1 = vsel %vm1502_vm15, %v1449_v22, %v1555_v58  ;;  %v1318_v28 = vpop.f32.mrb[142].mxu1  ;;  %v2144_v18 = vpop.f32.mrb[142].mxu0  ;;  %v5373_v58 = vld [vmem:[#allocation9_spill] sm:$0xff] }
 0x1f6   :  { %v3142_v45 = vpack.c.bf16 %v2492_v59, %v2492_v59  ;;  %v1661_v30 = vmax.f32 %v5069_v49, %v1608_v1  ;;  %v2440_v63 = vsel %vm2334_vm0, %v2281_v43, %v2387_v24  ;;  %v1450_v57 = vadd.f32 %v5134_v17, %v1397_v4  ;;  %v3548_v0 = vpop.f32.mrb[143].mxu0  ;;  %v3442_v12 = vpop.f32.mrb[143].mxu1 }
 0x1f7   :  { %v2282_v38 = vadd.f32 %v5134_v17, %v2229_v53  ;;  %v5178_v44 = vadd.f32 %v5134_v17, %v608_v50  ;;  %v2493_v62 = vmax.f32 %v1659_v35, %v2440_v63  ;;  %v1398_v16 = vmul.f32 %v5146_v7, %v1318_v28 }
 0x1f8   :  { %2759 = vst.msk [vmem:[%s5344_s5 + $0xa0] sm:$0xf] %vm2718_vm11, %v3142_v45  ;;  %v2230_v49 = vmul.f32 %v5146_v7, %v2144_v18  ;;  %vm1503_vm2 = vcmp.ge.f32.partialorder %v1450_v57, 0.0  ;;  %v1556_v37 = vmul.f32 %v5158_v39, %v1450_v57  ;;  %v609_v15 = vmul.f32 %v5146_v7, %v5372_v3 }
 0x1f9   :  { %vm2335_vm4 = vcmp.ge.f32.partialorder %v2282_v38, 0.0  ;;  %v2388_v27 = vmul.f32 %v5158_v39, %v2282_v38  ;;  %v3143_v34 = vpack.c.bf16 %v2493_v62, %v2493_v62  ;;  %v1451_v26 = vadd.f32 %v5134_v17, %v1398_v16  ;;  %v5374_v62 = vld [vmem:[#allocation10_spill] sm:$0xff] }
 0x1fa   :  { %v2283_v40 = vadd.f32 %v5134_v17, %v2230_v49  ;;  %v5195_v8 = vsel %vm718_vm12, %v5114_v9, %v777_v11  ;;  %v5198_v51 = vsel %vm719_vm1, %v666_v14, %v778_v46  ;;  %v1609_v52 = vsel %vm1503_vm2, %v1450_v57, %v1556_v37 }
 0x1fb   :  { %v2441_v5 = vsel %vm2335_vm4, %v2282_v38, %v2388_v27  ;;  %2760 = vst.msk [vmem:[%s5344_s5 + $0xa4] sm:$0xf] %vm2718_vm11, %v3143_v34  ;;  %v1662_v61 = vmax.f32 %v5100_v10, %v1609_v52  ;;  %vm1504_vm5 = vcmp.ge.f32.partialorder %v1451_v26, 0.0  ;;  %v1557_v35 = vmul.f32 %v5158_v39, %v1451_v26  ;;  %v1323_v20 = vpop.f32.mrb[144].mxu1  ;;  %v2149_v29 = vpop.f32.mrb[144].mxu0 }
 0x1fc   :  { %v2494_v54 = vmax.f32 %v1660_v32, %v2441_v5  ;;  %vm2336_vm6 = vcmp.ge.f32.partialorder %v2283_v40, 0.0  ;;  %v2389_v9 = vmul.f32 %v5158_v39, %v2283_v40  ;;  %v1399_v2 = vmul.f32 %v5146_v7, %v1323_v20  ;;  %v3445_v6 = vpop.f32.mrb[145].mxu1  ;;  %v3551_v33 = vpop.f32.mrb[145].mxu0 }
 0x1fd   :  { %v2231_v36 = vmul.f32 %v5146_v7, %v2149_v29  ;;  %vm720_vm7 = vcmp.ge.f32.partialorder %v5178_v44, 0.0  ;;  %v5211_v25 = vadd.f32 %v5134_v17, %v609_v15  ;;  %v1610_v19 = vsel %vm1504_vm5, %v1451_v26, %v1557_v35  ;;  %v1326_v31 = vpop.f32.mrb[146].mxu1  ;;  %v2152_v13 = vpop.f32.mrb[146].mxu0 }
 0x1fe   :  { %v3144_v10 = vpack.c.bf16 %v2494_v54, %v2494_v54  ;;  %v1663_v14 = vmax.f32 %v5126_v47, %v1610_v19  ;;  %v2442_v48 = vsel %vm2336_vm6, %v2283_v40, %v2389_v9  ;;  %v1452_v22 = vadd.f32 %v5134_v17, %v1399_v2  ;;  %v3552_v11 = vpop.f32.mrb[147].mxu0  ;;  %v3446_v42 = vpop.f32.mrb[147].mxu1 }
 0x1ff   :  { %v2284_v43 = vadd.f32 %v5134_v17, %v2231_v36  ;;  %v779_v50 = vmul.f32 %v5158_v39, %v5178_v44  ;;  %v2495_v55 = vmax.f32 %v1661_v30, %v2442_v48  ;;  %v1400_v60 = vmul.f32 %v5146_v7, %v1326_v31 }
 0x200   :  { %2761 = vst.msk [vmem:[%s5344_s5 + $0xa8] sm:$0xf] %vm2718_vm11, %v3144_v10  ;;  %v2232_v47 = vmul.f32 %v5146_v7, %v2152_v13  ;;  %vm1505_vm8 = vcmp.ge.f32.partialorder %v1452_v22, 0.0  ;;  %v1558_v32 = vmul.f32 %v5158_v39, %v1452_v22  ;;  %v610_v23 = vmul.f32 %v5146_v7, %v5373_v58 }
 0x201   :  { %vm2337_vm9 = vcmp.ge.f32.partialorder %v2284_v43, 0.0  ;;  %v2390_v59 = vmul.f32 %v5158_v39, %v2284_v43  ;;  %v3145_v41 = vpack.c.bf16 %v2495_v55, %v2495_v55  ;;  %v1453_v24 = vadd.f32 %v5134_v17, %v1400_v60 }
 0x202   :  { %v2285_v4 = vadd.f32 %v5134_v17, %v2232_v47  ;;  %vm721_vm3 = vcmp.ge.f32.partialorder %v5211_v25, 0.0  ;;  %v780_v53 = vmul.f32 %v5158_v39, %v5211_v25  ;;  %v1611_v56 = vsel %vm1505_vm8, %v1452_v22, %v1558_v32 }
 0x203   :  { %v2443_v21 = vsel %vm2337_vm9, %v2284_v43, %v2390_v59  ;;  %2762 = vst.msk [vmem:[%s5344_s5 + $0xac] sm:$0xf] %vm2718_vm11, %v3145_v41  ;;  %v1664_v46 = vmax.f32 %v5195_v8, %v1611_v56  ;;  %vm1506_vm10 = vcmp.ge.f32.partialorder %v1453_v24, 0.0  ;;  %v1559_v1 = vmul.f32 %v5158_v39, %v1453_v24  ;;  %v1331_v28 = vpop.f32.mrb[148].mxu1  ;;  %v2157_v18 = vpop.f32.mrb[148].mxu0 }
 0x204   :  { %v2496_v45 = vmax.f32 %v1662_v61, %v2443_v21  ;;  %vm2338_vm12 = vcmp.ge.f32.partialorder %v2285_v4, 0.0  ;;  %v2391_v30 = vmul.f32 %v5158_v39, %v2285_v4  ;;  %v1401_v63 = vmul.f32 %v5146_v7, %v1331_v28  ;;  %v3449_v38 = vpop.f32.mrb[149].mxu1  ;;  %v3555_v0 = vpop.f32.mrb[149].mxu0 }
 0x205   :  { %v2233_v57 = vmul.f32 %v5146_v7, %v2157_v18  ;;  %v5243_v12 = vadd.f32 %v5134_v17, %v610_v23  ;;  %v611_v16 = vmul.f32 %v5146_v7, %v5374_v62  ;;  %v1612_v37 = vsel %vm1506_vm10, %v1453_v24, %v1559_v1  ;;  %v1334_v27 = vpop.f32.mrb[150].mxu1  ;;  %v2160_v3 = vpop.f32.mrb[150].mxu0 }
 0x206   :  { %v3146_v49 = vpack.c.bf16 %v2496_v45, %v2496_v45  ;;  %v1665_v15 = vmax.f32 %v5198_v51, %v1612_v37  ;;  %v2444_v34 = vsel %vm2338_vm12, %v2285_v4, %v2391_v30  ;;  %v1454_v26 = vadd.f32 %v5134_v17, %v1401_v63  ;;  %v3556_v8 = vpop.f32.mrb[151].mxu0  ;;  %v3450_v52 = vpop.f32.mrb[151].mxu1 }
 0x207   :  { %v2286_v40 = vadd.f32 %v5134_v17, %v2233_v57  ;;  %v832_v5 = vsel %vm720_vm7, %v5178_v44, %v779_v50  ;;  %v2497_v61 = vmax.f32 %v1663_v14, %v2444_v34  ;;  %v1402_v54 = vmul.f32 %v5146_v7, %v1334_v27  ;;  %v5375_v50 = vld [vmem:[#allocation11_spill] sm:$0xff] }
 0x208   :  { %2763 = vst.msk [vmem:[%s5344_s5 + $0xb0] sm:$0xf] %vm2718_vm11, %v3146_v49  ;;  %v2234_v51 = vmul.f32 %v5146_v7, %v2160_v3  ;;  %vm1507_vm13 = vcmp.ge.f32.partialorder %v1454_v26, 0.0  ;;  %v1560_v35 = vmul.f32 %v5158_v39, %v1454_v26  ;;  %v5264_v44 = vsel %vm721_vm3, %v5211_v25, %v780_v53 }
 0x209   :  { %vm2339_vm14 = vcmp.ge.f32.partialorder %v2286_v40, 0.0  ;;  %v2392_v20 = vmul.f32 %v5158_v39, %v2286_v40  ;;  %v3147_v29 = vpack.c.bf16 %v2497_v61, %v2497_v61  ;;  %v1455_v9 = vadd.f32 %v5134_v17, %v1402_v54 }
 0x20a   :  { %v2287_v2 = vadd.f32 %v5134_v17, %v2234_v51  ;;  %vm722_vm15 = vcmp.ge.f32.partialorder %v5243_v12, 0.0  ;;  %v670_v36 = vadd.f32 %v5134_v17, %v611_v16  ;;  %v1613_v6 = vsel %vm1507_vm13, %v1454_v26, %v1560_v35 }
 0x20b   :  { %v2445_v33 = vsel %vm2339_vm14, %v2286_v40, %v2392_v20  ;;  %2764 = vst.msk [vmem:[%s5344_s5 + $0xb4] sm:$0xf] %vm2718_vm11, %v3147_v29  ;;  %v1666_v10 = vmax.f32 %v832_v5, %v1613_v6  ;;  %vm1508_vm0 = vcmp.ge.f32.partialorder %v1455_v9, 0.0  ;;  %v1561_v25 = vmul.f32 %v5158_v39, %v1455_v9  ;;  %v1339_v31 = vpop.f32.mrb[152].mxu1  ;;  %v2165_v13 = vpop.f32.mrb[152].mxu0 }
 0x20c   :  { %v2498_v19 = vmax.f32 %v1664_v46, %v2445_v33  ;;  %vm2340_vm1 = vcmp.ge.f32.partialorder %v2287_v2, 0.0  ;;  %v2393_v14 = vmul.f32 %v5158_v39, %v2287_v2  ;;  %v1403_v48 = vmul.f32 %v5146_v7, %v1339_v31  ;;  %v3453_v43 = vpop.f32.mrb[153].mxu1  ;;  %v3559_v11 = vpop.f32.mrb[153].mxu0 }
 0x20d   :  { %v2235_v22 = vmul.f32 %v5146_v7, %v2165_v13  ;;  %v781_v42 = vmul.f32 %v5158_v39, %v5243_v12  ;;  %v612_v55 = vmul.f32 %v5146_v7, %v5375_v50  ;;  %v1614_v47 = vsel %vm1508_vm0, %v1455_v9, %v1561_v25  ;;  %v1342_v32 = vpop.f32.mrb[154].mxu1  ;;  %v2168_v59 = vpop.f32.mrb[154].mxu0 }
 0x20e   :  { %v3148_v60 = vpack.c.bf16 %v2498_v19, %v2498_v19  ;;  %v1667_v58 = vmax.f32 %v5264_v44, %v1614_v47  ;;  %v2446_v23 = vsel %vm2340_vm1, %v2287_v2, %v2393_v14  ;;  %v1456_v41 = vadd.f32 %v5134_v17, %v1403_v48  ;;  %v3560_v4 = vpop.f32.mrb[155].mxu0  ;;  %v3454_v53 = vpop.f32.mrb[155].mxu1 }
 0x20f   :  { %v2288_v24 = vadd.f32 %v5134_v17, %v2235_v22  ;;  %v782_v56 = vmul.f32 %v5158_v39, %v670_v36  ;;  %v2499_v21 = vmax.f32 %v1665_v15, %v2446_v23  ;;  %v1404_v46 = vmul.f32 %v5146_v7, %v1342_v32 }
 0x210   :  { %2765 = vst.msk [vmem:[%s5344_s5 + $0xb8] sm:$0xf] %vm2718_vm11, %v3148_v60  ;;  %v2236_v45 = vmul.f32 %v5146_v7, %v2168_v59  ;;  %vm1509_vm2 = vcmp.ge.f32.partialorder %v1456_v41, 0.0  ;;  %v1562_v1 = vmul.f32 %v5158_v39, %v1456_v41  ;;  %v671_v18 = vadd.f32 %v5134_v17, %v612_v55 }
 0x211   :  { %vm2341_vm4 = vcmp.ge.f32.partialorder %v2288_v24, 0.0  ;;  %v2394_v28 = vmul.f32 %v5158_v39, %v2288_v24  ;;  %v3149_v30 = vpack.c.bf16 %v2499_v21, %v2499_v21  ;;  %v1457_v63 = vadd.f32 %v5134_v17, %v1404_v46 }
 0x212   :  { %v2289_v57 = vadd.f32 %v5134_v17, %v2236_v45  ;;  %v834_v38 = vsel %vm722_vm15, %v5243_v12, %v781_v42  ;;  %vm723_vm5 = vcmp.ge.f32.partialorder %v670_v36, 0.0  ;;  %v1615_v0 = vsel %vm1509_vm2, %v1456_v41, %v1562_v1 }
 0x213   :  { %v2447_v62 = vsel %vm2341_vm4, %v2288_v24, %v2394_v28  ;;  %2766 = vst.msk [vmem:[%s5344_s5 + $0xbc] sm:$0xf] %vm2718_vm11, %v3149_v30  ;;  %v1668_v16 = vmax.f32 %v834_v38, %v1615_v0  ;;  %vm1510_vm6 = vcmp.ge.f32.partialorder %v1457_v63, 0.0  ;;  %v1563_v37 = vmul.f32 %v5158_v39, %v1457_v63  ;;  %v1347_v27 = vpop.f32.mrb[156].mxu1  ;;  %v2173_v3 = vpop.f32.mrb[156].mxu0 }
 0x214   :  { %v2500_v49 = vmax.f32 %v1666_v10, %v2447_v62  ;;  %vm2342_vm7 = vcmp.ge.f32.partialorder %v2289_v57, 0.0  ;;  %v2395_v15 = vmul.f32 %v5158_v39, %v2289_v57  ;;  %v1405_v12 = vmul.f32 %v5146_v7, %v1347_v27  ;;  %v3563_v26 = vpop.f32.mrb[157].mxu0  ;;  %v3457_v40 = vpop.f32.mrb[157].mxu1 }
 0x215   :  { %v2237_v34 = vmul.f32 %v5146_v7, %v2173_v3  ;;  %v835_v8 = vsel %vm723_vm5, %v670_v36, %v782_v56  ;;  %v783_v52 = vmul.f32 %v5158_v39, %v671_v18  ;;  %v1616_v61 = vsel %vm1510_vm6, %v1457_v63, %v1563_v37  ;;  %v2176_v54 = vpop.f32.mrb[158].mxu0  ;;  %v1350_v51 = vpop.f32.mrb[158].mxu1 }
 0x216   :  { %v3150_v5 = vpack.c.bf16 %v2500_v49, %v2500_v49  ;;  %v1669_v35 = vmax.f32 %v835_v8, %v1616_v61  ;;  %v2448_v20 = vsel %vm2342_vm7, %v2289_v57, %v2395_v15  ;;  %v1458_v44 = vadd.f32 %v5134_v17, %v1405_v12  ;;  %v3564_v9 = vpop.f32.mrb[159].mxu0  ;;  %v3458_v2 = vpop.f32.mrb[159].mxu1 }
 0x217   :  { %v2290_v29 = vadd.f32 %v5134_v17, %v2237_v34  ;;  %vm724_vm8 = vcmp.ge.f32.partialorder %v671_v18, 0.0  ;;  %v2501_v36 = vmax.f32 %v1667_v58, %v2448_v20  ;;  %v2238_v6 = vmul.f32 %v5146_v7, %v2176_v54 }
 0x218   :  { %2767 = vst.msk [vmem:[%s5344_s5 + $0xc0] sm:$0xf] %vm2718_vm11, %v3150_v5  ;;  %vm1511_vm9 = vcmp.ge.f32.partialorder %v1458_v44, 0.0  ;;  %v1564_v33 = vmul.f32 %v5158_v39, %v1458_v44  ;;  %v836_v31 = vsel %vm724_vm8, %v671_v18, %v783_v52  ;;  %vm2771_vm13 = vcmask 254976  }
 0x219   :  { %vm2343_vm3 = vcmp.ge.f32.partialorder %v2290_v29, 0.0  ;;  %v2396_v10 = vmul.f32 %v5158_v39, %v2290_v29  ;;  %v3151_v19 = vpack.c.bf16 %v2501_v36, %v2501_v36  ;;  %v2291_v25 = vadd.f32 %v5134_v17, %v2238_v6 }
 0x21a   :  { %v1617_v13 = vsel %vm1511_vm9, %v1458_v44, %v1564_v33 }
 0x21b   :  { %v2449_v14 = vsel %vm2343_vm3, %v2290_v29, %v2396_v10  ;;  %2768 = vst.msk [vmem:[%s5344_s5 + $0xc4] sm:$0xf] %vm2718_vm11, %v3151_v19  ;;  %v1670_v48 = vmax.f32 %v836_v31, %v1617_v13  ;;  %vm2344_vm10 = vcmp.ge.f32.partialorder %v2291_v25, 0.0  ;;  %v2397_v43 = vmul.f32 %v5158_v39, %v2291_v25  ;;  %v2181_v11 = vpop.f32.mrb[160].mxu0 }
 0x21c   :  { %v2502_v22 = vmax.f32 %v1668_v16, %v2449_v14  ;;  %v2239_v42 = vmul.f32 %v5146_v7, %v2181_v11  ;;  %v3567_v50 = vpop.f32.mrb[161].mxu0 }
 0x21d   :  { %v2450_v60 = vsel %vm2344_vm10, %v2291_v25, %v2397_v43  ;;  %v2184_v47 = vpop.f32.mrb[162].mxu0 }
 0x21e   :  { %v3152_v55 = vpack.c.bf16 %v2502_v22, %v2502_v22  ;;  %v2503_v32 = vmax.f32 %v1669_v35, %v2450_v60  ;;  %v2292_v59 = vadd.f32 %v5134_v17, %v2239_v42  ;;  %v3568_v58 = vpop.f32.mrb[163].mxu0 }
 0x220   :  { %2769 = vst.msk [vmem:[%s5344_s5 + $0xc8] sm:$0xf] %vm2718_vm11, %v3152_v55  ;;  %v3153_v23 = vpack.c.bf16 %v2503_v32, %v2503_v32  ;;  %vm2345_vm12 = vcmp.ge.f32.partialorder %v2292_v59, 0.0  ;;  %v2398_v41 = vmul.f32 %v5158_v39, %v2292_v59 }
 0x222   :  { %2770 = vst.msk [vmem:[%s5344_s5 + $0xcc] sm:$0xf] %vm2718_vm11, %v3153_v23  ;;  %v2451_v7 = vsel %vm2345_vm12, %v2292_v59, %v2398_v41 }
 0x223   :  { %v2504_v24 = vmax.f32 %v1670_v48, %v2451_v7 }
 0x225   :  { %v3154_v4 = vpack.c.bf16 %v2504_v24, %v2504_v24 }
 0x227   :  { %2772 = vst.msk [vmem:[%s5344_s5 + $0xd0] sm:$0x3] %vm2771_vm13, %v3154_v4 }

// kernel: model_forward.4
= control target key start
LH: loop header
LB: loop body
LE: loop exit
PB: predicated region body
PF: predicated region fallthrough
CT: control target
= control target key end

     0   :  { %v1702_v22 = vmov 0   ;;  %vm371_vm0 = vcmask 785408   ;;  %vm1273_vm6 = vcmask 519168   ;;  %s2456_s1 = inlined_call_operand.vmem [shape: bf16[480,64], index: 1, kind: input, shape index: {}]   ;;  %s2457_s0 = inlined_call_operand.vmem [shape: bf16[3,72,480], index: 0, kind: input, shape index: {}]   ;;  %s2458_s2 = inlined_call_operand.vmem [shape: f32[1,64], index: 2, kind: input, shape index: {}]   ;;  %s2459_s3 = inlined_call_operand.vmem [shape: f32[1,64], index: 3, kind: input, shape index: {}]   ;;  %s2460_s4 = inlined_call_operand.vmem [shape: f32[1,64], index: 4, kind: input, shape index: {}]   ;;  %s2461_s5 = inlined_call_operand.vmem [shape: bf16[72,64], index: 5, kind: output, shape index: {}]  }
   0x1   :  { %v1588_v0 = vld [vmem:[%s2456_s1 + $0x40] sm:$0xff]   ;;  %v1744_v2 = vld [vmem:[%s2456_s1 + $0x48] sm:$0xff]   ;;  %v1758_v4 = vld [vmem:[%s2456_s1 + $0x50] sm:$0xff]  }
   0x2   :  { %v1739_v1 = vld [vmem:[%s2456_s1] sm:$0xff]   ;;  %1449 = vmatprep.subr.bf16.mxu1 %v1588_v0  ;;  %1495 = vmatprep.subr.bf16.mxu0 %v1588_v0  ;;  %v1751_v3 = vld [vmem:[%s2456_s1 + $0x8] sm:$0xff]   ;;  %v1765_v5 = vld [vmem:[%s2456_s1 + $0x10] sm:$0xff]  }
   0x3   :  { %1450 = vmatpush3.bf16.msra.mxu1 %v1739_v1  ;;  %1496 = vmatpush3.bf16.msra.mxu0 %v1739_v1  ;;  %v1772_v6 = vld [vmem:[%s2456_s1 + $0x58] sm:$0xff]   ;;  %v1786_v8 = vld [vmem:[%s2456_s1 + $0x60] sm:$0xff]   ;;  %v1800_v10 = vld [vmem:[%s2456_s1 + $0x68] sm:$0xff]  }
   0x4   :  { %1451 = vmatprep.subr.bf16.mxu1 %v1744_v2  ;;  %1497 = vmatprep.subr.bf16.mxu0 %v1744_v2  ;;  %v1779_v7 = vld [vmem:[%s2456_s1 + $0x18] sm:$0xff]   ;;  %v1793_v9 = vld [vmem:[%s2456_s1 + $0x20] sm:$0xff]   ;;  %v1813_v13 = vld [vmem:[%s2456_s1 + $0x28] sm:$0xff]  }
   0x5   :  { %v1606_v11 = vld [vmem:[%s2457_s0 + $0x4] ss:$16 sps:$4 sm:$0xff]   ;;  %v1834_v16 = vld [vmem:[%s2456_s1 + $0x78] sm:$0xff]   ;;  %v1604_v18 = vld [vmem:[%s2457_s0] ss:$16 sps:$4 sm:$0xff]  }
   0x6   :  { %v1609_v12 = vld [vmem:[%s2457_s0 + $0x94] ss:$16 sps:$4 sm:$0xff]   ;;  %419 = vmatprep.mubr.bf16.mxu1 %v1606_v11  ;;  %v1841_v17 = vld [vmem:[%s2456_s1 + $0x38] sm:$0xff]   ;;  %v1607_v19 = vld [vmem:[%s2457_s0 + $0x90] ss:$16 sps:$4 sm:$0xff]  }
   0x7   :  { %1452 = vmatpush3.bf16.msra.mxu1 %v1751_v3  ;;  %1498 = vmatpush3.bf16.msra.mxu0 %v1751_v3  ;;  %v1820_v14 = vld [vmem:[%s2456_s1 + $0x70] sm:$0xff]   ;;  %v1854_v20 = vld [vmem:[%s2456_s1 + $0x80] sm:$0xff]   ;;  %v1869_v24 = vld [vmem:[%s2456_s1 + $0x88] sm:$0xff]  }
   0x8   :  { %1453 = vmatprep.subr.bf16.mxu1 %v1758_v4  ;;  %1499 = vmatprep.subr.bf16.mxu0 %v1758_v4  ;;  %v1827_v15 = vld [vmem:[%s2456_s1 + $0x30] sm:$0xff]   ;;  %v1899_v30 = vld [vmem:[%s2456_s1 + $0x98] sm:$0xff]   ;;  %v1910_v32 = vld [vmem:[%s2456_s1 + $0xa0] sm:$0xff]  }
   0x9   :  { %749 = vmatprep.mubr.bf16.mxu0 %v1609_v12  ;;  %v1612_v21 = vld [vmem:[%s2457_s0 + $0xb4] ss:$16 sps:$4 sm:$0xff]   ;;  %v1614_v25 = vld [vmem:[%s2457_s0 + $0xb0] ss:$16 sps:$4 sm:$0xff]   ;;  %v1929_v36 = vld [vmem:[%s2456_s1 + $0xa8] sm:$0xff]  }
   0xa   :  { %v1621_v23 = vld [vmem:[%s2457_s0 + $0x24] ss:$16 sps:$4 sm:$0xff]   ;;  %v1624_v26 = vld [vmem:[%s2457_s0 + $0x20] ss:$16 sps:$4 sm:$0xff]   ;;  %v1959_v44 = vld [vmem:[%s2456_s1 + $0xb8] sm:$0xff]  }
   0xb   :  { %1454 = vmatpush3.bf16.msra.mxu1 %v1765_v5  ;;  %1500 = vmatpush3.bf16.msra.mxu0 %v1765_v5  ;;  %v1884_v27 = vld [vmem:[%s2456_s1 + $0x90] sm:$0xff]   ;;  %v40_v40 = vld [vmem:[%s2457_s0 + $0x80] sm:$0xff]  ;;  %v1651_v49 = vld [vmem:[%s2457_s0 + $0xc] ss:$16 sps:$4 sm:$0xff]  }
   0xc   :  { %1455 = vmatprep.subr.bf16.mxu1 %v1772_v6  ;;  %1501 = vmatprep.subr.bf16.mxu0 %v1772_v6  ;;  %v1617_v28 = vld [vmem:[%s2457_s0 + $0xd4] ss:$16 sps:$4 sm:$0xff]   ;;  %v1619_v31 = vld [vmem:[%s2457_s0 + $0xd0] ss:$16 sps:$4 sm:$0xff]   ;;  %v1304_v43 = vcombine.high %v40_v40, %v40_v40  ;;  %v1303_v46 = vcombine.low %v40_v40, %v40_v40  ;;  %v1983_v50 = vld [vmem:[%s2456_s1 + $0xc8] sm:$0xff]  }
   0xd   :  { %v1629_v29 = vld [vmem:[%s2457_s0 + $0x44] ss:$16 sps:$4 sm:$0xff]   ;;  %v1632_v33 = vld [vmem:[%s2457_s0 + $0x40] ss:$16 sps:$4 sm:$0xff]   ;;  %v2005_v54 = vld [vmem:[%s2456_s1 + $0xd8] sm:$0xff]  }
   0xe   :  { %v1625_v34 = vld [vmem:[%s2457_s0 + $0xf4] ss:$16 sps:$4 sm:$0xff]   ;;  %v1627_v38 = vld [vmem:[%s2457_s0 + $0xf0] ss:$16 sps:$4 sm:$0xff]   ;;  %v2029_v58 = vld [vmem:[%s2456_s1 + $0xe8] sm:$0xff]  }
   0xf   :  { %1456 = vmatpush3.bf16.msra.mxu1 %v1779_v7  ;;  %1502 = vmatpush3.bf16.msra.mxu0 %v1779_v7  ;;  %v1636_v35 = vld [vmem:[%s2457_s0 + $0x64] ss:$16 sps:$4 sm:$0xff]   ;;  %v1639_v39 = vld [vmem:[%s2457_s0 + $0x60] ss:$16 sps:$4 sm:$0xff]   ;;  %v1649_v59 = vld [vmem:[%s2457_s0 + $0x8] ss:$16 sps:$4 sm:$0xff]  }
  0x10   :  { %1457 = vmatprep.subr.bf16.mxu1 %v1786_v8  ;;  %1503 = vmatprep.subr.bf16.mxu0 %v1786_v8  ;;  %v1361_v37 = vld [vmem:[%s2457_s0 + $0x110] sm:$0xff]  ;;  %v1968_v47 = vld [vmem:[%s2456_s1 + $0xc0] sm:$0xff]   ;;  %v1654_v61 = vld [vmem:[%s2457_s0 + $0x2c] ss:$16 sps:$4 sm:$0xff]  }
  0x11   :  { %v1950_v41 = vld [vmem:[%s2456_s1 + $0xb0] sm:$0xff]   ;;  %v1380_v42 = vcombine.high %v1361_v37, %v1361_v37  ;;  %v1379_v45 = vcombine.low %v1361_v37, %v1361_v37  ;;  %v2017_v56 = vld [vmem:[%s2456_s1 + $0xe0] sm:$0xff]   ;;  %v1657_v63 = vld [vmem:[%s2457_s0 + $0x28] ss:$16 sps:$4 sm:$0xff]  }
  0x12   :  { %v1642_v48 = vld [vmem:[%s2457_s0 + $0x124] ss:$16 sps:$4 sm:$0xff]   ;;  %v1640_v51 = vld [vmem:[%s2457_s0 + $0x120] ss:$16 sps:$4 sm:$0xff]   ;;  %v1684_v12 = vld [vmem:[%s2457_s0 + $0x9c] ss:$16 sps:$4 sm:$0xff]  }
  0x13   :  { %1458 = vmatpush3.bf16.msra.mxu1 %v1793_v9  ;;  %1504 = vmatpush3.bf16.msra.mxu0 %v1793_v9  ;;  %v1994_v52 = vld [vmem:[%s2456_s1 + $0xd0] sm:$0xff]  }
  0x14   :  { %1459 = vmatprep.subr.bf16.mxu1 %v1800_v10  ;;  %1505 = vmatprep.subr.bf16.mxu0 %v1800_v10  ;;  %v1652_v53 = vld [vmem:[%s2457_s0 + $0x144] ss:$16 sps:$4 sm:$0xff]   ;;  %v1656_v55 = vld [vmem:[%s2457_s0 + $0x140] ss:$16 sps:$4 sm:$0xff]  }
  0x15   :  { %v1658_v57 = vld [vmem:[%s2457_s0 + $0x164] ss:$16 sps:$4 sm:$0xff]   ;;  %v1662_v60 = vld [vmem:[%s2457_s0 + $0x160] ss:$16 sps:$4 sm:$0xff]  }
  0x16   :  { %v1664_v62 = vld [vmem:[%s2457_s0 + $0x184] ss:$16 sps:$4 sm:$0xff]  }
  0x17   :  { %1460 = vmatpush3.bf16.msra.mxu1 %v1813_v13  ;;  %1506 = vmatpush3.bf16.msra.mxu0 %v1813_v13 }
  0x18   :  { %1461 = vmatprep.subr.bf16.mxu1 %v1820_v14  ;;  %1507 = vmatprep.subr.bf16.mxu0 %v1820_v14 }
  0x1b   :  { %1462 = vmatpush3.bf16.msra.mxu1 %v1827_v15  ;;  %1508 = vmatpush3.bf16.msra.mxu0 %v1827_v15 }
  0x1c   :  { %1463 = vmatprep.subr.bf16.mxu1 %v1834_v16  ;;  %1509 = vmatprep.subr.bf16.mxu0 %v1834_v16 }
  0x1f   :  { %1464 = vmatpush3.bf16.msra.mxu1 %v1841_v17  ;;  %1510 = vmatpush3.bf16.msra.mxu0 %v1841_v17 }
  0x20   :  { %459 = vmatprep.subr.bf16.mxu1 %v1702_v22  ;;  %1541 = vmatprep.subr.bf16.mxu0 %v1588_v0  ;;  %v1668_v0 = vld [vmem:[%s2457_s0 + $0x180] ss:$16 sps:$4 sm:$0xff]  }
  0x22   :  { %420 = vmatmul.mubr.bf16.vlgmr.msra.gmra.mrb[0].mxu1 %v1604_v18  ;;  %750 = vmatmul.mubr.bf16.vlgmr.msra.gmra.mrb[0].mxu0 %v1607_v19  ;;  %v1685_v18 = vld [vmem:[%s2457_s0 + $0x168] ss:$16 sps:$4 sm:$0xff]   ;;  %v1686_v19 = vld [vmem:[%s2457_s0 + $0x18c] ss:$16 sps:$4 sm:$0xff]  }
  0x23   :  { %460 = vmatpush1.bf16.msra.mxu1 %v1854_v20  ;;  %757 = vmatprep.mubr.bf16.mxu0 %v1612_v21  ;;  %v1405_v21 = vld [vmem:[%s2457_s0 + $0x1a8] sm:$0xff] }
  0x24   :  { %461 = vmatprep.subr.bf16.mxu1 %v1702_v22  ;;  %1542 = vmatpush3.bf16.msra.mxu0 %v1739_v1  ;;  %v1404_v1 = vld [vmem:[%s2457_s0 + $0x1a0] sm:$0xff] }
  0x25   :  { %1543 = vmatprep.subr.bf16.mxu0 %v1744_v2  ;;  %427 = vmatprep.mubr.bf16.mxu1 %v1621_v23  ;;  %v1660_v2 = vld [vmem:[%s2457_s0 + $0x4c] ss:$16 sps:$4 sm:$0xff]   ;;  %v1691_v23 = vld [vmem:[%s2457_s0 + $0xb8] ss:$16 sps:$4 sm:$0xff]  }
  0x27   :  { %462 = vmatpush1.bf16.msra.mxu1 %v1869_v24 }
  0x28   :  { %463 = vmatprep.subr.bf16.mxu1 %v1702_v22  ;;  %1544 = vmatpush3.bf16.msra.mxu0 %v1751_v3  ;;  %v1423_v3 = vcombine.high %v1404_v1, %v1404_v1 }
  0x29   :  { %1545 = vmatprep.subr.bf16.mxu0 %v1758_v4  ;;  %v1663_v4 = vld [vmem:[%s2457_s0 + $0x48] ss:$16 sps:$4 sm:$0xff]  }
  0x2a   :  { %758 = vmatmul.mubr.bf16.gmra.mrb[4].mxu0 %v1614_v25  ;;  %428 = vmatmul.mubr.bf16.gmra.mrb[4].mxu1 %v1624_v26  ;;  %v1693_v25 = vld [vmem:[%s2457_s0 + $0xdc] ss:$16 sps:$4 sm:$0xff]   ;;  %v1424_v26 = vcombine.low %v1405_v21, %v1405_v21 }
  0x2b   :  { %464 = vmatpush1.bf16.msra.mxu1 %v1884_v27  ;;  %765 = vmatprep.mubr.bf16.mxu0 %v1617_v28  ;;  %v1697_v28 = vld [vmem:[%s2457_s0 + $0xfc] ss:$16 sps:$4 sm:$0xff]  }
  0x2c   :  { %465 = vmatprep.subr.bf16.mxu1 %v1702_v22  ;;  %1546 = vmatpush3.bf16.msra.mxu0 %v1765_v5  ;;  %v1422_v5 = vcombine.low %v1404_v1, %v1404_v1 }
  0x2d   :  { %1547 = vmatprep.subr.bf16.mxu0 %v1772_v6  ;;  %435 = vmatprep.mubr.bf16.mxu1 %v1629_v29  ;;  %v1666_v6 = vld [vmem:[%s2457_s0 + $0x6c] ss:$16 sps:$4 sm:$0xff]  }
  0x2e   :  { %v1362_v29 = vld [vmem:[%s2457_s0 + $0x118] sm:$0xff] }
  0x2f   :  { %466 = vmatpush1.bf16.msra.mxu1 %v1899_v30 }
  0x30   :  { %467 = vmatprep.subr.bf16.mxu1 %v1702_v22  ;;  %1548 = vmatpush3.bf16.msra.mxu0 %v1779_v7  ;;  %v1676_v7 = vld [vmem:[%s2457_s0 + $0x12c] ss:$16 sps:$4 sm:$0xff]  }
  0x31   :  { %1549 = vmatprep.subr.bf16.mxu0 %v1786_v8  ;;  %v1669_v8 = vld [vmem:[%s2457_s0 + $0x68] ss:$16 sps:$4 sm:$0xff]  }
  0x32   :  { %766 = vmatmul.mubr.bf16.gmra.mrb[8].mxu0 %v1619_v31  ;;  %436 = vmatmul.mubr.bf16.gmra.mrb[8].mxu1 %v1632_v33  ;;  %v1382_v31 = vcombine.high %v1362_v29, %v1362_v29 }
  0x33   :  { %468 = vmatpush1.bf16.msra.mxu1 %v1910_v32  ;;  %773 = vmatprep.mubr.bf16.mxu0 %v1625_v34 }
  0x34   :  { %469 = vmatprep.subr.bf16.mxu1 %v1702_v22  ;;  %1550 = vmatpush3.bf16.msra.mxu0 %v1793_v9  ;;  %v41_v9 = vld [vmem:[%s2457_s0 + $0x88] sm:$0xff] }
  0x35   :  { %1551 = vmatprep.subr.bf16.mxu0 %v1800_v10  ;;  %443 = vmatprep.mubr.bf16.mxu1 %v1636_v35  ;;  %v1306_v10 = vcombine.high %v41_v9, %v41_v9  ;;  %v1305_v11 = vcombine.low %v41_v9, %v41_v9 }
  0x37   :  { %470 = vmatpush1.bf16.msra.mxu1 %v1929_v36 }
  0x38   :  { %471 = vmatprep.subr.bf16.mxu1 %v1702_v22  ;;  %1552 = vmatpush3.bf16.msra.mxu0 %v1813_v13  ;;  %v1674_v13 = vld [vmem:[%s2457_s0 + $0x128] ss:$16 sps:$4 sm:$0xff]  }
  0x39   :  { %1553 = vmatprep.subr.bf16.mxu0 %v1820_v14  ;;  %v1677_v14 = vld [vmem:[%s2457_s0 + $0x14c] ss:$16 sps:$4 sm:$0xff]  }
  0x3a   :  { %774 = vmatmul.mubr.bf16.gmra.mrb[12].mxu0 %v1627_v38  ;;  %444 = vmatmul.mubr.bf16.gmra.mrb[12].mxu1 %v1639_v39 }
  0x3b   :  { %472 = vmatpush1.bf16.msra.mxu1 %v1950_v41  ;;  %781 = vmatprep.mubr.bf16.mxu0 %v1380_v42 }
  0x3c   :  { %473 = vmatprep.subr.bf16.mxu1 %v1702_v22  ;;  %1554 = vmatpush3.bf16.msra.mxu0 %v1827_v15  ;;  %v1679_v15 = vld [vmem:[%s2457_s0 + $0x148] ss:$16 sps:$4 sm:$0xff]  }
  0x3d   :  { %1555 = vmatprep.subr.bf16.mxu0 %v1834_v16  ;;  %451 = vmatprep.mubr.bf16.mxu1 %v1304_v43  ;;  %v1680_v16 = vld [vmem:[%s2457_s0 + $0x16c] ss:$16 sps:$4 sm:$0xff]  }
  0x3f   :  { %474 = vmatpush1.bf16.msra.mxu1 %v1959_v44 }
  0x40   :  { %475 = vmatprep.subr.bf16.mxu1 %v1702_v22  ;;  %1556 = vmatpush3.bf16.msra.mxu0 %v1841_v17  ;;  %v1682_v17 = vld [vmem:[%s2457_s0 + $0x98] ss:$16 sps:$4 sm:$0xff]  }
  0x41   :  { %1110 = vmatprep.subr.bf16.mxu0 %v1702_v22 }
  0x42   :  { %782 = vmatmul.mubr.bf16.gmra.mrb[16].mxu0 %v1379_v45  ;;  %452 = vmatmul.mubr.bf16.gmra.mrb[16].mxu1 %v1303_v46 }
  0x43   :  { %476 = vmatpush1.bf16.msra.mxu1 %v1968_v47  ;;  %1070 = vmatprep.mubr.bf16.mxu0 %v1642_v48 }
  0x44   :  { %477 = vmatprep.subr.bf16.mxu1 %v1702_v22  ;;  %1337 = vmatprep.mubr.msk.bf16.mxu1 %vm371_vm0, %v1651_v49 }
  0x47   :  { %478 = vmatpush1.bf16.msra.mxu1 %v1983_v50 }
  0x48   :  { %479 = vmatprep.subr.bf16.mxu1 %v1702_v22 }
  0x4a   :  { %1071 = vmatmul.mubr.bf16.vlgmr.msra.gmra.mrb[20].mxu0 %v1640_v51 }
  0x4b   :  { %1111 = vmatpush1.bf16.msra.mxu0 %v1854_v20  ;;  %480 = vmatpush1.bf16.msra.mxu1 %v1994_v52 }
  0x4c   :  { %1112 = vmatprep.subr.bf16.mxu0 %v1702_v22  ;;  %481 = vmatprep.subr.bf16.mxu1 %v1702_v22 }
  0x4d   :  { %1078 = vmatprep.mubr.bf16.mxu0 %v1652_v53 }
  0x4f   :  { %1113 = vmatpush1.bf16.msra.mxu0 %v1869_v24  ;;  %482 = vmatpush1.bf16.msra.mxu1 %v2005_v54 }
  0x50   :  { %1114 = vmatprep.subr.bf16.mxu0 %v1702_v22  ;;  %483 = vmatprep.subr.bf16.mxu1 %v1702_v22 }
  0x52   :  { %1079 = vmatmul.mubr.bf16.gmra.mrb[24].mxu0 %v1656_v55 }
  0x53   :  { %1115 = vmatpush1.bf16.msra.mxu0 %v1884_v27  ;;  %484 = vmatpush1.bf16.msra.mxu1 %v2017_v56 }
  0x54   :  { %1116 = vmatprep.subr.bf16.mxu0 %v1702_v22  ;;  %485 = vmatprep.subr.bf16.mxu1 %v1702_v22 }
  0x55   :  { %1086 = vmatprep.mubr.bf16.mxu0 %v1658_v57 }
  0x57   :  { %1117 = vmatpush1.bf16.msra.mxu0 %v1899_v30  ;;  %486 = vmatpush1.bf16.msra.mxu1 %v2029_v58 }
  0x58   :  { %1118 = vmatprep.subr.bf16.mxu0 %v1702_v22  ;;  %789 = vmatprep.subr.bf16.mxu1 %v1702_v22 }
  0x5a   :  { %492 = vmatmul.mubr.bf16.vlgmr.msra.gmra.mrb[20].mxu1 %v1649_v59  ;;  %1087 = vmatmul.mubr.bf16.gmra.mrb[28].mxu0 %v1662_v60 }
  0x5b   :  { %1119 = vmatpush1.bf16.msra.mxu0 %v1910_v32  ;;  %790 = vmatpush1.bf16.msra.mxu1 %v1854_v20  ;;  %v1688_v20 = vld [vmem:[%s2457_s0 + $0xbc] ss:$16 sps:$4 sm:$0xff]  }
  0x5c   :  { %1120 = vmatprep.subr.bf16.mxu0 %v1702_v22  ;;  %791 = vmatprep.subr.bf16.mxu1 %v1702_v22 }
  0x5d   :  { %1338 = vmatprep.mubr.msk.bf16.mxu1 %vm371_vm0, %v1654_v61  ;;  %1094 = vmatprep.mubr.bf16.mxu0 %v1664_v62 }
  0x5f   :  { %1121 = vmatpush1.bf16.msra.mxu0 %v1929_v36  ;;  %792 = vmatpush1.bf16.msra.mxu1 %v1869_v24  ;;  %v1425_v24 = vcombine.high %v1405_v21, %v1405_v21 }
  0x60   :  { %1122 = vmatprep.subr.bf16.mxu0 %v1702_v22  ;;  %793 = vmatprep.subr.bf16.mxu1 %v1702_v22 }
  0x62   :  { %500 = vmatmul.mubr.bf16.gmra.mrb[24].mxu1 %v1657_v63  ;;  %1095 = vmatmul.mubr.bf16.gmra.mrb[32].mxu0 %v1668_v0 }
  0x63   :  { %1123 = vmatpush1.bf16.msra.mxu0 %v1950_v41  ;;  %794 = vmatpush1.bf16.msra.mxu1 %v1884_v27  ;;  %v1696_v27 = vld [vmem:[%s2457_s0 + $0xd8] ss:$16 sps:$4 sm:$0xff]  }
  0x64   :  { %1124 = vmatprep.subr.bf16.mxu0 %v1702_v22  ;;  %795 = vmatprep.subr.bf16.mxu1 %v1702_v22 }
  0x65   :  { %1339 = vmatprep.mubr.msk.bf16.mxu1 %vm371_vm0, %v1660_v2  ;;  %1102 = vmatprep.mubr.bf16.mxu0 %v1423_v3 }
  0x67   :  { %1125 = vmatpush1.bf16.msra.mxu0 %v1959_v44  ;;  %796 = vmatpush1.bf16.msra.mxu1 %v1899_v30  ;;  %v1699_v30 = vld [vmem:[%s2457_s0 + $0xf8] ss:$16 sps:$4 sm:$0xff]  }
  0x68   :  { %1126 = vmatprep.subr.bf16.mxu0 %v1702_v22  ;;  %797 = vmatprep.subr.bf16.mxu1 %v1702_v22 }
  0x6a   :  { %508 = vmatmul.mubr.bf16.gmra.mrb[28].mxu1 %v1663_v4  ;;  %1103 = vmatmul.mubr.bf16.gmra.mrb[36].mxu0 %v1422_v5 }
  0x6b   :  { %1127 = vmatpush1.bf16.msra.mxu0 %v1968_v47  ;;  %798 = vmatpush1.bf16.msra.mxu1 %v1910_v32  ;;  %v1381_v32 = vcombine.low %v1362_v29, %v1362_v29 }
  0x6c   :  { %1128 = vmatprep.subr.bf16.mxu0 %v1702_v22  ;;  %799 = vmatprep.subr.bf16.mxu1 %v1702_v22 }
  0x6d   :  { %1340 = vmatprep.mubr.msk.bf16.mxu1 %vm371_vm0, %v1666_v6  ;;  %1426 = vmatprep.mubr.msk.bf16.mxu0 %vm371_vm0, %v1676_v7 }
  0x6f   :  { %1129 = vmatpush1.bf16.msra.mxu0 %v1983_v50  ;;  %800 = vmatpush1.bf16.msra.mxu1 %v1929_v36 }
  0x70   :  { %1130 = vmatprep.subr.bf16.mxu0 %v1702_v22  ;;  %801 = vmatprep.subr.bf16.mxu1 %v1702_v22 }
  0x72   :  { %516 = vmatmul.mubr.bf16.gmra.mrb[32].mxu1 %v1669_v8 }
  0x73   :  { %1131 = vmatpush1.bf16.msra.mxu0 %v1994_v52  ;;  %802 = vmatpush1.bf16.msra.mxu1 %v1950_v41 }
  0x74   :  { %1132 = vmatprep.subr.bf16.mxu0 %v1702_v22  ;;  %803 = vmatprep.subr.bf16.mxu1 %v1702_v22 }
  0x75   :  { %1341 = vmatprep.mubr.msk.bf16.mxu1 %vm371_vm0, %v1306_v10 }
  0x77   :  { %1133 = vmatpush1.bf16.msra.mxu0 %v2005_v54  ;;  %804 = vmatpush1.bf16.msra.mxu1 %v1959_v44 }
  0x78   :  { %1134 = vmatprep.subr.bf16.mxu0 %v1702_v22  ;;  %805 = vmatprep.subr.bf16.mxu1 %v1702_v22 }
  0x7a   :  { %524 = vmatmul.mubr.bf16.gmra.mrb[36].mxu1 %v1305_v11 }
  0x7b   :  { %1135 = vmatpush1.bf16.msra.mxu0 %v2017_v56  ;;  %806 = vmatpush1.bf16.msra.mxu1 %v1968_v47 }
  0x7c   :  { %1136 = vmatprep.subr.bf16.mxu0 %v1702_v22  ;;  %807 = vmatprep.subr.bf16.mxu1 %v1702_v22 }
  0x7d   :  { %1383 = vmatprep.mubr.msk.bf16.mxu1 %vm371_vm0, %v1684_v12 }
  0x7f   :  { %1137 = vmatpush1.bf16.msra.mxu0 %v2029_v58  ;;  %808 = vmatpush1.bf16.msra.mxu1 %v1983_v50 }
  0x80   :  { %809 = vmatprep.subr.bf16.mxu1 %v1702_v22 }
  0x82   :  { %1143 = vmatmul.mubr.bf16.vlgmr.msra.gmra.mrb[40].mxu0 %v1674_v13 }
  0x83   :  { %810 = vmatpush1.bf16.msra.mxu1 %v1994_v52  ;;  %1427 = vmatprep.mubr.msk.bf16.mxu0 %vm371_vm0, %v1677_v14 }
  0x84   :  { %811 = vmatprep.subr.bf16.mxu1 %v1702_v22 }
  0x87   :  { %812 = vmatpush1.bf16.msra.mxu1 %v2005_v54 }
  0x88   :  { %813 = vmatprep.subr.bf16.mxu1 %v1702_v22 }
  0x8a   :  { %1151 = vmatmul.mubr.bf16.gmra.mrb[44].mxu0 %v1679_v15 }
  0x8b   :  { %814 = vmatpush1.bf16.msra.mxu1 %v2017_v56  ;;  %1428 = vmatprep.mubr.msk.bf16.mxu0 %vm371_vm0, %v1680_v16 }
  0x8c   :  { %815 = vmatprep.subr.bf16.mxu1 %v1702_v22  ;;  %v1690_v22 = vld [vmem:[%s2457_s0 + $0x188] ss:$16 sps:$4 sm:$0xff]  }
  0x8f   :  { %816 = vmatpush1.bf16.msra.mxu1 %v2029_v58 }
  0x92   :  { %1159 = vmatmul.mubr.bf16.gmra.mrb[48].mxu0 %v1685_v18  ;;  %822 = vmatmul.mubr.bf16.vlgmr.msra.gmra.mrb[40].mxu1 %v1682_v17 }
  0x93   :  { %1429 = vmatprep.mubr.msk.bf16.mxu0 %vm371_vm0, %v1686_v19  ;;  %1384 = vmatprep.mubr.msk.bf16.mxu1 %vm371_vm0, %v1688_v20 }
  0x9a   :  { %1167 = vmatmul.mubr.bf16.gmra.mrb[52].mxu0 %v1690_v22  ;;  %830 = vmatmul.mubr.bf16.gmra.mrb[44].mxu1 %v1691_v23 }
  0x9b   :  { %1430 = vmatprep.mubr.msk.bf16.mxu0 %vm371_vm0, %v1425_v24  ;;  %1385 = vmatprep.mubr.msk.bf16.mxu1 %vm371_vm0, %v1693_v25 }
  0xa2   :  { %1175 = vmatmul.mubr.bf16.gmra.mrb[56].mxu0 %v1424_v26  ;;  %838 = vmatmul.mubr.bf16.gmra.mrb[48].mxu1 %v1696_v27 }
  0xa3   :  { %1386 = vmatprep.mubr.msk.bf16.mxu1 %vm371_vm0, %v1697_v28 }
  0xaa   :  { %846 = vmatmul.mubr.bf16.gmra.mrb[52].mxu1 %v1699_v30 }
  0xab   :  { %1387 = vmatprep.mubr.msk.bf16.mxu1 %vm371_vm0, %v1382_v31 }
  0xb2   :  { %854 = vmatmul.mubr.bf16.gmra.mrb[56].mxu1 %v1381_v32 }
  0xf5   :  { %v1465_v33 = vpop.f32.mrb[0].mxu1  ;;  %v1511_v34 = vpop.f32.mrb[0].mxu0 }
  0xf6   :  { %v1466_v35 = vpop.f32.mrb[1].mxu1  ;;  %v1512_v36 = vpop.f32.mrb[1].mxu0 }
  0xf7   :  { %v2187_v37 = vadd.f32 %v1466_v35, %v1465_v33  ;;  %v1468_v38 = vpop.f32.mrb[2].mxu1  ;;  %v2189_v39 = vadd.f32 %v1512_v36, %v1511_v34  ;;  %v1514_v40 = vpop.f32.mrb[2].mxu0 }
  0xf8   :  { %v1469_v41 = vpop.f32.mrb[3].mxu1  ;;  %v1515_v42 = vpop.f32.mrb[3].mxu0 }
  0xf9   :  { %v2191_v43 = vadd.f32 %v1469_v41, %v1468_v38  ;;  %v2193_v44 = vadd.f32 %v1515_v42, %v1514_v40 }
  0xfd   :  { %v1471_v45 = vpop.f32.mrb[4].mxu1  ;;  %v1517_v46 = vpop.f32.mrb[4].mxu0 }
  0xfe   :  { %v1472_v47 = vpop.f32.mrb[5].mxu1  ;;  %v1518_v48 = vpop.f32.mrb[5].mxu0 }
  0xff   :  { %v2195_v49 = vadd.f32 %v1472_v47, %v1471_v45  ;;  %v1474_v50 = vpop.f32.mrb[6].mxu1  ;;  %v2197_v51 = vadd.f32 %v1518_v48, %v1517_v46  ;;  %v1520_v52 = vpop.f32.mrb[6].mxu0 }
 0x100   :  { %v1475_v53 = vpop.f32.mrb[7].mxu1  ;;  %v1521_v54 = vpop.f32.mrb[7].mxu0 }
 0x101   :  { %v2199_v55 = vadd.f32 %v1475_v53, %v1474_v50  ;;  %v2201_v56 = vadd.f32 %v1521_v54, %v1520_v52 }
 0x105   :  { %v1477_v57 = vpop.f32.mrb[8].mxu1  ;;  %v1523_v58 = vpop.f32.mrb[8].mxu0 }
 0x106   :  { %v1478_v59 = vpop.f32.mrb[9].mxu1  ;;  %v1524_v60 = vpop.f32.mrb[9].mxu0 }
 0x107   :  { %v2203_v61 = vadd.f32 %v1478_v59, %v1477_v57  ;;  %v1480_v62 = vpop.f32.mrb[10].mxu1  ;;  %v2205_v63 = vadd.f32 %v1524_v60, %v1523_v58  ;;  %v1526_v0 = vpop.f32.mrb[10].mxu0 }
 0x108   :  { %v1481_v1 = vpop.f32.mrb[11].mxu1  ;;  %v1527_v2 = vpop.f32.mrb[11].mxu0 }
 0x109   :  { %v2207_v3 = vadd.f32 %v1481_v1, %v1480_v62  ;;  %v2209_v4 = vadd.f32 %v1527_v2, %v1526_v0 }
 0x10d   :  { %v1483_v5 = vpop.f32.mrb[12].mxu1  ;;  %v1529_v6 = vpop.f32.mrb[12].mxu0 }
 0x10e   :  { %v1484_v7 = vpop.f32.mrb[13].mxu1  ;;  %v1530_v8 = vpop.f32.mrb[13].mxu0 }
 0x10f   :  { %v2211_v9 = vadd.f32 %v1484_v7, %v1483_v5  ;;  %v1486_v10 = vpop.f32.mrb[14].mxu1  ;;  %v2213_v11 = vadd.f32 %v1530_v8, %v1529_v6  ;;  %v1532_v12 = vpop.f32.mrb[14].mxu0 }
 0x110   :  { %v1487_v13 = vpop.f32.mrb[15].mxu1  ;;  %v1533_v14 = vpop.f32.mrb[15].mxu0 }
 0x111   :  { %v2215_v15 = vadd.f32 %v1487_v13, %v1486_v10  ;;  %v2217_v16 = vadd.f32 %v1533_v14, %v1532_v12 }
 0x115   :  { %v1489_v17 = vpop.f32.mrb[16].mxu1  ;;  %v1535_v18 = vpop.f32.mrb[16].mxu0 }
 0x116   :  { %v1490_v19 = vpop.f32.mrb[17].mxu1  ;;  %v1536_v20 = vpop.f32.mrb[17].mxu0 }
 0x117   :  { %v1491_v21 = vadd.f32 %v1490_v19, %v1489_v17  ;;  %v1492_v22 = vpop.f32.mrb[18].mxu1  ;;  %v2219_v23 = vadd.f32 %v1536_v20, %v1535_v18  ;;  %v1538_v24 = vpop.f32.mrb[18].mxu0 }
 0x118   :  { %v1493_v25 = vpop.f32.mrb[19].mxu1  ;;  %v1539_v26 = vpop.f32.mrb[19].mxu0 }
 0x11d   :  { %v1557_v27 = vpop.f32.mrb[20].mxu0 }
 0x11e   :  { %v1558_v28 = vpop.f32.mrb[21].mxu0 }
 0x11f   :  { %v1559_v29 = vadd.f32 %v1558_v28, %v1557_v27  ;;  %v1560_v30 = vpop.f32.mrb[22].mxu0 }
 0x120   :  { %v1561_v31 = vpop.f32.mrb[23].mxu0 }
 0x121   :  { %v1562_v32 = vadd.f32 %v1561_v31, %v1560_v30 }
 0x125   :  { %v1563_v33 = vpop.f32.mrb[24].mxu0 }
 0x126   :  { %v1564_v34 = vpop.f32.mrb[25].mxu0 }
 0x127   :  { %v2221_v35 = vadd.f32 %v1564_v34, %v1563_v33  ;;  %v1566_v36 = vpop.f32.mrb[26].mxu0 }
 0x128   :  { %v1567_v38 = vpop.f32.mrb[27].mxu0 }
 0x129   :  { %v2223_v40 = vadd.f32 %v1567_v38, %v1566_v36 }
 0x12d   :  { %v493_v41 = vpop.f32.mrb[20].mxu1  ;;  %v1569_v42 = vpop.f32.mrb[28].mxu0 }
 0x12e   :  { %v494_v45 = vadd.f32 %v2187_v37, %v493_v41  ;;  %v495_v46 = vpop.f32.mrb[21].mxu1  ;;  %v1570_v47 = vpop.f32.mrb[29].mxu0 }
 0x12f   :  { %v496_v48 = vpop.f32.mrb[22].mxu1  ;;  %v2226_v50 = vadd.f32 %v1570_v47, %v1569_v42  ;;  %v1572_v52 = vpop.f32.mrb[30].mxu0 }
 0x130   :  { %v497_v53 = vadd.f32 %v2191_v43, %v496_v48  ;;  %v498_v54 = vpop.f32.mrb[23].mxu1  ;;  %v1573_v57 = vpop.f32.mrb[31].mxu0 }
 0x131   :  { %v2229_v58 = vadd.f32 %v1573_v57, %v1572_v52  ;;  %v2259_v52 = vld [vmem:[%s2459_s3] ss:$0 sm:$0xff] }
 0x135   :  { %v501_v59 = vpop.f32.mrb[24].mxu1  ;;  %v1575_v60 = vpop.f32.mrb[32].mxu0 }
 0x136   :  { %v502_v62 = vadd.f32 %v2195_v49, %v501_v59  ;;  %v503_v0 = vpop.f32.mrb[25].mxu1  ;;  %v1576_v1 = vpop.f32.mrb[33].mxu0 }
 0x137   :  { %v504_v2 = vpop.f32.mrb[26].mxu1  ;;  %v2232_v37 = vadd.f32 %v1576_v1, %v1575_v60  ;;  %v1578_v5 = vpop.f32.mrb[34].mxu0 }
 0x138   :  { %v505_v6 = vadd.f32 %v2199_v55, %v504_v2  ;;  %v506_v7 = vpop.f32.mrb[27].mxu1  ;;  %v1579_v8 = vpop.f32.mrb[35].mxu0  ;;  %v2271_v2 = vld [vmem:[%s2460_s4] ss:$0 sm:$0xff] }
 0x139   :  { %v2235_v10 = vadd.f32 %v1579_v8, %v1578_v5 }
 0x13d   :  { %v509_v43 = vpop.f32.mrb[28].mxu1  ;;  %v1581_v12 = vpop.f32.mrb[36].mxu0 }
 0x13e   :  { %v510_v13 = vadd.f32 %v2203_v61, %v509_v43  ;;  %v511_v14 = vpop.f32.mrb[29].mxu1  ;;  %v1582_v17 = vpop.f32.mrb[37].mxu0 }
 0x13f   :  { %v512_v18 = vpop.f32.mrb[30].mxu1  ;;  %v2238_v49 = vadd.f32 %v1582_v17, %v1581_v12  ;;  %v1584_v19 = vpop.f32.mrb[38].mxu0 }
 0x140   :  { %v513_v20 = vadd.f32 %v2207_v3, %v512_v18  ;;  %v514_v22 = vpop.f32.mrb[31].mxu1  ;;  %v1585_v24 = vpop.f32.mrb[39].mxu0 }
 0x145   :  { %v517_v25 = vpop.f32.mrb[32].mxu1 }
 0x146   :  { %v2242_v55 = vadd.f32 %v2211_v9, %v517_v25  ;;  %v519_v26 = vpop.f32.mrb[33].mxu1  ;;  %v2252_v9 = vld [vmem:[%s2458_s2] ss:$0 sm:$0xff] }
 0x147   :  { %v520_v27 = vpop.f32.mrb[34].mxu1  ;;  %v538_v48 = vmul.f32 %v2252_v9, %v497_v53  ;;  %v540_v57 = vmul.f32 %v2252_v9, %v505_v6  ;;  %v541_v60 = vmul.f32 %v2252_v9, %v510_v13  ;;  %v542_v12 = vmul.f32 %v2252_v9, %v513_v20 }
 0x148   :  { %v2245_v28 = vadd.f32 %v2215_v15, %v520_v27  ;;  %v522_v61 = vpop.f32.mrb[35].mxu1  ;;  %v537_v15 = vmul.f32 %v2252_v9, %v494_v45 }
 0x149   :  { %v553_v1 = vadd.f32 %v2259_v52, %v538_v48  ;;  %v556_v5 = vadd.f32 %v2259_v52, %v541_v60 }
 0x14a   :  { %v552_v53 = vadd.f32 %v2259_v52, %v537_v15  ;;  %v544_v15 = vmul.f32 %v2252_v9, %v2245_v28 }
 0x14b   :  { %vm562_vm2 = vcmp.ge.f32.partialorder %v553_v1, 0.0  ;;  %v577_v43 = vmul.f32 %v2271_v2, %v553_v1  ;;  %v580_v27 = vmul.f32 %v2271_v2, %v556_v5  ;;  %vm565_vm5 = vcmp.ge.f32.partialorder %v556_v5, 0.0 }
 0x14c   :  { %vm561_vm1 = vcmp.ge.f32.partialorder %v552_v53, 0.0  ;;  %v576_v6 = vmul.f32 %v2271_v2, %v552_v53 }
 0x14d   :  { %v525_v30 = vpop.f32.mrb[36].mxu1 }
 0x14e   :  { %v2247_v31 = vadd.f32 %v1491_v21, %v525_v30  ;;  %v527_v33 = vpop.f32.mrb[37].mxu1 }
 0x14f   :  { %v528_v34 = vpop.f32.mrb[38].mxu1 }
 0x150   :  { %v529_v36 = vpop.f32.mrb[39].mxu1 }
 0x151   :  { %v585_v36 = vsel %vm561_vm1, %v552_v53, %v576_v6 }
 0x155   :  { %v1144_v38 = vpop.f32.mrb[40].mxu0 }
 0x156   :  { %v1145_v3 = vadd.f32 %v1559_v29, %v1144_v38  ;;  %v1146_v41 = vpop.f32.mrb[41].mxu0 }
 0x157   :  { %v1147_v42 = vpop.f32.mrb[42].mxu0 }
 0x158   :  { %v1148_v46 = vadd.f32 %v1562_v32, %v1147_v42  ;;  %v1149_v47 = vpop.f32.mrb[43].mxu0  ;;  %v539_v32 = vmul.f32 %v2252_v9, %v502_v62  ;;  %v555_v62 = vadd.f32 %v2259_v52, %v540_v57 }
 0x159   :  { %v543_v47 = vmul.f32 %v2252_v9, %v2242_v55 }
 0x15a   :  { %v1183_v13 = vmul.f32 %v2252_v9, %v1148_v46  ;;  %v579_v22 = vmul.f32 %v2271_v2, %v555_v62  ;;  %vm564_vm4 = vcmp.ge.f32.partialorder %v555_v62, 0.0  ;;  %v2307_v46 = vsel %vm565_vm5, %v556_v5, %v580_v27 }
 0x15c   :  { %v1192_v38 = vadd.f32 %v2259_v52, %v1183_v13  ;;  %v2304_v41 = vsel %vm564_vm4, %v555_v62, %v579_v22 }
 0x15d   :  { %v1152_v21 = vpop.f32.mrb[44].mxu0 }
 0x15e   :  { %v1153_v29 = vadd.f32 %v2221_v35, %v1152_v21  ;;  %v1154_v54 = vpop.f32.mrb[45].mxu0  ;;  %v554_v35 = vadd.f32 %v2259_v52, %v539_v32  ;;  %v1210_v60 = vmul.f32 %v2271_v2, %v1192_v38  ;;  %vm1201_vm11 = vcmp.ge.f32.partialorder %v1192_v38, 0.0 }
 0x15f   :  { %v1155_v59 = vpop.f32.mrb[46].mxu0 }
 0x160   :  { %v1156_v45 = vadd.f32 %v2223_v40, %v1155_v59  ;;  %v1157_v0 = vpop.f32.mrb[47].mxu0  ;;  %v1182_v40 = vmul.f32 %v2252_v9, %v1145_v3  ;;  %vm563_vm3 = vcmp.ge.f32.partialorder %v554_v35, 0.0  ;;  %v578_v19 = vmul.f32 %v2271_v2, %v554_v35 }
 0x161   :  { %v1184_v54 = vmul.f32 %v2252_v9, %v1153_v29  ;;  %v1219_v22 = vsel %vm1201_vm11, %v1192_v38, %v1210_v60 }
 0x162   :  { %v1191_v33 = vadd.f32 %v2259_v52, %v1182_v40  ;;  %v1185_v55 = vmul.f32 %v2252_v9, %v1156_v45 }
 0x164   :  { %v1209_v21 = vmul.f32 %v2271_v2, %v1191_v33  ;;  %vm1200_vm9 = vcmp.ge.f32.partialorder %v1191_v33, 0.0 }
 0x165   :  { %v1160_v7 = vpop.f32.mrb[48].mxu0  ;;  %v823_v8 = vpop.f32.mrb[40].mxu1 }
 0x166   :  { %v2282_v14 = vadd.f32 %v2226_v50, %v1160_v7  ;;  %v1162_v17 = vpop.f32.mrb[49].mxu0  ;;  %v825_v18 = vpop.f32.mrb[41].mxu1  ;;  %v824_v24 = vadd.f32 %v2189_v39, %v823_v8  ;;  %v2296_v39 = vadd.f32 %v2259_v52, %v542_v12  ;;  %v1193_v12 = vadd.f32 %v2259_v52, %v1184_v54 }
 0x167   :  { %v1163_v25 = vpop.f32.mrb[50].mxu0  ;;  %v826_v26 = vpop.f32.mrb[42].mxu1 }
 0x168   :  { %v2289_v20 = vadd.f32 %v2229_v58, %v1163_v25  ;;  %v827_v50 = vadd.f32 %v2193_v44, %v826_v26  ;;  %v828_v61 = vpop.f32.mrb[43].mxu1  ;;  %v1165_v30 = vpop.f32.mrb[51].mxu0  ;;  %v861_v34 = vmul.f32 %v2252_v9, %v824_v24  ;;  %v586_v58 = vsel %vm562_vm2, %v553_v1, %v577_v43 }
 0x169   :  { %v2302_v44 = vsel %vm563_vm3, %v554_v35, %v578_v19  ;;  %vm566_vm8 = vcmp.ge.f32.partialorder %v2296_v39, 0.0  ;;  %v1218_v43 = vsel %vm1200_vm9, %v1191_v33, %v1209_v21  ;;  %v2343_v25 = vadd.f32 %v2259_v52, %v544_v15 }
 0x16a   :  { %v862_v3 = vmul.f32 %v2252_v9, %v827_v50  ;;  %v870_v42 = vadd.f32 %v2259_v52, %v861_v34  ;;  %v1211_v61 = vmul.f32 %v2271_v2, %v1193_v12  ;;  %v1186_v30 = vmul.f32 %v2252_v9, %v2282_v14 }
 0x16b   :  { %vm1202_vm13 = vcmp.ge.f32.partialorder %v1193_v12, 0.0  ;;  %v1187_v14 = vmul.f32 %v2252_v9, %v2289_v20  ;;  %vm568_vm1 = vcmp.ge.f32.partialorder %v2343_v25, 0.0 }
 0x16c   :  { %v871_v48 = vadd.f32 %v2259_v52, %v862_v3  ;;  %vm879_vm7 = vcmp.ge.f32.partialorder %v870_v42, 0.0  ;;  %v888_v32 = vmul.f32 %v2271_v2, %v870_v42 }
 0x16d   :  { %v1168_v57 = vpop.f32.mrb[52].mxu0  ;;  %v831_v59 = vpop.f32.mrb[44].mxu1 }
 0x16e   :  { %vm880_vm10 = vcmp.ge.f32.partialorder %v871_v48, 0.0  ;;  %v1170_v28 = vpop.f32.mrb[53].mxu0  ;;  %v833_v0 = vpop.f32.mrb[45].mxu1  ;;  %v897_v53 = vsel %vm879_vm7, %v870_v42, %v888_v32  ;;  %v889_v1 = vmul.f32 %v2271_v2, %v871_v48  ;;  %v2322_v29 = vadd.f32 %v2232_v37, %v1168_v57 }
 0x16f   :  { %v832_v35 = vadd.f32 %v2197_v51, %v831_v59  ;;  %v1171_v62 = vpop.f32.mrb[54].mxu0  ;;  %v834_v5 = vpop.f32.mrb[46].mxu1  ;;  %v906_v6 = vmax.f32 %v585_v36, %v897_v53  ;;  %v1194_v51 = vadd.f32 %v2259_v52, %v1185_v55  ;;  %v1220_v55 = vsel %vm1202_vm13, %v1193_v12, %v1211_v61 }
 0x170   :  { %v2326_v40 = vadd.f32 %v2235_v10, %v1171_v62  ;;  %v835_v45 = vadd.f32 %v2201_v56, %v834_v5  ;;  %v836_v7 = vpop.f32.mrb[47].mxu1  ;;  %v1173_v8 = vpop.f32.mrb[55].mxu0  ;;  %v898_v37 = vsel %vm880_vm10, %v871_v48, %v889_v1  ;;  %v581_v10 = vmul.f32 %v2271_v2, %v2296_v39 }
 0x171   :  { %v863_v13 = vmul.f32 %v2252_v9, %v832_v35  ;;  %v1227_v17 = vmax.f32 %v906_v6, %v1218_v43  ;;  %v907_v18 = vmax.f32 %v586_v58, %v898_v37  ;;  %v2338_v56 = vadd.f32 %v2259_v52, %v543_v47 }
 0x172   :  { %v864_v19 = vmul.f32 %v2252_v9, %v835_v45  ;;  %v1212_v38 = vmul.f32 %v2271_v2, %v1194_v51  ;;  %vm1203_vm15 = vcmp.ge.f32.partialorder %v1194_v51, 0.0  ;;  %v1195_v28 = vadd.f32 %v2259_v52, %v1186_v30 }
 0x173   :  { %v872_v24 = vadd.f32 %v2259_v52, %v863_v13  ;;  %v1440_v26 = vpack.c.bf16 %v1227_v17, %v1227_v17  ;;  %v1228_v27 = vmax.f32 %v907_v18, %v1219_v22  ;;  %v1188_v62 = vmul.f32 %v2252_v9, %v2322_v29 }
 0x174   :  { %v873_v50 = vadd.f32 %v2259_v52, %v864_v19  ;;  %v1221_v35 = vsel %vm1203_vm15, %v1194_v51, %v1212_v38  ;;  %vm567_vm0 = vcmp.ge.f32.partialorder %v2338_v56, 0.0  ;;  %v545_v7 = vmul.f32 %v2252_v9, %v2247_v31 }
 0x175   :  { %vm881_vm12 = vcmp.ge.f32.partialorder %v872_v24, 0.0  ;;  %v890_v33 = vmul.f32 %v2271_v2, %v872_v24  ;;  %v1176_v34 = vpop.f32.mrb[56].mxu0  ;;  %v839_v36 = vpop.f32.mrb[48].mxu1  ;;  %1274 = vst.msk [vmem:[%s2461_s5] sm:$0xf] %vm1273_vm6, %v1440_v26  ;;  %v1441_v3 = vpack.c.bf16 %v1228_v27, %v1228_v27  ;;  %vm1204_vm2 = vcmp.ge.f32.partialorder %v1195_v28, 0.0 }
 0x176   :  { %vm882_vm14 = vcmp.ge.f32.partialorder %v873_v50, 0.0  ;;  %v841_v58 = vpop.f32.mrb[49].mxu1  ;;  %v1178_v42 = vpop.f32.mrb[57].mxu0  ;;  %v891_v15 = vmul.f32 %v2271_v2, %v873_v50  ;;  %v2359_v48 = vadd.f32 %v2238_v49, %v1176_v34  ;;  %v840_v57 = vadd.f32 %v2205_v63, %v839_v36 }
 0x177   :  { %v899_v47 = vsel %vm881_vm12, %v872_v24, %v890_v33  ;;  %v842_v21 = vpop.f32.mrb[50].mxu1  ;;  %v1179_v54 = vpop.f32.mrb[58].mxu0  ;;  %1275 = vst.msk [vmem:[%s2461_s5 + $0x4] sm:$0xf] %vm1273_vm6, %v1441_v3  ;;  %v590_v49 = vsel %vm566_vm8, %v2296_v39, %v581_v10  ;;  %v1196_v39 = vadd.f32 %v2259_v52, %v1187_v14  ;;  %v1213_v8 = vmul.f32 %v2271_v2, %v1195_v28 }
 0x178   :  { %v908_v32 = vmax.f32 %v2302_v44, %v899_v47  ;;  %v843_v20 = vadd.f32 %v2209_v4, %v842_v21  ;;  %v844_v59 = vpop.f32.mrb[51].mxu1  ;;  %v1180_v60 = vpop.f32.mrb[59].mxu0  ;;  %v900_v0 = vsel %vm882_vm14, %v873_v50, %v891_v15  ;;  %v865_v44 = vmul.f32 %v2252_v9, %v840_v57 }
 0x179   :  { %v909_v1 = vmax.f32 %v2304_v41, %v900_v0  ;;  %v582_v4 = vmul.f32 %v2271_v2, %v2338_v56  ;;  %v1189_v43 = vmul.f32 %v2252_v9, %v2326_v40  ;;  %v1214_v31 = vmul.f32 %v2271_v2, %v1196_v39 }
 0x17a   :  { %v1229_v53 = vmax.f32 %v908_v32, %v1220_v55  ;;  %v866_v63 = vmul.f32 %v2252_v9, %v843_v20  ;;  %v874_v6 = vadd.f32 %v2259_v52, %v865_v44  ;;  %v1197_v51 = vadd.f32 %v2259_v52, %v1188_v62 }
 0x17b   :  { %v1230_v41 = vmax.f32 %v909_v1, %v1221_v35  ;;  %v583_v19 = vmul.f32 %v2271_v2, %v2343_v25  ;;  %vm1205_vm5 = vcmp.ge.f32.partialorder %v1196_v39, 0.0  ;;  %v1198_v26 = vadd.f32 %v2259_v52, %v1189_v43 }
 0x17c   :  { %v1442_v5 = vpack.c.bf16 %v1229_v53, %v1229_v53  ;;  %v875_v45 = vadd.f32 %v2259_v52, %v866_v63  ;;  %vm883_vm3 = vcmp.ge.f32.partialorder %v874_v6, 0.0  ;;  %v892_v37 = vmul.f32 %v2271_v2, %v874_v6 }
 0x17d   :  { %v847_v29 = vpop.f32.mrb[52].mxu1  ;;  %v1443_v12 = vpack.c.bf16 %v1230_v41, %v1230_v41  ;;  %v560_v61 = vadd.f32 %v2259_v52, %v545_v7  ;;  %v1222_v30 = vsel %vm1204_vm2, %v1195_v28, %v1213_v8  ;;  %v1223_v36 = vsel %vm1205_vm5, %v1196_v39, %v1214_v31 }
 0x17e   :  { %1276 = vst.msk [vmem:[%s2461_s5 + $0x8] sm:$0xf] %vm1273_vm6, %v1442_v5  ;;  %vm884_vm4 = vcmp.ge.f32.partialorder %v875_v45, 0.0  ;;  %v849_v13 = vpop.f32.mrb[53].mxu1  ;;  %v893_v17 = vmul.f32 %v2271_v2, %v875_v45  ;;  %v848_v40 = vadd.f32 %v2213_v11, %v847_v29  ;;  %v901_v10 = vsel %vm883_vm3, %v874_v6, %v892_v37 }
 0x17f   :  { %v850_v18 = vpop.f32.mrb[54].mxu1  ;;  %1277 = vst.msk [vmem:[%s2461_s5 + $0xc] sm:$0xf] %vm1273_vm6, %v1443_v12  ;;  %v910_v27 = vmax.f32 %v2307_v46, %v901_v10  ;;  %vm1206_vm7 = vcmp.ge.f32.partialorder %v1197_v51, 0.0  ;;  %v1215_v3 = vmul.f32 %v2271_v2, %v1197_v51  ;;  %v1190_v46 = vmul.f32 %v2252_v9, %v2359_v48 }
 0x180   :  { %v851_v22 = vadd.f32 %v2217_v16, %v850_v18  ;;  %v852_v24 = vpop.f32.mrb[55].mxu1  ;;  %v902_v50 = vsel %vm884_vm4, %v875_v45, %v893_v17  ;;  %v867_v11 = vmul.f32 %v2252_v9, %v848_v40  ;;  %v1216_v14 = vmul.f32 %v2271_v2, %v1198_v26 }
 0x181   :  { %v911_v33 = vmax.f32 %v590_v49, %v902_v50  ;;  %v1231_v38 = vmax.f32 %v910_v27, %v1222_v30  ;;  %v591_v48 = vsel %vm567_vm0, %v2338_v56, %v582_v4  ;;  %v592_v59 = vsel %vm568_vm1, %v2343_v25, %v583_v19 }
 0x182   :  { %v868_v34 = vmul.f32 %v2252_v9, %v851_v22  ;;  %v876_v16 = vadd.f32 %v2259_v52, %v867_v11  ;;  %vm1207_vm10 = vcmp.ge.f32.partialorder %v1198_v26, 0.0  ;;  %v1199_v55 = vadd.f32 %v2259_v52, %v1190_v46 }
 0x183   :  { %v1232_v58 = vmax.f32 %v911_v33, %v1223_v36  ;;  %v1444_v47 = vpack.c.bf16 %v1231_v38, %v1231_v38  ;;  %v1224_v0 = vsel %vm1206_vm7, %v1197_v51, %v1215_v3  ;;  %v584_v1 = vmul.f32 %v2271_v2, %v560_v61 }
 0x184   :  { %v877_v42 = vadd.f32 %v2259_v52, %v868_v34  ;;  %vm885_vm8 = vcmp.ge.f32.partialorder %v876_v16, 0.0  ;;  %v894_v15 = vmul.f32 %v2271_v2, %v876_v16  ;;  %v1225_v44 = vsel %vm1207_vm10, %v1198_v26, %v1216_v14 }
 0x185   :  { %v855_v21 = vpop.f32.mrb[56].mxu1  ;;  %v1445_v54 = vpack.c.bf16 %v1232_v58, %v1232_v58  ;;  %1278 = vst.msk [vmem:[%s2461_s5 + $0x10] sm:$0xf] %vm1273_vm6, %v1444_v47  ;;  %vm569_vm11 = vcmp.ge.f32.partialorder %v560_v61, 0.0  ;;  %v1217_v39 = vmul.f32 %v2271_v2, %v1199_v55  ;;  %vm1208_vm13 = vcmp.ge.f32.partialorder %v1199_v55, 0.0 }
 0x186   :  { %vm886_vm9 = vcmp.ge.f32.partialorder %v877_v42, 0.0  ;;  %v895_v32 = vmul.f32 %v2271_v2, %v877_v42  ;;  %v856_v57 = vadd.f32 %v2219_v23, %v855_v21  ;;  %v857_v20 = vpop.f32.mrb[57].mxu1  ;;  %v903_v60 = vsel %vm885_vm8, %v876_v16, %v894_v15 }
 0x187   :  { %v858_v49 = vpop.f32.mrb[58].mxu1  ;;  %1279 = vst.msk [vmem:[%s2461_s5 + $0x14] sm:$0xf] %vm1273_vm6, %v1445_v54  ;;  %v912_v23 = vmax.f32 %v591_v48, %v903_v60  ;;  %v593_v41 = vsel %vm569_vm11, %v560_v61, %v584_v1  ;;  %v1226_v45 = vsel %vm1208_vm13, %v1199_v55, %v1217_v39 }
 0x188   :  { %v904_v56 = vsel %vm886_vm9, %v877_v42, %v895_v32  ;;  %v869_v28 = vmul.f32 %v2252_v9, %v856_v57  ;;  %v859_v25 = vpop.f32.mrb[59].mxu1 }
 0x189   :  { %v913_v53 = vmax.f32 %v592_v59, %v904_v56  ;;  %v1233_v63 = vmax.f32 %v912_v23, %v1224_v0 }
 0x18a   :  { %v878_v4 = vadd.f32 %v2259_v52, %v869_v28 }
 0x18b   :  { %v1234_v35 = vmax.f32 %v913_v53, %v1225_v44  ;;  %v1446_v62 = vpack.c.bf16 %v1233_v63, %v1233_v63 }
 0x18c   :  { %vm887_vm12 = vcmp.ge.f32.partialorder %v878_v4, 0.0  ;;  %v896_v5 = vmul.f32 %v2271_v2, %v878_v4 }
 0x18d   :  { %v1447_v9 = vpack.c.bf16 %v1234_v35, %v1234_v35  ;;  %1280 = vst.msk [vmem:[%s2461_s5 + $0x18] sm:$0xf] %vm1273_vm6, %v1446_v62 }
 0x18e   :  { %v905_v6 = vsel %vm887_vm12, %v878_v4, %v896_v5 }
 0x18f   :  { %1281 = vst.msk [vmem:[%s2461_s5 + $0x1c] sm:$0xf] %vm1273_vm6, %v1447_v9  ;;  %v914_v52 = vmax.f32 %v593_v41, %v905_v6 }
 0x191   :  { %v1235_v7 = vmax.f32 %v914_v52, %v1226_v45 }
 0x193   :  { %v1448_v8 = vpack.c.bf16 %v1235_v7, %v1235_v7 }
 0x195   :  { %1282 = vst.msk [vmem:[%s2461_s5 + $0x20] sm:$0xf] %vm1273_vm6, %v1448_v8 }

// kernel: model_forward.5
= control target key start
LH: loop header
LB: loop body
LE: loop exit
PB: predicated region body
PF: predicated region fallthrough
CT: control target
= control target key end

     0   :  { %v6459_v36 = vmov 1966171168   ;;  %v614_v38 = vlaneseq  ;;  %s8450_s0 = inlined_call_operand.vmem [shape: bf16[2,2304], index: 0, kind: input, shape index: {}]   ;;  %s8451_s1 = inlined_call_operand.vmem [shape: bf16[2304,512], index: 1, kind: input, shape index: {}]   ;;  %s8452_s2 = inlined_call_operand.vmem [shape: f32[1,512], index: 2, kind: input, shape index: {}]   ;;  %s8453_s3 = inlined_call_operand.vmem [shape: f32[1,512], index: 3, kind: input, shape index: {}]   ;;  %s8454_s4 = inlined_call_operand.vmem [shape: f32[1,512], index: 4, kind: input, shape index: {}]   ;;  %s8455_s5 = inlined_call_operand.vmem [shape: bf16[512,12], index: 5, kind: input, shape index: {}]   ;;  %s8456_s6 = inlined_call_operand.vmem [shape: f32[1,12], index: 6, kind: input, shape index: {}]   ;;  %s8457_s7 = inlined_call_operand.hbm [shape: f32[2,12], index: 7, kind: output, shape index: {}]  }
   0x1   :  { %v5535_v0 = vld [vmem:[%s8451_s1 + $0x4] ss:$16 sps:$4 sm:$0xff]   ;;  %v5537_v1 = vld [vmem:[%s8451_s1 + $0xc] ss:$16 sps:$4 sm:$0xff]   ;;  %v5539_v2 = vld [vmem:[%s8451_s1] ss:$16 sps:$4 sm:$0xff]   ;;  %v612_v37 = vunpack.c.l.s4 %v6459_v36 }
   0x2   :  { %3628 = vmatprep.subr.bf16.mxu0 %v5535_v0  ;;  %v5540_v3 = vld [vmem:[%s8451_s1 + $0x8] ss:$16 sps:$4 sm:$0xff]   ;;  %3997 = vmatprep.subr.bf16.mxu1 %v5537_v1  ;;  %v5541_v4 = vld [vmem:[%s8451_s1 + $0x24] ss:$16 sps:$4 sm:$0xff]   ;;  %v5543_v5 = vld [vmem:[%s8451_s1 + $0x2c] ss:$16 sps:$4 sm:$0xff]  }
   0x3   :  { %3629 = vmatpush1.bf16.msra.mxu0 %v5539_v2  ;;  %3998 = vmatpush1.bf16.msra.mxu1 %v5540_v3  ;;  %v5545_v6 = vld [vmem:[%s8451_s1 + $0x20] ss:$16 sps:$4 sm:$0xff]   ;;  %v5546_v7 = vld [vmem:[%s8451_s1 + $0x28] ss:$16 sps:$4 sm:$0xff]   ;;  %v5547_v8 = vld [vmem:[%s8451_s1 + $0x44] ss:$16 sps:$4 sm:$0xff]   ;;  %v613_v42 = vunpack.c.0.s8 %v612_v37 }
   0x4   :  { %3630 = vmatprep.subr.bf16.mxu0 %v5541_v4  ;;  %3999 = vmatprep.subr.bf16.mxu1 %v5543_v5  ;;  %v5549_v9 = vld [vmem:[%s8451_s1 + $0x4c] ss:$16 sps:$4 sm:$0xff]   ;;  %v5551_v10 = vld [vmem:[%s8451_s1 + $0x40] ss:$16 sps:$4 sm:$0xff]   ;;  %v5552_v11 = vld [vmem:[%s8451_s1 + $0x48] ss:$16 sps:$4 sm:$0xff]  }
   0x5   :  { %v5553_v12 = vld [vmem:[%s8451_s1 + $0x64] ss:$16 sps:$4 sm:$0xff]   ;;  %v5555_v13 = vld [vmem:[%s8451_s1 + $0x6c] ss:$16 sps:$4 sm:$0xff]   ;;  %v5557_v14 = vld [vmem:[%s8451_s1 + $0x60] ss:$16 sps:$4 sm:$0xff]  }
   0x6   :  { %v5558_v15 = vld [vmem:[%s8451_s1 + $0x68] ss:$16 sps:$4 sm:$0xff]   ;;  %v5559_v16 = vld [vmem:[%s8451_s1 + $0x84] ss:$16 sps:$4 sm:$0xff]   ;;  %v5561_v17 = vld [vmem:[%s8451_s1 + $0x8c] ss:$16 sps:$4 sm:$0xff]  }
   0x7   :  { %3631 = vmatpush1.bf16.msra.mxu0 %v5545_v6  ;;  %4000 = vmatpush1.bf16.msra.mxu1 %v5546_v7  ;;  %v5563_v18 = vld [vmem:[%s8451_s1 + $0x80] ss:$16 sps:$4 sm:$0xff]   ;;  %v5564_v19 = vld [vmem:[%s8451_s1 + $0x88] ss:$16 sps:$4 sm:$0xff]   ;;  %v5565_v20 = vld [vmem:[%s8451_s1 + $0xa4] ss:$16 sps:$4 sm:$0xff]  }
   0x8   :  { %3632 = vmatprep.subr.bf16.mxu0 %v5547_v8  ;;  %4001 = vmatprep.subr.bf16.mxu1 %v5549_v9  ;;  %v5567_v21 = vld [vmem:[%s8451_s1 + $0xac] ss:$16 sps:$4 sm:$0xff]   ;;  %v5569_v22 = vld [vmem:[%s8451_s1 + $0xa0] ss:$16 sps:$4 sm:$0xff]   ;;  %v5570_v23 = vld [vmem:[%s8451_s1 + $0xa8] ss:$16 sps:$4 sm:$0xff]  }
   0x9   :  { %v5571_v24 = vld [vmem:[%s8451_s1 + $0xc4] ss:$16 sps:$4 sm:$0xff]   ;;  %v5573_v25 = vld [vmem:[%s8451_s1 + $0xcc] ss:$16 sps:$4 sm:$0xff]   ;;  %v5575_v26 = vld [vmem:[%s8451_s1 + $0xc0] ss:$16 sps:$4 sm:$0xff]  }
   0xa   :  { %v5576_v27 = vld [vmem:[%s8451_s1 + $0xc8] ss:$16 sps:$4 sm:$0xff]   ;;  %v5577_v28 = vld [vmem:[%s8451_s1 + $0xe4] ss:$16 sps:$4 sm:$0xff]   ;;  %v5579_v29 = vld [vmem:[%s8451_s1 + $0xec] ss:$16 sps:$4 sm:$0xff]  }
   0xb   :  { %3633 = vmatpush1.bf16.msra.mxu0 %v5551_v10  ;;  %4002 = vmatpush1.bf16.msra.mxu1 %v5552_v11  ;;  %v5581_v30 = vld [vmem:[%s8451_s1 + $0xe0] ss:$16 sps:$4 sm:$0xff]   ;;  %v5582_v31 = vld [vmem:[%s8451_s1 + $0xe8] ss:$16 sps:$4 sm:$0xff]   ;;  %v5583_v32 = vld [vmem:[%s8451_s1 + $0x104] ss:$16 sps:$4 sm:$0xff]  }
   0xc   :  { %3634 = vmatprep.subr.bf16.mxu0 %v5553_v12  ;;  %4003 = vmatprep.subr.bf16.mxu1 %v5555_v13  ;;  %v5585_v33 = vld [vmem:[%s8451_s1 + $0x10c] ss:$16 sps:$4 sm:$0xff]   ;;  %v5587_v34 = vld [vmem:[%s8451_s1 + $0x100] ss:$16 sps:$4 sm:$0xff]   ;;  %v5588_v35 = vld [vmem:[%s8451_s1 + $0x108] ss:$16 sps:$4 sm:$0xff]  }
   0xd   :  { %v5589_v39 = vld [vmem:[%s8451_s1 + $0x124] ss:$16 sps:$4 sm:$0xff]   ;;  %v5591_v40 = vld [vmem:[%s8451_s1 + $0x12c] ss:$16 sps:$4 sm:$0xff]   ;;  %v5593_v41 = vld [vmem:[%s8451_s1 + $0x120] ss:$16 sps:$4 sm:$0xff]  }
   0xe   :  { %v6618_v43 = vshrl.u32 %v614_v38, 7  ;;  %v5594_v44 = vld [vmem:[%s8451_s1 + $0x128] ss:$16 sps:$4 sm:$0xff]   ;;  %v5595_v45 = vld [vmem:[%s8451_s1 + $0x144] ss:$16 sps:$4 sm:$0xff]  }
   0xf   :  { %3635 = vmatpush1.bf16.msra.mxu0 %v5557_v14  ;;  %4004 = vmatpush1.bf16.msra.mxu1 %v5558_v15  ;;  %v5597_v46 = vld [vmem:[%s8451_s1 + $0x14c] ss:$16 sps:$4 sm:$0xff]   ;;  %v5599_v47 = vld [vmem:[%s8451_s1 + $0x140] ss:$16 sps:$4 sm:$0xff]   ;;  %v5600_v48 = vld [vmem:[%s8451_s1 + $0x148] ss:$16 sps:$4 sm:$0xff]  }
  0x10   :  { %3636 = vmatprep.subr.bf16.mxu0 %v5559_v16  ;;  %4005 = vmatprep.subr.bf16.mxu1 %v5561_v17  ;;  %v6636_v49 = vsub.s32 %v613_v42, %v6618_v43  ;;  %v5601_v50 = vld [vmem:[%s8451_s1 + $0x164] ss:$16 sps:$4 sm:$0xff]   ;;  %v5603_v51 = vld [vmem:[%s8451_s1 + $0x16c] ss:$16 sps:$4 sm:$0xff]   ;;  %v5605_v53 = vld [vmem:[%s8451_s1 + $0x160] ss:$16 sps:$4 sm:$0xff]  }
  0x11   :  { %v6647_v52 = vld [vmem:[%s8450_s0] sm:$0xff]  ;;  %v5606_v55 = vld [vmem:[%s8451_s1 + $0x168] ss:$16 sps:$4 sm:$0xff]   ;;  %v5609_v57 = vld [vmem:[%s8451_s1 + $0x18c] ss:$16 sps:$4 sm:$0xff]  }
  0x12   :  { %v617_v54 = vrot.slane %v6647_v52, %v6636_v49  ;;  %v5607_v56 = vld [vmem:[%s8451_s1 + $0x184] ss:$16 sps:$4 sm:$0xff]   ;;  %v5611_v59 = vld [vmem:[%s8451_s1 + $0x180] ss:$16 sps:$4 sm:$0xff]   ;;  %v5612_v61 = vld [vmem:[%s8451_s1 + $0x188] ss:$16 sps:$4 sm:$0xff]  }
  0x13   :  { %3637 = vmatpush1.bf16.msra.mxu0 %v5563_v18  ;;  %4006 = vmatpush1.bf16.msra.mxu1 %v5564_v19  ;;  %v5613_v62 = vld [vmem:[%s8451_s1 + $0x1a4] ss:$16 sps:$4 sm:$0xff]   ;;  %v5615_v63 = vld [vmem:[%s8451_s1 + $0x1ac] ss:$16 sps:$4 sm:$0xff]   ;;  %v5617_v0 = vld [vmem:[%s8451_s1 + $0x1a0] ss:$16 sps:$4 sm:$0xff]  }
  0x14   :  { %3638 = vmatprep.subr.bf16.mxu0 %v5565_v20  ;;  %4007 = vmatprep.subr.bf16.mxu1 %v5567_v21  ;;  %v625_v58 = vcombine.high %v617_v54, %v617_v54  ;;  %v5618_v1 = vld [vmem:[%s8451_s1 + $0x1a8] ss:$16 sps:$4 sm:$0xff]   ;;  %v5619_v2 = vld [vmem:[%s8451_s1 + $0x1c4] ss:$16 sps:$4 sm:$0xff]   ;;  %v5621_v3 = vld [vmem:[%s8451_s1 + $0x1cc] ss:$16 sps:$4 sm:$0xff]   ;;  %v6716_v13 = vrot.slane %v617_v54, %v6636_v49 }
  0x15   :  { %v5623_v4 = vld [vmem:[%s8451_s1 + $0x1c0] ss:$16 sps:$4 sm:$0xff]   ;;  %v5624_v5 = vld [vmem:[%s8451_s1 + $0x1c8] ss:$16 sps:$4 sm:$0xff]   ;;  %v5625_v6 = vld [vmem:[%s8451_s1 + $0x1e4] ss:$16 sps:$4 sm:$0xff]  }
  0x16   :  { %v647_v60 = vrot.slane %v625_v58, %v6636_v49  ;;  %v5627_v7 = vld [vmem:[%s8451_s1 + $0x1ec] ss:$16 sps:$4 sm:$0xff]   ;;  %v5629_v8 = vld [vmem:[%s8451_s1 + $0x1e0] ss:$16 sps:$4 sm:$0xff]   ;;  %v5630_v9 = vld [vmem:[%s8451_s1 + $0x1e8] ss:$16 sps:$4 sm:$0xff]  }
  0x17   :  { %3639 = vmatpush1.bf16.msra.mxu0 %v5569_v22  ;;  %4008 = vmatpush1.bf16.msra.mxu1 %v5570_v23  ;;  %v5633_v10 = vld [vmem:[%s8451_s1 + $0x204] ss:$16 sps:$4 sm:$0xff]   ;;  %v5636_v11 = vld [vmem:[%s8451_s1 + $0x20c] ss:$16 sps:$4 sm:$0xff]   ;;  %v5631_v12 = vld [vmem:[%s8451_s1 + $0x200] ss:$16 sps:$4 sm:$0xff]  }
  0x18   :  { %3640 = vmatprep.subr.bf16.mxu0 %v5571_v24  ;;  %4009 = vmatprep.subr.bf16.mxu1 %v5573_v25  ;;  %v5634_v14 = vld [vmem:[%s8451_s1 + $0x208] ss:$16 sps:$4 sm:$0xff]   ;;  %v5639_v15 = vld [vmem:[%s8451_s1 + $0x224] ss:$16 sps:$4 sm:$0xff]   ;;  %v5642_v16 = vld [vmem:[%s8451_s1 + $0x22c] ss:$16 sps:$4 sm:$0xff]   ;;  %v657_v17 = vcombine.high %v647_v60, %v647_v60 }
  0x19   :  { %3660 = vmatprep.mubr.bf16.mxu0 %v647_v60  ;;  %4029 = vmatprep.mubr.bf16.mxu1 %v647_v60  ;;  %v5637_v18 = vld [vmem:[%s8451_s1 + $0x220] ss:$16 sps:$4 sm:$0xff]   ;;  %v5640_v19 = vld [vmem:[%s8451_s1 + $0x228] ss:$16 sps:$4 sm:$0xff]   ;;  %v5645_v20 = vld [vmem:[%s8451_s1 + $0x244] ss:$16 sps:$4 sm:$0xff]  }
  0x1a   :  { %v5648_v21 = vld [vmem:[%s8451_s1 + $0x24c] ss:$16 sps:$4 sm:$0xff]   ;;  %v5643_v22 = vld [vmem:[%s8451_s1 + $0x240] ss:$16 sps:$4 sm:$0xff]   ;;  %v5646_v23 = vld [vmem:[%s8451_s1 + $0x248] ss:$16 sps:$4 sm:$0xff]  }
  0x1b   :  { %3641 = vmatpush1.bf16.msra.mxu0 %v5575_v26  ;;  %4010 = vmatpush1.bf16.msra.mxu1 %v5576_v27  ;;  %v5651_v24 = vld [vmem:[%s8451_s1 + $0x264] ss:$16 sps:$4 sm:$0xff]   ;;  %v5654_v25 = vld [vmem:[%s8451_s1 + $0x26c] ss:$16 sps:$4 sm:$0xff]   ;;  %v5649_v26 = vld [vmem:[%s8451_s1 + $0x260] ss:$16 sps:$4 sm:$0xff]  }
  0x1c   :  { %3642 = vmatprep.subr.bf16.mxu0 %v5577_v28  ;;  %4011 = vmatprep.subr.bf16.mxu1 %v5579_v29  ;;  %v5652_v27 = vld [vmem:[%s8451_s1 + $0x268] ss:$16 sps:$4 sm:$0xff]   ;;  %v5657_v28 = vld [vmem:[%s8451_s1 + $0x284] ss:$16 sps:$4 sm:$0xff]   ;;  %v5660_v29 = vld [vmem:[%s8451_s1 + $0x28c] ss:$16 sps:$4 sm:$0xff]  }
  0x1d   :  { %v5669_v36 = vld [vmem:[%s8451_s1 + $0x2c4] ss:$16 sps:$4 sm:$0xff]   ;;  %v5672_v37 = vld [vmem:[%s8451_s1 + $0x2cc] ss:$16 sps:$4 sm:$0xff]   ;;  %v5667_v38 = vld [vmem:[%s8451_s1 + $0x2c0] ss:$16 sps:$4 sm:$0xff]  }
  0x1e   :  { %v5673_v42 = vld [vmem:[%s8451_s1 + $0x2e0] ss:$16 sps:$4 sm:$0xff]   ;;  %v5688_v54 = vld [vmem:[%s8451_s1 + $0x328] ss:$16 sps:$4 sm:$0xff]   ;;  %v5702_v60 = vld [vmem:[%s8451_s1 + $0x36c] ss:$16 sps:$4 sm:$0xff]  }
  0x1f   :  { %3643 = vmatpush1.bf16.msra.mxu0 %v5581_v30  ;;  %4012 = vmatpush1.bf16.msra.mxu1 %v5582_v31  ;;  %v5655_v30 = vld [vmem:[%s8451_s1 + $0x280] ss:$16 sps:$4 sm:$0xff]   ;;  %v5658_v31 = vld [vmem:[%s8451_s1 + $0x288] ss:$16 sps:$4 sm:$0xff]  }
  0x20   :  { %3644 = vmatprep.subr.bf16.mxu0 %v5583_v32  ;;  %4013 = vmatprep.subr.bf16.mxu1 %v5585_v33  ;;  %v5663_v32 = vld [vmem:[%s8451_s1 + $0x2a4] ss:$16 sps:$4 sm:$0xff]   ;;  %v5666_v33 = vld [vmem:[%s8451_s1 + $0x2ac] ss:$16 sps:$4 sm:$0xff]   ;;  %v5694_v58 = vld [vmem:[%s8451_s1 + $0x348] ss:$16 sps:$4 sm:$0xff]  }
  0x23   :  { %3645 = vmatpush1.bf16.msra.mxu0 %v5587_v34  ;;  %4014 = vmatpush1.bf16.msra.mxu1 %v5588_v35  ;;  %v5661_v34 = vld [vmem:[%s8451_s1 + $0x2a0] ss:$16 sps:$4 sm:$0xff]   ;;  %v5664_v35 = vld [vmem:[%s8451_s1 + $0x2a8] ss:$16 sps:$4 sm:$0xff]  }
  0x24   :  { %3646 = vmatprep.subr.bf16.mxu0 %v5589_v39  ;;  %4015 = vmatprep.subr.bf16.mxu1 %v5591_v40  ;;  %v5670_v39 = vld [vmem:[%s8451_s1 + $0x2c8] ss:$16 sps:$4 sm:$0xff]   ;;  %v5675_v40 = vld [vmem:[%s8451_s1 + $0x2e4] ss:$16 sps:$4 sm:$0xff]  }
  0x27   :  { %3647 = vmatpush1.bf16.msra.mxu0 %v5593_v41  ;;  %4016 = vmatpush1.bf16.msra.mxu1 %v5594_v44  ;;  %v5678_v41 = vld [vmem:[%s8451_s1 + $0x2ec] ss:$16 sps:$4 sm:$0xff]   ;;  %v5676_v44 = vld [vmem:[%s8451_s1 + $0x2e8] ss:$16 sps:$4 sm:$0xff]  }
  0x28   :  { %3648 = vmatprep.subr.bf16.mxu0 %v5595_v45  ;;  %4017 = vmatprep.subr.bf16.mxu1 %v5597_v46  ;;  %v5681_v45 = vld [vmem:[%s8451_s1 + $0x304] ss:$16 sps:$4 sm:$0xff]   ;;  %v5684_v46 = vld [vmem:[%s8451_s1 + $0x30c] ss:$16 sps:$4 sm:$0xff]  }
  0x2b   :  { %3649 = vmatpush1.bf16.msra.mxu0 %v5599_v47  ;;  %4018 = vmatpush1.bf16.msra.mxu1 %v5600_v48  ;;  %v5679_v47 = vld [vmem:[%s8451_s1 + $0x300] ss:$16 sps:$4 sm:$0xff]   ;;  %v5682_v48 = vld [vmem:[%s8451_s1 + $0x308] ss:$16 sps:$4 sm:$0xff]  }
  0x2c   :  { %3650 = vmatprep.subr.bf16.mxu0 %v5601_v50  ;;  %4019 = vmatprep.subr.bf16.mxu1 %v5603_v51  ;;  %v5687_v50 = vld [vmem:[%s8451_s1 + $0x324] ss:$16 sps:$4 sm:$0xff]   ;;  %v5690_v51 = vld [vmem:[%s8451_s1 + $0x32c] ss:$16 sps:$4 sm:$0xff]  }
  0x2f   :  { %3651 = vmatpush1.bf16.msra.mxu0 %v5605_v53  ;;  %4020 = vmatpush1.bf16.msra.mxu1 %v5606_v55  ;;  %v5685_v53 = vld [vmem:[%s8451_s1 + $0x320] ss:$16 sps:$4 sm:$0xff]   ;;  %v5693_v55 = vld [vmem:[%s8451_s1 + $0x344] ss:$16 sps:$4 sm:$0xff]  }
  0x30   :  { %3652 = vmatprep.subr.bf16.mxu0 %v5607_v56  ;;  %4021 = vmatprep.subr.bf16.mxu1 %v5609_v57  ;;  %v5696_v56 = vld [vmem:[%s8451_s1 + $0x34c] ss:$16 sps:$4 sm:$0xff]   ;;  %v5691_v57 = vld [vmem:[%s8451_s1 + $0x340] ss:$16 sps:$4 sm:$0xff]  }
  0x33   :  { %3653 = vmatpush1.bf16.msra.mxu0 %v5611_v59  ;;  %4022 = vmatpush1.bf16.msra.mxu1 %v5612_v61  ;;  %v5699_v59 = vld [vmem:[%s8451_s1 + $0x364] ss:$16 sps:$4 sm:$0xff]   ;;  %v5697_v61 = vld [vmem:[%s8451_s1 + $0x360] ss:$16 sps:$4 sm:$0xff]  }
  0x34   :  { %3654 = vmatprep.subr.bf16.mxu0 %v5613_v62  ;;  %4023 = vmatprep.subr.bf16.mxu1 %v5615_v63  ;;  %v5700_v62 = vld [vmem:[%s8451_s1 + $0x368] ss:$16 sps:$4 sm:$0xff]   ;;  %v5705_v63 = vld [vmem:[%s8451_s1 + $0x384] ss:$16 sps:$4 sm:$0xff]  }
  0x37   :  { %3655 = vmatpush1.bf16.msra.mxu0 %v5617_v0  ;;  %4024 = vmatpush1.bf16.msra.mxu1 %v5618_v1  ;;  %v5708_v0 = vld [vmem:[%s8451_s1 + $0x38c] ss:$16 sps:$4 sm:$0xff]   ;;  %v5703_v1 = vld [vmem:[%s8451_s1 + $0x380] ss:$16 sps:$4 sm:$0xff]  }
  0x38   :  { %3656 = vmatprep.subr.bf16.mxu0 %v5619_v2  ;;  %4025 = vmatprep.subr.bf16.mxu1 %v5621_v3  ;;  %v5706_v2 = vld [vmem:[%s8451_s1 + $0x388] ss:$16 sps:$4 sm:$0xff]   ;;  %v5711_v3 = vld [vmem:[%s8451_s1 + $0x3a4] ss:$16 sps:$4 sm:$0xff]  }
  0x3b   :  { %3657 = vmatpush1.bf16.msra.mxu0 %v5623_v4  ;;  %4026 = vmatpush1.bf16.msra.mxu1 %v5624_v5  ;;  %v5714_v4 = vld [vmem:[%s8451_s1 + $0x3ac] ss:$16 sps:$4 sm:$0xff]   ;;  %v5709_v5 = vld [vmem:[%s8451_s1 + $0x3a0] ss:$16 sps:$4 sm:$0xff]  }
  0x3c   :  { %3658 = vmatprep.subr.bf16.mxu0 %v5625_v6  ;;  %4027 = vmatprep.subr.bf16.mxu1 %v5627_v7  ;;  %v5712_v6 = vld [vmem:[%s8451_s1 + $0x3a8] ss:$16 sps:$4 sm:$0xff]   ;;  %v5717_v7 = vld [vmem:[%s8451_s1 + $0x3c4] ss:$16 sps:$4 sm:$0xff]  }
  0x3f   :  { %3659 = vmatpush1.bf16.msra.mxu0 %v5629_v8  ;;  %4028 = vmatpush1.bf16.msra.mxu1 %v5630_v9  ;;  %v5720_v8 = vld [vmem:[%s8451_s1 + $0x3cc] ss:$16 sps:$4 sm:$0xff]   ;;  %v610_v9 = vcombine.high %v6647_v52, %v6647_v52 }
  0x40   :  { %3669 = vmatprep.subr.bf16.mxu0 %v5633_v10  ;;  %4038 = vmatprep.subr.bf16.mxu1 %v5636_v11  ;;  %v5715_v10 = vld [vmem:[%s8451_s1 + $0x3c0] ss:$16 sps:$4 sm:$0xff]   ;;  %v5718_v11 = vld [vmem:[%s8451_s1 + $0x3c8] ss:$16 sps:$4 sm:$0xff]   ;;  %v5726_v52 = vld [vmem:[%s8451_s1 + $0x3ec] ss:$16 sps:$4 sm:$0xff]  }
  0x42   :  { %3661 = vmatmul.mubr.bf16.vlgmr.msra.gmra.mrb[0].mxu0 %v6716_v13  ;;  %4030 = vmatmul.mubr.bf16.vlgmr.msra.gmra.mrb[0].mxu1 %v6716_v13 }
  0x43   :  { %3670 = vmatpush1.bf16.msra.mxu0 %v5631_v12  ;;  %4039 = vmatpush1.bf16.msra.mxu1 %v5634_v14  ;;  %v5723_v12 = vld [vmem:[%s8451_s1 + $0x3e4] ss:$16 sps:$4 sm:$0xff]   ;;  %v6900_v14 = vrot.slane %v610_v9, %v6636_v49  ;;  %v5802_v9 = vld [vmem:[%s8451_s1 + $0x588] ss:$16 sps:$4 sm:$0xff]  }
  0x44   :  { %3671 = vmatprep.subr.bf16.mxu0 %v5639_v15  ;;  %4040 = vmatprep.subr.bf16.mxu1 %v5642_v16  ;;  %v5721_v15 = vld [vmem:[%s8451_s1 + $0x3e0] ss:$16 sps:$4 sm:$0xff]   ;;  %v5724_v16 = vld [vmem:[%s8451_s1 + $0x3e8] ss:$16 sps:$4 sm:$0xff]  }
  0x45   :  { %3701 = vmatprep.mubr.bf16.mxu0 %v657_v17  ;;  %4070 = vmatprep.mubr.bf16.mxu1 %v657_v17  ;;  %v5729_v17 = vld [vmem:[%s8451_s1 + $0x404] ss:$16 sps:$4 sm:$0xff]  }
  0x47   :  { %3672 = vmatpush1.bf16.msra.mxu0 %v5637_v18  ;;  %4041 = vmatpush1.bf16.msra.mxu1 %v5640_v19  ;;  %v5732_v18 = vld [vmem:[%s8451_s1 + $0x40c] ss:$16 sps:$4 sm:$0xff]   ;;  %v626_v19 = vcombine.high %v6900_v14, %v6900_v14 }
  0x48   :  { %3673 = vmatprep.subr.bf16.mxu0 %v5645_v20  ;;  %4042 = vmatprep.subr.bf16.mxu1 %v5648_v21  ;;  %v5727_v20 = vld [vmem:[%s8451_s1 + $0x400] ss:$16 sps:$4 sm:$0xff]   ;;  %v655_v21 = vcombine.high %v6716_v13, %v6716_v13 }
  0x49   :  { %v5733_v13 = vld [vmem:[%s8451_s1 + $0x420] ss:$16 sps:$4 sm:$0xff]  }
  0x4b   :  { %3674 = vmatpush1.bf16.msra.mxu0 %v5643_v22  ;;  %4043 = vmatpush1.bf16.msra.mxu1 %v5646_v23  ;;  %v5730_v22 = vld [vmem:[%s8451_s1 + $0x408] ss:$16 sps:$4 sm:$0xff]   ;;  %v5735_v23 = vld [vmem:[%s8451_s1 + $0x424] ss:$16 sps:$4 sm:$0xff]  }
  0x4c   :  { %3675 = vmatprep.subr.bf16.mxu0 %v5651_v24  ;;  %4044 = vmatprep.subr.bf16.mxu1 %v5654_v25  ;;  %v5738_v24 = vld [vmem:[%s8451_s1 + $0x42c] ss:$16 sps:$4 sm:$0xff]   ;;  %v6931_v25 = vrot.slane %v626_v19, %v6636_v49  ;;  %v5819_v19 = vld [vmem:[%s8451_s1 + $0x5e4] ss:$16 sps:$4 sm:$0xff]  }
  0x4f   :  { %3676 = vmatpush1.bf16.msra.mxu0 %v5649_v26  ;;  %4045 = vmatpush1.bf16.msra.mxu1 %v5652_v27  ;;  %v5736_v26 = vld [vmem:[%s8451_s1 + $0x428] ss:$16 sps:$4 sm:$0xff]   ;;  %v5741_v27 = vld [vmem:[%s8451_s1 + $0x444] ss:$16 sps:$4 sm:$0xff]  }
  0x50   :  { %3677 = vmatprep.subr.bf16.mxu0 %v5657_v28  ;;  %4046 = vmatprep.subr.bf16.mxu1 %v5660_v29  ;;  %v5744_v28 = vld [vmem:[%s8451_s1 + $0x44c] ss:$16 sps:$4 sm:$0xff]   ;;  %v5739_v29 = vld [vmem:[%s8451_s1 + $0x440] ss:$16 sps:$4 sm:$0xff]  }
  0x53   :  { %3678 = vmatpush1.bf16.msra.mxu0 %v5655_v30  ;;  %4047 = vmatpush1.bf16.msra.mxu1 %v5658_v31  ;;  %v5742_v30 = vld [vmem:[%s8451_s1 + $0x448] ss:$16 sps:$4 sm:$0xff]   ;;  %v5747_v31 = vld [vmem:[%s8451_s1 + $0x464] ss:$16 sps:$4 sm:$0xff]  }
  0x54   :  { %3679 = vmatprep.subr.bf16.mxu0 %v5663_v32  ;;  %4048 = vmatprep.subr.bf16.mxu1 %v5666_v33  ;;  %v5750_v32 = vld [vmem:[%s8451_s1 + $0x46c] ss:$16 sps:$4 sm:$0xff]   ;;  %v5745_v33 = vld [vmem:[%s8451_s1 + $0x460] ss:$16 sps:$4 sm:$0xff]  }
  0x57   :  { %3680 = vmatpush1.bf16.msra.mxu0 %v5661_v34  ;;  %4049 = vmatpush1.bf16.msra.mxu1 %v5664_v35  ;;  %v5748_v34 = vld [vmem:[%s8451_s1 + $0x468] ss:$16 sps:$4 sm:$0xff]   ;;  %v5753_v35 = vld [vmem:[%s8451_s1 + $0x484] ss:$16 sps:$4 sm:$0xff]  }
  0x58   :  { %3681 = vmatprep.subr.bf16.mxu0 %v5669_v36  ;;  %4050 = vmatprep.subr.bf16.mxu1 %v5672_v37  ;;  %v5756_v36 = vld [vmem:[%s8451_s1 + $0x48c] ss:$16 sps:$4 sm:$0xff]   ;;  %v5751_v37 = vld [vmem:[%s8451_s1 + $0x480] ss:$16 sps:$4 sm:$0xff]  }
  0x5b   :  { %3682 = vmatpush1.bf16.msra.mxu0 %v5667_v38  ;;  %4051 = vmatpush1.bf16.msra.mxu1 %v5670_v39  ;;  %v5754_v38 = vld [vmem:[%s8451_s1 + $0x488] ss:$16 sps:$4 sm:$0xff]   ;;  %v5759_v39 = vld [vmem:[%s8451_s1 + $0x4a4] ss:$16 sps:$4 sm:$0xff]  }
  0x5c   :  { %3683 = vmatprep.subr.bf16.mxu0 %v5675_v40  ;;  %4052 = vmatprep.subr.bf16.mxu1 %v5678_v41  ;;  %v5762_v40 = vld [vmem:[%s8451_s1 + $0x4ac] ss:$16 sps:$4 sm:$0xff]   ;;  %v5757_v41 = vld [vmem:[%s8451_s1 + $0x4a0] ss:$16 sps:$4 sm:$0xff]  }
  0x5f   :  { %3684 = vmatpush1.bf16.msra.mxu0 %v5673_v42  ;;  %4053 = vmatpush1.bf16.msra.mxu1 %v5676_v44  ;;  %v5760_v42 = vld [vmem:[%s8451_s1 + $0x4a8] ss:$16 sps:$4 sm:$0xff]   ;;  %v5765_v44 = vld [vmem:[%s8451_s1 + $0x4c4] ss:$16 sps:$4 sm:$0xff]  }
  0x60   :  { %3685 = vmatprep.subr.bf16.mxu0 %v5681_v45  ;;  %4054 = vmatprep.subr.bf16.mxu1 %v5684_v46  ;;  %v5768_v45 = vld [vmem:[%s8451_s1 + $0x4cc] ss:$16 sps:$4 sm:$0xff]   ;;  %v5763_v46 = vld [vmem:[%s8451_s1 + $0x4c0] ss:$16 sps:$4 sm:$0xff]  }
  0x63   :  { %3686 = vmatpush1.bf16.msra.mxu0 %v5679_v47  ;;  %4055 = vmatpush1.bf16.msra.mxu1 %v5682_v48  ;;  %v5766_v47 = vld [vmem:[%s8451_s1 + $0x4c8] ss:$16 sps:$4 sm:$0xff]   ;;  %v5771_v48 = vld [vmem:[%s8451_s1 + $0x4e4] ss:$16 sps:$4 sm:$0xff]  }
  0x64   :  { %3687 = vmatprep.subr.bf16.mxu0 %v5687_v50  ;;  %4056 = vmatprep.subr.bf16.mxu1 %v5690_v51  ;;  %v5774_v50 = vld [vmem:[%s8451_s1 + $0x4ec] ss:$16 sps:$4 sm:$0xff]   ;;  %v5769_v51 = vld [vmem:[%s8451_s1 + $0x4e0] ss:$16 sps:$4 sm:$0xff]  }
  0x67   :  { %3688 = vmatpush1.bf16.msra.mxu0 %v5685_v53  ;;  %4057 = vmatpush1.bf16.msra.mxu1 %v5688_v54  ;;  %v5772_v53 = vld [vmem:[%s8451_s1 + $0x4e8] ss:$16 sps:$4 sm:$0xff]   ;;  %v5777_v54 = vld [vmem:[%s8451_s1 + $0x504] ss:$16 sps:$4 sm:$0xff]  }
  0x68   :  { %3689 = vmatprep.subr.bf16.mxu0 %v5693_v55  ;;  %4058 = vmatprep.subr.bf16.mxu1 %v5696_v56  ;;  %v5780_v55 = vld [vmem:[%s8451_s1 + $0x50c] ss:$16 sps:$4 sm:$0xff]   ;;  %v5775_v56 = vld [vmem:[%s8451_s1 + $0x500] ss:$16 sps:$4 sm:$0xff]  }
  0x6b   :  { %3690 = vmatpush1.bf16.msra.mxu0 %v5691_v57  ;;  %4059 = vmatpush1.bf16.msra.mxu1 %v5694_v58  ;;  %v5778_v57 = vld [vmem:[%s8451_s1 + $0x508] ss:$16 sps:$4 sm:$0xff]   ;;  %v5783_v58 = vld [vmem:[%s8451_s1 + $0x524] ss:$16 sps:$4 sm:$0xff]  }
  0x6c   :  { %3691 = vmatprep.subr.bf16.mxu0 %v5699_v59  ;;  %4060 = vmatprep.subr.bf16.mxu1 %v5702_v60  ;;  %v5786_v59 = vld [vmem:[%s8451_s1 + $0x52c] ss:$16 sps:$4 sm:$0xff]   ;;  %v5781_v60 = vld [vmem:[%s8451_s1 + $0x520] ss:$16 sps:$4 sm:$0xff]  }
  0x6f   :  { %3692 = vmatpush1.bf16.msra.mxu0 %v5697_v61  ;;  %4061 = vmatpush1.bf16.msra.mxu1 %v5700_v62  ;;  %v5784_v61 = vld [vmem:[%s8451_s1 + $0x528] ss:$16 sps:$4 sm:$0xff]   ;;  %v5789_v62 = vld [vmem:[%s8451_s1 + $0x544] ss:$16 sps:$4 sm:$0xff]  }
  0x70   :  { %3693 = vmatprep.subr.bf16.mxu0 %v5705_v63  ;;  %4062 = vmatprep.subr.bf16.mxu1 %v5708_v0  ;;  %v5792_v63 = vld [vmem:[%s8451_s1 + $0x54c] ss:$16 sps:$4 sm:$0xff]   ;;  %v5787_v0 = vld [vmem:[%s8451_s1 + $0x540] ss:$16 sps:$4 sm:$0xff]  }
  0x73   :  { %3694 = vmatpush1.bf16.msra.mxu0 %v5703_v1  ;;  %4063 = vmatpush1.bf16.msra.mxu1 %v5706_v2  ;;  %v5790_v1 = vld [vmem:[%s8451_s1 + $0x548] ss:$16 sps:$4 sm:$0xff]   ;;  %v5795_v2 = vld [vmem:[%s8451_s1 + $0x564] ss:$16 sps:$4 sm:$0xff]  }
  0x74   :  { %3695 = vmatprep.subr.bf16.mxu0 %v5711_v3  ;;  %4064 = vmatprep.subr.bf16.mxu1 %v5714_v4  ;;  %v5798_v3 = vld [vmem:[%s8451_s1 + $0x56c] ss:$16 sps:$4 sm:$0xff]   ;;  %v5793_v4 = vld [vmem:[%s8451_s1 + $0x560] ss:$16 sps:$4 sm:$0xff]  }
  0x77   :  { %3696 = vmatpush1.bf16.msra.mxu0 %v5709_v5  ;;  %4065 = vmatpush1.bf16.msra.mxu1 %v5712_v6  ;;  %v5796_v5 = vld [vmem:[%s8451_s1 + $0x568] ss:$16 sps:$4 sm:$0xff]   ;;  %v5801_v6 = vld [vmem:[%s8451_s1 + $0x584] ss:$16 sps:$4 sm:$0xff]  }
  0x78   :  { %3697 = vmatprep.subr.bf16.mxu0 %v5717_v7  ;;  %4066 = vmatprep.subr.bf16.mxu1 %v5720_v8  ;;  %v5804_v7 = vld [vmem:[%s8451_s1 + $0x58c] ss:$16 sps:$4 sm:$0xff]   ;;  %v5799_v8 = vld [vmem:[%s8451_s1 + $0x580] ss:$16 sps:$4 sm:$0xff]  }
  0x7b   :  { %3698 = vmatpush1.bf16.msra.mxu0 %v5715_v10  ;;  %4067 = vmatpush1.bf16.msra.mxu1 %v5718_v11  ;;  %v5807_v10 = vld [vmem:[%s8451_s1 + $0x5a4] ss:$16 sps:$4 sm:$0xff]   ;;  %v5810_v11 = vld [vmem:[%s8451_s1 + $0x5ac] ss:$16 sps:$4 sm:$0xff]  }
  0x7c   :  { %3699 = vmatprep.subr.bf16.mxu0 %v5723_v12  ;;  %4068 = vmatprep.subr.bf16.mxu1 %v5726_v52  ;;  %v5805_v12 = vld [vmem:[%s8451_s1 + $0x5a0] ss:$16 sps:$4 sm:$0xff]   ;;  %v5808_v52 = vld [vmem:[%s8451_s1 + $0x5a8] ss:$16 sps:$4 sm:$0xff]  }
  0x7f   :  { %3700 = vmatpush1.bf16.msra.mxu0 %v5721_v15  ;;  %4069 = vmatpush1.bf16.msra.mxu1 %v5724_v16  ;;  %v5813_v15 = vld [vmem:[%s8451_s1 + $0x5c4] ss:$16 sps:$4 sm:$0xff]   ;;  %v5816_v16 = vld [vmem:[%s8451_s1 + $0x5cc] ss:$16 sps:$4 sm:$0xff]  }
  0x80   :  { %3710 = vmatprep.subr.bf16.mxu0 %v5729_v17  ;;  %4079 = vmatprep.subr.bf16.mxu1 %v5732_v18  ;;  %v5811_v17 = vld [vmem:[%s8451_s1 + $0x5c0] ss:$16 sps:$4 sm:$0xff]   ;;  %v5814_v18 = vld [vmem:[%s8451_s1 + $0x5c8] ss:$16 sps:$4 sm:$0xff]  }
  0x82   :  { %3702 = vmatmul.mubr.bf16.vlgmr.msra.gmra.mrb[0].mxu0 %v655_v21  ;;  %4071 = vmatmul.mubr.bf16.vlgmr.msra.gmra.mrb[0].mxu1 %v655_v21  ;;  %v5817_v21 = vld [vmem:[%s8451_s1 + $0x5e0] ss:$16 sps:$4 sm:$0xff]  }
  0x83   :  { %3711 = vmatpush1.bf16.msra.mxu0 %v5727_v20  ;;  %4080 = vmatpush1.bf16.msra.mxu1 %v5730_v22  ;;  %v5822_v20 = vld [vmem:[%s8451_s1 + $0x5ec] ss:$16 sps:$4 sm:$0xff]   ;;  %v5820_v22 = vld [vmem:[%s8451_s1 + $0x5e8] ss:$16 sps:$4 sm:$0xff]  }
  0x84   :  { %3712 = vmatprep.subr.bf16.mxu0 %v5735_v23  ;;  %4081 = vmatprep.subr.bf16.mxu1 %v5738_v24  ;;  %v5826_v23 = vld [vmem:[%s8451_s1 + $0x604] ss:$16 sps:$4 sm:$0xff]   ;;  %v5829_v24 = vld [vmem:[%s8451_s1 + $0x60c] ss:$16 sps:$4 sm:$0xff]  }
  0x85   :  { %3742 = vmatprep.mubr.bf16.mxu0 %v6931_v25  ;;  %4111 = vmatprep.mubr.bf16.mxu1 %v6931_v25 }
  0x87   :  { %3713 = vmatpush1.bf16.msra.mxu0 %v5733_v13  ;;  %4082 = vmatpush1.bf16.msra.mxu1 %v5736_v26  ;;  %v5824_v13 = vld [vmem:[%s8451_s1 + $0x600] ss:$16 sps:$4 sm:$0xff]   ;;  %v7120_v26 = vrot.slane %v6900_v14, %v6636_v49  ;;  %v658_v14 = vcombine.high %v6931_v25, %v6931_v25  ;;  %v5838_v25 = vld [vmem:[%s8451_s1 + $0x644] ss:$16 sps:$4 sm:$0xff]  }
  0x88   :  { %3714 = vmatprep.subr.bf16.mxu0 %v5741_v27  ;;  %4083 = vmatprep.subr.bf16.mxu1 %v5744_v28  ;;  %v5827_v27 = vld [vmem:[%s8451_s1 + $0x608] ss:$16 sps:$4 sm:$0xff]   ;;  %v5832_v28 = vld [vmem:[%s8451_s1 + $0x624] ss:$16 sps:$4 sm:$0xff]  }
  0x8b   :  { %3715 = vmatpush1.bf16.msra.mxu0 %v5739_v29  ;;  %4084 = vmatpush1.bf16.msra.mxu1 %v5742_v30  ;;  %v5835_v29 = vld [vmem:[%s8451_s1 + $0x62c] ss:$16 sps:$4 sm:$0xff]   ;;  %v5830_v30 = vld [vmem:[%s8451_s1 + $0x620] ss:$16 sps:$4 sm:$0xff]  }
  0x8c   :  { %3716 = vmatprep.subr.bf16.mxu0 %v5747_v31  ;;  %4085 = vmatprep.subr.bf16.mxu1 %v5750_v32  ;;  %v5833_v31 = vld [vmem:[%s8451_s1 + $0x628] ss:$16 sps:$4 sm:$0xff]   ;;  %v5841_v32 = vld [vmem:[%s8451_s1 + $0x64c] ss:$16 sps:$4 sm:$0xff]  }
  0x8f   :  { %3717 = vmatpush1.bf16.msra.mxu0 %v5745_v33  ;;  %4086 = vmatpush1.bf16.msra.mxu1 %v5748_v34  ;;  %v5836_v33 = vld [vmem:[%s8451_s1 + $0x640] ss:$16 sps:$4 sm:$0xff]   ;;  %v5839_v34 = vld [vmem:[%s8451_s1 + $0x648] ss:$16 sps:$4 sm:$0xff]  }
  0x90   :  { %3718 = vmatprep.subr.bf16.mxu0 %v5753_v35  ;;  %4087 = vmatprep.subr.bf16.mxu1 %v5756_v36  ;;  %v5844_v35 = vld [vmem:[%s8451_s1 + $0x664] ss:$16 sps:$4 sm:$0xff]   ;;  %v5847_v36 = vld [vmem:[%s8451_s1 + $0x66c] ss:$16 sps:$4 sm:$0xff]  }
  0x93   :  { %3719 = vmatpush1.bf16.msra.mxu0 %v5751_v37  ;;  %4088 = vmatpush1.bf16.msra.mxu1 %v5754_v38  ;;  %v5842_v37 = vld [vmem:[%s8451_s1 + $0x660] ss:$16 sps:$4 sm:$0xff]   ;;  %v5845_v38 = vld [vmem:[%s8451_s1 + $0x668] ss:$16 sps:$4 sm:$0xff]  }
  0x94   :  { %3720 = vmatprep.subr.bf16.mxu0 %v5759_v39  ;;  %4089 = vmatprep.subr.bf16.mxu1 %v5762_v40  ;;  %v5850_v39 = vld [vmem:[%s8451_s1 + $0x684] ss:$16 sps:$4 sm:$0xff]   ;;  %v5853_v40 = vld [vmem:[%s8451_s1 + $0x68c] ss:$16 sps:$4 sm:$0xff]  }
  0x97   :  { %3721 = vmatpush1.bf16.msra.mxu0 %v5757_v41  ;;  %4090 = vmatpush1.bf16.msra.mxu1 %v5760_v42  ;;  %v5848_v41 = vld [vmem:[%s8451_s1 + $0x680] ss:$16 sps:$4 sm:$0xff]   ;;  %v5851_v42 = vld [vmem:[%s8451_s1 + $0x688] ss:$16 sps:$4 sm:$0xff]  }
  0x98   :  { %3722 = vmatprep.subr.bf16.mxu0 %v5765_v44  ;;  %4091 = vmatprep.subr.bf16.mxu1 %v5768_v45  ;;  %v5856_v44 = vld [vmem:[%s8451_s1 + $0x6a4] ss:$16 sps:$4 sm:$0xff]   ;;  %v5859_v45 = vld [vmem:[%s8451_s1 + $0x6ac] ss:$16 sps:$4 sm:$0xff]  }
  0x9b   :  { %3723 = vmatpush1.bf16.msra.mxu0 %v5763_v46  ;;  %4092 = vmatpush1.bf16.msra.mxu1 %v5766_v47  ;;  %v5854_v46 = vld [vmem:[%s8451_s1 + $0x6a0] ss:$16 sps:$4 sm:$0xff]   ;;  %v5857_v47 = vld [vmem:[%s8451_s1 + $0x6a8] ss:$16 sps:$4 sm:$0xff]  }
  0x9c   :  { %3724 = vmatprep.subr.bf16.mxu0 %v5771_v48  ;;  %4093 = vmatprep.subr.bf16.mxu1 %v5774_v50  ;;  %v5862_v48 = vld [vmem:[%s8451_s1 + $0x6c4] ss:$16 sps:$4 sm:$0xff]   ;;  %v5865_v50 = vld [vmem:[%s8451_s1 + $0x6cc] ss:$16 sps:$4 sm:$0xff]  }
  0x9f   :  { %3725 = vmatpush1.bf16.msra.mxu0 %v5769_v51  ;;  %4094 = vmatpush1.bf16.msra.mxu1 %v5772_v53  ;;  %v5860_v51 = vld [vmem:[%s8451_s1 + $0x6c0] ss:$16 sps:$4 sm:$0xff]   ;;  %v5863_v53 = vld [vmem:[%s8451_s1 + $0x6c8] ss:$16 sps:$4 sm:$0xff]  }
  0xa0   :  { %3726 = vmatprep.subr.bf16.mxu0 %v5777_v54  ;;  %4095 = vmatprep.subr.bf16.mxu1 %v5780_v55  ;;  %v5868_v54 = vld [vmem:[%s8451_s1 + $0x6e4] ss:$16 sps:$4 sm:$0xff]   ;;  %v5871_v55 = vld [vmem:[%s8451_s1 + $0x6ec] ss:$16 sps:$4 sm:$0xff]  }
  0xa3   :  { %3727 = vmatpush1.bf16.msra.mxu0 %v5775_v56  ;;  %4096 = vmatpush1.bf16.msra.mxu1 %v5778_v57  ;;  %v5866_v56 = vld [vmem:[%s8451_s1 + $0x6e0] ss:$16 sps:$4 sm:$0xff]   ;;  %v5869_v57 = vld [vmem:[%s8451_s1 + $0x6e8] ss:$16 sps:$4 sm:$0xff]  }
  0xa4   :  { %3728 = vmatprep.subr.bf16.mxu0 %v5783_v58  ;;  %4097 = vmatprep.subr.bf16.mxu1 %v5786_v59  ;;  %v5874_v58 = vld [vmem:[%s8451_s1 + $0x704] ss:$16 sps:$4 sm:$0xff]   ;;  %v5877_v59 = vld [vmem:[%s8451_s1 + $0x70c] ss:$16 sps:$4 sm:$0xff]  }
  0xa7   :  { %3729 = vmatpush1.bf16.msra.mxu0 %v5781_v60  ;;  %4098 = vmatpush1.bf16.msra.mxu1 %v5784_v61  ;;  %v5872_v60 = vld [vmem:[%s8451_s1 + $0x700] ss:$16 sps:$4 sm:$0xff]   ;;  %v5875_v61 = vld [vmem:[%s8451_s1 + $0x708] ss:$16 sps:$4 sm:$0xff]  }
  0xa8   :  { %3730 = vmatprep.subr.bf16.mxu0 %v5789_v62  ;;  %4099 = vmatprep.subr.bf16.mxu1 %v5792_v63  ;;  %v5880_v62 = vld [vmem:[%s8451_s1 + $0x724] ss:$16 sps:$4 sm:$0xff]   ;;  %v5883_v63 = vld [vmem:[%s8451_s1 + $0x72c] ss:$16 sps:$4 sm:$0xff]  }
  0xab   :  { %3731 = vmatpush1.bf16.msra.mxu0 %v5787_v0  ;;  %4100 = vmatpush1.bf16.msra.mxu1 %v5790_v1  ;;  %v5878_v0 = vld [vmem:[%s8451_s1 + $0x720] ss:$16 sps:$4 sm:$0xff]   ;;  %v5881_v1 = vld [vmem:[%s8451_s1 + $0x728] ss:$16 sps:$4 sm:$0xff]  }
  0xac   :  { %3732 = vmatprep.subr.bf16.mxu0 %v5795_v2  ;;  %4101 = vmatprep.subr.bf16.mxu1 %v5798_v3  ;;  %v5886_v2 = vld [vmem:[%s8451_s1 + $0x744] ss:$16 sps:$4 sm:$0xff]   ;;  %v5889_v3 = vld [vmem:[%s8451_s1 + $0x74c] ss:$16 sps:$4 sm:$0xff]  }
  0xaf   :  { %3733 = vmatpush1.bf16.msra.mxu0 %v5793_v4  ;;  %4102 = vmatpush1.bf16.msra.mxu1 %v5796_v5  ;;  %v5884_v4 = vld [vmem:[%s8451_s1 + $0x740] ss:$16 sps:$4 sm:$0xff]   ;;  %v5887_v5 = vld [vmem:[%s8451_s1 + $0x748] ss:$16 sps:$4 sm:$0xff]  }
  0xb0   :  { %3734 = vmatprep.subr.bf16.mxu0 %v5801_v6  ;;  %4103 = vmatprep.subr.bf16.mxu1 %v5804_v7  ;;  %v5892_v6 = vld [vmem:[%s8451_s1 + $0x764] ss:$16 sps:$4 sm:$0xff]   ;;  %v5895_v7 = vld [vmem:[%s8451_s1 + $0x76c] ss:$16 sps:$4 sm:$0xff]  }
  0xb3   :  { %3735 = vmatpush1.bf16.msra.mxu0 %v5799_v8  ;;  %4104 = vmatpush1.bf16.msra.mxu1 %v5802_v9  ;;  %v5890_v8 = vld [vmem:[%s8451_s1 + $0x760] ss:$16 sps:$4 sm:$0xff]   ;;  %v5893_v9 = vld [vmem:[%s8451_s1 + $0x768] ss:$16 sps:$4 sm:$0xff]  }
  0xb4   :  { %3736 = vmatprep.subr.bf16.mxu0 %v5807_v10  ;;  %4105 = vmatprep.subr.bf16.mxu1 %v5810_v11  ;;  %v5898_v10 = vld [vmem:[%s8451_s1 + $0x784] ss:$16 sps:$4 sm:$0xff]   ;;  %v5901_v11 = vld [vmem:[%s8451_s1 + $0x78c] ss:$16 sps:$4 sm:$0xff]  }
  0xb7   :  { %3737 = vmatpush1.bf16.msra.mxu0 %v5805_v12  ;;  %4106 = vmatpush1.bf16.msra.mxu1 %v5808_v52  ;;  %v5896_v12 = vld [vmem:[%s8451_s1 + $0x780] ss:$16 sps:$4 sm:$0xff]   ;;  %v5899_v52 = vld [vmem:[%s8451_s1 + $0x788] ss:$16 sps:$4 sm:$0xff]  }
  0xb8   :  { %3738 = vmatprep.subr.bf16.mxu0 %v5813_v15  ;;  %4107 = vmatprep.subr.bf16.mxu1 %v5816_v16  ;;  %v5904_v15 = vld [vmem:[%s8451_s1 + $0x7a4] ss:$16 sps:$4 sm:$0xff]   ;;  %v5907_v16 = vld [vmem:[%s8451_s1 + $0x7ac] ss:$16 sps:$4 sm:$0xff]  }
  0xbb   :  { %3739 = vmatpush1.bf16.msra.mxu0 %v5811_v17  ;;  %4108 = vmatpush1.bf16.msra.mxu1 %v5814_v18  ;;  %v5902_v17 = vld [vmem:[%s8451_s1 + $0x7a0] ss:$16 sps:$4 sm:$0xff]   ;;  %v5905_v18 = vld [vmem:[%s8451_s1 + $0x7a8] ss:$16 sps:$4 sm:$0xff]  }
  0xbc   :  { %3740 = vmatprep.subr.bf16.mxu0 %v5819_v19  ;;  %4109 = vmatprep.subr.bf16.mxu1 %v5822_v20  ;;  %v5910_v19 = vld [vmem:[%s8451_s1 + $0x7c4] ss:$16 sps:$4 sm:$0xff]   ;;  %v5913_v20 = vld [vmem:[%s8451_s1 + $0x7cc] ss:$16 sps:$4 sm:$0xff]  }
  0xbf   :  { %3741 = vmatpush1.bf16.msra.mxu0 %v5817_v21  ;;  %4110 = vmatpush1.bf16.msra.mxu1 %v5820_v22  ;;  %v7294_v21 = vld.sshfl [vmem:[%s8450_s0 + $0x8] sm:$0xff pattern:$0x75316420]  ;;  %v5908_v22 = vld [vmem:[%s8451_s1 + $0x7c0] ss:$16 sps:$4 sm:$0xff]  }
  0xc0   :  { %3751 = vmatprep.subr.bf16.mxu0 %v5826_v23  ;;  %4120 = vmatprep.subr.bf16.mxu1 %v5829_v24  ;;  %v5911_v23 = vld [vmem:[%s8451_s1 + $0x7c8] ss:$16 sps:$4 sm:$0xff]   ;;  %v5916_v24 = vld [vmem:[%s8451_s1 + $0x7e4] ss:$16 sps:$4 sm:$0xff]  }
  0xc2   :  { %3743 = vmatmul.mubr.bf16.vlgmr.msra.gmra.mrb[0].mxu0 %v7120_v26  ;;  %4112 = vmatmul.mubr.bf16.vlgmr.msra.gmra.mrb[0].mxu1 %v7120_v26 }
  0xc3   :  { %3752 = vmatpush1.bf16.msra.mxu0 %v5824_v13  ;;  %4121 = vmatpush1.bf16.msra.mxu1 %v5827_v27  ;;  %v5919_v13 = vld [vmem:[%s8451_s1 + $0x7ec] ss:$16 sps:$4 sm:$0xff]   ;;  %v5914_v27 = vld [vmem:[%s8451_s1 + $0x7e0] ss:$16 sps:$4 sm:$0xff]  }
  0xc4   :  { %3753 = vmatprep.subr.bf16.mxu0 %v5832_v28  ;;  %4122 = vmatprep.subr.bf16.mxu1 %v5835_v29  ;;  %v5917_v28 = vld [vmem:[%s8451_s1 + $0x7e8] ss:$16 sps:$4 sm:$0xff]   ;;  %v5922_v29 = vld [vmem:[%s8451_s1 + $0x804] ss:$16 sps:$4 sm:$0xff]  }
  0xc5   :  { %3783 = vmatprep.mubr.bf16.mxu0 %v658_v14  ;;  %4152 = vmatprep.mubr.bf16.mxu1 %v658_v14  ;;  %v5925_v14 = vld [vmem:[%s8451_s1 + $0x80c] ss:$16 sps:$4 sm:$0xff]  }
  0xc7   :  { %3754 = vmatpush1.bf16.msra.mxu0 %v5830_v30  ;;  %4123 = vmatpush1.bf16.msra.mxu1 %v5833_v31  ;;  %v674_v30 = vcombine.high %v7294_v21, %v7294_v21  ;;  %v656_v31 = vcombine.high %v7120_v26, %v7120_v26  ;;  %v5931_v26 = vld [vmem:[%s8451_s1 + $0x82c] ss:$16 sps:$4 sm:$0xff]  }
  0xc8   :  { %3755 = vmatprep.subr.bf16.mxu0 %v5838_v25  ;;  %4124 = vmatprep.subr.bf16.mxu1 %v5841_v32  ;;  %v5920_v25 = vld [vmem:[%s8451_s1 + $0x800] ss:$16 sps:$4 sm:$0xff]   ;;  %v5923_v32 = vld [vmem:[%s8451_s1 + $0x808] ss:$16 sps:$4 sm:$0xff]  }
  0xcb   :  { %3756 = vmatpush1.bf16.msra.mxu0 %v5836_v33  ;;  %4125 = vmatpush1.bf16.msra.mxu1 %v5839_v34  ;;  %v5928_v33 = vld [vmem:[%s8451_s1 + $0x824] ss:$16 sps:$4 sm:$0xff]   ;;  %v7337_v34 = vrot.slane %v674_v30, %v6636_v49 }
  0xcc   :  { %3757 = vmatprep.subr.bf16.mxu0 %v5844_v35  ;;  %4126 = vmatprep.subr.bf16.mxu1 %v5847_v36  ;;  %v5926_v35 = vld [vmem:[%s8451_s1 + $0x820] ss:$16 sps:$4 sm:$0xff]   ;;  %v5929_v36 = vld [vmem:[%s8451_s1 + $0x828] ss:$16 sps:$4 sm:$0xff]   ;;  %v6012_v30 = vld [vmem:[%s8451_s1 + $0x9e4] ss:$16 sps:$4 sm:$0xff]  }
  0xcf   :  { %3758 = vmatpush1.bf16.msra.mxu0 %v5842_v37  ;;  %4127 = vmatpush1.bf16.msra.mxu1 %v5845_v38  ;;  %v5934_v37 = vld [vmem:[%s8451_s1 + $0x844] ss:$16 sps:$4 sm:$0xff]   ;;  %v5937_v38 = vld [vmem:[%s8451_s1 + $0x84c] ss:$16 sps:$4 sm:$0xff]  }
  0xd0   :  { %3759 = vmatprep.subr.bf16.mxu0 %v5850_v39  ;;  %4128 = vmatprep.subr.bf16.mxu1 %v5853_v40  ;;  %v5932_v39 = vld [vmem:[%s8451_s1 + $0x840] ss:$16 sps:$4 sm:$0xff]   ;;  %v5935_v40 = vld [vmem:[%s8451_s1 + $0x848] ss:$16 sps:$4 sm:$0xff]  }
  0xd3   :  { %3760 = vmatpush1.bf16.msra.mxu0 %v5848_v41  ;;  %4129 = vmatpush1.bf16.msra.mxu1 %v5851_v42  ;;  %v5940_v41 = vld [vmem:[%s8451_s1 + $0x864] ss:$16 sps:$4 sm:$0xff]   ;;  %v5943_v42 = vld [vmem:[%s8451_s1 + $0x86c] ss:$16 sps:$4 sm:$0xff]  }
  0xd4   :  { %3761 = vmatprep.subr.bf16.mxu0 %v5856_v44  ;;  %4130 = vmatprep.subr.bf16.mxu1 %v5859_v45  ;;  %v5938_v44 = vld [vmem:[%s8451_s1 + $0x860] ss:$16 sps:$4 sm:$0xff]   ;;  %v5941_v45 = vld [vmem:[%s8451_s1 + $0x868] ss:$16 sps:$4 sm:$0xff]  }
  0xd7   :  { %3762 = vmatpush1.bf16.msra.mxu0 %v5854_v46  ;;  %4131 = vmatpush1.bf16.msra.mxu1 %v5857_v47  ;;  %v5946_v46 = vld [vmem:[%s8451_s1 + $0x884] ss:$16 sps:$4 sm:$0xff]   ;;  %v5949_v47 = vld [vmem:[%s8451_s1 + $0x88c] ss:$16 sps:$4 sm:$0xff]  }
  0xd8   :  { %3763 = vmatprep.subr.bf16.mxu0 %v5862_v48  ;;  %4132 = vmatprep.subr.bf16.mxu1 %v5865_v50  ;;  %v5944_v48 = vld [vmem:[%s8451_s1 + $0x880] ss:$16 sps:$4 sm:$0xff]   ;;  %v5947_v50 = vld [vmem:[%s8451_s1 + $0x888] ss:$16 sps:$4 sm:$0xff]  }
  0xdb   :  { %3764 = vmatpush1.bf16.msra.mxu0 %v5860_v51  ;;  %4133 = vmatpush1.bf16.msra.mxu1 %v5863_v53  ;;  %v5952_v51 = vld [vmem:[%s8451_s1 + $0x8a4] ss:$16 sps:$4 sm:$0xff]   ;;  %v5955_v53 = vld [vmem:[%s8451_s1 + $0x8ac] ss:$16 sps:$4 sm:$0xff]  }
  0xdc   :  { %3765 = vmatprep.subr.bf16.mxu0 %v5868_v54  ;;  %4134 = vmatprep.subr.bf16.mxu1 %v5871_v55  ;;  %v5950_v54 = vld [vmem:[%s8451_s1 + $0x8a0] ss:$16 sps:$4 sm:$0xff]   ;;  %v5953_v55 = vld [vmem:[%s8451_s1 + $0x8a8] ss:$16 sps:$4 sm:$0xff]  }
  0xdf   :  { %3766 = vmatpush1.bf16.msra.mxu0 %v5866_v56  ;;  %4135 = vmatpush1.bf16.msra.mxu1 %v5869_v57  ;;  %v5958_v56 = vld [vmem:[%s8451_s1 + $0x8c4] ss:$16 sps:$4 sm:$0xff]   ;;  %v5961_v57 = vld [vmem:[%s8451_s1 + $0x8cc] ss:$16 sps:$4 sm:$0xff]  }
  0xe0   :  { %3767 = vmatprep.subr.bf16.mxu0 %v5874_v58  ;;  %4136 = vmatprep.subr.bf16.mxu1 %v5877_v59  ;;  %v5956_v58 = vld [vmem:[%s8451_s1 + $0x8c0] ss:$16 sps:$4 sm:$0xff]   ;;  %v5959_v59 = vld [vmem:[%s8451_s1 + $0x8c8] ss:$16 sps:$4 sm:$0xff]  }
  0xe3   :  { %3768 = vmatpush1.bf16.msra.mxu0 %v5872_v60  ;;  %4137 = vmatpush1.bf16.msra.mxu1 %v5875_v61  ;;  %v5964_v60 = vld [vmem:[%s8451_s1 + $0x8e4] ss:$16 sps:$4 sm:$0xff]   ;;  %v5967_v61 = vld [vmem:[%s8451_s1 + $0x8ec] ss:$16 sps:$4 sm:$0xff]  }
  0xe4   :  { %3769 = vmatprep.subr.bf16.mxu0 %v5880_v62  ;;  %4138 = vmatprep.subr.bf16.mxu1 %v5883_v63  ;;  %v5962_v62 = vld [vmem:[%s8451_s1 + $0x8e0] ss:$16 sps:$4 sm:$0xff]   ;;  %v5965_v63 = vld [vmem:[%s8451_s1 + $0x8e8] ss:$16 sps:$4 sm:$0xff]  }
  0xe7   :  { %3770 = vmatpush1.bf16.msra.mxu0 %v5878_v0  ;;  %4139 = vmatpush1.bf16.msra.mxu1 %v5881_v1  ;;  %v5970_v0 = vld [vmem:[%s8451_s1 + $0x904] ss:$16 sps:$4 sm:$0xff]   ;;  %v5973_v1 = vld [vmem:[%s8451_s1 + $0x90c] ss:$16 sps:$4 sm:$0xff]  }
  0xe8   :  { %3771 = vmatprep.subr.bf16.mxu0 %v5886_v2  ;;  %4140 = vmatprep.subr.bf16.mxu1 %v5889_v3  ;;  %v5968_v2 = vld [vmem:[%s8451_s1 + $0x900] ss:$16 sps:$4 sm:$0xff]   ;;  %v5971_v3 = vld [vmem:[%s8451_s1 + $0x908] ss:$16 sps:$4 sm:$0xff]  }
  0xeb   :  { %3772 = vmatpush1.bf16.msra.mxu0 %v5884_v4  ;;  %4141 = vmatpush1.bf16.msra.mxu1 %v5887_v5  ;;  %v5976_v4 = vld [vmem:[%s8451_s1 + $0x924] ss:$16 sps:$4 sm:$0xff]   ;;  %v5979_v5 = vld [vmem:[%s8451_s1 + $0x92c] ss:$16 sps:$4 sm:$0xff]  }
  0xec   :  { %3773 = vmatprep.subr.bf16.mxu0 %v5892_v6  ;;  %4142 = vmatprep.subr.bf16.mxu1 %v5895_v7  ;;  %v5974_v6 = vld [vmem:[%s8451_s1 + $0x920] ss:$16 sps:$4 sm:$0xff]   ;;  %v5977_v7 = vld [vmem:[%s8451_s1 + $0x928] ss:$16 sps:$4 sm:$0xff]  }
  0xef   :  { %3774 = vmatpush1.bf16.msra.mxu0 %v5890_v8  ;;  %4143 = vmatpush1.bf16.msra.mxu1 %v5893_v9  ;;  %v5982_v8 = vld [vmem:[%s8451_s1 + $0x944] ss:$16 sps:$4 sm:$0xff]   ;;  %v5985_v9 = vld [vmem:[%s8451_s1 + $0x94c] ss:$16 sps:$4 sm:$0xff]  }
  0xf0   :  { %3775 = vmatprep.subr.bf16.mxu0 %v5898_v10  ;;  %4144 = vmatprep.subr.bf16.mxu1 %v5901_v11  ;;  %v5980_v10 = vld [vmem:[%s8451_s1 + $0x940] ss:$16 sps:$4 sm:$0xff]   ;;  %v5983_v11 = vld [vmem:[%s8451_s1 + $0x948] ss:$16 sps:$4 sm:$0xff]  }
  0xf3   :  { %3776 = vmatpush1.bf16.msra.mxu0 %v5896_v12  ;;  %4145 = vmatpush1.bf16.msra.mxu1 %v5899_v52  ;;  %v5988_v12 = vld [vmem:[%s8451_s1 + $0x964] ss:$16 sps:$4 sm:$0xff]   ;;  %v5991_v52 = vld [vmem:[%s8451_s1 + $0x96c] ss:$16 sps:$4 sm:$0xff]  }
  0xf4   :  { %3777 = vmatprep.subr.bf16.mxu0 %v5904_v15  ;;  %4146 = vmatprep.subr.bf16.mxu1 %v5907_v16  ;;  %v5986_v15 = vld [vmem:[%s8451_s1 + $0x960] ss:$16 sps:$4 sm:$0xff]   ;;  %v5989_v16 = vld [vmem:[%s8451_s1 + $0x968] ss:$16 sps:$4 sm:$0xff]  }
  0xf7   :  { %3778 = vmatpush1.bf16.msra.mxu0 %v5902_v17  ;;  %4147 = vmatpush1.bf16.msra.mxu1 %v5905_v18  ;;  %v5994_v17 = vld [vmem:[%s8451_s1 + $0x984] ss:$16 sps:$4 sm:$0xff]   ;;  %v5997_v18 = vld [vmem:[%s8451_s1 + $0x98c] ss:$16 sps:$4 sm:$0xff]  }
  0xf8   :  { %3779 = vmatprep.subr.bf16.mxu0 %v5910_v19  ;;  %4148 = vmatprep.subr.bf16.mxu1 %v5913_v20  ;;  %v5992_v19 = vld [vmem:[%s8451_s1 + $0x980] ss:$16 sps:$4 sm:$0xff]   ;;  %v5995_v20 = vld [vmem:[%s8451_s1 + $0x988] ss:$16 sps:$4 sm:$0xff]  }
  0xfb   :  { %3780 = vmatpush1.bf16.msra.mxu0 %v5908_v22  ;;  %4149 = vmatpush1.bf16.msra.mxu1 %v5911_v23  ;;  %v6000_v22 = vld [vmem:[%s8451_s1 + $0x9a4] ss:$16 sps:$4 sm:$0xff]   ;;  %v6003_v23 = vld [vmem:[%s8451_s1 + $0x9ac] ss:$16 sps:$4 sm:$0xff]  }
  0xfc   :  { %3781 = vmatprep.subr.bf16.mxu0 %v5916_v24  ;;  %4150 = vmatprep.subr.bf16.mxu1 %v5919_v13  ;;  %v5998_v24 = vld [vmem:[%s8451_s1 + $0x9a0] ss:$16 sps:$4 sm:$0xff]   ;;  %v6001_v13 = vld [vmem:[%s8451_s1 + $0x9a8] ss:$16 sps:$4 sm:$0xff]  }
  0xff   :  { %3782 = vmatpush1.bf16.msra.mxu0 %v5914_v27  ;;  %4151 = vmatpush1.bf16.msra.mxu1 %v5917_v28  ;;  %v6006_v27 = vld [vmem:[%s8451_s1 + $0x9c4] ss:$16 sps:$4 sm:$0xff]   ;;  %v6009_v28 = vld [vmem:[%s8451_s1 + $0x9cc] ss:$16 sps:$4 sm:$0xff]  }
 0x100   :  { %3792 = vmatprep.subr.bf16.mxu0 %v5922_v29  ;;  %4161 = vmatprep.subr.bf16.mxu1 %v5925_v14  ;;  %v6004_v29 = vld [vmem:[%s8451_s1 + $0x9c0] ss:$16 sps:$4 sm:$0xff]   ;;  %v6007_v14 = vld [vmem:[%s8451_s1 + $0x9c8] ss:$16 sps:$4 sm:$0xff]  }
 0x102   :  { %3784 = vmatmul.mubr.bf16.vlgmr.msra.gmra.mrb[0].mxu0 %v656_v31  ;;  %4153 = vmatmul.mubr.bf16.vlgmr.msra.gmra.mrb[0].mxu1 %v656_v31  ;;  %v6015_v31 = vld [vmem:[%s8451_s1 + $0x9ec] ss:$16 sps:$4 sm:$0xff]  }
 0x103   :  { %3793 = vmatpush1.bf16.msra.mxu0 %v5920_v25  ;;  %4162 = vmatpush1.bf16.msra.mxu1 %v5923_v32  ;;  %v6010_v25 = vld [vmem:[%s8451_s1 + $0x9e0] ss:$16 sps:$4 sm:$0xff]   ;;  %v6013_v32 = vld [vmem:[%s8451_s1 + $0x9e8] ss:$16 sps:$4 sm:$0xff]  }
 0x104   :  { %3794 = vmatprep.subr.bf16.mxu0 %v5928_v33  ;;  %4163 = vmatprep.subr.bf16.mxu1 %v5931_v26  ;;  %v6018_v33 = vld [vmem:[%s8451_s1 + $0xa04] ss:$16 sps:$4 sm:$0xff]   ;;  %v6021_v26 = vld [vmem:[%s8451_s1 + $0xa0c] ss:$16 sps:$4 sm:$0xff]  }
 0x105   :  { %3824 = vmatprep.mubr.bf16.mxu0 %v7337_v34  ;;  %4193 = vmatprep.mubr.bf16.mxu1 %v7337_v34 }
 0x107   :  { %3795 = vmatpush1.bf16.msra.mxu0 %v5926_v35  ;;  %4164 = vmatpush1.bf16.msra.mxu1 %v5929_v36  ;;  %v7523_v35 = vrot.slane %v7294_v21, %v6636_v49  ;;  %v6016_v36 = vld [vmem:[%s8451_s1 + $0xa00] ss:$16 sps:$4 sm:$0xff]   ;;  %v6027_v21 = vld [vmem:[%s8451_s1 + $0xa2c] ss:$16 sps:$4 sm:$0xff]  }
 0x108   :  { %3796 = vmatprep.subr.bf16.mxu0 %v5934_v37  ;;  %4165 = vmatprep.subr.bf16.mxu1 %v5937_v38  ;;  %v6019_v37 = vld [vmem:[%s8451_s1 + $0xa08] ss:$16 sps:$4 sm:$0xff]   ;;  %v6024_v38 = vld [vmem:[%s8451_s1 + $0xa24] ss:$16 sps:$4 sm:$0xff]  }
 0x10b   :  { %3797 = vmatpush1.bf16.msra.mxu0 %v5932_v39  ;;  %4166 = vmatpush1.bf16.msra.mxu1 %v5935_v40  ;;  %v706_v39 = vcombine.high %v7337_v34, %v7337_v34  ;;  %v6022_v40 = vld [vmem:[%s8451_s1 + $0xa20] ss:$16 sps:$4 sm:$0xff]   ;;  %v6030_v34 = vld [vmem:[%s8451_s1 + $0xa44] ss:$16 sps:$4 sm:$0xff]  }
 0x10c   :  { %3798 = vmatprep.subr.bf16.mxu0 %v5940_v41  ;;  %4167 = vmatprep.subr.bf16.mxu1 %v5943_v42  ;;  %v6025_v41 = vld [vmem:[%s8451_s1 + $0xa28] ss:$16 sps:$4 sm:$0xff]   ;;  %v6033_v42 = vld [vmem:[%s8451_s1 + $0xa4c] ss:$16 sps:$4 sm:$0xff]  }
 0x10f   :  { %3799 = vmatpush1.bf16.msra.mxu0 %v5938_v44  ;;  %4168 = vmatpush1.bf16.msra.mxu1 %v5941_v45  ;;  %v6028_v44 = vld [vmem:[%s8451_s1 + $0xa40] ss:$16 sps:$4 sm:$0xff]   ;;  %v6031_v45 = vld [vmem:[%s8451_s1 + $0xa48] ss:$16 sps:$4 sm:$0xff]  }
 0x110   :  { %3800 = vmatprep.subr.bf16.mxu0 %v5946_v46  ;;  %4169 = vmatprep.subr.bf16.mxu1 %v5949_v47  ;;  %v6036_v46 = vld [vmem:[%s8451_s1 + $0xa64] ss:$16 sps:$4 sm:$0xff]   ;;  %v6039_v47 = vld [vmem:[%s8451_s1 + $0xa6c] ss:$16 sps:$4 sm:$0xff]  }
 0x113   :  { %3801 = vmatpush1.bf16.msra.mxu0 %v5944_v48  ;;  %4170 = vmatpush1.bf16.msra.mxu1 %v5947_v50  ;;  %v6034_v48 = vld [vmem:[%s8451_s1 + $0xa60] ss:$16 sps:$4 sm:$0xff]   ;;  %v6037_v50 = vld [vmem:[%s8451_s1 + $0xa68] ss:$16 sps:$4 sm:$0xff]  }
 0x114   :  { %3802 = vmatprep.subr.bf16.mxu0 %v5952_v51  ;;  %4171 = vmatprep.subr.bf16.mxu1 %v5955_v53  ;;  %v6042_v51 = vld [vmem:[%s8451_s1 + $0xa84] ss:$16 sps:$4 sm:$0xff]   ;;  %v6045_v53 = vld [vmem:[%s8451_s1 + $0xa8c] ss:$16 sps:$4 sm:$0xff]  }
 0x117   :  { %3803 = vmatpush1.bf16.msra.mxu0 %v5950_v54  ;;  %4172 = vmatpush1.bf16.msra.mxu1 %v5953_v55  ;;  %v6040_v54 = vld [vmem:[%s8451_s1 + $0xa80] ss:$16 sps:$4 sm:$0xff]   ;;  %v6043_v55 = vld [vmem:[%s8451_s1 + $0xa88] ss:$16 sps:$4 sm:$0xff]  }
 0x118   :  { %3804 = vmatprep.subr.bf16.mxu0 %v5958_v56  ;;  %4173 = vmatprep.subr.bf16.mxu1 %v5961_v57  ;;  %v6048_v56 = vld [vmem:[%s8451_s1 + $0xaa4] ss:$16 sps:$4 sm:$0xff]   ;;  %v6051_v57 = vld [vmem:[%s8451_s1 + $0xaac] ss:$16 sps:$4 sm:$0xff]  }
 0x11b   :  { %3805 = vmatpush1.bf16.msra.mxu0 %v5956_v58  ;;  %4174 = vmatpush1.bf16.msra.mxu1 %v5959_v59  ;;  %v6046_v58 = vld [vmem:[%s8451_s1 + $0xaa0] ss:$16 sps:$4 sm:$0xff]   ;;  %v6049_v59 = vld [vmem:[%s8451_s1 + $0xaa8] ss:$16 sps:$4 sm:$0xff]  }
 0x11c   :  { %3806 = vmatprep.subr.bf16.mxu0 %v5964_v60  ;;  %4175 = vmatprep.subr.bf16.mxu1 %v5967_v61  ;;  %v6054_v60 = vld [vmem:[%s8451_s1 + $0xac4] ss:$16 sps:$4 sm:$0xff]   ;;  %v6057_v61 = vld [vmem:[%s8451_s1 + $0xacc] ss:$16 sps:$4 sm:$0xff]  }
 0x11f   :  { %3807 = vmatpush1.bf16.msra.mxu0 %v5962_v62  ;;  %4176 = vmatpush1.bf16.msra.mxu1 %v5965_v63  ;;  %v6052_v62 = vld [vmem:[%s8451_s1 + $0xac0] ss:$16 sps:$4 sm:$0xff]   ;;  %v6055_v63 = vld [vmem:[%s8451_s1 + $0xac8] ss:$16 sps:$4 sm:$0xff]  }
 0x120   :  { %3808 = vmatprep.subr.bf16.mxu0 %v5970_v0  ;;  %4177 = vmatprep.subr.bf16.mxu1 %v5973_v1  ;;  %v6060_v0 = vld [vmem:[%s8451_s1 + $0xae4] ss:$16 sps:$4 sm:$0xff]   ;;  %v6063_v1 = vld [vmem:[%s8451_s1 + $0xaec] ss:$16 sps:$4 sm:$0xff]  }
 0x123   :  { %3809 = vmatpush1.bf16.msra.mxu0 %v5968_v2  ;;  %4178 = vmatpush1.bf16.msra.mxu1 %v5971_v3  ;;  %v6058_v2 = vld [vmem:[%s8451_s1 + $0xae0] ss:$16 sps:$4 sm:$0xff]   ;;  %v6061_v3 = vld [vmem:[%s8451_s1 + $0xae8] ss:$16 sps:$4 sm:$0xff]  }
 0x124   :  { %3810 = vmatprep.subr.bf16.mxu0 %v5976_v4  ;;  %4179 = vmatprep.subr.bf16.mxu1 %v5979_v5  ;;  %v6066_v4 = vld [vmem:[%s8451_s1 + $0xb04] ss:$16 sps:$4 sm:$0xff]   ;;  %v6069_v5 = vld [vmem:[%s8451_s1 + $0xb0c] ss:$16 sps:$4 sm:$0xff]  }
 0x127   :  { %3811 = vmatpush1.bf16.msra.mxu0 %v5974_v6  ;;  %4180 = vmatpush1.bf16.msra.mxu1 %v5977_v7  ;;  %v6064_v6 = vld [vmem:[%s8451_s1 + $0xb00] ss:$16 sps:$4 sm:$0xff]   ;;  %v6067_v7 = vld [vmem:[%s8451_s1 + $0xb08] ss:$16 sps:$4 sm:$0xff]  }
 0x128   :  { %3812 = vmatprep.subr.bf16.mxu0 %v5982_v8  ;;  %4181 = vmatprep.subr.bf16.mxu1 %v5985_v9  ;;  %v6072_v8 = vld [vmem:[%s8451_s1 + $0xb24] ss:$16 sps:$4 sm:$0xff]   ;;  %v6075_v9 = vld [vmem:[%s8451_s1 + $0xb2c] ss:$16 sps:$4 sm:$0xff]  }
 0x12b   :  { %3813 = vmatpush1.bf16.msra.mxu0 %v5980_v10  ;;  %4182 = vmatpush1.bf16.msra.mxu1 %v5983_v11  ;;  %v6070_v10 = vld [vmem:[%s8451_s1 + $0xb20] ss:$16 sps:$4 sm:$0xff]   ;;  %v6073_v11 = vld [vmem:[%s8451_s1 + $0xb28] ss:$16 sps:$4 sm:$0xff]  }
 0x12c   :  { %3814 = vmatprep.subr.bf16.mxu0 %v5988_v12  ;;  %4183 = vmatprep.subr.bf16.mxu1 %v5991_v52  ;;  %v6078_v12 = vld [vmem:[%s8451_s1 + $0xb44] ss:$16 sps:$4 sm:$0xff]   ;;  %v6081_v52 = vld [vmem:[%s8451_s1 + $0xb4c] ss:$16 sps:$4 sm:$0xff]  }
 0x12f   :  { %3815 = vmatpush1.bf16.msra.mxu0 %v5986_v15  ;;  %4184 = vmatpush1.bf16.msra.mxu1 %v5989_v16  ;;  %v6076_v15 = vld [vmem:[%s8451_s1 + $0xb40] ss:$16 sps:$4 sm:$0xff]   ;;  %v6079_v16 = vld [vmem:[%s8451_s1 + $0xb48] ss:$16 sps:$4 sm:$0xff]  }
 0x130   :  { %3816 = vmatprep.subr.bf16.mxu0 %v5994_v17  ;;  %4185 = vmatprep.subr.bf16.mxu1 %v5997_v18  ;;  %v6084_v17 = vld [vmem:[%s8451_s1 + $0xb64] ss:$16 sps:$4 sm:$0xff]   ;;  %v6087_v18 = vld [vmem:[%s8451_s1 + $0xb6c] ss:$16 sps:$4 sm:$0xff]  }
 0x133   :  { %3817 = vmatpush1.bf16.msra.mxu0 %v5992_v19  ;;  %4186 = vmatpush1.bf16.msra.mxu1 %v5995_v20  ;;  %v6082_v19 = vld [vmem:[%s8451_s1 + $0xb60] ss:$16 sps:$4 sm:$0xff]   ;;  %v6085_v20 = vld [vmem:[%s8451_s1 + $0xb68] ss:$16 sps:$4 sm:$0xff]  }
 0x134   :  { %3818 = vmatprep.subr.bf16.mxu0 %v6000_v22  ;;  %4187 = vmatprep.subr.bf16.mxu1 %v6003_v23  ;;  %v6090_v22 = vld [vmem:[%s8451_s1 + $0xb84] ss:$16 sps:$4 sm:$0xff]   ;;  %v6093_v23 = vld [vmem:[%s8451_s1 + $0xb8c] ss:$16 sps:$4 sm:$0xff]  }
 0x137   :  { %3819 = vmatpush1.bf16.msra.mxu0 %v5998_v24  ;;  %4188 = vmatpush1.bf16.msra.mxu1 %v6001_v13  ;;  %v6088_v24 = vld [vmem:[%s8451_s1 + $0xb80] ss:$16 sps:$4 sm:$0xff]   ;;  %v6091_v13 = vld [vmem:[%s8451_s1 + $0xb88] ss:$16 sps:$4 sm:$0xff]  }
 0x138   :  { %3820 = vmatprep.subr.bf16.mxu0 %v6006_v27  ;;  %4189 = vmatprep.subr.bf16.mxu1 %v6009_v28  ;;  %v6096_v27 = vld [vmem:[%s8451_s1 + $0xba4] ss:$16 sps:$4 sm:$0xff]   ;;  %v6099_v28 = vld [vmem:[%s8451_s1 + $0xbac] ss:$16 sps:$4 sm:$0xff]  }
 0x13b   :  { %3821 = vmatpush1.bf16.msra.mxu0 %v6004_v29  ;;  %4190 = vmatpush1.bf16.msra.mxu1 %v6007_v14  ;;  %v6094_v29 = vld [vmem:[%s8451_s1 + $0xba0] ss:$16 sps:$4 sm:$0xff]   ;;  %v6097_v14 = vld [vmem:[%s8451_s1 + $0xba8] ss:$16 sps:$4 sm:$0xff]  }
 0x13c   :  { %3822 = vmatprep.subr.bf16.mxu0 %v6012_v30  ;;  %4191 = vmatprep.subr.bf16.mxu1 %v6015_v31  ;;  %v6102_v30 = vld [vmem:[%s8451_s1 + $0xbc4] ss:$16 sps:$4 sm:$0xff]   ;;  %v6105_v31 = vld [vmem:[%s8451_s1 + $0xbcc] ss:$16 sps:$4 sm:$0xff]  }
 0x13f   :  { %3823 = vmatpush1.bf16.msra.mxu0 %v6010_v25  ;;  %4192 = vmatpush1.bf16.msra.mxu1 %v6013_v32  ;;  %v6433_v25 = vld [vmem:[%s8450_s0 + $0x8] sm:$0xff] }
 0x140   :  { %3833 = vmatprep.subr.bf16.mxu0 %v6018_v33  ;;  %4202 = vmatprep.subr.bf16.mxu1 %v6021_v26  ;;  %v659_v32 = vcombine.high %v6433_v25, %v6433_v25  ;;  %v6100_v33 = vld [vmem:[%s8451_s1 + $0xbc0] ss:$16 sps:$4 sm:$0xff]   ;;  %v6103_v26 = vld [vmem:[%s8451_s1 + $0xbc8] ss:$16 sps:$4 sm:$0xff]  }
 0x142   :  { %3825 = vmatmul.mubr.bf16.vlgmr.msra.gmra.mrb[0].mxu0 %v7523_v35  ;;  %4194 = vmatmul.mubr.bf16.vlgmr.msra.gmra.mrb[0].mxu1 %v7523_v35 }
 0x143   :  { %3834 = vmatpush1.bf16.msra.mxu0 %v6016_v36  ;;  %4203 = vmatpush1.bf16.msra.mxu1 %v6019_v37  ;;  %v6108_v36 = vld [vmem:[%s8451_s1 + $0xbe4] ss:$16 sps:$4 sm:$0xff]   ;;  %v6111_v37 = vld [vmem:[%s8451_s1 + $0xbec] ss:$16 sps:$4 sm:$0xff]  }
 0x144   :  { %3835 = vmatprep.subr.bf16.mxu0 %v6024_v38  ;;  %4204 = vmatprep.subr.bf16.mxu1 %v6027_v21  ;;  %v7713_v38 = vrot.slane %v659_v32, %v6636_v49  ;;  %v6106_v21 = vld [vmem:[%s8451_s1 + $0xbe0] ss:$16 sps:$4 sm:$0xff]  }
 0x145   :  { %3865 = vmatprep.mubr.bf16.mxu0 %v706_v39  ;;  %4234 = vmatprep.mubr.bf16.mxu1 %v706_v39  ;;  %v6109_v39 = vld [vmem:[%s8451_s1 + $0xbe8] ss:$16 sps:$4 sm:$0xff]  }
 0x147   :  { %3836 = vmatpush1.bf16.msra.mxu0 %v6022_v40  ;;  %4205 = vmatpush1.bf16.msra.mxu1 %v6025_v41  ;;  %v6114_v40 = vld [vmem:[%s8451_s1 + $0xc04] ss:$16 sps:$4 sm:$0xff]   ;;  %v6117_v41 = vld [vmem:[%s8451_s1 + $0xc0c] ss:$16 sps:$4 sm:$0xff]  }
 0x148   :  { %3837 = vmatprep.subr.bf16.mxu0 %v6030_v34  ;;  %4206 = vmatprep.subr.bf16.mxu1 %v6033_v42  ;;  %v675_v34 = vcombine.high %v7713_v38, %v7713_v38  ;;  %v704_v42 = vcombine.high %v7523_v35, %v7523_v35  ;;  %v6123_v35 = vld [vmem:[%s8451_s1 + $0xc2c] ss:$16 sps:$4 sm:$0xff]  }
 0x14b   :  { %3838 = vmatpush1.bf16.msra.mxu0 %v6028_v44  ;;  %4207 = vmatpush1.bf16.msra.mxu1 %v6031_v45  ;;  %v6112_v44 = vld [vmem:[%s8451_s1 + $0xc00] ss:$16 sps:$4 sm:$0xff]   ;;  %v6115_v45 = vld [vmem:[%s8451_s1 + $0xc08] ss:$16 sps:$4 sm:$0xff]  }
 0x14c   :  { %3839 = vmatprep.subr.bf16.mxu0 %v6036_v46  ;;  %4208 = vmatprep.subr.bf16.mxu1 %v6039_v47  ;;  %v6120_v46 = vld [vmem:[%s8451_s1 + $0xc24] ss:$16 sps:$4 sm:$0xff]   ;;  %v7744_v47 = vrot.slane %v675_v34, %v6636_v49 }
 0x14f   :  { %3840 = vmatpush1.bf16.msra.mxu0 %v6034_v48  ;;  %4209 = vmatpush1.bf16.msra.mxu1 %v6037_v50 }
 0x150   :  { %3841 = vmatprep.subr.bf16.mxu0 %v6042_v51  ;;  %4210 = vmatprep.subr.bf16.mxu1 %v6045_v53 }
 0x153   :  { %3842 = vmatpush1.bf16.msra.mxu0 %v6040_v54  ;;  %4211 = vmatpush1.bf16.msra.mxu1 %v6043_v55 }
 0x154   :  { %3843 = vmatprep.subr.bf16.mxu0 %v6048_v56  ;;  %4212 = vmatprep.subr.bf16.mxu1 %v6051_v57 }
 0x157   :  { %3844 = vmatpush1.bf16.msra.mxu0 %v6046_v58  ;;  %4213 = vmatpush1.bf16.msra.mxu1 %v6049_v59 }
 0x158   :  { %3845 = vmatprep.subr.bf16.mxu0 %v6054_v60  ;;  %4214 = vmatprep.subr.bf16.mxu1 %v6057_v61 }
 0x15b   :  { %3846 = vmatpush1.bf16.msra.mxu0 %v6052_v62  ;;  %4215 = vmatpush1.bf16.msra.mxu1 %v6055_v63 }
 0x15c   :  { %3847 = vmatprep.subr.bf16.mxu0 %v6060_v0  ;;  %4216 = vmatprep.subr.bf16.mxu1 %v6063_v1 }
 0x15f   :  { %3848 = vmatpush1.bf16.msra.mxu0 %v6058_v2  ;;  %4217 = vmatpush1.bf16.msra.mxu1 %v6061_v3 }
 0x160   :  { %3849 = vmatprep.subr.bf16.mxu0 %v6066_v4  ;;  %4218 = vmatprep.subr.bf16.mxu1 %v6069_v5 }
 0x163   :  { %3850 = vmatpush1.bf16.msra.mxu0 %v6064_v6  ;;  %4219 = vmatpush1.bf16.msra.mxu1 %v6067_v7 }
 0x164   :  { %3851 = vmatprep.subr.bf16.mxu0 %v6072_v8  ;;  %4220 = vmatprep.subr.bf16.mxu1 %v6075_v9 }
 0x167   :  { %3852 = vmatpush1.bf16.msra.mxu0 %v6070_v10  ;;  %4221 = vmatpush1.bf16.msra.mxu1 %v6073_v11 }
 0x168   :  { %3853 = vmatprep.subr.bf16.mxu0 %v6078_v12  ;;  %4222 = vmatprep.subr.bf16.mxu1 %v6081_v52 }
 0x16b   :  { %3854 = vmatpush1.bf16.msra.mxu0 %v6076_v15  ;;  %4223 = vmatpush1.bf16.msra.mxu1 %v6079_v16 }
 0x16c   :  { %3855 = vmatprep.subr.bf16.mxu0 %v6084_v17  ;;  %4224 = vmatprep.subr.bf16.mxu1 %v6087_v18 }
 0x16f   :  { %3856 = vmatpush1.bf16.msra.mxu0 %v6082_v19  ;;  %4225 = vmatpush1.bf16.msra.mxu1 %v6085_v20 }
 0x170   :  { %3857 = vmatprep.subr.bf16.mxu0 %v6090_v22  ;;  %4226 = vmatprep.subr.bf16.mxu1 %v6093_v23 }
 0x173   :  { %3858 = vmatpush1.bf16.msra.mxu0 %v6088_v24  ;;  %4227 = vmatpush1.bf16.msra.mxu1 %v6091_v13 }
 0x174   :  { %3859 = vmatprep.subr.bf16.mxu0 %v6096_v27  ;;  %4228 = vmatprep.subr.bf16.mxu1 %v6099_v28 }
 0x177   :  { %3860 = vmatpush1.bf16.msra.mxu0 %v6094_v29  ;;  %4229 = vmatpush1.bf16.msra.mxu1 %v6097_v14 }
 0x178   :  { %3861 = vmatprep.subr.bf16.mxu0 %v6102_v30  ;;  %4230 = vmatprep.subr.bf16.mxu1 %v6105_v31 }
 0x17b   :  { %3862 = vmatpush1.bf16.msra.mxu0 %v6100_v33  ;;  %4231 = vmatpush1.bf16.msra.mxu1 %v6103_v26 }
 0x17c   :  { %3863 = vmatprep.subr.bf16.mxu0 %v6108_v36  ;;  %4232 = vmatprep.subr.bf16.mxu1 %v6111_v37 }
 0x17f   :  { %3864 = vmatpush1.bf16.msra.mxu0 %v6106_v21  ;;  %4233 = vmatpush1.bf16.msra.mxu1 %v6109_v39 }
 0x180   :  { %3874 = vmatprep.subr.bf16.mxu0 %v6114_v40  ;;  %4243 = vmatprep.subr.bf16.mxu1 %v6117_v41 }
 0x181   :  { %12 = vsyncpa [#allocation3], 0  ;;  %v6118_v48 = vld [vmem:[%s8451_s1 + $0xc20] ss:$16 sps:$4 sm:$0xff]   ;;  %v6121_v50 = vld [vmem:[%s8451_s1 + $0xc28] ss:$16 sps:$4 sm:$0xff]  }
 0x182   :  { %3866 = vmatmul.mubr.bf16.vlgmr.msra.gmra.mrb[0].mxu0 %v704_v42  ;;  %4235 = vmatmul.mubr.bf16.vlgmr.msra.gmra.mrb[0].mxu1 %v704_v42  ;;  %v6126_v51 = vld [vmem:[%s8451_s1 + $0xc44] ss:$16 sps:$4 sm:$0xff]   ;;  %v6129_v53 = vld [vmem:[%s8451_s1 + $0xc4c] ss:$16 sps:$4 sm:$0xff]   ;;  %v6124_v54 = vld [vmem:[%s8451_s1 + $0xc40] ss:$16 sps:$4 sm:$0xff]  }
 0x183   :  { %3875 = vmatpush1.bf16.msra.mxu0 %v6112_v44  ;;  %4244 = vmatpush1.bf16.msra.mxu1 %v6115_v45  ;;  %v6127_v55 = vld [vmem:[%s8451_s1 + $0xc48] ss:$16 sps:$4 sm:$0xff]   ;;  %v6132_v56 = vld [vmem:[%s8451_s1 + $0xc64] ss:$16 sps:$4 sm:$0xff]   ;;  %v6135_v57 = vld [vmem:[%s8451_s1 + $0xc6c] ss:$16 sps:$4 sm:$0xff]  }
 0x184   :  { %3876 = vmatprep.subr.bf16.mxu0 %v6120_v46  ;;  %4245 = vmatprep.subr.bf16.mxu1 %v6123_v35  ;;  %v6130_v58 = vld [vmem:[%s8451_s1 + $0xc60] ss:$16 sps:$4 sm:$0xff]   ;;  %v6133_v59 = vld [vmem:[%s8451_s1 + $0xc68] ss:$16 sps:$4 sm:$0xff]   ;;  %v6138_v60 = vld [vmem:[%s8451_s1 + $0xc84] ss:$16 sps:$4 sm:$0xff]  }
 0x185   :  { %3906 = vmatprep.mubr.bf16.mxu0 %v7744_v47  ;;  %4275 = vmatprep.mubr.bf16.mxu1 %v7744_v47  ;;  %v6141_v61 = vld [vmem:[%s8451_s1 + $0xc8c] ss:$16 sps:$4 sm:$0xff]   ;;  %v6136_v62 = vld [vmem:[%s8451_s1 + $0xc80] ss:$16 sps:$4 sm:$0xff]   ;;  %v6139_v63 = vld [vmem:[%s8451_s1 + $0xc88] ss:$16 sps:$4 sm:$0xff]  }
 0x186   :  { %v6144_v0 = vld [vmem:[%s8451_s1 + $0xca4] ss:$16 sps:$4 sm:$0xff]   ;;  %v6147_v1 = vld [vmem:[%s8451_s1 + $0xcac] ss:$16 sps:$4 sm:$0xff]   ;;  %v6142_v2 = vld [vmem:[%s8451_s1 + $0xca0] ss:$16 sps:$4 sm:$0xff]  }
 0x187   :  { %3877 = vmatpush1.bf16.msra.mxu0 %v6118_v48  ;;  %4246 = vmatpush1.bf16.msra.mxu1 %v6121_v50  ;;  %v6145_v3 = vld [vmem:[%s8451_s1 + $0xca8] ss:$16 sps:$4 sm:$0xff]   ;;  %v6150_v4 = vld [vmem:[%s8451_s1 + $0xcc4] ss:$16 sps:$4 sm:$0xff]   ;;  %v6153_v5 = vld [vmem:[%s8451_s1 + $0xccc] ss:$16 sps:$4 sm:$0xff]   ;;  %v7930_v48 = vrot.slane %v7713_v38, %v6636_v49 }
 0x188   :  { %3878 = vmatprep.subr.bf16.mxu0 %v6126_v51  ;;  %4247 = vmatprep.subr.bf16.mxu1 %v6129_v53  ;;  %v6148_v6 = vld [vmem:[%s8451_s1 + $0xcc0] ss:$16 sps:$4 sm:$0xff]   ;;  %v6151_v7 = vld [vmem:[%s8451_s1 + $0xcc8] ss:$16 sps:$4 sm:$0xff]   ;;  %v6156_v8 = vld [vmem:[%s8451_s1 + $0xce4] ss:$16 sps:$4 sm:$0xff]  }
 0x189   :  { %v6159_v9 = vld [vmem:[%s8451_s1 + $0xcec] ss:$16 sps:$4 sm:$0xff]   ;;  %v6154_v10 = vld [vmem:[%s8451_s1 + $0xce0] ss:$16 sps:$4 sm:$0xff]   ;;  %v6157_v11 = vld [vmem:[%s8451_s1 + $0xce8] ss:$16 sps:$4 sm:$0xff]  }
 0x18a   :  { %v6162_v12 = vld [vmem:[%s8451_s1 + $0xd04] ss:$16 sps:$4 sm:$0xff]   ;;  %v6165_v52 = vld [vmem:[%s8451_s1 + $0xd0c] ss:$16 sps:$4 sm:$0xff]   ;;  %v6160_v15 = vld [vmem:[%s8451_s1 + $0xd00] ss:$16 sps:$4 sm:$0xff]  }
 0x18b   :  { %3879 = vmatpush1.bf16.msra.mxu0 %v6124_v54  ;;  %4248 = vmatpush1.bf16.msra.mxu1 %v6127_v55  ;;  %v6163_v16 = vld [vmem:[%s8451_s1 + $0xd08] ss:$16 sps:$4 sm:$0xff]   ;;  %v6168_v17 = vld [vmem:[%s8451_s1 + $0xd24] ss:$16 sps:$4 sm:$0xff]   ;;  %v6171_v18 = vld [vmem:[%s8451_s1 + $0xd2c] ss:$16 sps:$4 sm:$0xff]   ;;  %v707_v54 = vcombine.high %v7744_v47, %v7744_v47 }
 0x18c   :  { %3880 = vmatprep.subr.bf16.mxu0 %v6132_v56  ;;  %4249 = vmatprep.subr.bf16.mxu1 %v6135_v57  ;;  %v6166_v19 = vld [vmem:[%s8451_s1 + $0xd20] ss:$16 sps:$4 sm:$0xff]   ;;  %v6169_v20 = vld [vmem:[%s8451_s1 + $0xd28] ss:$16 sps:$4 sm:$0xff]   ;;  %v6174_v22 = vld [vmem:[%s8451_s1 + $0xd44] ss:$16 sps:$4 sm:$0xff]  }
 0x18d   :  { %v6177_v23 = vld [vmem:[%s8451_s1 + $0xd4c] ss:$16 sps:$4 sm:$0xff]   ;;  %v6172_v24 = vld [vmem:[%s8451_s1 + $0xd40] ss:$16 sps:$4 sm:$0xff]   ;;  %v6175_v13 = vld [vmem:[%s8451_s1 + $0xd48] ss:$16 sps:$4 sm:$0xff]  }
 0x18e   :  { %v6180_v27 = vld [vmem:[%s8451_s1 + $0xd64] ss:$16 sps:$4 sm:$0xff]   ;;  %v6183_v28 = vld [vmem:[%s8451_s1 + $0xd6c] ss:$16 sps:$4 sm:$0xff]   ;;  %v6178_v29 = vld [vmem:[%s8451_s1 + $0xd60] ss:$16 sps:$4 sm:$0xff]  }
 0x18f   :  { %3881 = vmatpush1.bf16.msra.mxu0 %v6130_v58  ;;  %4250 = vmatpush1.bf16.msra.mxu1 %v6133_v59  ;;  %v6181_v14 = vld [vmem:[%s8451_s1 + $0xd68] ss:$16 sps:$4 sm:$0xff]   ;;  %v6186_v30 = vld [vmem:[%s8451_s1 + $0xd84] ss:$16 sps:$4 sm:$0xff]   ;;  %v6189_v31 = vld [vmem:[%s8451_s1 + $0xd8c] ss:$16 sps:$4 sm:$0xff]  }
 0x190   :  { %3882 = vmatprep.subr.bf16.mxu0 %v6138_v60  ;;  %4251 = vmatprep.subr.bf16.mxu1 %v6141_v61  ;;  %v6184_v25 = vld [vmem:[%s8451_s1 + $0xd80] ss:$16 sps:$4 sm:$0xff]   ;;  %v6187_v32 = vld [vmem:[%s8451_s1 + $0xd88] ss:$16 sps:$4 sm:$0xff]   ;;  %v6192_v33 = vld [vmem:[%s8451_s1 + $0xda4] ss:$16 sps:$4 sm:$0xff]  }
 0x191   :  { %v6195_v26 = vld [vmem:[%s8451_s1 + $0xdac] ss:$16 sps:$4 sm:$0xff]   ;;  %v6190_v36 = vld [vmem:[%s8451_s1 + $0xda0] ss:$16 sps:$4 sm:$0xff]   ;;  %v6193_v37 = vld [vmem:[%s8451_s1 + $0xda8] ss:$16 sps:$4 sm:$0xff]  }
 0x192   :  { %v6198_v21 = vld [vmem:[%s8451_s1 + $0xdc4] ss:$16 sps:$4 sm:$0xff]   ;;  %v6201_v39 = vld [vmem:[%s8451_s1 + $0xdcc] ss:$16 sps:$4 sm:$0xff]   ;;  %v6196_v40 = vld [vmem:[%s8451_s1 + $0xdc0] ss:$16 sps:$4 sm:$0xff]  }
 0x193   :  { %3883 = vmatpush1.bf16.msra.mxu0 %v6136_v62  ;;  %4252 = vmatpush1.bf16.msra.mxu1 %v6139_v63  ;;  %v6199_v41 = vld [vmem:[%s8451_s1 + $0xdc8] ss:$16 sps:$4 sm:$0xff]   ;;  %v6204_v34 = vld [vmem:[%s8451_s1 + $0xde4] ss:$16 sps:$4 sm:$0xff]   ;;  %v6207_v42 = vld [vmem:[%s8451_s1 + $0xdec] ss:$16 sps:$4 sm:$0xff]  }
 0x194   :  { %3884 = vmatprep.subr.bf16.mxu0 %v6144_v0  ;;  %4253 = vmatprep.subr.bf16.mxu1 %v6147_v1  ;;  %v6202_v44 = vld [vmem:[%s8451_s1 + $0xde0] ss:$16 sps:$4 sm:$0xff]   ;;  %v6205_v45 = vld [vmem:[%s8451_s1 + $0xde8] ss:$16 sps:$4 sm:$0xff]   ;;  %v6211_v46 = vld [vmem:[%s8451_s1 + $0xe04] ss:$16 sps:$4 sm:$0xff]  }
 0x195   :  { %v6214_v35 = vld [vmem:[%s8451_s1 + $0xe0c] ss:$16 sps:$4 sm:$0xff]   ;;  %v6209_v50 = vld [vmem:[%s8451_s1 + $0xe00] ss:$16 sps:$4 sm:$0xff]   ;;  %v6212_v51 = vld [vmem:[%s8451_s1 + $0xe08] ss:$16 sps:$4 sm:$0xff]  }
 0x196   :  { %v6217_v53 = vld [vmem:[%s8451_s1 + $0xe24] ss:$16 sps:$4 sm:$0xff]   ;;  %v6220_v38 = vld [vmem:[%s8451_s1 + $0xe2c] ss:$16 sps:$4 sm:$0xff]   ;;  %v6215_v55 = vld [vmem:[%s8451_s1 + $0xe20] ss:$16 sps:$4 sm:$0xff]  }
 0x197   :  { %3885 = vmatpush1.bf16.msra.mxu0 %v6142_v2  ;;  %4254 = vmatpush1.bf16.msra.mxu1 %v6145_v3  ;;  %v6218_v56 = vld [vmem:[%s8451_s1 + $0xe28] ss:$16 sps:$4 sm:$0xff]   ;;  %v6223_v47 = vld [vmem:[%s8451_s1 + $0xe44] ss:$16 sps:$4 sm:$0xff]   ;;  %v6226_v57 = vld [vmem:[%s8451_s1 + $0xe4c] ss:$16 sps:$4 sm:$0xff]  }
 0x198   :  { %3886 = vmatprep.subr.bf16.mxu0 %v6150_v4  ;;  %4255 = vmatprep.subr.bf16.mxu1 %v6153_v5  ;;  %v6221_v58 = vld [vmem:[%s8451_s1 + $0xe40] ss:$16 sps:$4 sm:$0xff]   ;;  %v6224_v59 = vld [vmem:[%s8451_s1 + $0xe48] ss:$16 sps:$4 sm:$0xff]   ;;  %v6229_v60 = vld [vmem:[%s8451_s1 + $0xe64] ss:$16 sps:$4 sm:$0xff]  }
 0x199   :  { %v6232_v61 = vld [vmem:[%s8451_s1 + $0xe6c] ss:$16 sps:$4 sm:$0xff]   ;;  %v6227_v62 = vld [vmem:[%s8451_s1 + $0xe60] ss:$16 sps:$4 sm:$0xff]   ;;  %v6230_v63 = vld [vmem:[%s8451_s1 + $0xe68] ss:$16 sps:$4 sm:$0xff]  }
 0x19a   :  { %v6235_v0 = vld [vmem:[%s8451_s1 + $0xe84] ss:$16 sps:$4 sm:$0xff]   ;;  %v6238_v1 = vld [vmem:[%s8451_s1 + $0xe8c] ss:$16 sps:$4 sm:$0xff]   ;;  %v6233_v2 = vld [vmem:[%s8451_s1 + $0xe80] ss:$16 sps:$4 sm:$0xff]  }
 0x19b   :  { %3887 = vmatpush1.bf16.msra.mxu0 %v6148_v6  ;;  %4256 = vmatpush1.bf16.msra.mxu1 %v6151_v7  ;;  %v6236_v3 = vld [vmem:[%s8451_s1 + $0xe88] ss:$16 sps:$4 sm:$0xff]   ;;  %v6241_v4 = vld [vmem:[%s8451_s1 + $0xea4] ss:$16 sps:$4 sm:$0xff]   ;;  %v6244_v5 = vld [vmem:[%s8451_s1 + $0xeac] ss:$16 sps:$4 sm:$0xff]  }
 0x19c   :  { %3888 = vmatprep.subr.bf16.mxu0 %v6156_v8  ;;  %4257 = vmatprep.subr.bf16.mxu1 %v6159_v9  ;;  %v6239_v6 = vld [vmem:[%s8451_s1 + $0xea0] ss:$16 sps:$4 sm:$0xff]   ;;  %v6242_v7 = vld [vmem:[%s8451_s1 + $0xea8] ss:$16 sps:$4 sm:$0xff]   ;;  %v6247_v8 = vld [vmem:[%s8451_s1 + $0xec4] ss:$16 sps:$4 sm:$0xff]  }
 0x19d   :  { %v6250_v9 = vld [vmem:[%s8451_s1 + $0xecc] ss:$16 sps:$4 sm:$0xff]   ;;  %vm4799_vm4 = vcmask 91136  }
 0x19f   :  { %3889 = vmatpush1.bf16.msra.mxu0 %v6154_v10  ;;  %4258 = vmatpush1.bf16.msra.mxu1 %v6157_v11  ;;  %v6245_v10 = vld [vmem:[%s8451_s1 + $0xec0] ss:$16 sps:$4 sm:$0xff]   ;;  %v6248_v11 = vld [vmem:[%s8451_s1 + $0xec8] ss:$16 sps:$4 sm:$0xff]  }
 0x1a0   :  { %3890 = vmatprep.subr.bf16.mxu0 %v6162_v12  ;;  %4259 = vmatprep.subr.bf16.mxu1 %v6165_v52  ;;  %v6253_v12 = vld [vmem:[%s8451_s1 + $0xee4] ss:$16 sps:$4 sm:$0xff]   ;;  %v6256_v52 = vld [vmem:[%s8451_s1 + $0xeec] ss:$16 sps:$4 sm:$0xff]  }
 0x1a3   :  { %3891 = vmatpush1.bf16.msra.mxu0 %v6160_v15  ;;  %4260 = vmatpush1.bf16.msra.mxu1 %v6163_v16  ;;  %v6251_v15 = vld [vmem:[%s8451_s1 + $0xee0] ss:$16 sps:$4 sm:$0xff]   ;;  %v6254_v16 = vld [vmem:[%s8451_s1 + $0xee8] ss:$16 sps:$4 sm:$0xff]  }
 0x1a4   :  { %3892 = vmatprep.subr.bf16.mxu0 %v6168_v17  ;;  %4261 = vmatprep.subr.bf16.mxu1 %v6171_v18  ;;  %v6259_v17 = vld [vmem:[%s8451_s1 + $0xf04] ss:$16 sps:$4 sm:$0xff]   ;;  %v6262_v18 = vld [vmem:[%s8451_s1 + $0xf0c] ss:$16 sps:$4 sm:$0xff]  }
 0x1a7   :  { %3893 = vmatpush1.bf16.msra.mxu0 %v6166_v19  ;;  %4262 = vmatpush1.bf16.msra.mxu1 %v6169_v20  ;;  %v6257_v19 = vld [vmem:[%s8451_s1 + $0xf00] ss:$16 sps:$4 sm:$0xff]   ;;  %v6260_v20 = vld [vmem:[%s8451_s1 + $0xf08] ss:$16 sps:$4 sm:$0xff]  }
 0x1a8   :  { %3894 = vmatprep.subr.bf16.mxu0 %v6174_v22  ;;  %4263 = vmatprep.subr.bf16.mxu1 %v6177_v23  ;;  %v6265_v22 = vld [vmem:[%s8451_s1 + $0xf24] ss:$16 sps:$4 sm:$0xff]   ;;  %v6268_v23 = vld [vmem:[%s8451_s1 + $0xf2c] ss:$16 sps:$4 sm:$0xff]  }
 0x1ab   :  { %3895 = vmatpush1.bf16.msra.mxu0 %v6172_v24  ;;  %4264 = vmatpush1.bf16.msra.mxu1 %v6175_v13  ;;  %v6263_v24 = vld [vmem:[%s8451_s1 + $0xf20] ss:$16 sps:$4 sm:$0xff]   ;;  %v6266_v13 = vld [vmem:[%s8451_s1 + $0xf28] ss:$16 sps:$4 sm:$0xff]  }
 0x1ac   :  { %3896 = vmatprep.subr.bf16.mxu0 %v6180_v27  ;;  %4265 = vmatprep.subr.bf16.mxu1 %v6183_v28  ;;  %v6271_v27 = vld [vmem:[%s8451_s1 + $0xf44] ss:$16 sps:$4 sm:$0xff]   ;;  %v6274_v28 = vld [vmem:[%s8451_s1 + $0xf4c] ss:$16 sps:$4 sm:$0xff]  }
 0x1af   :  { %3897 = vmatpush1.bf16.msra.mxu0 %v6178_v29  ;;  %4266 = vmatpush1.bf16.msra.mxu1 %v6181_v14  ;;  %v6269_v29 = vld [vmem:[%s8451_s1 + $0xf40] ss:$16 sps:$4 sm:$0xff]   ;;  %v6272_v14 = vld [vmem:[%s8451_s1 + $0xf48] ss:$16 sps:$4 sm:$0xff]  }
 0x1b0   :  { %3898 = vmatprep.subr.bf16.mxu0 %v6186_v30  ;;  %4267 = vmatprep.subr.bf16.mxu1 %v6189_v31  ;;  %v6277_v30 = vld [vmem:[%s8451_s1 + $0xf64] ss:$16 sps:$4 sm:$0xff]   ;;  %v6280_v31 = vld [vmem:[%s8451_s1 + $0xf6c] ss:$16 sps:$4 sm:$0xff]  }
 0x1b3   :  { %3899 = vmatpush1.bf16.msra.mxu0 %v6184_v25  ;;  %4268 = vmatpush1.bf16.msra.mxu1 %v6187_v32  ;;  %v6275_v25 = vld [vmem:[%s8451_s1 + $0xf60] ss:$16 sps:$4 sm:$0xff]   ;;  %v6278_v32 = vld [vmem:[%s8451_s1 + $0xf68] ss:$16 sps:$4 sm:$0xff]  }
 0x1b4   :  { %3900 = vmatprep.subr.bf16.mxu0 %v6192_v33  ;;  %4269 = vmatprep.subr.bf16.mxu1 %v6195_v26  ;;  %v6283_v33 = vld [vmem:[%s8451_s1 + $0xf84] ss:$16 sps:$4 sm:$0xff]   ;;  %v6286_v26 = vld [vmem:[%s8451_s1 + $0xf8c] ss:$16 sps:$4 sm:$0xff]  }
 0x1b7   :  { %3901 = vmatpush1.bf16.msra.mxu0 %v6190_v36  ;;  %4270 = vmatpush1.bf16.msra.mxu1 %v6193_v37  ;;  %v6281_v36 = vld [vmem:[%s8451_s1 + $0xf80] ss:$16 sps:$4 sm:$0xff]   ;;  %v6284_v37 = vld [vmem:[%s8451_s1 + $0xf88] ss:$16 sps:$4 sm:$0xff]  }
 0x1b8   :  { %3902 = vmatprep.subr.bf16.mxu0 %v6198_v21  ;;  %4271 = vmatprep.subr.bf16.mxu1 %v6201_v39  ;;  %v6289_v21 = vld [vmem:[%s8451_s1 + $0xfa4] ss:$16 sps:$4 sm:$0xff]   ;;  %v6292_v39 = vld [vmem:[%s8451_s1 + $0xfac] ss:$16 sps:$4 sm:$0xff]  }
 0x1bb   :  { %3903 = vmatpush1.bf16.msra.mxu0 %v6196_v40  ;;  %4272 = vmatpush1.bf16.msra.mxu1 %v6199_v41  ;;  %v6287_v40 = vld [vmem:[%s8451_s1 + $0xfa0] ss:$16 sps:$4 sm:$0xff]   ;;  %v6290_v41 = vld [vmem:[%s8451_s1 + $0xfa8] ss:$16 sps:$4 sm:$0xff]  }
 0x1bc   :  { %3904 = vmatprep.subr.bf16.mxu0 %v6204_v34  ;;  %4273 = vmatprep.subr.bf16.mxu1 %v6207_v42  ;;  %v6295_v34 = vld [vmem:[%s8451_s1 + $0xfc4] ss:$16 sps:$4 sm:$0xff]   ;;  %v6298_v42 = vld [vmem:[%s8451_s1 + $0xfcc] ss:$16 sps:$4 sm:$0xff]  }
 0x1bf   :  { %3905 = vmatpush1.bf16.msra.mxu0 %v6202_v44  ;;  %4274 = vmatpush1.bf16.msra.mxu1 %v6205_v45  ;;  %v6293_v44 = vld [vmem:[%s8451_s1 + $0xfc0] ss:$16 sps:$4 sm:$0xff]   ;;  %v6296_v45 = vld [vmem:[%s8451_s1 + $0xfc8] ss:$16 sps:$4 sm:$0xff]  }
 0x1c0   :  { %3915 = vmatprep.subr.bf16.mxu0 %v6211_v46  ;;  %4284 = vmatprep.subr.bf16.mxu1 %v6214_v35  ;;  %v6301_v46 = vld [vmem:[%s8451_s1 + $0xfe4] ss:$16 sps:$4 sm:$0xff]   ;;  %v6304_v35 = vld [vmem:[%s8451_s1 + $0xfec] ss:$16 sps:$4 sm:$0xff]  }
 0x1c2   :  { %3907 = vmatmul.mubr.bf16.vlgmr.msra.gmra.mrb[0].mxu0 %v7930_v48  ;;  %4276 = vmatmul.mubr.bf16.vlgmr.msra.gmra.mrb[0].mxu1 %v7930_v48 }
 0x1c3   :  { %3916 = vmatpush1.bf16.msra.mxu0 %v6209_v50  ;;  %4285 = vmatpush1.bf16.msra.mxu1 %v6212_v51  ;;  %v8119_v50 = vld.sshfl [vmem:[%s8450_s0 + $0x10] sm:$0x11 pattern:$0x75316420] }
 0x1c4   :  { %3917 = vmatprep.subr.bf16.mxu0 %v6217_v53  ;;  %4286 = vmatprep.subr.bf16.mxu1 %v6220_v38  ;;  %v6299_v51 = vld [vmem:[%s8451_s1 + $0xfe0] ss:$16 sps:$4 sm:$0xff]   ;;  %v6302_v53 = vld [vmem:[%s8451_s1 + $0xfe8] ss:$16 sps:$4 sm:$0xff]   ;;  %v6307_v38 = vld [vmem:[%s8451_s1 + $0x1004] ss:$16 sps:$4 sm:$0xff]  }
 0x1c5   :  { %3947 = vmatprep.mubr.bf16.mxu0 %v707_v54  ;;  %4316 = vmatprep.mubr.bf16.mxu1 %v707_v54  ;;  %v6310_v54 = vld [vmem:[%s8451_s1 + $0x100c] ss:$16 sps:$4 sm:$0xff]  }
 0x1c7   :  { %3918 = vmatpush1.bf16.msra.mxu0 %v6215_v55  ;;  %4287 = vmatpush1.bf16.msra.mxu1 %v6218_v56  ;;  %v715_v55 = vcombine.high %v8119_v50, %v8119_v50  ;;  %v705_v56 = vcombine.high %v7930_v48, %v7930_v48  ;;  %v6316_v48 = vld [vmem:[%s8451_s1 + $0x102c] ss:$16 sps:$4 sm:$0xff]  }
 0x1c8   :  { %3919 = vmatprep.subr.bf16.mxu0 %v6223_v47  ;;  %4288 = vmatprep.subr.bf16.mxu1 %v6226_v57  ;;  %v6305_v47 = vld [vmem:[%s8451_s1 + $0x1000] ss:$16 sps:$4 sm:$0xff]   ;;  %v6308_v57 = vld [vmem:[%s8451_s1 + $0x1008] ss:$16 sps:$4 sm:$0xff]  }
 0x1cb   :  { %3920 = vmatpush1.bf16.msra.mxu0 %v6221_v58  ;;  %4289 = vmatpush1.bf16.msra.mxu1 %v6224_v59  ;;  %v6313_v58 = vld [vmem:[%s8451_s1 + $0x1024] ss:$16 sps:$4 sm:$0xff]   ;;  %v729_v59 = vrot.slane %v715_v55, %v6636_v49 }
 0x1cc   :  { %3921 = vmatprep.subr.bf16.mxu0 %v6229_v60  ;;  %4290 = vmatprep.subr.bf16.mxu1 %v6232_v61  ;;  %v6311_v60 = vld [vmem:[%s8451_s1 + $0x1020] ss:$16 sps:$4 sm:$0xff]   ;;  %v6314_v61 = vld [vmem:[%s8451_s1 + $0x1028] ss:$16 sps:$4 sm:$0xff]   ;;  %v6397_v55 = vld [vmem:[%s8451_s1 + $0x11e4] ss:$16 sps:$4 sm:$0xff]  }
 0x1cf   :  { %3922 = vmatpush1.bf16.msra.mxu0 %v6227_v62  ;;  %4291 = vmatpush1.bf16.msra.mxu1 %v6230_v63  ;;  %v6319_v62 = vld [vmem:[%s8451_s1 + $0x1044] ss:$16 sps:$4 sm:$0xff]   ;;  %v6322_v63 = vld [vmem:[%s8451_s1 + $0x104c] ss:$16 sps:$4 sm:$0xff]  }
 0x1d0   :  { %3923 = vmatprep.subr.bf16.mxu0 %v6235_v0  ;;  %4292 = vmatprep.subr.bf16.mxu1 %v6238_v1  ;;  %v6317_v0 = vld [vmem:[%s8451_s1 + $0x1040] ss:$16 sps:$4 sm:$0xff]   ;;  %v6320_v1 = vld [vmem:[%s8451_s1 + $0x1048] ss:$16 sps:$4 sm:$0xff]  }
 0x1d3   :  { %3924 = vmatpush1.bf16.msra.mxu0 %v6233_v2  ;;  %4293 = vmatpush1.bf16.msra.mxu1 %v6236_v3  ;;  %v6325_v2 = vld [vmem:[%s8451_s1 + $0x1064] ss:$16 sps:$4 sm:$0xff]   ;;  %v6328_v3 = vld [vmem:[%s8451_s1 + $0x106c] ss:$16 sps:$4 sm:$0xff]  }
 0x1d4   :  { %3925 = vmatprep.subr.bf16.mxu0 %v6241_v4  ;;  %4294 = vmatprep.subr.bf16.mxu1 %v6244_v5  ;;  %v6323_v4 = vld [vmem:[%s8451_s1 + $0x1060] ss:$16 sps:$4 sm:$0xff]   ;;  %v6326_v5 = vld [vmem:[%s8451_s1 + $0x1068] ss:$16 sps:$4 sm:$0xff]  }
 0x1d7   :  { %3926 = vmatpush1.bf16.msra.mxu0 %v6239_v6  ;;  %4295 = vmatpush1.bf16.msra.mxu1 %v6242_v7  ;;  %v6331_v6 = vld [vmem:[%s8451_s1 + $0x1084] ss:$16 sps:$4 sm:$0xff]   ;;  %v6334_v7 = vld [vmem:[%s8451_s1 + $0x108c] ss:$16 sps:$4 sm:$0xff]  }
 0x1d8   :  { %3927 = vmatprep.subr.bf16.mxu0 %v6247_v8  ;;  %4296 = vmatprep.subr.bf16.mxu1 %v6250_v9  ;;  %v6329_v8 = vld [vmem:[%s8451_s1 + $0x1080] ss:$16 sps:$4 sm:$0xff]   ;;  %v6332_v9 = vld [vmem:[%s8451_s1 + $0x1088] ss:$16 sps:$4 sm:$0xff]  }
 0x1db   :  { %3928 = vmatpush1.bf16.msra.mxu0 %v6245_v10  ;;  %4297 = vmatpush1.bf16.msra.mxu1 %v6248_v11  ;;  %v6337_v10 = vld [vmem:[%s8451_s1 + $0x10a4] ss:$16 sps:$4 sm:$0xff]   ;;  %v6340_v11 = vld [vmem:[%s8451_s1 + $0x10ac] ss:$16 sps:$4 sm:$0xff]  }
 0x1dc   :  { %3929 = vmatprep.subr.bf16.mxu0 %v6253_v12  ;;  %4298 = vmatprep.subr.bf16.mxu1 %v6256_v52  ;;  %v6335_v12 = vld [vmem:[%s8451_s1 + $0x10a0] ss:$16 sps:$4 sm:$0xff]   ;;  %v6338_v52 = vld [vmem:[%s8451_s1 + $0x10a8] ss:$16 sps:$4 sm:$0xff]  }
 0x1df   :  { %3930 = vmatpush1.bf16.msra.mxu0 %v6251_v15  ;;  %4299 = vmatpush1.bf16.msra.mxu1 %v6254_v16  ;;  %v6343_v15 = vld [vmem:[%s8451_s1 + $0x10c4] ss:$16 sps:$4 sm:$0xff]   ;;  %v6346_v16 = vld [vmem:[%s8451_s1 + $0x10cc] ss:$16 sps:$4 sm:$0xff]  }
 0x1e0   :  { %3931 = vmatprep.subr.bf16.mxu0 %v6259_v17  ;;  %4300 = vmatprep.subr.bf16.mxu1 %v6262_v18  ;;  %v6341_v17 = vld [vmem:[%s8451_s1 + $0x10c0] ss:$16 sps:$4 sm:$0xff]   ;;  %v6344_v18 = vld [vmem:[%s8451_s1 + $0x10c8] ss:$16 sps:$4 sm:$0xff]  }
 0x1e3   :  { %3932 = vmatpush1.bf16.msra.mxu0 %v6257_v19  ;;  %4301 = vmatpush1.bf16.msra.mxu1 %v6260_v20  ;;  %v6349_v19 = vld [vmem:[%s8451_s1 + $0x10e4] ss:$16 sps:$4 sm:$0xff]   ;;  %v6352_v20 = vld [vmem:[%s8451_s1 + $0x10ec] ss:$16 sps:$4 sm:$0xff]  }
 0x1e4   :  { %3933 = vmatprep.subr.bf16.mxu0 %v6265_v22  ;;  %4302 = vmatprep.subr.bf16.mxu1 %v6268_v23  ;;  %v6347_v22 = vld [vmem:[%s8451_s1 + $0x10e0] ss:$16 sps:$4 sm:$0xff]   ;;  %v6350_v23 = vld [vmem:[%s8451_s1 + $0x10e8] ss:$16 sps:$4 sm:$0xff]  }
 0x1e7   :  { %3934 = vmatpush1.bf16.msra.mxu0 %v6263_v24  ;;  %4303 = vmatpush1.bf16.msra.mxu1 %v6266_v13  ;;  %v6355_v24 = vld [vmem:[%s8451_s1 + $0x1104] ss:$16 sps:$4 sm:$0xff]   ;;  %v6358_v13 = vld [vmem:[%s8451_s1 + $0x110c] ss:$16 sps:$4 sm:$0xff]  }
 0x1e8   :  { %3935 = vmatprep.subr.bf16.mxu0 %v6271_v27  ;;  %4304 = vmatprep.subr.bf16.mxu1 %v6274_v28  ;;  %v6353_v27 = vld [vmem:[%s8451_s1 + $0x1100] ss:$16 sps:$4 sm:$0xff]   ;;  %v6356_v28 = vld [vmem:[%s8451_s1 + $0x1108] ss:$16 sps:$4 sm:$0xff]  }
 0x1eb   :  { %3936 = vmatpush1.bf16.msra.mxu0 %v6269_v29  ;;  %4305 = vmatpush1.bf16.msra.mxu1 %v6272_v14  ;;  %v6361_v29 = vld [vmem:[%s8451_s1 + $0x1124] ss:$16 sps:$4 sm:$0xff]   ;;  %v6364_v14 = vld [vmem:[%s8451_s1 + $0x112c] ss:$16 sps:$4 sm:$0xff]  }
 0x1ec   :  { %3937 = vmatprep.subr.bf16.mxu0 %v6277_v30  ;;  %4306 = vmatprep.subr.bf16.mxu1 %v6280_v31  ;;  %v6359_v30 = vld [vmem:[%s8451_s1 + $0x1120] ss:$16 sps:$4 sm:$0xff]   ;;  %v6362_v31 = vld [vmem:[%s8451_s1 + $0x1128] ss:$16 sps:$4 sm:$0xff]  }
 0x1ef   :  { %3938 = vmatpush1.bf16.msra.mxu0 %v6275_v25  ;;  %4307 = vmatpush1.bf16.msra.mxu1 %v6278_v32  ;;  %v6367_v25 = vld [vmem:[%s8451_s1 + $0x1144] ss:$16 sps:$4 sm:$0xff]   ;;  %v6370_v32 = vld [vmem:[%s8451_s1 + $0x114c] ss:$16 sps:$4 sm:$0xff]  }
 0x1f0   :  { %3939 = vmatprep.subr.bf16.mxu0 %v6283_v33  ;;  %4308 = vmatprep.subr.bf16.mxu1 %v6286_v26  ;;  %v6365_v33 = vld [vmem:[%s8451_s1 + $0x1140] ss:$16 sps:$4 sm:$0xff]   ;;  %v6368_v26 = vld [vmem:[%s8451_s1 + $0x1148] ss:$16 sps:$4 sm:$0xff]  }
 0x1f3   :  { %3940 = vmatpush1.bf16.msra.mxu0 %v6281_v36  ;;  %4309 = vmatpush1.bf16.msra.mxu1 %v6284_v37  ;;  %v6373_v36 = vld [vmem:[%s8451_s1 + $0x1164] ss:$16 sps:$4 sm:$0xff]   ;;  %v6376_v37 = vld [vmem:[%s8451_s1 + $0x116c] ss:$16 sps:$4 sm:$0xff]  }
 0x1f4   :  { %3941 = vmatprep.subr.bf16.mxu0 %v6289_v21  ;;  %4310 = vmatprep.subr.bf16.mxu1 %v6292_v39  ;;  %v6371_v21 = vld [vmem:[%s8451_s1 + $0x1160] ss:$16 sps:$4 sm:$0xff]   ;;  %v6374_v39 = vld [vmem:[%s8451_s1 + $0x1168] ss:$16 sps:$4 sm:$0xff]  }
 0x1f7   :  { %3942 = vmatpush1.bf16.msra.mxu0 %v6287_v40  ;;  %4311 = vmatpush1.bf16.msra.mxu1 %v6290_v41  ;;  %v6379_v40 = vld [vmem:[%s8451_s1 + $0x1184] ss:$16 sps:$4 sm:$0xff]   ;;  %v6382_v41 = vld [vmem:[%s8451_s1 + $0x118c] ss:$16 sps:$4 sm:$0xff]  }
 0x1f8   :  { %3943 = vmatprep.subr.bf16.mxu0 %v6295_v34  ;;  %4312 = vmatprep.subr.bf16.mxu1 %v6298_v42  ;;  %v6377_v34 = vld [vmem:[%s8451_s1 + $0x1180] ss:$16 sps:$4 sm:$0xff]   ;;  %v6380_v42 = vld [vmem:[%s8451_s1 + $0x1188] ss:$16 sps:$4 sm:$0xff]  }
 0x1fb   :  { %3944 = vmatpush1.bf16.msra.mxu0 %v6293_v44  ;;  %4313 = vmatpush1.bf16.msra.mxu1 %v6296_v45  ;;  %v6385_v44 = vld [vmem:[%s8451_s1 + $0x11a4] ss:$16 sps:$4 sm:$0xff]   ;;  %v6388_v45 = vld [vmem:[%s8451_s1 + $0x11ac] ss:$16 sps:$4 sm:$0xff]  }
 0x1fc   :  { %3945 = vmatprep.subr.bf16.mxu0 %v6301_v46  ;;  %4314 = vmatprep.subr.bf16.mxu1 %v6304_v35  ;;  %v6383_v46 = vld [vmem:[%s8451_s1 + $0x11a0] ss:$16 sps:$4 sm:$0xff]   ;;  %v6386_v35 = vld [vmem:[%s8451_s1 + $0x11a8] ss:$16 sps:$4 sm:$0xff]  }
 0x1ff   :  { %3946 = vmatpush1.bf16.msra.mxu0 %v6299_v51  ;;  %4315 = vmatpush1.bf16.msra.mxu1 %v6302_v53  ;;  %v6391_v51 = vld [vmem:[%s8451_s1 + $0x11c4] ss:$16 sps:$4 sm:$0xff]   ;;  %v6394_v53 = vld [vmem:[%s8451_s1 + $0x11cc] ss:$16 sps:$4 sm:$0xff]  }
 0x200   :  { %3956 = vmatprep.subr.bf16.mxu0 %v6307_v38  ;;  %4325 = vmatprep.subr.bf16.mxu1 %v6310_v54  ;;  %v6389_v38 = vld [vmem:[%s8451_s1 + $0x11c0] ss:$16 sps:$4 sm:$0xff]   ;;  %v6392_v54 = vld [vmem:[%s8451_s1 + $0x11c8] ss:$16 sps:$4 sm:$0xff]  }
 0x202   :  { %3948 = vmatmul.mubr.bf16.vlgmr.msra.gmra.mrb[0].mxu0 %v705_v56  ;;  %4317 = vmatmul.mubr.bf16.vlgmr.msra.gmra.mrb[0].mxu1 %v705_v56  ;;  %v6400_v56 = vld [vmem:[%s8451_s1 + $0x11ec] ss:$16 sps:$4 sm:$0xff]  }
 0x203   :  { %3957 = vmatpush1.bf16.msra.mxu0 %v6305_v47  ;;  %4326 = vmatpush1.bf16.msra.mxu1 %v6308_v57  ;;  %v6395_v47 = vld [vmem:[%s8451_s1 + $0x11e0] ss:$16 sps:$4 sm:$0xff]   ;;  %v6398_v57 = vld [vmem:[%s8451_s1 + $0x11e8] ss:$16 sps:$4 sm:$0xff]  }
 0x204   :  { %3958 = vmatprep.subr.bf16.mxu0 %v6313_v58  ;;  %4327 = vmatprep.subr.bf16.mxu1 %v6316_v48  ;;  %v6401_v58 = vld [vmem:[%s8455_s5 + $0x40] sm:$0xff]  }
 0x205   :  { %3988 = vmatprep.mubr.bf16.mxu0 %v729_v59  ;;  %4357 = vmatprep.mubr.bf16.mxu1 %v729_v59  ;;  %v6402_v48 = vld [vmem:[%s8455_s5 + $0xc0] sm:$0xff]   ;;  %v722_v59 = vrot.slane %v8119_v50, %v6636_v49  ;;  %v6406_v49 = vld [vmem:[%s8455_s5 + $0xc8] sm:$0xff]  }
 0x206   :  { %v6407_v50 = vld [vmem:[%s8455_s5 + $0x8] sm:$0xff]  }
 0x207   :  { %3959 = vmatpush1.bf16.msra.mxu0 %v6311_v60  ;;  %4328 = vmatpush1.bf16.msra.mxu1 %v6314_v61  ;;  %v6403_v60 = vld [vmem:[%s8455_s5] sm:$0xff]  }
 0x208   :  { %3960 = vmatprep.subr.bf16.mxu0 %v6319_v62  ;;  %4329 = vmatprep.subr.bf16.mxu1 %v6322_v63  ;;  %v6404_v61 = vld [vmem:[%s8455_s5 + $0x80] sm:$0xff]   ;;  %v6405_v62 = vld [vmem:[%s8455_s5 + $0x48] sm:$0xff]  }
 0x209   :  { %v6408_v63 = vld [vmem:[%s8455_s5 + $0x88] sm:$0xff]  }
 0x20b   :  { %3961 = vmatpush1.bf16.msra.mxu0 %v6317_v0  ;;  %4330 = vmatpush1.bf16.msra.mxu1 %v6320_v1  ;;  %v6409_v0 = vld [vmem:[%s8455_s5 + $0x50] sm:$0xff]  }
 0x20c   :  { %3962 = vmatprep.subr.bf16.mxu0 %v6325_v2  ;;  %4331 = vmatprep.subr.bf16.mxu1 %v6328_v3  ;;  %v6410_v1 = vld [vmem:[%s8455_s5 + $0xd0] sm:$0xff]  }
 0x20d   :  { %v6411_v2 = vld [vmem:[%s8455_s5 + $0x10] sm:$0xff]  }
 0x20e   :  { %v6412_v3 = vld [vmem:[%s8455_s5 + $0x90] sm:$0xff]  }
 0x20f   :  { %3963 = vmatpush1.bf16.msra.mxu0 %v6323_v4  ;;  %4332 = vmatpush1.bf16.msra.mxu1 %v6326_v5  ;;  %v6413_v4 = vld [vmem:[%s8455_s5 + $0x58] sm:$0xff]  }
 0x210   :  { %3964 = vmatprep.subr.bf16.mxu0 %v6331_v6  ;;  %4333 = vmatprep.subr.bf16.mxu1 %v6334_v7  ;;  %v6414_v5 = vld [vmem:[%s8455_s5 + $0xd8] sm:$0xff]  }
 0x211   :  { %v6415_v6 = vld [vmem:[%s8455_s5 + $0x18] sm:$0xff]  }
 0x212   :  { %v6416_v7 = vld [vmem:[%s8455_s5 + $0x98] sm:$0xff]  }
 0x213   :  { %3965 = vmatpush1.bf16.msra.mxu0 %v6329_v8  ;;  %4334 = vmatpush1.bf16.msra.mxu1 %v6332_v9  ;;  %v6417_v8 = vld [vmem:[%s8455_s5 + $0x60] sm:$0xff]  }
 0x214   :  { %3966 = vmatprep.subr.bf16.mxu0 %v6337_v10  ;;  %4335 = vmatprep.subr.bf16.mxu1 %v6340_v11  ;;  %v6418_v9 = vld [vmem:[%s8455_s5 + $0xe0] sm:$0xff]  }
 0x215   :  { %v6419_v10 = vld [vmem:[%s8455_s5 + $0x20] sm:$0xff]  }
 0x216   :  { %v6420_v11 = vld [vmem:[%s8455_s5 + $0xa0] sm:$0xff]  }
 0x217   :  { %3967 = vmatpush1.bf16.msra.mxu0 %v6335_v12  ;;  %4336 = vmatpush1.bf16.msra.mxu1 %v6338_v52  ;;  %v6421_v12 = vld [vmem:[%s8455_s5 + $0x68] sm:$0xff]  }
 0x218   :  { %3968 = vmatprep.subr.bf16.mxu0 %v6343_v15  ;;  %4337 = vmatprep.subr.bf16.mxu1 %v6346_v16  ;;  %v6422_v52 = vld [vmem:[%s8455_s5 + $0xe8] sm:$0xff]  }
 0x219   :  { %v6423_v15 = vld [vmem:[%s8455_s5 + $0x28] sm:$0xff]  }
 0x21a   :  { %v6424_v16 = vld [vmem:[%s8455_s5 + $0xa8] sm:$0xff]  }
 0x21b   :  { %3969 = vmatpush1.bf16.msra.mxu0 %v6341_v17  ;;  %4338 = vmatpush1.bf16.msra.mxu1 %v6344_v18  ;;  %v6425_v17 = vld [vmem:[%s8455_s5 + $0x70] sm:$0xff]  }
 0x21c   :  { %3970 = vmatprep.subr.bf16.mxu0 %v6349_v19  ;;  %4339 = vmatprep.subr.bf16.mxu1 %v6352_v20  ;;  %v6426_v18 = vld [vmem:[%s8455_s5 + $0xf0] sm:$0xff]  }
 0x21d   :  { %v6427_v19 = vld [vmem:[%s8455_s5 + $0x30] sm:$0xff]  }
 0x21e   :  { %v6428_v20 = vld [vmem:[%s8455_s5 + $0xb0] sm:$0xff]  }
 0x21f   :  { %3971 = vmatpush1.bf16.msra.mxu0 %v6347_v22  ;;  %4340 = vmatpush1.bf16.msra.mxu1 %v6350_v23  ;;  %v6429_v22 = vld [vmem:[%s8455_s5 + $0x78] sm:$0xff]  }
 0x220   :  { %3972 = vmatprep.subr.bf16.mxu0 %v6355_v24  ;;  %4341 = vmatprep.subr.bf16.mxu1 %v6358_v13  ;;  %v6430_v23 = vld [vmem:[%s8455_s5 + $0xf8] sm:$0xff]  }
 0x221   :  { %v6431_v24 = vld [vmem:[%s8455_s5 + $0x38] sm:$0xff]  }
 0x222   :  { %v6432_v13 = vld [vmem:[%s8455_s5 + $0xb8] sm:$0xff]  }
 0x223   :  { %3973 = vmatpush1.bf16.msra.mxu0 %v6353_v27  ;;  %4342 = vmatpush1.bf16.msra.mxu1 %v6356_v28  ;;  %v4370_v27 = vsub.s32 0, %v6618_v43  ;;  %v4378_v28 = vsub.s32 2, %v6618_v43 }
 0x224   :  { %3974 = vmatprep.subr.bf16.mxu0 %v6361_v29  ;;  %4343 = vmatprep.subr.bf16.mxu1 %v6364_v14  ;;  %v4366_v29 = vld [vmem:[%s8452_s2] sm:$0xf]  ;;  %v4374_v14 = vsub.s32 1, %v6618_v43 }
 0x227   :  { %3975 = vmatpush1.bf16.msra.mxu0 %v6359_v30  ;;  %4344 = vmatpush1.bf16.msra.mxu1 %v6362_v31  ;;  %v4382_v30 = vsub.s32 3, %v6618_v43  ;;  %v4392_v31 = vld [vmem:[%s8453_s3] sm:$0xf] }
 0x228   :  { %3976 = vmatprep.subr.bf16.mxu0 %v6367_v25  ;;  %4345 = vmatprep.subr.bf16.mxu1 %v6370_v32  ;;  %v4371_v25 = vrot.slane %v4366_v29, %v4370_v27  ;;  %v4379_v32 = vrot.slane %v4366_v29, %v4378_v28 }
 0x22b   :  { %3977 = vmatpush1.bf16.msra.mxu0 %v6365_v33  ;;  %4346 = vmatpush1.bf16.msra.mxu1 %v6368_v26  ;;  %v4422_v33 = vld [vmem:[%s8454_s4] sm:$0xf]  ;;  %v4375_v26 = vrot.slane %v4366_v29, %v4374_v14  ;;  %s6460_s4 = smov [#allocation2]  }
 0x22c   :  { %3978 = vmatprep.subr.bf16.mxu0 %v6373_v36  ;;  %4347 = vmatprep.subr.bf16.mxu1 %v6376_v37  ;;  %v4383_v36 = vrot.slane %v4366_v29, %v4382_v30  ;;  %v4397_v37 = vrot.slane %v4392_v31, %v4370_v27  ;;  %v4427_v43 = vrot.slane %v4422_v33, %v4370_v27  ;;  %s4807_s23 = sshll.u32 %s6460_s4, 4  ;;  %s4808_s23 = int_to_ptr.vmem [resolvable:$true] %s4807_s23 }
 0x22d   :  { %s6435_s24 = scalar_lea.vmem %s4808_s23, 32  ;;  %p6440_p1 = scmp.lt.s32.totalorder %s4808_s23, %s4808_s23 }
 0x22e   :  { %p6436_p0 = scmp.ne.s32.totalorder %s4808_s23, %s6435_s24  ;;  %p6441_p2 = scmp.lt.s32.totalorder %s6435_s24, %s6435_s24 }
 0x22f   :  { %3979 = vmatpush1.bf16.msra.mxu0 %v6371_v21  ;;  %4348 = vmatpush1.bf16.msra.mxu1 %v6374_v39  ;;  %v4405_v21 = vrot.slane %v4392_v31, %v4378_v28 }
 0x230   :  { %3980 = vmatprep.subr.bf16.mxu0 %v6379_v40  ;;  %4349 = vmatprep.subr.bf16.mxu1 %v6382_v41  ;;  %v4401_v41 = vrot.slane %v4392_v31, %v4374_v14  ;;  %p6442_p3 = por %p6441_p2, %p6440_p1 }
 0x232   :  { %p6443_p4 = pnand %p6442_p3, %p6436_p0 }
 0x233   :  { %3981 = vmatpush1.bf16.msra.mxu0 %v6377_v34  ;;  %4350 = vmatpush1.bf16.msra.mxu1 %v6380_v42  ;;  %v4409_v34 = vrot.slane %v4392_v31, %v4382_v30 }
 0x234   :  { %3982 = vmatprep.subr.bf16.mxu0 %v6385_v44  ;;  %4351 = vmatprep.subr.bf16.mxu1 %v6388_v45  ;;  %v4435_v45 = vrot.slane %v4422_v33, %v4378_v28 }
 0x237   :  { %3983 = vmatpush1.bf16.msra.mxu0 %v6383_v46  ;;  %4352 = vmatpush1.bf16.msra.mxu1 %v6386_v35 }
 0x238   :  { %3984 = vmatprep.subr.bf16.mxu0 %v6391_v51  ;;  %4353 = vmatprep.subr.bf16.mxu1 %v6394_v53  ;;  %v4431_v53 = vrot.slane %v4422_v33, %v4374_v14 }
 0x23b   :  { %3985 = vmatpush1.bf16.msra.mxu0 %v6389_v38  ;;  %4354 = vmatpush1.bf16.msra.mxu1 %v6392_v54  ;;  %v4439_v54 = vrot.slane %v4422_v33, %v4382_v30 }
 0x23c   :  { %3986 = vmatprep.subr.bf16.mxu0 %v6397_v55  ;;  %4355 = vmatprep.subr.bf16.mxu1 %v6400_v56 }
 0x23f   :  { %3987 = vmatpush1.bf16.msra.mxu0 %v6395_v47  ;;  %4356 = vmatpush1.bf16.msra.mxu1 %v6398_v57 }
 0x240   :  { %5425 = vmatprep.subr.bf16.mxu0 %v6401_v58  ;;  %5447 = vmatprep.subr.bf16.mxu1 %v6402_v48 }
 0x242   :  { %3989 = vmatmul.mubr.bf16.vlgmr.msra.gmra.mrb[0].mxu0 %v722_v59  ;;  %4358 = vmatmul.mubr.bf16.vlgmr.msra.gmra.mrb[0].mxu1 %v722_v59 }
 0x243   :  { %5426 = vmatpush3.bf16.msra.mxu0 %v6403_v60  ;;  %5448 = vmatpush3.bf16.msra.mxu1 %v6404_v61 }
 0x244   :  { %5427 = vmatprep.subr.bf16.mxu0 %v6405_v62  ;;  %5449 = vmatprep.subr.bf16.mxu1 %v6406_v49 }
 0x247   :  { %5428 = vmatpush3.bf16.msra.mxu0 %v6407_v50  ;;  %5450 = vmatpush3.bf16.msra.mxu1 %v6408_v63 }
 0x248   :  { %5429 = vmatprep.subr.bf16.mxu0 %v6409_v0  ;;  %5451 = vmatprep.subr.bf16.mxu1 %v6410_v1 }
 0x24b   :  { %5430 = vmatpush3.bf16.msra.mxu0 %v6411_v2  ;;  %5452 = vmatpush3.bf16.msra.mxu1 %v6412_v3 }
 0x24c   :  { %5431 = vmatprep.subr.bf16.mxu0 %v6413_v4  ;;  %5453 = vmatprep.subr.bf16.mxu1 %v6414_v5 }
 0x24f   :  { %5432 = vmatpush3.bf16.msra.mxu0 %v6415_v6  ;;  %5454 = vmatpush3.bf16.msra.mxu1 %v6416_v7 }
 0x250   :  { %5433 = vmatprep.subr.bf16.mxu0 %v6417_v8  ;;  %5455 = vmatprep.subr.bf16.mxu1 %v6418_v9  ;;  %v5392_v9 = vld [vmem:[%s8456_s6] ss:$0 sm:$0xff] }
 0x253   :  { %5434 = vmatpush3.bf16.msra.mxu0 %v6419_v10  ;;  %5456 = vmatpush3.bf16.msra.mxu1 %v6420_v11 }
 0x254   :  { %5435 = vmatprep.subr.bf16.mxu0 %v6421_v12  ;;  %5457 = vmatprep.subr.bf16.mxu1 %v6422_v52 }
 0x257   :  { %5436 = vmatpush3.bf16.msra.mxu0 %v6423_v15  ;;  %5458 = vmatpush3.bf16.msra.mxu1 %v6424_v16 }
 0x258   :  { %5437 = vmatprep.subr.bf16.mxu0 %v6425_v17  ;;  %5459 = vmatprep.subr.bf16.mxu1 %v6426_v18 }
 0x25b   :  { %5438 = vmatpush3.bf16.msra.mxu0 %v6427_v19  ;;  %5460 = vmatpush3.bf16.msra.mxu1 %v6428_v20 }
 0x25c   :  { %5439 = vmatprep.subr.bf16.mxu0 %v6429_v22  ;;  %5461 = vmatprep.subr.bf16.mxu1 %v6430_v23 }
 0x25f   :  { %5440 = vmatpush3.bf16.msra.mxu0 %v6431_v24  ;;  %5462 = vmatpush3.bf16.msra.mxu1 %v6432_v13 }
 0x315   :  { %v3990_v39 = vpop.f32.mrb[0].mxu0  ;;  %v4359_v40 = vpop.f32.mrb[0].mxu1 }
 0x316   :  { %v4388_v42 = vmul.f32 %v4371_v25, %v3990_v39  ;;  %v4390_v44 = vmul.f32 %v4379_v32, %v4359_v40  ;;  %v3992_v46 = vpop.f32.mrb[1].mxu0  ;;  %v4361_v35 = vpop.f32.mrb[1].mxu1 }
 0x317   :  { %v4389_v51 = vmul.f32 %v4375_v26, %v3992_v46  ;;  %v4391_v38 = vmul.f32 %v4383_v36, %v4361_v35  ;;  %v3994_v55 = vpop.f32.mrb[2].mxu0  ;;  %v4363_v56 = vpop.f32.mrb[2].mxu1 }
 0x318   :  { %v4414_v47 = vadd.f32 %v4397_v37, %v4388_v42  ;;  %v4416_v57 = vadd.f32 %v4405_v21, %v4390_v44  ;;  %v3995_v58 = vpop.f32.mrb[3].mxu0  ;;  %v4364_v48 = vpop.f32.mrb[3].mxu1 }
 0x319   :  { %v4415_v59 = vadd.f32 %v4401_v41, %v4389_v51  ;;  %v4417_v60 = vadd.f32 %v4409_v34, %v4391_v38 }
 0x31a   :  { %vm4418_vm0 = vcmp.ge.f32.partialorder %v4414_v47, 0.0  ;;  %v4444_v61 = vmul.f32 %v4427_v43, %v4414_v47  ;;  %vm4420_vm1 = vcmp.ge.f32.partialorder %v4416_v57, 0.0  ;;  %v4446_v62 = vmul.f32 %v4435_v45, %v4416_v57 }
 0x31b   :  { %v4445_v49 = vmul.f32 %v4431_v53, %v4415_v59  ;;  %v4447_v50 = vmul.f32 %v4439_v54, %v4417_v60  ;;  %vm4419_vm2 = vcmp.ge.f32.partialorder %v4415_v59, 0.0  ;;  %vm4421_vm3 = vcmp.ge.f32.partialorder %v4417_v60, 0.0 }
 0x31c   :  { %v4448_v63 = vsel %vm4418_vm0, %v4414_v47, %v4444_v61  ;;  %v4450_v0 = vsel %vm4420_vm1, %v4416_v57, %v4446_v62 }
 0x31d   :  { %v4449_v1 = vsel %vm4419_vm2, %v4415_v59, %v4445_v49  ;;  %v4451_v2 = vsel %vm4421_vm3, %v4417_v60, %v4447_v50  ;;  %v4452_v5 = vpack.c.bf16 %v4448_v63, %v4448_v63  ;;  %v4454_v6 = vpack.c.bf16 %v4450_v0, %v4450_v0 }
 0x31e   :  { %v4453_v3 = vpack.c.bf16 %v4449_v1, %v4449_v1  ;;  %v4455_v4 = vpack.c.bf16 %v4451_v2, %v4451_v2 }
 0x320   :  { %4751 = vmatprep.mubr.bf16.mxu0 %v4453_v3  ;;  %4791 = vmatprep.mubr.bf16.mxu1 %v4455_v4 }
 0x321   :  { %4752 = vmatmul.mubr.bf16.vlgmr.msra.gmra.mrb[4].mxu0 %v4452_v5  ;;  %4792 = vmatmul.mubr.bf16.vlgmr.msra.gmra.mrb[4].mxu1 %v4454_v6 }
 0x3f4   :  { %v5441_v7 = vpop.f32.mrb[4].mxu0  ;;  %v5463_v8 = vpop.f32.mrb[4].mxu1 }
 0x3f5   :  { %v5442_v10 = vpop.f32.mrb[5].mxu0  ;;  %v5464_v11 = vpop.f32.mrb[5].mxu1 }
 0x3f6   :  { %v5443_v12 = vadd.f32 %v5442_v10, %v5441_v7  ;;  %v5465_v52 = vadd.f32 %v5464_v11, %v5463_v8  ;;  %v5444_v15 = vpop.f32.mrb[6].mxu0  ;;  %v5466_v16 = vpop.f32.mrb[6].mxu1 }
 0x3f7   :  { %v5445_v17 = vpop.f32.mrb[7].mxu0  ;;  %v5467_v18 = vpop.f32.mrb[7].mxu1 }
 0x3f8   :  { %v4754_v19 = vadd.f32 %v5443_v12, %v5392_v9 }
 0x3fa   :  { %v4794_v20 = vadd.f32 %v5465_v52, %v4754_v19 }
 0x3fc   :  { %4800 = vst.msk [vmem:[#allocation2] sm:$0x3] %vm4799_vm4, %v4794_v20 }
 0x3fd   :  { %6446 = shalt.err (!%p6443_p4)
}
 0x3fe   :  { %s6447_s25 = scalar_lea.hbm %s8457_s7, 32 }
 0x3ff   :  { %p6448_p5 = scmp.ne.s32.totalorder %s8457_s7, %s6447_s25  ;;  %p6451_p6 = scmp.lt.u32.totalorder %s6447_s25, %s8457_s7 }
 0x401   :  { %p6453_p7 = pnand %p6451_p6, %p6448_p5 }
 0x403   :  { %6456 = shalt.err (!%p6453_p7)
}
 0x404   :  { %4810 = dma.vmem_to_hbm [thread:$0]  %s4808_s23, 32, %s8457_s7, [#allocation3]  }
 0x405   :  { %6457 = dma.done.wait [#allocation3], 32  }
 0x406   :  { %6458 = vsyncadd [#allocation3], 4294967264 }
 0x407   :  { %4814 = vsyncpa [#allocation3], 1 }

</bundles_post_ra>
